<compile_context>
chip_gen: v5e
topology: v5e:2x2
jax: 0.10.0
libtpu: 0.0.40
codegen_flags: <defaults>
</compile_context>

<pallas_src>
import functools

import jax
import jax.numpy as jnp
from jax import lax
from jax.experimental import pallas as pl
from jax.experimental.pallas import tpu as pltpu

_LANES = 128


def _round_up(x, m):
    return (x + m - 1) // m * m


def _vmem_limit_bytes():
    """Per-generation scoped-VMEM limit (v5e/v6e: 128 MiB physical, v7x: 64 MiB)."""
    try:
        cap = pltpu.get_tpu_info().vmem_capacity_bytes
        return int(min(max(cap - (16 << 20), 32 << 20), 100 << 20))
    except Exception:
        return 32 << 20


# -----------------------------------------------------------------------------
# Fused Pallas kernel: stem conv + residual block + global average pool
# -----------------------------------------------------------------------------
def _fused_backbone(x_col, w0, b0, w1, b1, w2, b2, *, H, W):
    """One fused pallas_call; each grid step processes one image entirely in VMEM.

    x_col : (B, H*(W+2), K0) bf16   "wide" im2col of the stem input (junk cols zero)
    w0    : (K0, N)  bf16           stem weight, 9 taps merged along K
    w1,w2 : (9, N, N) bf16          BN-folded 3x3 weights (lane-padded channels)
    b*    : (1, N)   f32            BN-folded biases (zero in padded lanes)
    returns (B, 1, N) f32 pooled features.
    """
    B, _, K0 = x_col.shape
    N = w0.shape[-1]
    Wp = W + 2
    Mw = H * Wp                       # rows of the "wide" layout (2 junk cols per row)
    S = (H + 2) * Wp + 2              # slab rows (+2 so every tap slice is in-bounds)
    dst_off = Wp + 1                  # slab row holding output position (0, 0)
    inv_hw = 1.0 / float(H * W)

    def kernel(xc_ref, w0_ref, b0_ref, w1_ref, b1_ref, w2_ref, b2_ref,
               out_ref, slab0, slab1):
        # Zero the slabs: borders / tail must be zero; interior is rewritten below.
        slab0[...] = jnp.zeros_like(slab0)
        slab1[...] = jnp.zeros_like(slab1)

        # Mask for the 2 junk columns (j >= W) of every width-(W+2) output row.
        col = lax.broadcasted_iota(jnp.int32, (Mw, 1), 0) % Wp
        valid = col < W

        # ---- stem: single merged-K matmul + bias + ReLU ----
        f0 = jnp.dot(xc_ref[...], w0_ref[...], preferred_element_type=jnp.float32)
        f0 = jnp.where(valid, jnp.maximum(f0 + b0_ref[...], 0.0), 0.0)
        # Wide rows land on the slab interior; masked junk cols land on padding cols.
        slab0[dst_off:dst_off + Mw, :] = f0.astype(slab0.dtype)

        def conv3x3(slab, w_ref):
            # 9 shifted MXU matmuls; each tap is a contiguous row-offset slice of the
            # flattened slab (no relayout copies).  Accumulate in a local value.
            acc = None
            for t in range(9):
                di, dj = divmod(t, 3)
                off = di * Wp + dj
                d = jnp.dot(slab[off:off + Mw, :], w_ref[t],
                            preferred_element_type=jnp.float32)
                acc = d if acc is None else acc + d
            return acc

        # ---- residual block, conv1: conv + BN + ReLU ----
        f1 = conv3x3(slab0, w1_ref)
        f1 = jnp.where(valid, jnp.maximum(f1 + b1_ref[...], 0.0), 0.0)
        slab1[dst_off:dst_off + Mw, :] = f1.astype(slab1.dtype)

        # ---- conv2 + BN, skip(f0), ReLU, fused global average pool ----
        f2 = conv3x3(slab1, w2_ref)
        res = slab0[dst_off:dst_off + Mw, :].astype(jnp.float32)   # f0 (junk cols = 0)
        f2 = jnp.where(valid, jnp.maximum(f2 + b2_ref[...] + res, 0.0), 0.0)
        out_ref[...] = (jnp.sum(f2, axis=0, keepdims=True) * inv_hw).astype(out_ref.dtype)

    return pl.pallas_call(
        kernel,
        out_shape=jax.ShapeDtypeStruct((B, 1, N), jnp.float32),
        grid_spec=pltpu.PrefetchScalarGridSpec(
            num_scalar_prefetch=0,
            grid=(B,),
            in_specs=[
                pl.BlockSpec((None, Mw, K0), lambda b: (b, 0, 0)),   # stem im2col (1 image)
                pl.BlockSpec((K0, N), lambda b: (0, 0)),             # stem weight
                pl.BlockSpec((1, N), lambda b: (0, 0)),              # stem bias
                pl.BlockSpec((9, N, N), lambda b: (0, 0, 0)),        # conv1 weights
                pl.BlockSpec((1, N), lambda b: (0, 0)),
                pl.BlockSpec((9, N, N), lambda b: (0, 0, 0)),        # conv2 weights
                pl.BlockSpec((1, N), lambda b: (0, 0)),
            ],
            out_specs=pl.BlockSpec((None, 1, N), lambda b: (b, 0, 0)),
            scratch_shapes=[pltpu.VMEM((S, N), jnp.bfloat16),        # padded f0 slab
                            pltpu.VMEM((S, N), jnp.bfloat16)],       # padded f1 slab
        ),
        compiler_params=pltpu.CompilerParams(
            dimension_semantics=("parallel",),
            vmem_limit_bytes=_vmem_limit_bytes(),
        ),
    )(x_col, w0, b0, w1, b1, w2, b2)


# -----------------------------------------------------------------------------
# Glue (plain JAX): BN folding, channel padding, parameter prep (hoisted, runs once)
# -----------------------------------------------------------------------------
def _fold_bn(w_oihw, gamma, beta, mean, var, eps=1e-5):
    """Fold eval-mode BatchNorm into conv weight/bias -> (9, Cin, Cout), (Cout,)."""
    scale = gamma / jnp.sqrt(var + eps)
    w = w_oihw * scale[:, None, None, None]
    cout, cin = w.shape[0], w.shape[1]
    w_taps = jnp.transpose(w, (2, 3, 1, 0)).reshape(9, cin, cout)   # tap-major, then cin
    b = beta - mean * scale
    return w_taps.astype(jnp.float32), b.astype(jnp.float32)


def prepare_kernel_params(params):
    """BN-fold, lane-pad Cout to 128, cast to bf16 -- done ONCE, outside the forward."""
    C = params["stem_w"].shape[0]
    cin = params["stem_w"].shape[1]
    N = _round_up(C, _LANES)

    # stem: 9 taps merged along K into one (K0, N) operand
    w0t, b0 = _fold_bn(params["stem_w"], *params["stem_bn"])
    K = 9 * cin
    K0 = _round_up(K, 32)
    w0 = jnp.zeros((K0, N), jnp.float32).at[:K, :C].set(w0t.reshape(K, C))
    bias0 = jnp.zeros((1, N), jnp.float32).at[0, :C].set(b0)

    def tap_weights(w_oihw, bn):
        wt, b = _fold_bn(w_oihw, *bn)
        w = jnp.zeros((9, N, N), jnp.float32).at[:, :C, :C].set(wt)
        bias = jnp.zeros((1, N), jnp.float32).at[0, :C].set(b)
        return w.astype(jnp.bfloat16), bias

    w1, bias1 = tap_weights(params["c1_w"], params["c1_bn"])
    w2, bias2 = tap_weights(params["c2_w"], params["c2_bn"])
    kp = dict(w0=w0.astype(jnp.bfloat16), b0=bias0, w1=w1, b1=bias1, w2=w2, b2=bias2)
    return kp, C


@jax.jit
def _encode_padded(x_nchw, kp):
    """NCHW images -> (B, N) pooled features (N = lane-padded channel count)."""
    B, cin, H, W = x_nchw.shape
    K0 = kp["w0"].shape[0]
    x = jnp.transpose(x_nchw, (0, 2, 3, 1)).astype(jnp.bfloat16)          # NHWC, bf16
    # "wide" stem im2col (tiny 3-channel input): H*(W+2) rows, junk rows & K-pad zero.
    xp = jnp.pad(x, ((0, 0), (1, 1), (1, 1), (0, 0)))
    cols = [xp[:, di:di + H, dj:dj + W, :] for di in range(3) for dj in range(3)]
    col = jnp.concatenate(cols, axis=-1)                                   # (B,H,W,9*cin)
    col = jnp.pad(col, ((0, 0), (0, 0), (0, 2), (0, K0 - 9 * cin)))        # wide + K pad
    x_col = col.reshape(B, H * (W + 2), K0)
    pooled = _fused_backbone(x_col, kp["w0"], kp["b0"], kp["w1"], kp["b1"],
                             kp["w2"], kp["b2"], H=H, W=W)                 # (B,1,N) f32
    return pooled[:, 0, :]


def image_encoder_forward(x_nchw, kp, C):
    """ImageEncoder.forward: NCHW image batch -> (B, C) pooled features."""
    return _encode_padded(x_nchw, kp)[:, :C]


def _init_params(key, c_in, c):
    ks = jax.random.split(key, 6)

    def conv(k, cin, cout):
        return 0.1 * jax.random.normal(k, (cout, cin, 3, 3), jnp.float32)

    def bn(k, cout):
        k0, k1, k2, k3 = jax.random.split(k, 4)
        return (1.0 + 0.05 * jax.random.normal(k0, (cout,), jnp.float32),   # gamma
                0.05 * jax.random.normal(k1, (cout,), jnp.float32),          # beta
                0.05 * jax.random.normal(k2, (cout,), jnp.float32),          # running_mean
                1.0 + jnp.abs(jax.random.normal(k3, (cout,), jnp.float32)))  # running_var

    p = {}
    p["stem_w"] = conv(ks[0], c_in, c); p["stem_bn"] = bn(ks[1], c)
    p["c1_w"] = conv(ks[2], c, c);      p["c1_bn"] = bn(ks[3], c)
    p["c2_w"] = conv(ks[4], c, c);      p["c2_bn"] = bn(ks[5], c)
    return p


# -----------------------------------------------------------------------------
# Reference (pure JAX, f32, same math) for a sanity check
# -----------------------------------------------------------------------------
def _im2col_3x3(x_nhwc):
    B, H, W, C = x_nhwc.shape
    xp = jnp.pad(x_nhwc, ((0, 0), (1, 1), (1, 1), (0, 0)))
    cols = [xp[:, di:di + H, dj:dj + W, :] for di in range(3) for dj in range(3)]
    return jnp.concatenate(cols, axis=-1).reshape(B * H * W, 9 * C)


def _reference_forward(x_nchw, params):
    def conv_bn(x_nhwc, w_oihw, bn, relu):
        w_taps, b = _fold_bn(w_oihw, *bn)
        w_mat = w_taps.reshape(-1, w_taps.shape[-1])
        y = _im2col_3x3(x_nhwc) @ w_mat + b
        if relu:
            y = jnp.maximum(y, 0.0)
        return y

    B, _, H, W = x_nchw.shape
    x = jnp.transpose(x_nchw, (0, 2, 3, 1)).astype(jnp.float32)
    f0 = conv_bn(x, params["stem_w"], params["stem_bn"], True)
    C = f0.shape[-1]
    f1 = conv_bn(f0.reshape(B, H, W, C), params["c1_w"], params["c1_bn"], True)
    f2 = conv_bn(f1.reshape(B, H, W, C), params["c2_w"], params["c2_bn"], False)
    f2 = jnp.maximum(f2 + f0, 0.0)
    return jnp.mean(f2.reshape(B, H * W, C), axis=1)


if __name__ == "__main__":
    key = jax.random.PRNGKey(0)
    k_x, k_p = jax.random.split(key)

    B, Cin, H, W, C = 2, 3, 16, 16, 32
    x = jax.random.normal(k_x, (B, Cin, H, W), jnp.float32)   # NCHW, like PyTorch
    params = _init_params(k_p, Cin, C)

    kp, C_out = prepare_kernel_params(params)                 # hoisted: runs once
    out = jax.block_until_ready(image_encoder_forward(x, kp, C_out))
    assert out.shape == (B, C), out.shape

    ref = jax.block_until_ready(_reference_forward(x, params))
    max_err = float(jnp.max(jnp.abs(out - ref)))
    # bf16 activations/weights vs f32 reference -> relaxed tolerance
    assert jnp.allclose(out, ref, atol=5e-2, rtol=5e-2), max_err

    print("KERNEL_OK")
</pallas_src>

<mosaic_0001>
module attributes {stable_mosaic.version = 11 : i64} {
  func.func @kernel(%arg0: i32, %arg1: memref<1x288x32xbf16, #tpu.memory_space<vmem>>, %arg2: memref<32x128xbf16, #tpu.memory_space<vmem>>, %arg3: memref<1x128xf32, #tpu.memory_space<vmem>>, %arg4: memref<9x128x128xbf16, #tpu.memory_space<vmem>>, %arg5: memref<1x128xf32, #tpu.memory_space<vmem>>, %arg6: memref<9x128x128xbf16, #tpu.memory_space<vmem>>, %arg7: memref<1x128xf32, #tpu.memory_space<vmem>>, %arg8: memref<1x1x128xf32, #tpu.memory_space<vmem>>, %arg9: memref<326x128xbf16, #tpu.memory_space<vmem>>, %arg10: memref<326x128xbf16, #tpu.memory_space<vmem>>) attributes {dimension_semantics = [#tpu.dimension_semantics<parallel>], iteration_bounds = array<i64: 2>, scalar_prefetch = 0 : i64, scratch_operands = 2 : i64, tpu.core_type = #tpu.core_type<tc>, window_params = [{transform_indices = @transform_0, window_bounds = array<i64: 1, 288, 32>}, {pipeline_mode = #tpu.pipeline_mode<synchronous>, transform_indices = @transform_1, window_bounds = array<i64: 32, 128>}, {pipeline_mode = #tpu.pipeline_mode<synchronous>, transform_indices = @transform_2, window_bounds = array<i64: 1, 128>}, {pipeline_mode = #tpu.pipeline_mode<synchronous>, transform_indices = @transform_3, window_bounds = array<i64: 9, 128, 128>}, {pipeline_mode = #tpu.pipeline_mode<synchronous>, transform_indices = @transform_4, window_bounds = array<i64: 1, 128>}, {pipeline_mode = #tpu.pipeline_mode<synchronous>, transform_indices = @transform_5, window_bounds = array<i64: 9, 128, 128>}, {pipeline_mode = #tpu.pipeline_mode<synchronous>, transform_indices = @transform_6, window_bounds = array<i64: 1, 128>}, {transform_indices = @transform_7, window_bounds = array<i64: 1, 1, 128>}]} {
    %cst = arith.constant 0.000000e+00 : bf16
    %0 = vector.broadcast %cst : bf16 to vector<326x128xbf16>
    %c0 = arith.constant 0 : index
    %c0_0 = arith.constant 0 : index
    %1 = vector.load %arg9[%c0, %c0_0] : memref<326x128xbf16, #tpu.memory_space<vmem>>, vector<326x128xbf16>
    tpu.vector_store %arg9[%c0, %c0_0], %0 {strides = array<i32>} : memref<326x128xbf16, #tpu.memory_space<vmem>>, vector<326x128xbf16>,
    %cst_1 = arith.constant 0.000000e+00 : bf16
    %2 = vector.broadcast %cst_1 : bf16 to vector<326x128xbf16>
    %c0_2 = arith.constant 0 : index
    %c0_3 = arith.constant 0 : index
    %3 = vector.load %arg10[%c0_2, %c0_3] : memref<326x128xbf16, #tpu.memory_space<vmem>>, vector<326x128xbf16>
    tpu.vector_store %arg10[%c0_2, %c0_3], %2 {strides = array<i32>} : memref<326x128xbf16, #tpu.memory_space<vmem>>, vector<326x128xbf16>,
    %4 = tpu.iota {dimensions = array<i32: 0>} : vector<288x1xi32>
    %c18_i32 = arith.constant 18 : i32
    %c0_i32 = arith.constant 0 : i32
    %5 = arith.cmpi eq, %c18_i32, %c0_i32 : i32
    %c1_i32 = arith.constant 1 : i32
    %6 = arith.select %5, %c1_i32, %c18_i32 : i32
    %7 = vector.broadcast %6 : i32 to vector<288x1xi32>
    %8 = arith.remsi %4, %7 : vector<288x1xi32>
    %c0_i32_4 = arith.constant 0 : i32
    %9 = vector.broadcast %c0_i32_4 : i32 to vector<288x1xi32>
    %10 = arith.cmpi ne, %8, %9 : vector<288x1xi32>
    %c0_i32_5 = arith.constant 0 : i32
    %11 = vector.broadcast %c0_i32_5 : i32 to vector<288x1xi32>
    %12 = arith.cmpi slt, %8, %11 : vector<288x1xi32>
    %c0_i32_6 = arith.constant 0 : i32
    %13 = arith.cmpi slt, %6, %c0_i32_6 : i32
    %14 = vector.broadcast %13 : i1 to vector<288x1xi1>
    %15 = vector.broadcast %14 : vector<288x1xi1> to vector<288x1xi1>
    %16 = arith.xori %12, %15 : vector<288x1xi1>
    %17 = arith.andi %16, %10 : vector<288x1xi1>
    %18 = vector.broadcast %6 : i32 to vector<288x1xi32>
    %19 = arith.addi %8, %18 : vector<288x1xi32>
    %20 = arith.select %17, %19, %8 : vector<288x1xi1>, vector<288x1xi32>
    %c16_i32 = arith.constant 16 : i32
    %21 = vector.broadcast %c16_i32 : i32 to vector<288x1xi32>
    %22 = arith.cmpi slt, %20, %21 : vector<288x1xi32>
    %c0_7 = arith.constant 0 : index
    %c0_8 = arith.constant 0 : index
    %c0_9 = arith.constant 0 : index
    %23 = vector.load %arg1[%c0_7, %c0_8, %c0_9] : memref<1x288x32xbf16, #tpu.memory_space<vmem>>, vector<1x288x32xbf16>
    %24 = vector.shape_cast %23 : vector<1x288x32xbf16> to vector<288x32xbf16>
    %c0_10 = arith.constant 0 : index
    %c0_11 = arith.constant 0 : index
    %25 = vector.load %arg2[%c0_10, %c0_11] : memref<32x128xbf16, #tpu.memory_space<vmem>>, vector<32x128xbf16>
    %cst_12 = arith.constant dense<0.000000e+00> : vector<288x128xf32>
    %26 = tpu.matmul %24, %25, %cst_12 {dimension_numbers = #tpu.dot_dimension_numbers<[1], [0], [0], [1], [0, 0, 1, 1], [], []>} : vector<288x32xbf16>, vector<32x128xbf16>, vector<288x128xf32> -> vector<288x128xf32>
    %c0_13 = arith.constant 0 : index
    %c0_14 = arith.constant 0 : index
    %27 = vector.load %arg3[%c0_13, %c0_14] : memref<1x128xf32, #tpu.memory_space<vmem>>, vector<1x128xf32>
    %28 = vector.broadcast %27 : vector<1x128xf32> to vector<288x128xf32>
    %29 = arith.addf %26, %28 : vector<288x128xf32>
    %cst_15 = arith.constant 0.000000e+00 : f32
    %30 = vector.broadcast %cst_15 : f32 to vector<288x128xf32>
    %31 = arith.maximumf %29, %30 : vector<288x128xf32>
    %cst_16 = arith.constant 0.000000e+00 : f32
    %32 = vector.shape_cast %22 : vector<288x1xi1> to vector<288x1xi1>
    %33 = vector.broadcast %32 : vector<288x1xi1> to vector<288x128xi1>
    %34 = vector.broadcast %cst_16 : f32 to vector<288x128xf32>
    %35 = arith.select %33, %31, %34 : vector<288x128xi1>, vector<288x128xf32>
    %36 = arith.truncf %35 : vector<288x128xf32> to vector<288x128xbf16>
    %c19 = arith.constant 19 : index
    %c0_17 = arith.constant 0 : index
    %37 = vector.load %arg9[%c19, %c0_17] : memref<326x128xbf16, #tpu.memory_space<vmem>>, vector<288x128xbf16>
    tpu.vector_store %arg9[%c19, %c0_17], %36 {strides = array<i32>} : memref<326x128xbf16, #tpu.memory_space<vmem>>, vector<288x128xbf16>,
    %c0_18 = arith.constant 0 : index
    %c0_19 = arith.constant 0 : index
    %38 = vector.load %arg9[%c0_18, %c0_19] : memref<326x128xbf16, #tpu.memory_space<vmem>>, vector<288x128xbf16>
    %c0_20 = arith.constant 0 : index
    %c0_21 = arith.constant 0 : index
    %c0_22 = arith.constant 0 : index
    %39 = vector.load %arg4[%c0_20, %c0_21, %c0_22] : memref<9x128x128xbf16, #tpu.memory_space<vmem>>, vector<1x128x128xbf16>
    %40 = vector.shape_cast %39 : vector<1x128x128xbf16> to vector<128x128xbf16>
    %cst_23 = arith.constant dense<0.000000e+00> : vector<288x128xf32>
    %41 = tpu.matmul %38, %40, %cst_23 {dimension_numbers = #tpu.dot_dimension_numbers<[1], [0], [0], [1], [0, 0, 1, 1], [], []>} : vector<288x128xbf16>, vector<128x128xbf16>, vector<288x128xf32> -> vector<288x128xf32>
    %c1 = arith.constant 1 : index
    %c0_24 = arith.constant 0 : index
    %42 = vector.load %arg9[%c1, %c0_24] : memref<326x128xbf16, #tpu.memory_space<vmem>>, vector<288x128xbf16>
    %c1_25 = arith.constant 1 : index
    %c0_26 = arith.constant 0 : index
    %c0_27 = arith.constant 0 : index
    %43 = vector.load %arg4[%c1_25, %c0_26, %c0_27] : memref<9x128x128xbf16, #tpu.memory_space<vmem>>, vector<1x128x128xbf16>
    %44 = vector.shape_cast %43 : vector<1x128x128xbf16> to vector<128x128xbf16>
    %cst_28 = arith.constant dense<0.000000e+00> : vector<288x128xf32>
    %45 = tpu.matmul %42, %44, %cst_28 {dimension_numbers = #tpu.dot_dimension_numbers<[1], [0], [0], [1], [0, 0, 1, 1], [], []>} : vector<288x128xbf16>, vector<128x128xbf16>, vector<288x128xf32> -> vector<288x128xf32>
    %46 = arith.addf %41, %45 : vector<288x128xf32>
    %c2 = arith.constant 2 : index
    %c0_29 = arith.constant 0 : index
    %47 = vector.load %arg9[%c2, %c0_29] : memref<326x128xbf16, #tpu.memory_space<vmem>>, vector<288x128xbf16>
    %c2_30 = arith.constant 2 : index
    %c0_31 = arith.constant 0 : index
    %c0_32 = arith.constant 0 : index
    %48 = vector.load %arg4[%c2_30, %c0_31, %c0_32] : memref<9x128x128xbf16, #tpu.memory_space<vmem>>, vector<1x128x128xbf16>
    %49 = vector.shape_cast %48 : vector<1x128x128xbf16> to vector<128x128xbf16>
    %cst_33 = arith.constant dense<0.000000e+00> : vector<288x128xf32>
    %50 = tpu.matmul %47, %49, %cst_33 {dimension_numbers = #tpu.dot_dimension_numbers<[1], [0], [0], [1], [0, 0, 1, 1], [], []>} : vector<288x128xbf16>, vector<128x128xbf16>, vector<288x128xf32> -> vector<288x128xf32>
    %51 = arith.addf %46, %50 : vector<288x128xf32>
    %c18 = arith.constant 18 : index
    %c0_34 = arith.constant 0 : index
    %52 = vector.load %arg9[%c18, %c0_34] : memref<326x128xbf16, #tpu.memory_space<vmem>>, vector<288x128xbf16>
    %c3 = arith.constant 3 : index
    %c0_35 = arith.constant 0 : index
    %c0_36 = arith.constant 0 : index
    %53 = vector.load %arg4[%c3, %c0_35, %c0_36] : memref<9x128x128xbf16, #tpu.memory_space<vmem>>, vector<1x128x128xbf16>
    %54 = vector.shape_cast %53 : vector<1x128x128xbf16> to vector<128x128xbf16>
    %cst_37 = arith.constant dense<0.000000e+00> : vector<288x128xf32>
    %55 = tpu.matmul %52, %54, %cst_37 {dimension_numbers = #tpu.dot_dimension_numbers<[1], [0], [0], [1], [0, 0, 1, 1], [], []>} : vector<288x128xbf16>, vector<128x128xbf16>, vector<288x128xf32> -> vector<288x128xf32>
    %56 = arith.addf %51, %55 : vector<288x128xf32>
    %c19_38 = arith.constant 19 : index
    %c0_39 = arith.constant 0 : index
    %57 = vector.load %arg9[%c19_38, %c0_39] : memref<326x128xbf16, #tpu.memory_space<vmem>>, vector<288x128xbf16>
    %c4 = arith.constant 4 : index
    %c0_40 = arith.constant 0 : index
    %c0_41 = arith.constant 0 : index
    %58 = vector.load %arg4[%c4, %c0_40, %c0_41] : memref<9x128x128xbf16, #tpu.memory_space<vmem>>, vector<1x128x128xbf16>
    %59 = vector.shape_cast %58 : vector<1x128x128xbf16> to vector<128x128xbf16>
    %cst_42 = arith.constant dense<0.000000e+00> : vector<288x128xf32>
    %60 = tpu.matmul %57, %59, %cst_42 {dimension_numbers = #tpu.dot_dimension_numbers<[1], [0], [0], [1], [0, 0, 1, 1], [], []>} : vector<288x128xbf16>, vector<128x128xbf16>, vector<288x128xf32> -> vector<288x128xf32>
    %61 = arith.addf %56, %60 : vector<288x128xf32>
    %c20 = arith.constant 20 : index
    %c0_43 = arith.constant 0 : index
    %62 = vector.load %arg9[%c20, %c0_43] : memref<326x128xbf16, #tpu.memory_space<vmem>>, vector<288x128xbf16>
    %c5 = arith.constant 5 : index
    %c0_44 = arith.constant 0 : index
    %c0_45 = arith.constant 0 : index
    %63 = vector.load %arg4[%c5, %c0_44, %c0_45] : memref<9x128x128xbf16, #tpu.memory_space<vmem>>, vector<1x128x128xbf16>
    %64 = vector.shape_cast %63 : vector<1x128x128xbf16> to vector<128x128xbf16>
    %cst_46 = arith.constant dense<0.000000e+00> : vector<288x128xf32>
    %65 = tpu.matmul %62, %64, %cst_46 {dimension_numbers = #tpu.dot_dimension_numbers<[1], [0], [0], [1], [0, 0, 1, 1], [], []>} : vector<288x128xbf16>, vector<128x128xbf16>, vector<288x128xf32> -> vector<288x128xf32>
    %66 = arith.addf %61, %65 : vector<288x128xf32>
    %c36 = arith.constant 36 : index
    %c0_47 = arith.constant 0 : index
    %67 = vector.load %arg9[%c36, %c0_47] : memref<326x128xbf16, #tpu.memory_space<vmem>>, vector<288x128xbf16>
    %c6 = arith.constant 6 : index
    %c0_48 = arith.constant 0 : index
    %c0_49 = arith.constant 0 : index
    %68 = vector.load %arg4[%c6, %c0_48, %c0_49] : memref<9x128x128xbf16, #tpu.memory_space<vmem>>, vector<1x128x128xbf16>
    %69 = vector.shape_cast %68 : vector<1x128x128xbf16> to vector<128x128xbf16>
    %cst_50 = arith.constant dense<0.000000e+00> : vector<288x128xf32>
    %70 = tpu.matmul %67, %69, %cst_50 {dimension_numbers = #tpu.dot_dimension_numbers<[1], [0], [0], [1], [0, 0, 1, 1], [], []>} : vector<288x128xbf16>, vector<128x128xbf16>, vector<288x128xf32> -> vector<288x128xf32>
    %71 = arith.addf %66, %70 : vector<288x128xf32>
    %c37 = arith.constant 37 : index
    %c0_51 = arith.constant 0 : index
    %72 = vector.load %arg9[%c37, %c0_51] : memref<326x128xbf16, #tpu.memory_space<vmem>>, vector<288x128xbf16>
    %c7 = arith.constant 7 : index
    %c0_52 = arith.constant 0 : index
    %c0_53 = arith.constant 0 : index
    %73 = vector.load %arg4[%c7, %c0_52, %c0_53] : memref<9x128x128xbf16, #tpu.memory_space<vmem>>, vector<1x128x128xbf16>
    %74 = vector.shape_cast %73 : vector<1x128x128xbf16> to vector<128x128xbf16>
    %cst_54 = arith.constant dense<0.000000e+00> : vector<288x128xf32>
    %75 = tpu.matmul %72, %74, %cst_54 {dimension_numbers = #tpu.dot_dimension_numbers<[1], [0], [0], [1], [0, 0, 1, 1], [], []>} : vector<288x128xbf16>, vector<128x128xbf16>, vector<288x128xf32> -> vector<288x128xf32>
    %76 = arith.addf %71, %75 : vector<288x128xf32>
    %c38 = arith.constant 38 : index
    %c0_55 = arith.constant 0 : index
    %77 = vector.load %arg9[%c38, %c0_55] : memref<326x128xbf16, #tpu.memory_space<vmem>>, vector<288x128xbf16>
    %c8 = arith.constant 8 : index
    %c0_56 = arith.constant 0 : index
    %c0_57 = arith.constant 0 : index
    %78 = vector.load %arg4[%c8, %c0_56, %c0_57] : memref<9x128x128xbf16, #tpu.memory_space<vmem>>, vector<1x128x128xbf16>
    %79 = vector.shape_cast %78 : vector<1x128x128xbf16> to vector<128x128xbf16>
    %cst_58 = arith.constant dense<0.000000e+00> : vector<288x128xf32>
    %80 = tpu.matmul %77, %79, %cst_58 {dimension_numbers = #tpu.dot_dimension_numbers<[1], [0], [0], [1], [0, 0, 1, 1], [], []>} : vector<288x128xbf16>, vector<128x128xbf16>, vector<288x128xf32> -> vector<288x128xf32>
    %81 = arith.addf %76, %80 : vector<288x128xf32>
    %c0_59 = arith.constant 0 : index
    %c0_60 = arith.constant 0 : index
    %82 = vector.load %arg5[%c0_59, %c0_60] : memref<1x128xf32, #tpu.memory_space<vmem>>, vector<1x128xf32>
    %83 = vector.broadcast %82 : vector<1x128xf32> to vector<288x128xf32>
    %84 = arith.addf %81, %83 : vector<288x128xf32>
    %cst_61 = arith.constant 0.000000e+00 : f32
    %85 = vector.broadcast %cst_61 : f32 to vector<288x128xf32>
    %86 = arith.maximumf %84, %85 : vector<288x128xf32>
    %cst_62 = arith.constant 0.000000e+00 : f32
    %87 = vector.shape_cast %22 : vector<288x1xi1> to vector<288x1xi1>
    %88 = vector.broadcast %87 : vector<288x1xi1> to vector<288x128xi1>
    %89 = vector.broadcast %cst_62 : f32 to vector<288x128xf32>
    %90 = arith.select %88, %86, %89 : vector<288x128xi1>, vector<288x128xf32>
    %91 = arith.truncf %90 : vector<288x128xf32> to vector<288x128xbf16>
    %c19_63 = arith.constant 19 : index
    %c0_64 = arith.constant 0 : index
    %92 = vector.load %arg10[%c19_63, %c0_64] : memref<326x128xbf16, #tpu.memory_space<vmem>>, vector<288x128xbf16>
    tpu.vector_store %arg10[%c19_63, %c0_64], %91 {strides = array<i32>} : memref<326x128xbf16, #tpu.memory_space<vmem>>, vector<288x128xbf16>,
    %c0_65 = arith.constant 0 : index
    %c0_66 = arith.constant 0 : index
    %93 = vector.load %arg10[%c0_65, %c0_66] : memref<326x128xbf16, #tpu.memory_space<vmem>>, vector<288x128xbf16>
    %c0_67 = arith.constant 0 : index
    %c0_68 = arith.constant 0 : index
    %c0_69 = arith.constant 0 : index
    %94 = vector.load %arg6[%c0_67, %c0_68, %c0_69] : memref<9x128x128xbf16, #tpu.memory_space<vmem>>, vector<1x128x128xbf16>
    %95 = vector.shape_cast %94 : vector<1x128x128xbf16> to vector<128x128xbf16>
    %cst_70 = arith.constant dense<0.000000e+00> : vector<288x128xf32>
    %96 = tpu.matmul %93, %95, %cst_70 {dimension_numbers = #tpu.dot_dimension_numbers<[1], [0], [0], [1], [0, 0, 1, 1], [], []>} : vector<288x128xbf16>, vector<128x128xbf16>, vector<288x128xf32> -> vector<288x128xf32>
    %c1_71 = arith.constant 1 : index
    %c0_72 = arith.constant 0 : index
    %97 = vector.load %arg10[%c1_71, %c0_72] : memref<326x128xbf16, #tpu.memory_space<vmem>>, vector<288x128xbf16>
    %c1_73 = arith.constant 1 : index
    %c0_74 = arith.constant 0 : index
    %c0_75 = arith.constant 0 : index
    %98 = vector.load %arg6[%c1_73, %c0_74, %c0_75] : memref<9x128x128xbf16, #tpu.memory_space<vmem>>, vector<1x128x128xbf16>
    %99 = vector.shape_cast %98 : vector<1x128x128xbf16> to vector<128x128xbf16>
    %cst_76 = arith.constant dense<0.000000e+00> : vector<288x128xf32>
    %100 = tpu.matmul %97, %99, %cst_76 {dimension_numbers = #tpu.dot_dimension_numbers<[1], [0], [0], [1], [0, 0, 1, 1], [], []>} : vector<288x128xbf16>, vector<128x128xbf16>, vector<288x128xf32> -> vector<288x128xf32>
    %101 = arith.addf %96, %100 : vector<288x128xf32>
    %c2_77 = arith.constant 2 : index
    %c0_78 = arith.constant 0 : index
    %102 = vector.load %arg10[%c2_77, %c0_78] : memref<326x128xbf16, #tpu.memory_space<vmem>>, vector<288x128xbf16>
    %c2_79 = arith.constant 2 : index
    %c0_80 = arith.constant 0 : index
    %c0_81 = arith.constant 0 : index
    %103 = vector.load %arg6[%c2_79, %c0_80, %c0_81] : memref<9x128x128xbf16, #tpu.memory_space<vmem>>, vector<1x128x128xbf16>
    %104 = vector.shape_cast %103 : vector<1x128x128xbf16> to vector<128x128xbf16>
    %cst_82 = arith.constant dense<0.000000e+00> : vector<288x128xf32>
    %105 = tpu.matmul %102, %104, %cst_82 {dimension_numbers = #tpu.dot_dimension_numbers<[1], [0], [0], [1], [0, 0, 1, 1], [], []>} : vector<288x128xbf16>, vector<128x128xbf16>, vector<288x128xf32> -> vector<288x128xf32>
    %106 = arith.addf %101, %105 : vector<288x128xf32>
    %c18_83 = arith.constant 18 : index
    %c0_84 = arith.constant 0 : index
    %107 = vector.load %arg10[%c18_83, %c0_84] : memref<326x128xbf16, #tpu.memory_space<vmem>>, vector<288x128xbf16>
    %c3_85 = arith.constant 3 : index
    %c0_86 = arith.constant 0 : index
    %c0_87 = arith.constant 0 : index
    %108 = vector.load %arg6[%c3_85, %c0_86, %c0_87] : memref<9x128x128xbf16, #tpu.memory_space<vmem>>, vector<1x128x128xbf16>
    %109 = vector.shape_cast %108 : vector<1x128x128xbf16> to vector<128x128xbf16>
    %cst_88 = arith.constant dense<0.000000e+00> : vector<288x128xf32>
    %110 = tpu.matmul %107, %109, %cst_88 {dimension_numbers = #tpu.dot_dimension_numbers<[1], [0], [0], [1], [0, 0, 1, 1], [], []>} : vector<288x128xbf16>, vector<128x128xbf16>, vector<288x128xf32> -> vector<288x128xf32>
    %111 = arith.addf %106, %110 : vector<288x128xf32>
    %c19_89 = arith.constant 19 : index
    %c0_90 = arith.constant 0 : index
    %112 = vector.load %arg10[%c19_89, %c0_90] : memref<326x128xbf16, #tpu.memory_space<vmem>>, vector<288x128xbf16>
    %c4_91 = arith.constant 4 : index
    %c0_92 = arith.constant 0 : index
    %c0_93 = arith.constant 0 : index
    %113 = vector.load %arg6[%c4_91, %c0_92, %c0_93] : memref<9x128x128xbf16, #tpu.memory_space<vmem>>, vector<1x128x128xbf16>
    %114 = vector.shape_cast %113 : vector<1x128x128xbf16> to vector<128x128xbf16>
    %cst_94 = arith.constant dense<0.000000e+00> : vector<288x128xf32>
    %115 = tpu.matmul %112, %114, %cst_94 {dimension_numbers = #tpu.dot_dimension_numbers<[1], [0], [0], [1], [0, 0, 1, 1], [], []>} : vector<288x128xbf16>, vector<128x128xbf16>, vector<288x128xf32> -> vector<288x128xf32>
    %116 = arith.addf %111, %115 : vector<288x128xf32>
    %c20_95 = arith.constant 20 : index
    %c0_96 = arith.constant 0 : index
    %117 = vector.load %arg10[%c20_95, %c0_96] : memref<326x128xbf16, #tpu.memory_space<vmem>>, vector<288x128xbf16>
    %c5_97 = arith.constant 5 : index
    %c0_98 = arith.constant 0 : index
    %c0_99 = arith.constant 0 : index
    %118 = vector.load %arg6[%c5_97, %c0_98, %c0_99] : memref<9x128x128xbf16, #tpu.memory_space<vmem>>, vector<1x128x128xbf16>
    %119 = vector.shape_cast %118 : vector<1x128x128xbf16> to vector<128x128xbf16>
    %cst_100 = arith.constant dense<0.000000e+00> : vector<288x128xf32>
    %120 = tpu.matmul %117, %119, %cst_100 {dimension_numbers = #tpu.dot_dimension_numbers<[1], [0], [0], [1], [0, 0, 1, 1], [], []>} : vector<288x128xbf16>, vector<128x128xbf16>, vector<288x128xf32> -> vector<288x128xf32>
    %121 = arith.addf %116, %120 : vector<288x128xf32>
    %c36_101 = arith.constant 36 : index
    %c0_102 = arith.constant 0 : index
    %122 = vector.load %arg10[%c36_101, %c0_102] : memref<326x128xbf16, #tpu.memory_space<vmem>>, vector<288x128xbf16>
    %c6_103 = arith.constant 6 : index
    %c0_104 = arith.constant 0 : index
    %c0_105 = arith.constant 0 : index
    %123 = vector.load %arg6[%c6_103, %c0_104, %c0_105] : memref<9x128x128xbf16, #tpu.memory_space<vmem>>, vector<1x128x128xbf16>
    %124 = vector.shape_cast %123 : vector<1x128x128xbf16> to vector<128x128xbf16>
    %cst_106 = arith.constant dense<0.000000e+00> : vector<288x128xf32>
    %125 = tpu.matmul %122, %124, %cst_106 {dimension_numbers = #tpu.dot_dimension_numbers<[1], [0], [0], [1], [0, 0, 1, 1], [], []>} : vector<288x128xbf16>, vector<128x128xbf16>, vector<288x128xf32> -> vector<288x128xf32>
    %126 = arith.addf %121, %125 : vector<288x128xf32>
    %c37_107 = arith.constant 37 : index
    %c0_108 = arith.constant 0 : index
    %127 = vector.load %arg10[%c37_107, %c0_108] : memref<326x128xbf16, #tpu.memory_space<vmem>>, vector<288x128xbf16>
    %c7_109 = arith.constant 7 : index
    %c0_110 = arith.constant 0 : index
    %c0_111 = arith.constant 0 : index
    %128 = vector.load %arg6[%c7_109, %c0_110, %c0_111] : memref<9x128x128xbf16, #tpu.memory_space<vmem>>, vector<1x128x128xbf16>
    %129 = vector.shape_cast %128 : vector<1x128x128xbf16> to vector<128x128xbf16>
    %cst_112 = arith.constant dense<0.000000e+00> : vector<288x128xf32>
    %130 = tpu.matmul %127, %129, %cst_112 {dimension_numbers = #tpu.dot_dimension_numbers<[1], [0], [0], [1], [0, 0, 1, 1], [], []>} : vector<288x128xbf16>, vector<128x128xbf16>, vector<288x128xf32> -> vector<288x128xf32>
    %131 = arith.addf %126, %130 : vector<288x128xf32>
    %c38_113 = arith.constant 38 : index
    %c0_114 = arith.constant 0 : index
    %132 = vector.load %arg10[%c38_113, %c0_114] : memref<326x128xbf16, #tpu.memory_space<vmem>>, vector<288x128xbf16>
    %c8_115 = arith.constant 8 : index
    %c0_116 = arith.constant 0 : index
    %c0_117 = arith.constant 0 : index
    %133 = vector.load %arg6[%c8_115, %c0_116, %c0_117] : memref<9x128x128xbf16, #tpu.memory_space<vmem>>, vector<1x128x128xbf16>
    %134 = vector.shape_cast %133 : vector<1x128x128xbf16> to vector<128x128xbf16>
    %cst_118 = arith.constant dense<0.000000e+00> : vector<288x128xf32>
    %135 = tpu.matmul %132, %134, %cst_118 {dimension_numbers = #tpu.dot_dimension_numbers<[1], [0], [0], [1], [0, 0, 1, 1], [], []>} : vector<288x128xbf16>, vector<128x128xbf16>, vector<288x128xf32> -> vector<288x128xf32>
    %136 = arith.addf %131, %135 : vector<288x128xf32>
    %c19_119 = arith.constant 19 : index
    %c0_120 = arith.constant 0 : index
    %137 = vector.load %arg9[%c19_119, %c0_120] : memref<326x128xbf16, #tpu.memory_space<vmem>>, vector<288x128xbf16>
    %138 = arith.extf %137 : vector<288x128xbf16> to vector<288x128xf32>
    %c0_121 = arith.constant 0 : index
    %c0_122 = arith.constant 0 : index
    %139 = vector.load %arg7[%c0_121, %c0_122] : memref<1x128xf32, #tpu.memory_space<vmem>>, vector<1x128xf32>
    %140 = vector.broadcast %139 : vector<1x128xf32> to vector<288x128xf32>
    %141 = arith.addf %136, %140 : vector<288x128xf32>
    %142 = arith.addf %141, %138 : vector<288x128xf32>
    %cst_123 = arith.constant 0.000000e+00 : f32
    %143 = vector.broadcast %cst_123 : f32 to vector<288x128xf32>
    %144 = arith.maximumf %142, %143 : vector<288x128xf32>
    %cst_124 = arith.constant 0.000000e+00 : f32
    %145 = vector.shape_cast %22 : vector<288x1xi1> to vector<288x1xi1>
    %146 = vector.broadcast %145 : vector<288x1xi1> to vector<288x128xi1>
    %147 = vector.broadcast %cst_124 : f32 to vector<288x128xf32>
    %148 = arith.select %146, %144, %147 : vector<288x128xi1>, vector<288x128xf32>
    %cst_125 = arith.constant dense<0.000000e+00> : vector<128xf32>
    %149 = vector.multi_reduction <add>, %148, %cst_125 [0] : vector<288x128xf32> to vector<128xf32>
    %150 = vector.shape_cast %149 : vector<128xf32> to vector<1x128xf32>
    %cst_126 = arith.constant 3.906250e-03 : f32
    %151 = vector.broadcast %cst_126 : f32 to vector<1x128xf32>
    %152 = arith.mulf %150, %151 : vector<1x128xf32>
    %c0_127 = arith.constant 0 : index
    %c0_128 = arith.constant 0 : index
    %c0_129 = arith.constant 0 : index
    %153 = vector.load %arg8[%c0_127, %c0_128, %c0_129] : memref<1x1x128xf32, #tpu.memory_space<vmem>>, vector<1x1x128xf32>
    %154 = vector.shape_cast %153 : vector<1x1x128xf32> to vector<1x128xf32>
    %155 = vector.shape_cast %152 : vector<1x128xf32> to vector<1x1x128xf32>
    tpu.vector_store %arg8[%c0_127, %c0_128, %c0_129], %155 {strides = array<i32>} : memref<1x1x128xf32, #tpu.memory_space<vmem>>, vector<1x1x128xf32>,
    return
  }
  func.func @transform_0(%arg0: i32) -> (i32, i32, i32) {
    %c0_i32 = arith.constant 0 : i32
    %c0_i32_0 = arith.constant 0 : i32
    %c0_i32_1 = arith.constant 0 : i32
    return %arg0, %c0_i32, %c0_i32_0 : i32, i32, i32
  }
  func.func @transform_1(%arg0: i32) -> (i32, i32) {
    %c0_i32 = arith.constant 0 : i32
    %c0_i32_0 = arith.constant 0 : i32
    %c0_i32_1 = arith.constant 0 : i32
    return %c0_i32, %c0_i32_0 : i32, i32
  }
  func.func @transform_2(%arg0: i32) -> (i32, i32) {
    %c0_i32 = arith.constant 0 : i32
    %c0_i32_0 = arith.constant 0 : i32
    %c0_i32_1 = arith.constant 0 : i32
    return %c0_i32, %c0_i32_0 : i32, i32
  }
  func.func @transform_3(%arg0: i32) -> (i32, i32, i32) {
    %c0_i32 = arith.constant 0 : i32
    %c0_i32_0 = arith.constant 0 : i32
    %c0_i32_1 = arith.constant 0 : i32
    %c0_i32_2 = arith.constant 0 : i32
    return %c0_i32, %c0_i32_0, %c0_i32_1 : i32, i32, i32
  }
  func.func @transform_4(%arg0: i32) -> (i32, i32) {
    %c0_i32 = arith.constant 0 : i32
    %c0_i32_0 = arith.constant 0 : i32
    %c0_i32_1 = arith.constant 0 : i32
    return %c0_i32, %c0_i32_0 : i32, i32
  }
  func.func @transform_5(%arg0: i32) -> (i32, i32, i32) {
    %c0_i32 = arith.constant 0 : i32
    %c0_i32_0 = arith.constant 0 : i32
    %c0_i32_1 = arith.constant 0 : i32
    %c0_i32_2 = arith.constant 0 : i32
    return %c0_i32, %c0_i32_0, %c0_i32_1 : i32, i32, i32
  }
  func.func @transform_6(%arg0: i32) -> (i32, i32) {
    %c0_i32 = arith.constant 0 : i32
    %c0_i32_0 = arith.constant 0 : i32
    %c0_i32_1 = arith.constant 0 : i32
    return %c0_i32, %c0_i32_0 : i32, i32
  }
  func.func @transform_7(%arg0: i32) -> (i32, i32, i32) {
    %c0_i32 = arith.constant 0 : i32
    %c0_i32_0 = arith.constant 0 : i32
    %c0_i32_1 = arith.constant 0 : i32
    return %arg0, %c0_i32, %c0_i32_0 : i32, i32, i32
  }
}

</mosaic_0001>

<bundles_post_ra>
// kernel: _encode_padded.1
= control target key start
LH: loop header
LB: loop body
LE: loop exit
PB: predicated region body
PF: predicated region fallthrough
CT: control target
= control target key end

     0   :  { %12 = vsyncpa [#allocation5], 0  ;;  %s16624_s0 = inlined_call_operand.vmem [shape: bf16[2,288,32], index: 0, kind: input, shape index: {}]   ;;  %s16625_s1 = inlined_call_operand.vmem [shape: bf16[32,128], index: 1, kind: input, shape index: {}]   ;;  %s16626_s2 = inlined_call_operand.vmem [shape: f32[1,128], index: 2, kind: input, shape index: {}]   ;;  %s16627_s3 = inlined_call_operand.vmem [shape: bf16[9,128,128], index: 3, kind: input, shape index: {}]   ;;  %s16628_s4 = inlined_call_operand.vmem [shape: f32[1,128], index: 4, kind: input, shape index: {}]   ;;  %s16629_s5 = inlined_call_operand.vmem [shape: bf16[9,128,128], index: 5, kind: input, shape index: {}]   ;;  %s16630_s6 = inlined_call_operand.vmem [shape: f32[1,128], index: 6, kind: input, shape index: {}]   ;;  %s16631_s7 = inlined_call_operand.hbm [shape: f32[2,1,128], index: 7, kind: output, shape index: {}]  }
   0x1   :  { %14 = vsyncpa [#allocation5 + $0x1], 0  ;;  %s11550_s24 = smov 0   ;;  %s11552_s25 = smov 0  }
   0x2   :  { %s11554_s26 = smov 0   ;;  %s11556_s27 = smov 0  }
   0x3 LB: > { %s11571_s28 = sadd.s32 4294967295, %s11507_s27   ;;  %s9596_s29 = sadd.s32 4294967294, %s11507_s27   ;;  %s11507_s27 = sphi %s11556_s27, %s18030_s27   ;;  %s11503_s26 = sphi %s11554_s26, %s18029_s26   ;;  %s11499_s25 = sphi %s11552_s25, %s18028_s25   ;;  %s11495_s24 = sphi %s11550_s24, %s18027_s24  }
   0x4   : > { %s11575_s30 = sadd.s32 1, %s11507_s27   ;;  %s179_s8 = sadd.s32 1, %s11503_s26 }
   0x5   : > { %s176_s9 = ssub.s32 %s11507_s27, %s11575_s30  ;;  %p189_p0 = scmp.ne.s32.totalorder %s11503_s26, %s11499_s25 }
   0x6   : > { %p177_p1 = scmp.eq.s32.totalorder %s176_s9, 0  ;;  %p190_p2 = scmp.eq.s32.totalorder %s11571_s28, 1 }
   0x7   : > { %p195_p3 = scmp.ne.s32.totalorder %s11499_s25, %s11495_s24  ;;  %p196_p4 = scmp.eq.s32.totalorder %s9596_s29, 1 }
   0x8   : > { %s11586_s10 = scalar_select %p177_p1, %s11503_s26, %s179_s8  }
   0x9   : > { %p11588_p5 = por %p190_p2, %p189_p0  ;;  %p11592_p6 = por %p196_p4, %p195_p3 }
   0xa   : > { %p9599_p7 = scmp.ge.s32.totalorder %s11507_s27, 1  ;;  %p240_p8 = scmp.lt.s32.totalorder %s11507_s27, 3 }
   0xc   : > { %p241_p9 = pnand %p9599_p7, %p240_p8 }
   0xe   : > { %244 = sbr.rel (%p241_p9) target bundleno = 2122 (0x84a), region = 48 }
  0x13   : > { %v10960_v0 = vld [vmem:[%s16625_s1 + $0x8] sm:$0xff]  ;;  %p271_p10 = scmp.lt.s32.totalorder %s11571_s28, 1  ;;  %v10959_v1 = vld [vmem:[%s16625_s1] sm:$0xff]  ;;  %vm16634_vm0 = vcmask 261120   ;;  %v11624_v7 = vld [vmem:[%s16627_s3 + $0x38] sm:$0xff]  ;;  %v359_v8 = vlaneseq  ;;  %v16685_v18 = vmov 0  }
  0x14   : > { %1863 = vmatpush.bf16.msra.mxu0 %v10960_v0  ;;  %11306 = vmatpush.bf16.msra.mxu3 %v10960_v0  ;;  %279 = vst [vmem:[#allocation2 + $0x8] sm:$0xf] %v16685_v18  ;;  %v11640_v21 = vld [vmem:[%s16627_s3 + $0x30] sm:$0xff]  ;;  %v10983_v25 = vld [vmem:[%s16627_s3 + $0x28] sm:$0xff]  ;;  %v10982_v33 = vld [vmem:[%s16627_s3 + $0x20] sm:$0xff]  ;;  %s269_s15 = sand.u32 1, %s11499_s25  }
  0x15   : > { %s272_s17 = scalar_select %p271_p10, %s11571_s28, 1  ;;  %3124 = vmatpush.bf16.msra.mxu2 %v11624_v7  ;;  %v11627_v9 = vshrl.u32 %v359_v8, 7  ;;  %277 = vst [vmem:[#allocation2] sm:$0xf] %v16685_v18  ;;  %v10981_v45 = vld [vmem:[%s16627_s3 + $0x18] sm:$0xff]  ;;  %v10980_v49 = vld [vmem:[%s16627_s3 + $0x10] sm:$0xff] }
  0x16   : > { %278 = vst [vmem:[#allocation2 + $0x4] sm:$0xf] %v16685_v18  ;;  %v10993_v50 = vld [vmem:[%s16627_s3 + $0x78] sm:$0xff]  ;;  %s270_s19 = scalar_lea.vmem [#allocation4], %s269_s15  ;;  %s9529_s23 = scalar_lea.sflag [#allocation5], %s269_s15 }
  0x17   : > { %s11340_s18 = smul.u32 144, %s272_s17  ;;  %v399_v10 = vand.u32 65535, %v11627_v9  ;;  %v400_v11 = vshrl.u32 %v11627_v9, 16  ;;  %v11634_v20 = vadd.s32 8, %v11627_v9  ;;  %280 = vst [vmem:[#allocation2 + $0xc] sm:$0xf] %v16685_v18  ;;  %2959 = vmatpush.bf16.msra.mxu1 %v10993_v50 }
  0x18   : > { %1864 = vmatpush.bf16.msra.mxu0 %v10959_v1  ;;  %11307 = vmatpush.bf16.msra.mxu3 %v10959_v1  ;;  %281 = vst [vmem:[#allocation2 + $0x10] sm:$0xf] %v16685_v18  ;;  %v11688_v55 = vadd.s32 16, %v11627_v9  ;;  %s9539_s20 = sshll.u32 %s270_s19, 4  ;;  %s9540_s20 = int_to_ptr.vmem [resolvable:$true] %s9539_s20 }
  0x19   : > { %s11609_s21 = scalar_lea.vmem %s16624_s0, %s11340_s18  ;;  %v403_v12 = vmul.u32 58254, %v399_v10  ;;  %v402_v14 = vmul.u32 14564, %v399_v10  ;;  %v404_v15 = vmul.u32 14564, %v400_v11  ;;  %v405_v22 = vmul.u32 58254, %v400_v11  ;;  %3125 = vmatpush.bf16.msra.mxu2 %v11640_v21  ;;  %282 = vst [vmem:[#allocation2 + $0x14] sm:$0xf] %v16685_v18  ;;  %s9537_s18 = scalar_lea.hbm %s16631_s7, %s11571_s28 }
  0x1a   : > { %v10941_v2 = vld [vmem:[%s11609_s21] sm:$0xff]  ;;  %v10942_v3 = vld [vmem:[%s11609_s21 + $0x8] sm:$0xff]  ;;  %v10943_v4 = vld [vmem:[%s11609_s21 + $0x10] sm:$0xff]  ;;  %v428_v24 = vand.u32 65535, %v11634_v20  ;;  %v429_v26 = vshrl.u32 %v11634_v20, 16  ;;  %v457_v56 = vand.u32 65535, %v11688_v55 }
  0x1b   : > { %9681 = vmatmul.msk.bf16.vlgmr.msra.gmra.mxu0 %vm16634_vm0, %v10941_v2  ;;  %v10944_v5 = vld [vmem:[%s11609_s21 + $0x18] sm:$0xff]  ;;  %v10945_v6 = vld [vmem:[%s11609_s21 + $0x20] sm:$0xff]  ;;  %v10946_v13 = vld [vmem:[%s11609_s21 + $0x28] sm:$0xff]  ;;  %v406_v16 = vshll.u32 %v403_v12, 16  ;;  %v408_v17 = vshll.u32 %v404_v15, 16  ;;  %v407_v37 = vshrl.u32 %v403_v12, 16 }
  0x1c   : > { %v432_v27 = vmul.u32 58254, %v428_v24  ;;  %v431_v29 = vmul.u32 14564, %v428_v24  ;;  %v433_v30 = vmul.u32 14564, %v429_v26  ;;  %283 = vst [vmem:[#allocation2 + $0x18] sm:$0xf] %v16685_v18  ;;  %v434_v34 = vmul.u32 58254, %v429_v26  ;;  %11308 = vmatpush.bf16.msrb.mxu3 %v10993_v50 }
  0x1d   : > { %vm410_vm1 = vc.u32 %v402_v14, %v406_v16  ;;  %v412_v19 = vadd.s32 %v406_v16, %v402_v14  ;;  %3126 = vmatpush.bf16.msra.mxu2 %v10983_v25  ;;  %284 = vst [vmem:[#allocation2 + $0x1c] sm:$0xf] %v16685_v18  ;;  %v10947_v42 = vld [vmem:[%s11609_s21 + $0x30] sm:$0xff]  ;;  %v409_v43 = vshrl.u32 %v404_v15, 16  ;;  %v458_v59 = vshrl.u32 %v11688_v55, 16  ;;  %v10948_v63 = vld [vmem:[%s11609_s21 + $0x38] sm:$0xff] }
  0x1e   : > { %v411_v23 = vsel %vm410_vm1, 1, %v16685_v18  ;;  %v435_v32 = vshll.u32 %v432_v27, 16  ;;  %v437_v35 = vshll.u32 %v433_v30, 16  ;;  %285 = vst [vmem:[#allocation2 + $0x20] sm:$0xf] %v16685_v18  ;;  %v436_v46 = vshrl.u32 %v432_v27, 16 }
  0x1f   : > { %vm414_vm2 = vc.u32 %v412_v19, %v408_v17  ;;  %v413_v28 = vadd.s32 %v411_v23, %v405_v22  ;;  %286 = vst [vmem:[#allocation2 + $0x24] sm:$0xf] %v16685_v18  ;;  %v438_v51 = vshrl.u32 %v433_v30, 16  ;;  %v461_v60 = vmul.u32 58254, %v457_v56  ;;  %v11726_v17 = vld [vmem:[%s16627_s3 + $0x8] sm:$0xff]  ;;  %v10992_v24 = vld [vmem:[%s16627_s3 + $0x70] sm:$0xff] }
  0x20   : > { %v415_v31 = vsel %vm414_vm2, 1, %v16685_v18  ;;  %vm439_vm3 = vc.u32 %v431_v29, %v435_v32  ;;  %v441_v36 = vadd.s32 %v435_v32, %v431_v29  ;;  %287 = vst [vmem:[#allocation2 + $0x28] sm:$0xf] %v16685_v18  ;;  %v460_v61 = vmul.u32 14564, %v457_v56  ;;  %2960 = vmatpush.bf16.msra.mxu1 %v10992_v24  ;;  %11309 = vmatpush.bf16.msrb.mxu3 %v10992_v24  ;;  %v10990_v56 = vld [vmem:[%s16627_s3 + $0x60] sm:$0xff]  ;;  %s9541_s22 = sshll.u32 %s9537_s18, 4  ;;  %s9542_s22 = int_to_ptr.hbm [resolvable:$true] %s9541_s22 }
  0x21   : > { %v417_v38 = vadd.s32 %v415_v31, %v413_v28  ;;  %v440_v39 = vsel %vm439_vm3, 1, %v16685_v18  ;;  %3127 = vmatpush.bf16.msra.mxu2 %v10982_v33  ;;  %288 = vst [vmem:[#allocation2 + $0x2c] sm:$0xf] %v16685_v18  ;;  %v462_v62 = vmul.u32 14564, %v458_v59  ;;  %v464_v1 = vshll.u32 %v461_v60, 16  ;;  %v11756_v33 = vld [vmem:[%s16627_s3] sm:$0xff] }
  0x22   : > { %v442_v40 = vadd.s32 %v440_v39, %v434_v34  ;;  %vm443_vm4 = vc.u32 %v441_v36, %v437_v35  ;;  %289 = vst [vmem:[#allocation2 + $0x30] sm:$0xf] %v16685_v18  ;;  %v11746_v30 = vadd.s32 32, %v11627_v9  ;;  %v10991_v39 = vld [vmem:[%s16627_s3 + $0x68] sm:$0xff]  ;;  %s11459_s29 = sshra.s32 %s9542_s22, 4  ;;  %s11465_s28 = scalar_lea.hbm %s16631_s7, 2  ;;  %s11460_s29 = int_to_ptr.hbm [resolvable:$true] %s11459_s29 }
  0x23   : > { %v444_v41 = vsel %vm443_vm4, 1, %v16685_v18  ;;  %v418_v44 = vadd.s32 %v417_v38, %v407_v37  ;;  %290 = vst [vmem:[#allocation2 + $0x34] sm:$0xf] %v16685_v18  ;;  %vm468_vm5 = vc.u32 %v460_v61, %v464_v1  ;;  %v467_v19 = vshrl.u32 %v462_v62, 16  ;;  %s11461_s8 = scalar_lea.hbm %s11460_s29, 1  ;;  %p11466_p0 = scmp.lt.s32.totalorder %s11460_s29, %s16631_s7 }
  0x24   : > { %v446_v47 = vadd.s32 %v444_v41, %v442_v40  ;;  %291 = vst [vmem:[#allocation2 + $0x38] sm:$0xf] %v16685_v18  ;;  %v469_v8 = vsel %vm468_vm5, 1, %v16685_v18  ;;  %v515_v36 = vand.u32 65535, %v11746_v30  ;;  %2961 = vmatpush.bf16.msra.mxu1 %v10991_v39  ;;  %11310 = vmatpush.bf16.msrb.mxu3 %v10991_v39  ;;  %vm2535_vm4 = vcmask 1043457   ;;  %p11462_p11 = scmp.ne.s32.totalorder %s11460_s29, %s11461_s8  ;;  %p11467_p1 = scmp.lt.s32.totalorder %s11465_s28, %s11461_s8 }
  0x25   : > { %3128 = vmatpush.bf16.msra.mxu2 %v10981_v45  ;;  %292 = vst [vmem:[#allocation2 + $0x3c] sm:$0xf] %v16685_v18  ;;  %v419_v48 = vadd.s32 %v418_v44, %v409_v43  ;;  %v516_v44 = vshrl.u32 %v11746_v30, 16  ;;  %v11777_v45 = vld [vmem:[%s16626_s2] ss:$0 sm:$0xff] }
  0x26   : > { %293 = vst [vmem:[#allocation2 + $0x40] sm:$0xf] %v16685_v18  ;;  %v447_v52 = vadd.s32 %v446_v47, %v436_v46  ;;  %v10949_v46 = vld [vmem:[%s11609_s21 + $0x40] sm:$0xff]  ;;  %p11463_p12 = pnand %p11462_p11, %p11588_p5  ;;  %p11468_p2 = por %p11467_p1, %p11466_p0 }
  0x27   : > { %294 = vst [vmem:[#allocation2 + $0x44] sm:$0xf] %v16685_v18  ;;  %v420_v53 = vshrl.u32 %v419_v48, 4 }
  0x28   : > { %295 = vst [vmem:[#allocation2 + $0x48] sm:$0xf] %v16685_v18  ;;  %v448_v54 = vadd.s32 %v447_v52, %v438_v51  ;;  %v11792_v51 = vld [vmem:[#allocation2] sm:$0xff]   ;;  %2962 = vmatpush.bf16.msra.mxu1 %v10990_v56  ;;  %11311 = vmatpush.bf16.msrb.mxu3 %v10990_v56  ;;  %p11464_p13 = pneg %p11463_p12 }
  0x29   : > { %3129 = vmatpush.bf16.msra.mxu2 %v10980_v49  ;;  %296 = vst [vmem:[#allocation2 + $0x4c] sm:$0xf] %v16685_v18  ;;  %v421_v57 = vmul.u32 18, %v420_v53  ;;  %v11789_v49 = vmul.u32 58254, %v515_v36  ;;  %v518_v53 = vmul.u32 14564, %v515_v36 }
  0x2a   : > { %297 = vst [vmem:[#allocation2 + $0x50] sm:$0xf] %v16685_v18  ;;  %v449_v58 = vshrl.u32 %v448_v54, 4  ;;  %v16817_v54 = vmov 0  ;;  %v2538_v36 = vld [vmem:[#allocation2 + $0x8] sm:$0xe]  ;;  %p11469_p3 = pnand %p11468_p2, %p11464_p13 }
  0x2b   : > { %9682 = vmatmul.msk.bf16.gmra.mxu0 %vm16634_vm0, %v10942_v3  ;;  %298 = vst [vmem:[#allocation2 + $0x54] sm:$0xf] %v16685_v18  ;;  %v11700_v0 = vsub.s32 %v11627_v9, %v421_v57  ;;  %v463_v3 = vmul.u32 58254, %v458_v59  ;;  %v522_v59 = vshll.u32 %v11789_v49, 16 }
  0x2c   : > { %299 = vst [vmem:[#allocation2 + $0x58] sm:$0xf] %v16685_v18  ;;  %v450_v2 = vmul.u32 18, %v449_v58  ;;  %v11804_v58 = vmul.u32 14564, %v516_v44 }
  0x2d   : > { %300 = vst [vmem:[#allocation2 + $0x5c] sm:$0xf] %v16685_v18  ;;  %v471_v11 = vadd.s32 %v469_v8, %v463_v3  ;;  %vm1440_vm7 = vcmp.ne.s32.totalorder %v11700_v0, 0  ;;  %vm1476_vm8 = vcmp.lt.s32.totalorder %v11700_v0, 0  ;;  %3130 = vmatpush.bf16.msra.mxu2 %v11726_v17  ;;  %vm526_vm1 = vc.u32 %v518_v53, %v522_v59  ;;  %v10989_v8 = vld [vmem:[%s16627_s3 + $0x58] sm:$0xff] }
  0x2e   : > { %301 = vst [vmem:[#allocation2 + $0x60] sm:$0xf] %v16685_v18  ;;  %v11717_v12 = vsub.s32 %v11634_v20, %v450_v2  ;;  %v1548_v20 = vadd.s32 18, %v11700_v0  ;;  %vm11739_vm9 = vmand %vm1476_vm8, %vm1440_vm7  ;;  %v524_v3 = vshll.u32 %v11804_v58, 16  ;;  %2963 = vmatpush.bf16.msra.mxu1 %v10989_v8  ;;  %11312 = vmatpush.bf16.msrb.mxu3 %v10989_v8 }
  0x2f   : > { %302 = vst [vmem:[#allocation2 + $0x64] sm:$0xf] %v16685_v18 }
  0x30   : > { %303 = vst [vmem:[#allocation2 + $0x68] sm:$0xf] %v16685_v18  ;;  %vm1441_vm10 = vcmp.ne.s32.totalorder %v11717_v12, 0  ;;  %vm1477_vm12 = vcmp.lt.s32.totalorder %v11717_v12, 0  ;;  %v1584_v37 = vsel %vm11739_vm9, %v1548_v20, %v11700_v0  ;;  %v11765_v38 = vadd.s32 18, %v11717_v12 }
  0x31   : > { %304 = vst [vmem:[#allocation2 + $0x6c] sm:$0xf] %v16685_v18  ;;  %3131 = vmatpush.bf16.msra.mxu2 %v11756_v33  ;;  %vm11785_vm14 = vmand %vm1477_vm12, %vm1441_vm10  ;;  %vm11795_vm15 = vcmp.lt.s32.totalorder %v1584_v37, 16  ;;  %v11816_v0 = vadd.s32 40, %v11627_v9  ;;  %vm16632_vm9 = vsmask.f32 1280 }
  0x32   : > { %305 = vst [vmem:[#allocation2 + $0x70] sm:$0xf] %v16685_v18  ;;  %v16818_v54 = vsel %vm11795_vm15, 4294967295, %v16817_v54  ;;  %v10987_v37 = vld [vmem:[%s16627_s3 + $0x48] sm:$0xff] }
  0x33   : > { %306 = vst [vmem:[#allocation2 + $0x74] sm:$0xf] %v16685_v18 }
  0x34   : > { %307 = vst [vmem:[#allocation2 + $0x78] sm:$0xf] %v16685_v18  ;;  %3132 = vmatmul.bf16.vlgmr.msra.gmra.mxu2 %v11792_v51 }
  0x35   : > { %308 = vst [vmem:[#allocation2 + $0x7c] sm:$0xf] %v16685_v18 }
  0x36   : > { %309 = vst [vmem:[#allocation2 + $0x80] sm:$0xf] %v16685_v18 }
  0x37   : > { %310 = vst [vmem:[#allocation2 + $0x84] sm:$0xf] %v16685_v18 }
  0x38   : > { %311 = vst [vmem:[#allocation2 + $0x88] sm:$0xf] %v16685_v18 }
  0x39   : > { %312 = vst [vmem:[#allocation2 + $0x8c] sm:$0xf] %v16685_v18 }
  0x3a   : > { %313 = vst [vmem:[#allocation2 + $0x90] sm:$0xf] %v16685_v18 }
  0x3b   : > { %9683 = vmatmul.msk.bf16.gmra.mxu0 %vm16634_vm0, %v10943_v4  ;;  %v466_v4 = vshll.u32 %v462_v62, 16  ;;  %314 = vst [vmem:[#allocation2 + $0x94] sm:$0xf] %v16685_v18 }
  0x3c   : > { %315 = vst [vmem:[#allocation2 + $0x98] sm:$0xf] %v16685_v18 }
  0x3d   : > { %316 = vst [vmem:[#allocation2 + $0x9c] sm:$0xf] %v16685_v18 }
  0x3e   : > { %317 = vst [vmem:[#allocation2 + $0xa0] sm:$0x7] %v16685_v18 }
  0x3f   : > { %318 = vst [vmem:[#allocation3] sm:$0xf] %v16685_v18 }
  0x40   : > { %319 = vst [vmem:[#allocation3 + $0x4] sm:$0xf] %v16685_v18 }
  0x41   : > { %320 = vst [vmem:[#allocation3 + $0x8] sm:$0xf] %v16685_v18 }
  0x42   : > { %16819 = vst [vmem:[#allocation7_spill] sm:$0xff] %v16818_v54 }
  0x43   : > { %321 = vst [vmem:[#allocation3 + $0xc] sm:$0xf] %v16685_v18 }
  0x44   : > { %322 = vst [vmem:[#allocation3 + $0x10] sm:$0xf] %v16685_v18 }
  0x45   : > { %323 = vst [vmem:[#allocation3 + $0x14] sm:$0xf] %v16685_v18 }
  0x46   : > { %324 = vst [vmem:[#allocation3 + $0x18] sm:$0xf] %v16685_v18 }
  0x47   : > { %325 = vst [vmem:[#allocation3 + $0x1c] sm:$0xf] %v16685_v18 }
  0x48   : > { %326 = vst [vmem:[#allocation3 + $0x20] sm:$0xf] %v16685_v18 }
  0x49   : > { %327 = vst [vmem:[#allocation3 + $0x24] sm:$0xf] %v16685_v18 }
  0x4a   : > { %328 = vst [vmem:[#allocation3 + $0x28] sm:$0xf] %v16685_v18 }
  0x4b   : > { %9684 = vmatmul.msk.bf16.gmra.mxu0 %vm16634_vm0, %v10944_v5  ;;  %v11705_v5 = vadd.s32 24, %v11627_v9  ;;  %329 = vst [vmem:[#allocation3 + $0x2c] sm:$0xf] %v16685_v18 }
  0x4c   : > { %330 = vst [vmem:[#allocation3 + $0x30] sm:$0xf] %v16685_v18 }
  0x4d   : > { %v486_v10 = vand.u32 65535, %v11705_v5  ;;  %v487_v15 = vshrl.u32 %v11705_v5, 16  ;;  %331 = vst [vmem:[#allocation3 + $0x34] sm:$0xf] %v16685_v18 }
  0x4e   : > { %332 = vst [vmem:[#allocation3 + $0x38] sm:$0xf] %v16685_v18 }
  0x4f   : > { %v490_v16 = vmul.u32 58254, %v486_v10  ;;  %v489_v23 = vmul.u32 14564, %v486_v10  ;;  %v11733_v25 = vmul.u32 14564, %v487_v15  ;;  %v492_v29 = vmul.u32 58254, %v487_v15  ;;  %333 = vst [vmem:[#allocation3 + $0x3c] sm:$0xf] %v16685_v18 }
  0x50   : > { %334 = vst [vmem:[#allocation3 + $0x40] sm:$0xf] %v16685_v18 }
  0x51   : > { %v493_v26 = vshll.u32 %v490_v16, 16  ;;  %v495_v31 = vshll.u32 %v11733_v25, 16  ;;  %v496_v52 = vshrl.u32 %v11733_v25, 16  ;;  %335 = vst [vmem:[#allocation3 + $0x44] sm:$0xf] %v16685_v18 }
  0x52   : > { %336 = vst [vmem:[#allocation3 + $0x48] sm:$0xf] %v16685_v18 }
  0x53   : > { %vm497_vm11 = vc.u32 %v489_v23, %v493_v26  ;;  %v499_v32 = vadd.s32 %v493_v26, %v489_v23  ;;  %v523_v23 = vshrl.u32 %v11789_v49, 16  ;;  %v10988_v26 = vld [vmem:[%s16627_s3 + $0x50] sm:$0xff]  ;;  %337 = vst [vmem:[#allocation3 + $0x4c] sm:$0xf] %v16685_v18 }
  0x54   : > { %v498_v35 = vsel %vm497_vm11, 1, %v16685_v18  ;;  %2964 = vmatpush.bf16.msra.mxu1 %v10988_v26  ;;  %11313 = vmatpush.bf16.msrb.mxu3 %v10988_v26  ;;  %338 = vst [vmem:[#allocation3 + $0x50] sm:$0xf] %v16685_v18 }
  0x55   : > { %v500_v40 = vadd.s32 %v498_v35, %v492_v29  ;;  %vm501_vm13 = vc.u32 %v499_v32, %v495_v31  ;;  %339 = vst [vmem:[#allocation3 + $0x54] sm:$0xf] %v16685_v18 }
  0x56   : > { %v502_v43 = vsel %vm501_vm13, 1, %v16685_v18  ;;  %vm2137_vm13 = vsmask.f32 5392  ;;  %340 = vst [vmem:[#allocation3 + $0x58] sm:$0xf] %v16685_v18 }
  0x57   : > { %v504_v48 = vadd.s32 %v502_v43, %v500_v40  ;;  %v16825_v43 = vmov 0  ;;  %341 = vst [vmem:[#allocation3 + $0x5c] sm:$0xf] %v16685_v18 }
  0x58   : > { %2965 = vmatpush.bf16.msra.mxu1 %v10987_v37  ;;  %11314 = vmatpush.bf16.msrb.mxu3 %v10987_v37  ;;  %342 = vst [vmem:[#allocation3 + $0x60] sm:$0xf] %v16685_v18 }
  0x59   : > { %343 = vst [vmem:[#allocation3 + $0x64] sm:$0xf] %v16685_v18 }
  0x5a   : > { %344 = vst [vmem:[#allocation3 + $0x68] sm:$0xf] %v16685_v18 }
  0x5b   : > { %9685 = vmatmul.msk.bf16.gmra.mxu0 %vm16634_vm0, %v10945_v6  ;;  %v470_v6 = vadd.s32 %v464_v1, %v460_v61  ;;  %v1585_v61 = vsel %vm11785_vm14, %v11765_v38, %v11717_v12  ;;  %345 = vst [vmem:[#allocation3 + $0x6c] sm:$0xf] %v16685_v18 }
  0x5c   : > { %vm11841_vm8 = vcmp.lt.s32.totalorder %v1585_v61, 16  ;;  %346 = vst [vmem:[#allocation3 + $0x70] sm:$0xf] %v16685_v18 }
  0x5d   : > { %vm472_vm6 = vc.u32 %v470_v6, %v466_v4  ;;  %v527_v4 = vsel %vm526_vm1, 1, %v16685_v18  ;;  %347 = vst [vmem:[#allocation3 + $0x74] sm:$0xf] %v16685_v18 }
  0x5e   : > { %v473_v14 = vsel %vm472_vm6, 1, %v16685_v18  ;;  %vm2536_vm6 = vsmask.f32 7942  ;;  %348 = vst [vmem:[#allocation3 + $0x78] sm:$0xf] %v16685_v18 }
  0x5f   : > { %v475_v22 = vadd.s32 %v473_v14, %v471_v11  ;;  %v528_v11 = vadd.s32 %v522_v59, %v518_v53  ;;  %v544_v14 = vand.u32 65535, %v11816_v0  ;;  %vm11873_vm12 = vmand %vm2535_vm4, %vm2536_vm6  ;;  %349 = vst [vmem:[#allocation3 + $0x7c] sm:$0xf] %v16685_v18 }
  0x60   : > { %v16826_v43 = vsel %vm11873_vm12, 4294967295, %v16825_v43  ;;  %vm11941_vm4 = vmor %vm16632_vm9, %vm2137_vm13  ;;  %350 = vst [vmem:[#allocation3 + $0x80] sm:$0xf] %v16685_v18 }
  0x61   : > { %vm530_vm7 = vc.u32 %v528_v11, %v524_v3  ;;  %v11860_v35 = vmul.u32 58254, %v544_v14  ;;  %v547_v38 = vmul.u32 14564, %v544_v14  ;;  %16827 = vst [vmem:[#allocation9_spill] sm:$0xff] %v16826_v43  ;;  %v10986_v3 = vld [vmem:[%s16627_s3 + $0x40] sm:$0xff] }
  0x62   : > { %v531_v20 = vsel %vm530_vm7, 1, %v16685_v18  ;;  %2966 = vmatpush.bf16.msra.mxu1 %v10986_v3  ;;  %11315 = vmatpush.bf16.msrb.mxu3 %v10986_v3  ;;  %351 = vst [vmem:[#allocation3 + $0x84] sm:$0xf] %v16685_v18 }
  0x63   : > { %352 = vst [vmem:[#allocation3 + $0x88] sm:$0xf] %v16685_v18 }
  0x64   : > { %353 = vst [vmem:[#allocation3 + $0x8c] sm:$0xf] %v16685_v18 }
  0x65   : > { %354 = vst [vmem:[#allocation3 + $0x90] sm:$0xf] %v16685_v18 }
  0x66   : > { %355 = vst [vmem:[#allocation3 + $0x94] sm:$0xf] %v16685_v18 }
  0x67   : > { %356 = vst [vmem:[#allocation3 + $0x98] sm:$0xf] %v16685_v18 }
  0x68   : > { %357 = vst [vmem:[#allocation3 + $0x9c] sm:$0xf] %v16685_v18 }
  0x69   : > { %358 = vst [vmem:[#allocation3 + $0xa0] sm:$0x7] %v16685_v18 }
  0x6b   : > { %9686 = vmatmul.msk.bf16.gmra.mxu0 %vm16634_vm0, %v10946_v13  ;;  %v465_v13 = vshrl.u32 %v461_v60, 16 }
  0x6d   : > { %v476_v28 = vadd.s32 %v475_v22, %v465_v13  ;;  %v16822_v22 = vmov 0 }
  0x6e   : > { %v16823_v22 = vsel %vm11841_vm8, 4294967295, %v16822_v22 }
  0x6f   : > { %v477_v34 = vadd.s32 %v476_v28, %v467_v19  ;;  %16824 = vst [vmem:[#allocation8_spill] sm:$0xff] %v16823_v22  ;;  %v545_v28 = vshrl.u32 %v11816_v0, 16 }
  0x71   : > { %v478_v41 = vshrl.u32 %v477_v34, 4  ;;  %v525_v34 = vshrl.u32 %v11804_v58, 16  ;;  %v11881_v47 = vmul.u32 14564, %v545_v28  ;;  %v550_v58 = vmul.u32 58254, %v545_v28 }
  0x72   : > { %v16835_v28 = vmov 0 }
  0x73   : > { %v479_v50 = vmul.u32 18, %v478_v41  ;;  %v2748_v41 = vshll.u32 %v11792_v51, 16  ;;  %v553_v59 = vshll.u32 %v11881_v47, 16  ;;  %v16836_v28 = vsel %vm11941_vm4, 4294967295, %v16835_v28 }
  0x74   : > { %16837 = vst [vmem:[#allocation11_spill] sm:$0xff] %v16836_v28 }
  0x75   : > { %v11813_v62 = vsub.s32 %v11688_v55, %v479_v50  ;;  %v16828_v50 = vmov 0 }
  0x77   : > { %vm1442_vm2 = vcmp.ne.s32.totalorder %v11813_v62, 0  ;;  %vm1478_vm3 = vcmp.lt.s32.totalorder %v11813_v62, 0  ;;  %v1550_v55 = vadd.s32 18, %v11813_v62 }
  0x78   : > { %vm11832_vm5 = vmand %vm1478_vm3, %vm1442_vm2 }
  0x79   : > { %v1586_v24 = vsel %vm11832_vm5, %v1550_v55, %v11813_v62  ;;  %v552_v55 = vshrl.u32 %v11860_v35, 16 }
  0x7a   : > { %vm11887_vm14 = vcmp.lt.s32.totalorder %v1586_v24, 16 }
  0x7b   : > { %9687 = vmatmul.msk.bf16.gmra.mxu0 %vm16634_vm0, %v10947_v42  ;;  %v494_v42 = vshrl.u32 %v490_v16, 16  ;;  %v16829_v50 = vsel %vm11887_vm14, 4294967295, %v16828_v50 }
  0x7c   : > { %16830 = vst [vmem:[#allocation10_spill] sm:$0xff] %v16829_v50 }
  0x7d   : > { %v505_v57 = vadd.s32 %v504_v48, %v494_v42  ;;  %v551_v48 = vshll.u32 %v11860_v35, 16 }
  0x7f   : > { %v506_v2 = vadd.s32 %v505_v57, %v496_v52  ;;  %v2746_v57 = vshrl.u32 %v11792_v51, 16  ;;  %vm11908_vm2 = vc.u32 %v547_v38, %v551_v48  ;;  %v10950_v51 = vld [vmem:[%s11609_s21 + $0x48] sm:$0xff] }
  0x80   : > { %v556_v14 = vsel %vm11908_vm2, 1, %v16685_v18 }
  0x81   : > { %v507_v10 = vshrl.u32 %v506_v2, 4 }
  0x83   : > { %v508_v16 = vmul.u32 18, %v507_v10 }
  0x85   : > { %v11852_v25 = vsub.s32 %v11705_v5, %v508_v16 }
  0x87   : > { %vm1443_vm10 = vcmp.ne.s32.totalorder %v11852_v25, 0  ;;  %vm1479_vm11 = vcmp.lt.s32.totalorder %v11852_v25, 0 }
  0x88   : > { %vm11895_vm1 = vmand %vm1479_vm11, %vm1443_vm10 }
  0x8b   : > { %9688 = vmatmul.msk.bf16.gmra.mxu0 %vm16634_vm0, %v10948_v63  ;;  %v521_v63 = vmul.u32 58254, %v516_v44 }
  0x8d   : > { %v529_v12 = vadd.s32 %v527_v4, %v521_v63  ;;  %v557_v4 = vadd.s32 %v551_v48, %v547_v38 }
  0x8f   : > { %v533_v27 = vadd.s32 %v531_v20, %v529_v12  ;;  %vm559_vm3 = vc.u32 %v557_v4, %v553_v59  ;;  %v558_v20 = vadd.s32 %v556_v14, %v550_v58 }
  0x91   : > { %v534_v42 = vadd.s32 %v533_v27, %v523_v23 }
  0x93   : > { %v535_v53 = vadd.s32 %v534_v42, %v525_v34 }
  0x95   : > { %v536_v62 = vshrl.u32 %v535_v53, 4 }
  0x97   : > { %v537_v12 = vmul.u32 18, %v536_v62 }
  0x98   : > { %v1866_v60 = vpop.f32.mrf.mxu0 }
  0x99   : > { %v1867_v1 = vadd.f32 %v11777_v45, %v1866_v60  ;;  %v538_v23 = vsub.s32 %v11746_v30, %v537_v12 }
  0x9b   : > { %v1956_v6 = vmax.f32 %v1867_v1, 0.0  ;;  %9689 = vmatmul.msk.bf16.gmra.mxu0 %vm16634_vm0, %v10949_v46  ;;  %v11879_v46 = vadd.s32 18, %v11852_v25  ;;  %v2750_v1 = vrot.slane %v2748_v41, 1  ;;  %vm1444_vm5 = vcmp.ne.s32.totalorder %v538_v23, 0 }
  0x9c   : > { %vm1480_vm6 = vcmp.lt.s32.totalorder %v538_v23, 0 }
  0x9d   : > { %v2064_v15 = vsel %vm11795_vm15, %v1956_v6, 0.0  ;;  %v1587_v2 = vsel %vm11895_vm1, %v11879_v46, %v11852_v25  ;;  %v560_v25 = vsel %vm559_vm3, 1, %v16685_v18  ;;  %vm11956_vm10 = vmand %vm1480_vm6, %vm1444_vm5  ;;  %v11960_v38 = vor.u32 %v2750_v1, %v2746_v57 }
  0x9e   : > { %v2100_v19 = vpack.c.bf16 %v2064_v15, %v2064_v15  ;;  %v11929_v15 = vadd.s32 48, %v11627_v9  ;;  %v562_v34 = vadd.s32 %v560_v25, %v558_v20  ;;  %vm11952_vm7 = vcmp.lt.s32.totalorder %v1587_v2, 16 }
  0x9f   : > { %v16843_v2 = vmov 0 }
  0xa0   : > { %v2140_v29 = vshrl.u32 %v2100_v19, 16  ;;  %v2143_v31 = vshll.u32 %v2100_v19, 16  ;;  %v1868_v32 = vpop.f32.mrf.mxu0  ;;  %v573_v26 = vand.u32 65535, %v11929_v15  ;;  %v574_v27 = vshrl.u32 %v11929_v15, 16 }
  0xa1   : > { %v1869_v5 = vadd.f32 %v11777_v45, %v1868_v32  ;;  %v1552_v32 = vadd.s32 18, %v538_v23  ;;  %v563_v42 = vadd.s32 %v562_v34, %v552_v55 }
  0xa2   : > { %v2142_v39 = vrot.slane %v2140_v29, 6  ;;  %v2145_v40 = vrot.slane %v2143_v31, 7  ;;  %v554_v29 = vshrl.u32 %v11881_v47, 16  ;;  %v577_v35 = vmul.u32 58254, %v573_v26 }
  0xa3   : > { %v1957_v44 = vmax.f32 %v1869_v5, 0.0  ;;  %v16838_v5 = vmov 0 }
  0xa4   : > { %v11884_v49 = vor.u32 %v2145_v40, %v2142_v39  ;;  %v16839_v5 = vsel %vm11952_vm7, 4294967295, %v16838_v5  ;;  %v576_v39 = vmul.u32 14564, %v573_v26  ;;  %v580_v52 = vshll.u32 %v577_v35, 16 }
  0xa5   : > { %v2065_v56 = vsel %vm11841_vm8, %v1957_v44, 0.0  ;;  %16840 = vst [vmem:[#allocation12_spill] sm:$0xff] %v16839_v5  ;;  %v578_v44 = vmul.u32 14564, %v574_v27  ;;  %v564_v57 = vadd.s32 %v563_v42, %v554_v29  ;;  %v581_v3 = vshrl.u32 %v577_v35, 16 }
  0xa6   : > { %v2539_v60 = vsel %vm11873_vm12, %v11884_v49, %v2538_v36  ;;  %v2101_v61 = vpack.c.bf16 %v2065_v56, %v2065_v56  ;;  %v2147_v6 = vrot.slane %v11884_v49, 4  ;;  %v579_v49 = vmul.u32 58254, %v574_v27 }
  0xa7   : > { %2540 = vst [vmem:[#allocation2 + $0x8] sm:$0xe] %v2539_v60  ;;  %v1588_v56 = vsel %vm11956_vm10, %v1552_v32, %v538_v23  ;;  %v582_v58 = vshll.u32 %v578_v44, 16  ;;  %vm584_vm11 = vc.u32 %v576_v39, %v580_v52  ;;  %v565_v63 = vshrl.u32 %v564_v57, 4 }
  0xa8   : > { %v2149_v8 = vshrl.u32 %v2101_v61, 16  ;;  %v2152_v10 = vshll.u32 %v2101_v61, 16  ;;  %v1871_v11 = vpop.f32.mrf.mxu0  ;;  %v586_v61 = vadd.s32 %v580_v52, %v576_v39  ;;  %v585_v1 = vsel %vm584_vm11, 1, %v16685_v18 }
  0xa9   : > { %v1872_v13 = vadd.f32 %v11777_v45, %v1871_v11  ;;  %vm11981_vm13 = vcmp.lt.s32.totalorder %v1588_v56, 16  ;;  %v587_v55 = vadd.s32 %v585_v1, %v579_v49  ;;  %vm16633_vm11 = vsmask.f32 7424 }
  0xaa   : > { %v2151_v16 = vrot.slane %v2149_v8, 6  ;;  %v2154_v19 = vrot.slane %v2152_v10, 7  ;;  %v16844_v2 = vsel %vm11981_vm13, 4294967295, %v16843_v2  ;;  %vm588_vm1 = vc.u32 %v586_v61, %v582_v58 }
  0xab   : > { %v1958_v24 = vmax.f32 %v1872_v13, 0.0  ;;  %9690 = vmatmul.msk.bf16.gmra.mxu0 %vm16634_vm0, %v10950_v51  ;;  %v11978_v51 = vadd.s32 56, %v11627_v9  ;;  %16845 = vst [vmem:[#allocation13_spill] sm:$0xff] %v16844_v2  ;;  %v589_v8 = vsel %vm588_vm1, 1, %v16685_v18  ;;  %v583_v13 = vshrl.u32 %v578_v44, 16 }
  0xac   : > { %v11945_v30 = vor.u32 %v2154_v19, %v2151_v16  ;;  %v591_v14 = vadd.s32 %v589_v8, %v587_v55  ;;  %v10951_v16 = vld [vmem:[%s11609_s21 + $0x50] sm:$0xff] }
  0xad   : > { %v2066_v31 = vsel %vm11887_vm14, %v1958_v24, 0.0  ;;  %v602_v10 = vand.u32 65535, %v11978_v51  ;;  %v603_v23 = vshrl.u32 %v11978_v51, 16  ;;  %v11998_v24 = vadd.s32 64, %v11627_v9 }
  0xae   : > { %v2102_v36 = vpack.c.bf16 %v2066_v31, %v2066_v31  ;;  %v11966_v40 = vsel %vm11941_vm4, %v2147_v6, %v11945_v30  ;;  %v2157_v41 = vrot.slane %v11945_v30, 4  ;;  %v566_v6 = vmul.u32 18, %v565_v63 }
  0xaf   : > { %v11995_v20 = vmul.u32 58254, %v602_v10  ;;  %v592_v29 = vadd.s32 %v591_v14, %v581_v3  ;;  %v605_v31 = vmul.u32 14564, %v602_v10  ;;  %v12008_v39 = vmul.u32 14564, %v603_v23  ;;  %2541 = vst [vmem:[#allocation2 + $0xc] sm:$0xf] %v11966_v40 }
  0xb0   : > { %v2159_v46 = vshrl.u32 %v2102_v36, 16  ;;  %v2162_v47 = vshll.u32 %v2102_v36, 16  ;;  %v1873_v48 = vpop.f32.mrf.mxu0  ;;  %v567_v19 = vsub.s32 %v11816_v0, %v566_v6  ;;  %v631_v56 = vand.u32 65535, %v11998_v24 }
  0xb1   : > { %v1874_v53 = vadd.f32 %v11777_v45, %v1873_v48  ;;  %v593_v37 = vadd.s32 %v592_v29, %v583_v13  ;;  %v610_v61 = vshrl.u32 %v11995_v20, 16  ;;  %v632_v1 = vshrl.u32 %v11998_v24, 16 }
  0xb2   : > { %v2161_v59 = vrot.slane %v2159_v46, 6  ;;  %v2164_v60 = vrot.slane %v2162_v47, 7  ;;  %vm1445_vm2 = vcmp.ne.s32.totalorder %v567_v19, 0  ;;  %vm1481_vm3 = vcmp.lt.s32.totalorder %v567_v19, 0 }
  0xb3   : > { %v1959_v62 = vmax.f32 %v1874_v53, 0.0  ;;  %v1553_v0 = vadd.s32 18, %v567_v19  ;;  %vm12004_vm5 = vmand %vm1481_vm3, %vm1445_vm2  ;;  %v609_v47 = vshll.u32 %v11995_v20, 16  ;;  %v594_v52 = vshrl.u32 %v593_v37, 4 }
  0xb4   : > { %v2165_v11 = vor.u32 %v2164_v60, %v2161_v59  ;;  %v608_v53 = vmul.u32 58254, %v603_v23  ;;  %v16848_v59 = vmov 0  ;;  %v12037_v10 = vmul.u32 58254, %v631_v56 }
  0xb5   : > { %v2067_v4 = vsel %vm11952_vm7, %v1959_v62, 0.0  ;;  %v1589_v46 = vsel %vm12004_vm5, %v1553_v0, %v567_v19  ;;  %vm613_vm6 = vc.u32 %v605_v31, %v609_v47  ;;  %v595_v60 = vmul.u32 18, %v594_v52 }
  0xb6   : > { %v2103_v12 = vpack.c.bf16 %v2067_v4, %v2067_v4  ;;  %v2166_v42 = vsel %vm11941_vm4, %v2157_v41, %v2165_v11  ;;  %v2167_v48 = vrot.slane %v2165_v11, 4  ;;  %v611_v41 = vshll.u32 %v12008_v39, 16  ;;  %v10961_v29 = vld [vmem:[#allocation2 + $0x8] sm:$0xff] }
  0xb7   : > { %vm12028_vm10 = vcmp.lt.s32.totalorder %v1589_v46, 16  ;;  %2542 = vst [vmem:[#allocation2 + $0x10] sm:$0xf] %v2166_v42  ;;  %v614_v62 = vsel %vm613_vm6, 1, %v16685_v18  ;;  %v615_v63 = vadd.s32 %v609_v47, %v605_v31  ;;  %v596_v4 = vsub.s32 %v11929_v15, %v595_v60  ;;  %3137 = vmatmul.bf16.gmra.mxu2 %v10961_v29 }
  0xb8   : > { %v2169_v25 = vshrl.u32 %v2103_v12, 16  ;;  %v2172_v26 = vshll.u32 %v2103_v12, 16  ;;  %v1876_v27 = vpop.f32.mrf.mxu0  ;;  %v16849_v59 = vsel %vm12028_vm10, 4294967295, %v16848_v59  ;;  %v616_v6 = vadd.s32 %v614_v62, %v608_v53 }
  0xb9   : > { %v1877_v32 = vadd.f32 %v11777_v45, %v1876_v27  ;;  %16850 = vst [vmem:[#allocation14_spill] sm:$0xff] %v16849_v59  ;;  %vm617_vm1 = vc.u32 %v615_v63, %v611_v41  ;;  %v12039_v11 = vmul.u32 14564, %v632_v1  ;;  %vm1446_vm2 = vcmp.ne.s32.totalorder %v596_v4, 0 }
  0xba   : > { %v2171_v34 = vrot.slane %v2169_v25, 6  ;;  %v2174_v35 = vrot.slane %v2172_v26, 7  ;;  %vm1482_vm3 = vcmp.lt.s32.totalorder %v596_v4, 0  ;;  %v1554_v19 = vadd.s32 18, %v596_v4 }
  0xbb   : > { %v1960_v44 = vmax.f32 %v1877_v32, 0.0  ;;  %9691 = vmatmul.msk.bf16.gmra.mxu0 %vm16634_vm0, %v10951_v16  ;;  %vm12041_vm5 = vmand %vm1482_vm3, %vm1446_vm2  ;;  %v618_v15 = vsel %vm617_vm1, 1, %v16685_v18  ;;  %v634_v23 = vmul.u32 14564, %v631_v56  ;;  %v638_v27 = vshll.u32 %v12037_v10, 16 }
  0xbc   : > { %v2175_v49 = vor.u32 %v2174_v35, %v2171_v34  ;;  %v620_v26 = vadd.s32 %v618_v15, %v616_v6  ;;  %v1590_v32 = vsel %vm12041_vm5, %v1554_v19, %v596_v4  ;;  %v612_v0 = vshrl.u32 %v12008_v39, 16 }
  0xbd   : > { %v2068_v30 = vsel %vm11981_vm13, %v1960_v44, 0.0  ;;  %v637_v34 = vmul.u32 58254, %v632_v1  ;;  %v639_v37 = vshrl.u32 %v12037_v10, 16  ;;  %v640_v42 = vshll.u32 %v12039_v11, 16 }
  0xbe   : > { %v2176_v57 = vsel %vm11941_vm4, %v2167_v48, %v2175_v49  ;;  %v2104_v58 = vpack.c.bf16 %v2068_v30, %v2068_v30  ;;  %v2177_v20 = vrot.slane %v2175_v49, 4  ;;  %v2753_v44 = vshll.u32 %v10961_v29, 16  ;;  %v10952_v48 = vld [vmem:[%s11609_s21 + $0x58] sm:$0xff] }
  0xbf   : > { %2543 = vst [vmem:[#allocation2 + $0x14] sm:$0xf] %v2176_v57  ;;  %vm12056_vm6 = vcmp.lt.s32.totalorder %v1590_v32, 16  ;;  %v16853_v46 = vmov 0  ;;  %v621_v39 = vadd.s32 %v620_v26, %v610_v61  ;;  %vm642_vm1 = vc.u32 %v634_v23, %v638_v27 }
  0xc0   : > { %v2179_v3 = vshrl.u32 %v2104_v58, 16  ;;  %v2182_v40 = vshll.u32 %v2104_v58, 16  ;;  %v1878_v55 = vpop.f32.mrf.mxu0  ;;  %v16854_v46 = vsel %vm12056_vm6, 4294967295, %v16853_v46  ;;  %v643_v30 = vsel %vm642_vm1, 1, %v16685_v18 }
  0xc1   : > { %v1879_v8 = vadd.f32 %v11777_v45, %v1878_v55  ;;  %16855 = vst [vmem:[#allocation15_spill] sm:$0xff] %v16854_v46  ;;  %v644_v41 = vadd.s32 %v638_v27, %v634_v23  ;;  %v2755_v56 = vrot.slane %v2753_v44, 1  ;;  %v622_v60 = vadd.s32 %v621_v39, %v612_v0 }
  0xc2   : > { %v2181_v12 = vrot.slane %v2179_v3, 6  ;;  %v2184_v13 = vrot.slane %v2182_v40, 7  ;;  %v645_v1 = vadd.s32 %v643_v30, %v637_v34  ;;  %v2757_v40 = vshrl.u32 %v10961_v29, 16 }
  0xc3   : > { %v1961_v14 = vmax.f32 %v1879_v8, 0.0  ;;  %vm646_vm2 = vc.u32 %v644_v41, %v640_v42  ;;  %v2756_v61 = vsel %vm16633_vm11, %v11960_v38, %v2755_v56  ;;  %v641_v55 = vshrl.u32 %v12039_v11, 16 }
  0xc4   : > { %v2185_v25 = vor.u32 %v2184_v13, %v2181_v12  ;;  %2967 = vmatmul.bf16.vlgmr.msra.gmra.mxu1 %v2756_v61  ;;  %v623_v8 = vshrl.u32 %v622_v60, 4  ;;  %v647_v10 = vsel %vm646_vm2, 1, %v16685_v18  ;;  %v10956_v12 = vld [vmem:[%s11609_s21 + $0x78] sm:$0xff]  ;;  %v12075_v38 = vadd.s32 72, %v11627_v9 }
  0xc5   : > { %v2069_v31 = vsel %vm12028_vm10, %v1961_v14, 0.0  ;;  %v2759_v14 = vor.u32 %v2757_v40, %v2755_v56  ;;  %v649_v16 = vadd.s32 %v647_v10, %v645_v1  ;;  %9696 = vmatmul.msk.bf16.vlgmr.msra.gmra.mxu3 %vm16634_vm0, %v10956_v12  ;;  %v12097_v41 = vadd.s32 80, %v11627_v9  ;;  %v10953_v40 = vld [vmem:[%s11609_s21 + $0x60] sm:$0xff] }
  0xc6   : > { %v2186_v35 = vsel %vm11941_vm4, %v2177_v20, %v2185_v25  ;;  %v2105_v36 = vpack.c.bf16 %v2069_v31, %v2069_v31  ;;  %v12060_v47 = vld [vmem:[#allocation2 + $0x10] sm:$0xff]  ;;  %v2187_v4 = vrot.slane %v2185_v25, 4  ;;  %v624_v23 = vmul.u32 18, %v623_v8  ;;  %11316 = vmatpush.bf16.msra.mxu3 %v11624_v7 }
  0xc7   : > { %2544 = vst [vmem:[#allocation2 + $0x18] sm:$0xf] %v2186_v35  ;;  %v2761_v58 = vshll.u32 %v12060_v47, 16  ;;  %v650_v20 = vadd.s32 %v649_v16, %v639_v37  ;;  %v2765_v25 = vshrl.u32 %v12060_v47, 16  ;;  %v660_v26 = vand.u32 65535, %v12075_v38  ;;  %3142 = vmatmul.bf16.gmra.mxu2 %v12060_v47 }
  0xc8   : > { %v2189_v49 = vshrl.u32 %v2105_v36, 16  ;;  %v2192_v52 = vshll.u32 %v2105_v36, 16  ;;  %v1881_v53 = vpop.f32.mrf.mxu0  ;;  %v661_v27 = vshrl.u32 %v12075_v38, 16  ;;  %v625_v0 = vsub.s32 %v11978_v51, %v624_v23 }
  0xc9   : > { %v1882_v57 = vadd.f32 %v11777_v45, %v1881_v53  ;;  %v12079_v11 = vrot.slane %v2761_v58, 1  ;;  %v651_v36 = vadd.s32 %v650_v20, %v641_v55  ;;  %v663_v42 = vmul.u32 14564, %v660_v26 }
  0xca   : > { %v2191_v62 = vrot.slane %v2189_v49, 6  ;;  %v2194_v63 = vrot.slane %v2192_v52, 7  ;;  %v12088_v44 = vmul.u32 58254, %v660_v26  ;;  %vm1447_vm3 = vcmp.ne.s32.totalorder %v625_v0, 0  ;;  %11317 = vmatpush.bf16.msra.mxu3 %v11640_v21 }
  0xcb   : > { %v1962_v3 = vmax.f32 %v1882_v57, 0.0  ;;  %9692 = vmatmul.msk.bf16.gmra.mxu0 %vm16634_vm0, %v10952_v48  ;;  %vm1483_vm5 = vcmp.lt.s32.totalorder %v625_v0, 0  ;;  %v1555_v39 = vadd.s32 18, %v625_v0  ;;  %v652_v7 = vshrl.u32 %v651_v36, 4 }
  0xcc   : > { %v2195_v6 = vor.u32 %v2194_v63, %v2191_v62  ;;  %vm1519_vm1 = vmand %vm1483_vm5, %vm1447_vm3  ;;  %v12090_v52 = vmul.u32 14564, %v661_v27  ;;  %v666_v53 = vmul.u32 58254, %v661_v27  ;;  %v667_v30 = vshll.u32 %v12088_v44, 16 }
  0xcd   : > { %v2070_v13 = vsel %vm12056_vm6, %v1962_v3, 0.0  ;;  %v2764_v56 = vsel %vm16633_vm11, %v2759_v14, %v12079_v11  ;;  %v1591_v57 = vsel %vm1519_vm1, %v1555_v39, %v625_v0  ;;  %v653_v58 = vmul.u32 18, %v652_v7 }
  0xce   : > { %v2196_v19 = vsel %vm11941_vm4, %v2187_v4, %v2195_v6  ;;  %v2106_v15 = vpack.c.bf16 %v2070_v13, %v2070_v13  ;;  %v2197_v29 = vrot.slane %v2195_v6, 4  ;;  %v668_v60 = vshrl.u32 %v12088_v44, 16  ;;  %v11384_v6 = vld [vmem:[%s16627_s3 + $0x28] sm:$0xff] }
  0xcf   : > { %2545 = vst [vmem:[#allocation2 + $0x1c] sm:$0xf] %v2196_v19  ;;  %vm12105_vm2 = vcmp.lt.s32.totalorder %v1591_v57, 16  ;;  %v16856_v62 = vmov 0  ;;  %v669_v1 = vshll.u32 %v12090_v52, 16  ;;  %vm671_vm3 = vc.u32 %v663_v42, %v667_v30  ;;  %11318 = vmatpush.bf16.msra.mxu3 %v11384_v6  ;;  %v11026_v19 = vld [vmem:[%s16627_s3 + $0xf8] sm:$0xff] }
  0xd0   : > { %v2199_v31 = vshrl.u32 %v2106_v15, 16  ;;  %v2202_v32 = vshll.u32 %v2106_v15, 16  ;;  %v1883_v34 = vpop.f32.mrf.mxu0  ;;  %v16857_v62 = vsel %vm12105_vm2, 4294967295, %v16856_v62  ;;  %v654_v3 = vsub.s32 %v11998_v24, %v653_v58  ;;  %3733 = vmatpush.bf16.msrb.mxu0 %v11026_v19  ;;  %v11386_v58 = vld [vmem:[%s16627_s3 + $0x18] sm:$0xff] }
  0xd1   : > { %v1884_v35 = vadd.f32 %v11777_v45, %v1883_v34  ;;  %16858 = vst [vmem:[#allocation16_spill] sm:$0xff] %v16857_v62  ;;  %v672_v55 = vsel %vm671_vm3, 1, %v16685_v18  ;;  %v673_v4 = vadd.s32 %v667_v30, %v663_v42  ;;  %v689_v14 = vand.u32 65535, %v12097_v41  ;;  %v10957_v42 = vld [vmem:[%s11609_s21 + $0x80] sm:$0xff] }
  0xd2   : > { %v2201_v37 = vrot.slane %v2199_v31, 6  ;;  %v2204_v48 = vrot.slane %v2202_v32, 7  ;;  %v674_v13 = vadd.s32 %v672_v55, %v666_v53  ;;  %vm1448_vm5 = vcmp.ne.s32.totalorder %v654_v3, 0  ;;  %v11385_v32 = vld [vmem:[%s16627_s3 + $0x20] sm:$0xff] }
  0xd3   : > { %v1963_v49 = vmax.f32 %v1884_v35, 0.0  ;;  %vm1484_vm1 = vcmp.lt.s32.totalorder %v654_v3, 0  ;;  %v1556_v16 = vadd.s32 18, %v654_v3  ;;  %v670_v20 = vshrl.u32 %v12090_v52, 16  ;;  %11319 = vmatpush.bf16.msra.mxu3 %v11385_v32 }
  0xd4   : > { %v12093_v51 = vor.u32 %v2204_v48, %v2201_v37  ;;  %vm1520_vm3 = vmand %vm1484_vm1, %vm1448_vm5  ;;  %vm675_vm9 = vc.u32 %v673_v4, %v669_v1  ;;  %v690_v31 = vshrl.u32 %v12097_v41, 16  ;;  %2972 = vmatmul.bf16.gmra.mxu1 %v2764_v56  ;;  %v16859_v36 = vmov 0 }
  0xd5   : > { %v2071_v61 = vsel %vm12105_vm2, %v1963_v49, 0.0  ;;  %v1592_v26 = vsel %vm1520_vm3, %v1556_v16, %v654_v3  ;;  %v693_v39 = vmul.u32 58254, %v689_v14  ;;  %v11025_v49 = vld [vmem:[%s16627_s3 + $0xf0] sm:$0xff]  ;;  %9697 = vmatmul.msk.bf16.gmra.mxu3 %vm16634_vm0, %v10957_v42  ;;  %v2767_v30 = vor.u32 %v2765_v25, %v12079_v11 }
  0xd6   : > { %v2206_v21 = vsel %vm11941_vm4, %v2197_v29, %v12093_v51  ;;  %v12109_v63 = vld [vmem:[#allocation2 + $0x18] sm:$0xff]  ;;  %v2107_v8 = vpack.c.bf16 %v2071_v61, %v2071_v61  ;;  %v676_v29 = vsel %vm675_vm9, 1, %v16685_v18  ;;  %v2207_v0 = vrot.slane %v12093_v51, 4  ;;  %3734 = vmatpush.bf16.msrb.mxu0 %v11025_v49  ;;  %v11387_v16 = vld [vmem:[%s16627_s3 + $0x10] sm:$0xff] }
  0xd7   : > { %2546 = vst [vmem:[#allocation2 + $0x20] sm:$0xf] %v2206_v21  ;;  %v2769_v12 = vshll.u32 %v12109_v63, 16  ;;  %vm12135_vm5 = vcmp.lt.s32.totalorder %v1592_v26, 16  ;;  %v678_v48 = vadd.s32 %v676_v29, %v674_v13  ;;  %v692_v51 = vmul.u32 14564, %v689_v14  ;;  %11320 = vmatpush.bf16.msra.mxu3 %v11386_v58  ;;  %v11023_v29 = vld [vmem:[%s16627_s3 + $0xe0] sm:$0xff]  ;;  %3147 = vmatmul.bf16.gmra.mxu2 %v12109_v63 }
  0xd8   : > { %v1886_v10 = vpop.f32.mrf.mxu0  ;;  %v2209_v15 = vshrl.u32 %v2107_v8, 16  ;;  %v2212_v23 = vshll.u32 %v2107_v8, 16  ;;  %v16860_v36 = vsel %vm12135_vm5, 4294967295, %v16859_v36  ;;  %v12145_v53 = vmul.u32 14564, %v690_v31 }
  0xd9   : > { %v1887_v24 = vadd.f32 %v11777_v45, %v1886_v10  ;;  %16861 = vst [vmem:[#allocation17_spill] sm:$0xff] %v16860_v36  ;;  %v2771_v37 = vrot.slane %v2769_v12, 1  ;;  %v679_v56 = vadd.s32 %v678_v48, %v668_v60  ;;  %v696_v57 = vshll.u32 %v693_v39, 16  ;;  %v11024_v60 = vld [vmem:[%s16627_s3 + $0xe8] sm:$0xff] }
  0xda   : > { %v2211_v34 = vrot.slane %v2209_v15, 6  ;;  %v2214_v35 = vrot.slane %v2212_v23, 7  ;;  %v697_v11 = vshrl.u32 %v693_v39, 16  ;;  %v698_v25 = vshll.u32 %v12145_v53, 16  ;;  %3735 = vmatpush.bf16.msrb.mxu0 %v11024_v60 }
  0xdb   : > { %v1964_v27 = vmax.f32 %v1887_v24, 0.0  ;;  %9693 = vmatmul.msk.bf16.gmra.mxu0 %vm16634_vm0, %v10953_v40  ;;  %v695_v40 = vmul.u32 58254, %v690_v31  ;;  %v2772_v55 = vsel %vm16633_vm11, %v2767_v30, %v2771_v37  ;;  %v680_v47 = vadd.s32 %v679_v56, %v670_v20  ;;  %11321 = vmatpush.bf16.msra.mxu3 %v11387_v16  ;;  %v11022_v30 = vld [vmem:[%s16627_s3 + $0xd8] sm:$0xff] }
  0xdc   : > { %v2215_v7 = vor.u32 %v2214_v35, %v2211_v34  ;;  %vm700_vm9 = vc.u32 %v692_v51, %v696_v57  ;;  %v702_v8 = vadd.s32 %v696_v57, %v692_v51  ;;  %v12169_v15 = vadd.s32 88, %v11627_v9 }
  0xdd   : > { %v2072_v44 = vsel %vm12135_vm5, %v1964_v27, 0.0  ;;  %v681_v12 = vshrl.u32 %v680_v47, 4  ;;  %v701_v14 = vsel %vm700_vm9, 1, %v16685_v18  ;;  %v699_v20 = vshrl.u32 %v12145_v53, 16 }
  0xde   : > { %v2108_v52 = vpack.c.bf16 %v2072_v44, %v2072_v44  ;;  %v2216_v21 = vsel %vm11941_vm4, %v2207_v0, %v2215_v7  ;;  %v2217_v10 = vrot.slane %v2215_v7, 4  ;;  %v703_v19 = vadd.s32 %v701_v14, %v695_v40  ;;  %v10954_v44 = vld [vmem:[%s11609_s21 + $0x68] sm:$0xff]  ;;  %3736 = vmatpush.bf16.msrb.mxu0 %v11023_v29 }
  0xdf   : > { %2547 = vst [vmem:[#allocation2 + $0x24] sm:$0xf] %v2216_v21  ;;  %vm704_vm1 = vc.u32 %v702_v8, %v698_v25  ;;  %v682_v23 = vmul.u32 18, %v681_v12  ;;  %v2773_v27 = vshrl.u32 %v12109_v63, 16  ;;  %v718_v0 = vand.u32 65535, %v12169_v15  ;;  %11322 = vmatpush.bf16.msra.mxu3 %v11726_v17  ;;  %v11021_v12 = vld [vmem:[%s16627_s3 + $0xd0] sm:$0xff] }
  0xe0   : > { %v2219_v1 = vshrl.u32 %v2108_v52, 16  ;;  %v2222_v61 = vshll.u32 %v2108_v52, 16  ;;  %v1888_v3 = vpop.f32.mrf.mxu0  ;;  %v705_v26 = vsel %vm704_vm1, 1, %v16685_v18  ;;  %v12182_v34 = vadd.s32 96, %v11627_v9 }
  0xe1   : > { %v1889_v13 = vadd.f32 %v11777_v45, %v1888_v3  ;;  %v707_v32 = vadd.s32 %v705_v26, %v703_v19  ;;  %v683_v35 = vsub.s32 %v12075_v38, %v682_v23  ;;  %v12187_v48 = vor.u32 %v2773_v27, %v2771_v37 }
  0xe2   : > { %v2221_v4 = vrot.slane %v2219_v1, 6  ;;  %v2224_v6 = vrot.slane %v2222_v61, 7  ;;  %v719_v39 = vshrl.u32 %v12169_v15, 16  ;;  %v722_v51 = vmul.u32 58254, %v718_v0  ;;  %3737 = vmatpush.bf16.msrb.mxu0 %v11022_v30  ;;  %v12234_v30 = vld [vmem:[%s16626_s2] ss:$0 sm:$0xff] }
  0xe3   : > { %v1965_v42 = vmax.f32 %v1889_v13, 0.0  ;;  %v708_v7 = vadd.s32 %v707_v32, %v697_v11  ;;  %v12193_v53 = vadd.s32 104, %v11627_v9  ;;  %vm1449_vm3 = vcmp.ne.s32.totalorder %v683_v35, 0  ;;  %11323 = vmatpush.bf16.msra.mxu3 %v11756_v33 }
  0xe4   : > { %v12166_v24 = vor.u32 %v2224_v6, %v2221_v4  ;;  %vm1485_vm9 = vcmp.lt.s32.totalorder %v683_v35, 0  ;;  %v1557_v38 = vadd.s32 18, %v683_v35  ;;  %v721_v37 = vmul.u32 14564, %v718_v0  ;;  %2977 = vmatmul.bf16.gmra.mxu1 %v2772_v55  ;;  %v10958_v6 = vld [vmem:[%s11609_s21 + $0x88] sm:$0xff] }
  0xe5   : > { %vm1521_vm1 = vmand %vm1485_vm9, %vm1449_vm3  ;;  %v709_v17 = vadd.s32 %v708_v7, %v699_v20  ;;  %v723_v57 = vmul.u32 14564, %v719_v39  ;;  %v747_v58 = vand.u32 65535, %v12182_v34  ;;  %v724_v1 = vmul.u32 58254, %v719_v39  ;;  %9698 = vmatmul.msk.bf16.gmra.mxu3 %vm16634_vm0, %v10958_v6 }
  0xe6   : > { %v2226_v31 = vsel %vm11941_vm4, %v2217_v10, %v12166_v24  ;;  %v2227_v49 = vrot.slane %v12166_v24, 4  ;;  %v12195_v63 = vld [vmem:[#allocation2 + $0x20] sm:$0xff]  ;;  %v1593_v21 = vsel %vm1521_vm1, %v1557_v38, %v683_v35  ;;  %v725_v61 = vshll.u32 %v722_v51, 16  ;;  %3738 = vmatpush.bf16.msrb.mxu0 %v11021_v12  ;;  %v10955_v24 = vld [vmem:[%s11609_s21 + $0x70] sm:$0xff] }
  0xe7   : > { %2548 = vst [vmem:[#allocation2 + $0x28] sm:$0xf] %v2226_v31  ;;  %v748_v3 = vshrl.u32 %v12182_v34, 16  ;;  %vm12207_vm11 = vcmp.lt.s32.totalorder %v1593_v21, 16  ;;  %v16862_v40 = vmov 0  ;;  %v727_v47 = vshll.u32 %v723_v57, 16  ;;  %3152 = vmatmul.bf16.gmra.mxu2 %v12195_v63 }
  0xe8   : > { %v1891_v52 = vpop.f32.mrf.mxu0  ;;  %v16863_v40 = vsel %vm12207_vm11, 4294967295, %v16862_v40  ;;  %v776_v11 = vand.u32 65535, %v12193_v53  ;;  %v2073_v25 = vsel %vm12207_vm11, %v1965_v42, 0.0  ;;  %v2777_v60 = vshll.u32 %v12195_v63, 16 }
  0xe9   : > { %v12201_v56 = vadd.f32 %v11777_v45, %v1891_v52  ;;  %16864 = vst [vmem:[#allocation18_spill] sm:$0xff] %v16863_v40  ;;  %v710_v45 = vshrl.u32 %v709_v17, 4  ;;  %vm729_vm3 = vc.u32 %v721_v37, %v725_v61  ;;  %v731_v4 = vadd.s32 %v725_v61, %v721_v37 }
  0xea   : > { %v2109_v8 = vpack.c.bf16 %v2073_v25, %v2073_v25  ;;  %v730_v10 = vsel %vm729_vm3, 1, %v16685_v18  ;;  %v726_v13 = vshrl.u32 %v722_v51, 16  ;;  %v751_v16 = vmul.u32 58254, %v747_v58 }
  0xeb   : > { %9694 = vmatmul.msk.bf16.gmra.mxu0 %vm16634_vm0, %v10954_v44  ;;  %v711_v33 = vmul.u32 18, %v710_v45  ;;  %v1966_v55 = vmax.f32 %v12201_v56, 0.0  ;;  %v732_v14 = vadd.s32 %v730_v10, %v724_v1  ;;  %vm733_vm9 = vc.u32 %v731_v4, %v727_v47  ;;  %v11020_v44 = vld [vmem:[%s16627_s3 + $0xc8] sm:$0xff] }
  0xec   : > { %v2229_v19 = vshrl.u32 %v2109_v8, 16  ;;  %v2232_v23 = vshll.u32 %v2109_v8, 16  ;;  %v734_v26 = vsel %vm733_vm9, 1, %v16685_v18  ;;  %v728_v29 = vshrl.u32 %v723_v57, 16  ;;  %3739 = vmatpush.bf16.msrb.mxu0 %v11020_v44 }
  0xed   : > { %v712_v20 = vsub.s32 %v12097_v41, %v711_v33  ;;  %v736_v31 = vadd.s32 %v734_v26, %v732_v14  ;;  %v750_v32 = vmul.u32 14564, %v747_v58  ;;  %v752_v0 = vmul.u32 14564, %v748_v3 }
  0xee   : > { %v2231_v35 = vrot.slane %v2229_v19, 6  ;;  %v2234_v42 = vrot.slane %v2232_v23, 7  ;;  %v753_v52 = vmul.u32 58254, %v748_v3  ;;  %v754_v51 = vshll.u32 %v751_v16, 16 }
  0xef   : > { %vm1450_vm1 = vcmp.ne.s32.totalorder %v712_v20, 0  ;;  %vm1486_vm3 = vcmp.lt.s32.totalorder %v712_v20, 0  ;;  %v1558_v41 = vadd.s32 18, %v712_v20  ;;  %v737_v7 = vadd.s32 %v736_v31, %v726_v13 }
  0xf0   : > { %v1893_v27 = vpop.f32.mrf.mxu0  ;;  %vm12227_vm0 = vmand %vm1486_vm3, %vm1450_vm1  ;;  %v2235_v38 = vor.u32 %v2234_v42, %v2231_v35  ;;  %v2779_v37 = vrot.slane %v2777_v60, 1  ;;  %v756_v56 = vshll.u32 %v752_v0, 16  ;;  %vm758_vm9 = vc.u32 %v750_v32, %v754_v51 }
  0xf1   : > { %v12237_v17 = vadd.f32 %v12234_v30, %v1893_v27  ;;  %v1594_v57 = vsel %vm12227_vm0, %v1558_v41, %v712_v20  ;;  %v738_v58 = vadd.s32 %v737_v7, %v728_v29  ;;  %v760_v21 = vadd.s32 %v754_v51, %v750_v32  ;;  %v11019_v29 = vld [vmem:[%s16627_s3 + $0xc0] sm:$0xff] }
  0xf2   : > { %v2236_v1 = vsel %vm11941_vm4, %v2227_v49, %v2235_v38  ;;  %vm12245_vm1 = vcmp.lt.s32.totalorder %v1594_v57, 16  ;;  %v16867_v61 = vmov 0  ;;  %v755_v3 = vshrl.u32 %v751_v16, 16  ;;  %3740 = vmatpush.bf16.msrb.mxu0 %v11019_v29 }
  0xf3   : > { %v16868_v61 = vsel %vm12245_vm1, 4294967295, %v16867_v61  ;;  %v759_v45 = vsel %vm758_vm9, 1, %v16685_v18  ;;  %2549 = vst [vmem:[#allocation2 + $0x2c] sm:$0xf] %v2236_v1  ;;  %v2074_v47 = vsel %vm12245_vm1, %v1966_v55, 0.0  ;;  %v739_v25 = vshrl.u32 %v738_v58, 4 }
  0xf4   : > { %16869 = vst [vmem:[#allocation19_spill] sm:$0xff] %v16868_v61  ;;  %v761_v60 = vadd.s32 %v759_v45, %v753_v52  ;;  %vm762_vm0 = vc.u32 %v760_v21, %v756_v56  ;;  %v2110_v4 = vpack.c.bf16 %v2074_v47, %v2074_v47  ;;  %vm16870_vm3 = vsmask.f32 7424 }
  0xf5   : > { %v2780_v49 = vsel %vm16870_vm3, %v12187_v48, %v2779_v37  ;;  %v763_v6 = vsel %vm762_vm0, 1, %v16685_v18  ;;  %v777_v33 = vshrl.u32 %v12193_v53, 16  ;;  %v740_v10 = vmul.u32 18, %v739_v25 }
  0xf6   : > { %v1967_v12 = vmax.f32 %v12237_v17, 0.0  ;;  %v757_v13 = vshrl.u32 %v752_v0, 16  ;;  %v765_v55 = vadd.s32 %v763_v6, %v761_v60  ;;  %v2237_v14 = vrot.slane %v2235_v38, 4  ;;  %2982 = vmatmul.bf16.gmra.mxu1 %v2780_v49 }
  0xf7   : > { %v2239_v16 = vshrl.u32 %v2110_v4, 16  ;;  %v2242_v19 = vshll.u32 %v2110_v4, 16  ;;  %v780_v23 = vmul.u32 58254, %v776_v11  ;;  %v741_v20 = vsub.s32 %v12169_v15, %v740_v10 }
  0xf8   : > { %v1896_v8 = vpop.f32.mrf.mxu0  ;;  %v766_v26 = vadd.s32 %v765_v55, %v755_v3  ;;  %vm16871_vm9 = vcmask 261120   ;;  %v779_v48 = vmul.u32 14564, %v776_v11  ;;  %v781_v27 = vmul.u32 14564, %v777_v33  ;;  %v12292_v55 = vld [vmem:[#allocation2 + $0xc] sm:$0xf] }
  0xf9   : > { %v2241_v31 = vrot.slane %v2239_v16, 6  ;;  %v2244_v32 = vrot.slane %v2242_v19, 7  ;;  %v2781_v0 = vshrl.u32 %v12195_v63, 16  ;;  %v783_v35 = vshll.u32 %v780_v23, 16 }
  0xfa   : > { %vm1451_vm0 = vcmp.ne.s32.totalorder %v741_v20, 0  ;;  %vm1487_vm3 = vcmp.lt.s32.totalorder %v741_v20, 0  ;;  %v1559_v15 = vadd.s32 18, %v741_v20  ;;  %v767_v42 = vadd.s32 %v766_v26, %v757_v13  ;;  %v12270_v39 = vld [vmem:[#allocation2 + $0x28] sm:$0xff] }
  0xfb   : > { %9695 = vmatmul.msk.bf16.gmra.mxu0 %vm16871_vm9, %v10955_v24  ;;  %v2245_v44 = vor.u32 %v2244_v32, %v2241_v31  ;;  %vm1523_vm9 = vmand %vm1487_vm3, %vm1451_vm0  ;;  %v1897_v11 = vadd.f32 %v12234_v30, %v1896_v8  ;;  %v782_v41 = vmul.u32 58254, %v777_v33  ;;  %v785_v7 = vshll.u32 %v781_v27, 16  ;;  %3157 = vmatmul.bf16.gmra.mxu2 %v12270_v39 }
  0xfc   : > { %v1595_v52 = vsel %vm1523_vm9, %v1559_v15, %v741_v20  ;;  %v768_v51 = vshrl.u32 %v767_v42, 4  ;;  %vm787_vm1 = vc.u32 %v779_v48, %v783_v35  ;;  %v789_v38 = vadd.s32 %v783_v35, %v779_v48 }
  0xfd   : > { %v2246_v63 = vsel %vm11941_vm4, %v2237_v14, %v2245_v44  ;;  %vm12274_vm11 = vcmp.lt.s32.totalorder %v1595_v52, 16  ;;  %v16872_v17 = vmov 0  ;;  %v2783_v56 = vor.u32 %v2781_v0, %v2779_v37  ;;  %v3483_v0 = vld [vmem:[#allocation2 + $0x8] sm:$0xe] }
  0xfe   : > { %v16873_v17 = vsel %vm12274_vm11, 4294967295, %v16872_v17  ;;  %v2785_v57 = vshll.u32 %v12270_v39, 16  ;;  %2550 = vst [vmem:[#allocation2 + $0x30] sm:$0xf] %v2246_v63  ;;  %v2075_v21 = vsel %vm12274_vm11, %v1967_v12, 0.0  ;;  %v769_v1 = vmul.u32 18, %v768_v51 }
  0xff   : > { %16874 = vst [vmem:[#allocation20_spill] sm:$0xff] %v16873_v17  ;;  %v788_v3 = vsel %vm787_vm1, 1, %v16685_v18  ;;  %vm791_vm0 = vc.u32 %v789_v38, %v785_v7  ;;  %v2111_v45 = vpack.c.bf16 %v2075_v21, %v2075_v21  ;;  %v784_v47 = vshrl.u32 %v780_v23, 16 }
 0x100   : > { %v1898_v58 = vpop.f32.mrf.mxu0  ;;  %v790_v25 = vadd.s32 %v788_v3, %v782_v41  ;;  %v792_v60 = vsel %vm791_vm0, 1, %v16685_v18  ;;  %v770_v24 = vsub.s32 %v12182_v34, %v769_v1  ;;  %v1968_v4 = vmax.f32 %v1897_v11, 0.0  ;;  %v12306_v41 = vld [vmem:[#allocation2 + $0x10] sm:$0xff] }
 0x101   : > { %v12284_v37 = vrot.slane %v2785_v57, 1  ;;  %v12287_v49 = vadd.s32 112, %v11627_v9  ;;  %v2249_v6 = vshrl.u32 %v2111_v45, 16  ;;  %v2252_v8 = vshll.u32 %v2111_v45, 16 }
 0x102   : > { %v786_v33 = vshrl.u32 %v781_v27, 16  ;;  %v794_v10 = vadd.s32 %v792_v60, %v790_v25  ;;  %vm1452_vm3 = vcmp.ne.s32.totalorder %v770_v24, 0  ;;  %vm1488_vm1 = vcmp.lt.s32.totalorder %v770_v24, 0 }
 0x103   : > { %v1560_v12 = vadd.s32 18, %v770_v24  ;;  %v12290_v13 = vadd.f32 %v12234_v30, %v1898_v58  ;;  %v2251_v14 = vrot.slane %v2249_v6, 6  ;;  %v2254_v34 = vrot.slane %v2252_v8, 7  ;;  %vm1524_vm9 = vmand %vm1488_vm1, %vm1452_vm3 }
 0x104   : > { %v795_v16 = vadd.s32 %v794_v10, %v784_v47  ;;  %v805_v19 = vand.u32 65535, %v12287_v49  ;;  %v2247_v23 = vrot.slane %v2245_v44, 4  ;;  %vm16875_vm0 = vsmask.f32 7424 }
 0x105   : > { %v1596_v20 = vsel %vm1524_vm9, %v1560_v12, %v770_v24  ;;  %v2788_v26 = vsel %vm16875_vm0, %v2783_v56, %v12284_v37  ;;  %v806_v48 = vshrl.u32 %v12287_v49, 16  ;;  %v2255_v27 = vor.u32 %v2254_v34, %v2251_v14 }
 0x106   : > { %vm12299_vm11 = vcmp.lt.s32.totalorder %v1596_v20, 16  ;;  %v16876_v29 = vmov 0  ;;  %v796_v31 = vadd.s32 %v795_v16, %v786_v33  ;;  %v16659_v35 = vunpack.c.l.b16 %v12292_v55  ;;  %2987 = vmatmul.bf16.gmra.mxu1 %v2788_v26 }
 0x107   : > { %v16877_v29 = vsel %vm12299_vm11, 4294967295, %v16876_v29  ;;  %v2076_v15 = vsel %vm12299_vm11, %v1968_v4, 0.0  ;;  %v808_v42 = vmul.u32 14564, %v805_v19  ;;  %v809_v44 = vmul.u32 58254, %v805_v19 }
 0x108   : > { %16878 = vst [vmem:[#allocation21_spill] sm:$0xff] %v16877_v29  ;;  %v1901_v32 = vpop.f32.mrf.mxu0  ;;  %v810_v11 = vmul.u32 14564, %v806_v48  ;;  %v2256_v7 = vsel %vm11941_vm4, %v2247_v23, %v2255_v27  ;;  %v2112_v52 = vpack.c.bf16 %v2076_v15, %v2076_v15  ;;  %v797_v51 = vshrl.u32 %v796_v31, 4 }
 0x109   : > { %v1969_v38 = vmax.f32 %v12290_v13, 0.0  ;;  %2551 = vst [vmem:[#allocation2 + $0x34] sm:$0xf] %v2256_v7  ;;  %v811_v63 = vmul.u32 58254, %v806_v48  ;;  %v812_v56 = vshll.u32 %v809_v44, 16  ;;  %v3574_v58 = vunpack.c.l.b16 %v3483_v0 }
 0x10a   : > { %v814_v57 = vshll.u32 %v810_v11, 16  ;;  %v2257_v21 = vrot.slane %v2255_v27, 4  ;;  %v2259_v1 = vshrl.u32 %v2112_v52, 16  ;;  %v2262_v3 = vshll.u32 %v2112_v52, 16 }
 0x10b   : > { %v798_v45 = vmul.u32 18, %v797_v51  ;;  %vm816_vm1 = vc.u32 %v808_v42, %v812_v56  ;;  %v818_v47 = vadd.s32 %v812_v56, %v808_v42  ;;  %v12313_v25 = vpack.c.b16 %v16659_v35, %v3574_v58 }
 0x10c   : > { %v3631_v60 = vrot.slane %v12306_v41, 1  ;;  %v2261_v24 = vrot.slane %v2259_v1, 6  ;;  %v2264_v4 = vrot.slane %v2262_v3, 7  ;;  %v817_v8 = vsel %vm816_vm1, 1, %v16685_v18 }
 0x10d   : > { %v799_v6 = vsub.s32 %v12193_v53, %v798_v45  ;;  %v813_v33 = vshrl.u32 %v809_v44, 16  ;;  %v819_v10 = vadd.s32 %v817_v8, %v811_v63  ;;  %vm820_vm9 = vc.u32 %v818_v47, %v814_v57 }
 0x10e   : > { %v3630_v12 = vrot.slane %v12313_v25, 1  ;;  %v2265_v13 = vor.u32 %v2264_v4, %v2261_v24  ;;  %v815_v16 = vshrl.u32 %v810_v11, 16  ;;  %v821_v19 = vsel %vm820_vm9, 1, %v16685_v18 }
 0x10f   : > { %vm1453_vm0 = vcmp.ne.s32.totalorder %v799_v6, 0  ;;  %vm1489_vm3 = vcmp.lt.s32.totalorder %v799_v6, 0  ;;  %v1561_v14 = vadd.s32 18, %v799_v6  ;;  %vm16879_vm5 = vcmask 1046528  }
 0x110   : > { %v1903_v34 = vpop.f32.mrf.mxu0  ;;  %vm1525_vm11 = vmand %vm1489_vm3, %vm1453_vm0  ;;  %v3632_v53 = vsel %vm16879_vm5, %v3630_v12, %v3631_v60  ;;  %v12324_v23 = vadd.s32 120, %v11627_v9  ;;  %v2266_v20 = vsel %vm11941_vm4, %v2257_v21, %v2265_v13  ;;  %v823_v48 = vadd.s32 %v821_v19, %v819_v10  ;;  %v12331_v31 = vld [vmem:[#allocation2 + $0x30] sm:$0xff]  ;;  %v12350_v12 = vld [vmem:[#allocation2 + $0x18] sm:$0xff] }
 0x111   : > { %v1597_v26 = vsel %vm1525_vm11, %v1561_v14, %v799_v6  ;;  %v12329_v27 = vadd.f32 %v12234_v30, %v1901_v32  ;;  %3741 = vmatmul.bf16.vlgmr.msrb.gmra.mxu0 %v3632_v53  ;;  %2552 = vst [vmem:[#allocation2 + $0x38] sm:$0xf] %v2266_v20  ;;  %v16880_v0 = vmov 0  ;;  %v2789_v7 = vshrl.u32 %v12270_v39, 16  ;;  %3162 = vmatmul.bf16.gmra.mxu2 %v12331_v31 }
 0x112   : > { %vm12333_vm3 = vcmp.lt.s32.totalorder %v1597_v26, 16  ;;  %v834_v15 = vand.u32 65535, %v12324_v23  ;;  %v835_v42 = vshrl.u32 %v12324_v23, 16  ;;  %v824_v11 = vadd.s32 %v823_v48, %v813_v33 }
 0x113   : > { %v16881_v0 = vsel %vm12333_vm3, 4294967295, %v16880_v0  ;;  %v2077_v44 = vsel %vm12333_vm3, %v1969_v38, 0.0  ;;  %v2793_v32 = vshll.u32 %v12331_v31, 16  ;;  %v1970_v58 = vmax.f32 %v12329_v27, 0.0 }
 0x114   : > { %16882 = vst [vmem:[#allocation22_spill] sm:$0xff] %v16881_v0  ;;  %v2113_v52 = vpack.c.bf16 %v2077_v44, %v2077_v44  ;;  %v837_v51 = vmul.u32 14564, %v834_v15  ;;  %v838_v63 = vmul.u32 58254, %v834_v15  ;;  %v839_v56 = vmul.u32 14564, %v835_v42 }
 0x115   : > { %v825_v57 = vadd.s32 %v824_v11, %v815_v16  ;;  %v2791_v21 = vor.u32 %v2789_v7, %v12284_v37  ;;  %v12345_v1 = vrot.slane %v2793_v32, 1  ;;  %v840_v38 = vmul.u32 58254, %v835_v42 }
 0x116   : > { %v2269_v3 = vshrl.u32 %v2113_v52, 16  ;;  %v2272_v45 = vshll.u32 %v2113_v52, 16  ;;  %v841_v47 = vshll.u32 %v838_v63, 16  ;;  %v2267_v39 = vrot.slane %v2265_v13, 4 }
 0x117   : > { %v826_v24 = vshrl.u32 %v825_v57, 4  ;;  %vm16883_vm11 = vsmask.f32 7424  ;;  %v843_v6 = vshll.u32 %v839_v56, 16  ;;  %v12354_v16 = vadd.f32 %v12234_v30, %v1903_v34 }
 0x118   : > { %v2796_v4 = vsel %vm16883_vm11, %v2791_v21, %v12345_v1  ;;  %v2271_v8 = vrot.slane %v2269_v3, 6  ;;  %v2274_v33 = vrot.slane %v2272_v45, 7  ;;  %vm845_vm5 = vc.u32 %v837_v51, %v841_v47  ;;  %v1906_v13 = vpop.f32.mrf.mxu0 }
 0x119   : > { %v847_v10 = vadd.s32 %v841_v47, %v837_v51  ;;  %v827_v37 = vmul.u32 18, %v826_v24  ;;  %v846_v14 = vsel %vm845_vm5, 1, %v16685_v18  ;;  %v12357_v19 = vadd.s32 128, %v11627_v9  ;;  %2992 = vmatmul.bf16.gmra.mxu1 %v2796_v4 }
 0x11a   : > { %v12359_v53 = vor.u32 %v2274_v33, %v2271_v8  ;;  %v842_v20 = vshrl.u32 %v838_v63, 16  ;;  %v848_v26 = vadd.s32 %v846_v14, %v840_v38  ;;  %v844_v44 = vshrl.u32 %v839_v56, 16 }
 0x11b   : > { %vm849_vm1 = vc.u32 %v847_v10, %v843_v6  ;;  %v828_v48 = vsub.s32 %v12287_v49, %v827_v37  ;;  %v863_v15 = vand.u32 65535, %v12357_v19  ;;  %v864_v42 = vshrl.u32 %v12357_v19, 16 }
 0x11c   : > { %v850_v27 = vsel %vm849_vm1, 1, %v16685_v18  ;;  %v2276_v34 = vsel %vm11941_vm4, %v2267_v39, %v12359_v53  ;;  %v3633_v7 = vrot.slane %v12350_v12, 1  ;;  %v12370_v49 = vadd.f32 %v12234_v30, %v1906_v13 }
 0x11d   : > { %v852_v11 = vadd.s32 %v850_v27, %v848_v26  ;;  %2553 = vst [vmem:[#allocation2 + $0x3c] sm:$0xf] %v2276_v34  ;;  %vm1454_vm9 = vcmp.ne.s32.totalorder %v828_v48, 0  ;;  %vm1490_vm0 = vcmp.lt.s32.totalorder %v828_v48, 0  ;;  %v1562_v32 = vadd.s32 18, %v828_v48 }
 0x11e   : > { %vm1526_vm11 = vmand %vm1490_vm0, %vm1454_vm9  ;;  %v866_v51 = vmul.u32 14564, %v863_v15  ;;  %v867_v63 = vmul.u32 58254, %v863_v15  ;;  %v868_v57 = vmul.u32 14564, %v864_v42  ;;  %v1971_v3 = vmax.f32 %v12354_v16, 0.0 }
 0x11f   : > { %v853_v52 = vadd.s32 %v852_v11, %v842_v20  ;;  %v1598_v21 = vsel %vm1526_vm11, %v1562_v32, %v828_v48  ;;  %v869_v45 = vmul.u32 58254, %v864_v42  ;;  %v16884_v56 = vmov 0 }
 0x120   : > { %vm12373_vm5 = vcmp.lt.s32.totalorder %v1598_v21, 16  ;;  %v870_v47 = vshll.u32 %v867_v63, 16  ;;  %vm16887_vm1 = vcmask 1046528   ;;  %v2277_v24 = vrot.slane %v12359_v53, 4 }
 0x121   : > { %v16885_v56 = vsel %vm12373_vm5, 4294967295, %v16884_v56  ;;  %v854_v38 = vadd.s32 %v853_v52, %v844_v44  ;;  %v3634_v39 = vsel %vm16887_vm1, %v3631_v60, %v3633_v7  ;;  %v2078_v4 = vsel %vm12373_vm5, %v1970_v58, 0.0  ;;  %v1908_v60 = vpop.f32.mrf.mxu0 }
 0x122   : > { %16886 = vst [vmem:[#allocation23_spill] sm:$0xff] %v16885_v56  ;;  %v872_v6 = vshll.u32 %v868_v57, 16  ;;  %v1972_v8 = vmax.f32 %v12370_v49, 0.0  ;;  %3746 = vmatmul.bf16.gmra.mxu0 %v3634_v39  ;;  %v2114_v33 = vpack.c.bf16 %v2078_v4, %v2078_v4  ;;  %vm874_vm9 = vc.u32 %v866_v51, %v870_v47 }
 0x123   : > { %v855_v10 = vshrl.u32 %v854_v38, 4  ;;  %v876_v37 = vadd.s32 %v870_v47, %v866_v51  ;;  %v871_v14 = vshrl.u32 %v867_v63, 16  ;;  %v873_v16 = vshrl.u32 %v868_v57, 16 }
 0x124   : > { %v875_v13 = vsel %vm874_vm9, 1, %v16685_v18  ;;  %v12388_v41 = vadd.s32 136, %v11627_v9  ;;  %v2279_v53 = vshrl.u32 %v2114_v33, 16  ;;  %v2282_v20 = vshll.u32 %v2114_v33, 16  ;;  %v12390_v48 = vld [vmem:[#allocation2 + $0x38] sm:$0xff] }
 0x125   : > { %v856_v26 = vmul.u32 18, %v855_v10  ;;  %v877_v58 = vadd.s32 %v875_v13, %v869_v45  ;;  %vm878_vm0 = vc.u32 %v876_v37, %v872_v6  ;;  %v2797_v27 = vshrl.u32 %v12331_v31, 16  ;;  %3167 = vmatmul.bf16.gmra.mxu2 %v12390_v48 }
 0x126   : > { %v892_v15 = vand.u32 65535, %v12388_v41  ;;  %v893_v42 = vshrl.u32 %v12388_v41, 16  ;;  %v2281_v34 = vrot.slane %v2279_v53, 6  ;;  %v2284_v44 = vrot.slane %v2282_v20, 7 }
 0x127   : > { %v857_v11 = vsub.s32 %v12324_v23, %v856_v26  ;;  %v879_v32 = vsel %vm878_vm0, 1, %v16685_v18  ;;  %v2801_v51 = vshll.u32 %v12390_v48, 16  ;;  %v2799_v38 = vor.u32 %v2797_v27, %v12345_v1 }
 0x128   : > { %v881_v52 = vadd.s32 %v879_v32, %v877_v58  ;;  %v895_v63 = vmul.u32 14564, %v892_v15  ;;  %v896_v57 = vmul.u32 58254, %v892_v15  ;;  %v2285_v21 = vor.u32 %v2284_v44, %v2281_v34 }
 0x129   : > { %vm1455_vm11 = vcmp.ne.s32.totalorder %v857_v11, 0  ;;  %vm1491_vm1 = vcmp.lt.s32.totalorder %v857_v11, 0  ;;  %v1563_v31 = vadd.s32 18, %v857_v11  ;;  %v12400_v47 = vrot.slane %v2801_v51, 1  ;;  %v1911_v15 = vpop.f32.mrf.mxu0 }
 0x12a   : > { %vm1527_vm9 = vmand %vm1491_vm1, %vm1455_vm11  ;;  %v882_v45 = vadd.s32 %v881_v52, %v871_v14  ;;  %v897_v23 = vmul.u32 14564, %v893_v42  ;;  %v2286_v39 = vsel %vm11941_vm4, %v2277_v24, %v2285_v21  ;;  %v898_v6 = vmul.u32 58254, %v893_v42 }
 0x12b   : > { %v1599_v4 = vsel %vm1527_vm9, %v1563_v31, %v857_v11  ;;  %v899_v33 = vshll.u32 %v896_v57, 16  ;;  %2554 = vst [vmem:[#allocation2 + $0x40] sm:$0xf] %v2286_v39  ;;  %v16888_v10 = vmov 0  ;;  %vm16891_vm11 = vsmask.f32 7424 }
 0x12c   : > { %vm12404_vm0 = vcmp.lt.s32.totalorder %v1599_v4, 16  ;;  %v883_v37 = vadd.s32 %v882_v45, %v873_v16  ;;  %v2804_v14 = vsel %vm16891_vm11, %v2799_v38, %v12400_v47  ;;  %v12411_v1 = vadd.f32 %v12234_v30, %v1908_v60  ;;  %v12419_v60 = vld [vmem:[#allocation2 + $0x20] sm:$0xff] }
 0x12d   : > { %v16889_v10 = vsel %vm12404_vm0, 4294967295, %v16888_v10  ;;  %v2287_v13 = vrot.slane %v2285_v21, 4  ;;  %v2079_v53 = vsel %vm12404_vm0, %v1971_v3, 0.0  ;;  %2997 = vmatmul.bf16.gmra.mxu1 %v2804_v14  ;;  %v901_v24 = vshll.u32 %v897_v23, 16 }
 0x12e   : > { %16890 = vst [vmem:[#allocation24_spill] sm:$0xff] %v16889_v10  ;;  %vm903_vm1 = vc.u32 %v895_v63, %v899_v33  ;;  %v2115_v20 = vpack.c.bf16 %v2079_v53, %v2079_v53  ;;  %v884_v26 = vshrl.u32 %v883_v37, 4  ;;  %v905_v27 = vadd.s32 %v899_v33, %v895_v63 }
 0x12f   : > { %v904_v58 = vsel %vm903_vm1, 1, %v16685_v18  ;;  %v900_v16 = vshrl.u32 %v896_v57, 16  ;;  %v902_v42 = vshrl.u32 %v897_v23, 16  ;;  %v12417_v44 = vadd.s32 144, %v11627_v9 }
 0x130   : > { %v906_v34 = vadd.s32 %v904_v58, %v898_v6  ;;  %v2289_v11 = vshrl.u32 %v2115_v20, 16  ;;  %v2292_v32 = vshll.u32 %v2115_v20, 16  ;;  %v885_v3 = vmul.u32 18, %v884_v26 }
 0x131   : > { %vm907_vm9 = vc.u32 %v905_v27, %v901_v24  ;;  %v921_v51 = vand.u32 65535, %v12417_v44  ;;  %v922_v21 = vshrl.u32 %v12417_v44, 16  ;;  %v12425_v63 = vadd.f32 %v12234_v30, %v1911_v15  ;;  %v1913_v12 = vpop.f32.mrf.mxu0 }
 0x132   : > { %v908_v52 = vsel %vm907_vm9, 1, %v16685_v18  ;;  %v2291_v57 = vrot.slane %v2289_v11, 6  ;;  %v2294_v31 = vrot.slane %v2292_v32, 7  ;;  %v886_v45 = vsub.s32 %v12357_v19, %v885_v3 }
 0x133   : > { %v910_v38 = vadd.s32 %v908_v52, %v906_v34  ;;  %v924_v23 = vmul.u32 14564, %v921_v51  ;;  %v925_v39 = vmul.u32 58254, %v921_v51  ;;  %v926_v4 = vmul.u32 14564, %v922_v21 }
 0x134   : > { %v3635_v6 = vrot.slane %v12419_v60, 1  ;;  %v2295_v33 = vor.u32 %v2294_v31, %v2291_v57  ;;  %vm1456_vm11 = vcmp.ne.s32.totalorder %v886_v45, 0  ;;  %vm1492_vm1 = vcmp.lt.s32.totalorder %v886_v45, 0 }
 0x135   : > { %v1564_v37 = vadd.s32 18, %v886_v45  ;;  %vm1528_vm9 = vmand %vm1492_vm1, %vm1456_vm11  ;;  %v911_v14 = vadd.s32 %v910_v38, %v900_v16  ;;  %v927_v53 = vmul.u32 58254, %v922_v21  ;;  %v928_v24 = vshll.u32 %v925_v39, 16 }
 0x136   : > { %v930_v20 = vshll.u32 %v926_v4, 16  ;;  %v2296_v26 = vsel %vm11941_vm4, %v2287_v13, %v2295_v33  ;;  %v1973_v19 = vmax.f32 %v12411_v1, 0.0  ;;  %v1974_v27 = vmax.f32 %v12425_v63, 0.0 }
 0x137   : > { %v1600_v58 = vsel %vm1528_vm9, %v1564_v37, %v886_v45  ;;  %2555 = vst [vmem:[#allocation2 + $0x44] sm:$0xf] %v2296_v26  ;;  %v16892_v15 = vmov 0  ;;  %v912_v34 = vadd.s32 %v911_v14, %v902_v42  ;;  %vm932_vm5 = vc.u32 %v924_v23, %v928_v24 }
 0x138   : > { %vm12433_vm0 = vcmp.lt.s32.totalorder %v1600_v58, 16  ;;  %v934_v11 = vadd.s32 %v928_v24, %v924_v23  ;;  %v929_v32 = vshrl.u32 %v925_v39, 16  ;;  %v933_v13 = vsel %vm932_vm5, 1, %v16685_v18 }
 0x139   : > { %v16893_v15 = vsel %vm12433_vm0, 4294967295, %v16892_v15  ;;  %v2080_v16 = vsel %vm12433_vm0, %v1972_v8, 0.0  ;;  %vm16895_vm11 = vcmask 1046528   ;;  %v913_v52 = vshrl.u32 %v912_v34, 4 }
 0x13a   : > { %16894 = vst [vmem:[#allocation25_spill] sm:$0xff] %v16893_v15  ;;  %v3636_v1 = vsel %vm16895_vm11, %v3633_v7, %v3635_v6  ;;  %v2116_v3 = vpack.c.bf16 %v2080_v16, %v2080_v16  ;;  %v935_v51 = vadd.s32 %v933_v13, %v927_v53  ;;  %vm936_vm1 = vc.u32 %v934_v11, %v930_v20 }
 0x13b   : > { %3751 = vmatmul.bf16.gmra.mxu0 %v3636_v1  ;;  %v2297_v42 = vrot.slane %v2295_v33, 4  ;;  %v937_v49 = vsel %vm936_vm1, 1, %v16685_v18  ;;  %v2805_v21 = vshrl.u32 %v12390_v48, 16  ;;  %v12450_v8 = vadd.s32 152, %v11627_v9 }
 0x13c   : > { %v2299_v57 = vshrl.u32 %v2116_v3, 16  ;;  %v2302_v31 = vshll.u32 %v2116_v3, 16  ;;  %v914_v45 = vmul.u32 18, %v913_v52  ;;  %v939_v38 = vadd.s32 %v937_v49, %v935_v51 }
 0x13d   : > { %v931_v23 = vshrl.u32 %v926_v4, 16  ;;  %v2807_v7 = vor.u32 %v2805_v21, %v12400_v47  ;;  %v950_v39 = vand.u32 65535, %v12450_v8  ;;  %v951_v37 = vshrl.u32 %v12450_v8, 16 }
 0x13e   : > { %v2301_v33 = vrot.slane %v2299_v57, 6  ;;  %v2304_v14 = vrot.slane %v2302_v31, 7  ;;  %v915_v53 = vsub.s32 %v12388_v41, %v914_v45  ;;  %v940_v48 = vadd.s32 %v939_v38, %v929_v32  ;;  %v12456_v24 = vld [vmem:[#allocation2 + $0x40] sm:$0xff] }
 0x13f   : > { %v953_v20 = vmul.u32 14564, %v950_v39  ;;  %v954_v26 = vmul.u32 58254, %v950_v39  ;;  %v955_v58 = vmul.u32 14564, %v951_v37  ;;  %v12459_v34 = vadd.f32 %v12234_v30, %v1913_v12  ;;  %3172 = vmatmul.bf16.gmra.mxu2 %v12456_v24 }
 0x140   : > { %v2305_v4 = vor.u32 %v2304_v14, %v2301_v33  ;;  %vm1457_vm5 = vcmp.ne.s32.totalorder %v915_v53, 0  ;;  %vm1493_vm9 = vcmp.lt.s32.totalorder %v915_v53, 0  ;;  %v1565_v47 = vadd.s32 18, %v915_v53 }
 0x141   : > { %vm1529_vm11 = vmand %vm1493_vm9, %vm1457_vm5  ;;  %v941_v11 = vadd.s32 %v940_v48, %v931_v23  ;;  %v2809_v16 = vshll.u32 %v12456_v24, 16  ;;  %v956_v41 = vmul.u32 58254, %v951_v37  ;;  %v957_v32 = vshll.u32 %v954_v26, 16 }
 0x142   : > { %v2306_v13 = vsel %vm11941_vm4, %v2297_v42, %v2305_v4  ;;  %v1601_v1 = vsel %vm1529_vm11, %v1565_v47, %v915_v53  ;;  %v958_v3 = vshrl.u32 %v954_v26, 16  ;;  %v959_v52 = vshll.u32 %v955_v58, 16  ;;  %v12483_v26 = vld [vmem:[#allocation2 + $0x28] sm:$0xff] }
 0x143   : > { %2556 = vst [vmem:[#allocation2 + $0x48] sm:$0xf] %v2306_v13  ;;  %vm12465_vm1 = vcmp.lt.s32.totalorder %v1601_v1, 16  ;;  %v16896_v51 = vmov 0  ;;  %v942_v49 = vshrl.u32 %v941_v11, 4  ;;  %v12469_v21 = vrot.slane %v2809_v16, 1 }
 0x144   : > { %v16897_v51 = vsel %vm12465_vm1, 4294967295, %v16896_v51  ;;  %v960_v57 = vshrl.u32 %v955_v58, 16  ;;  %v2081_v31 = vsel %vm12465_vm1, %v1973_v19, 0.0  ;;  %vm961_vm5 = vc.u32 %v953_v20, %v957_v32 }
 0x145   : > { %16898 = vst [vmem:[#allocation26_spill] sm:$0xff] %v16897_v51  ;;  %v963_v45 = vadd.s32 %v957_v32, %v953_v20  ;;  %v12474_v38 = vadd.s32 160, %v11627_v9  ;;  %v2117_v42 = vpack.c.bf16 %v2081_v31, %v2081_v31  ;;  %v943_v12 = vmul.u32 18, %v942_v49 }
 0x146   : > { %vm16899_vm9 = vsmask.f32 7424  ;;  %v962_v39 = vsel %vm961_vm5, 1, %v16685_v18  ;;  %v2307_v31 = vrot.slane %v2305_v4, 4 }
 0x147   : > { %v2812_v23 = vsel %vm16899_vm9, %v2807_v7, %v12469_v21  ;;  %v964_v37 = vadd.s32 %v962_v39, %v956_v41  ;;  %vm965_vm11 = vc.u32 %v963_v45, %v959_v52  ;;  %v979_v33 = vand.u32 65535, %v12474_v38  ;;  %v1916_v41 = vpop.f32.mrf.mxu0 }
 0x148   : > { %3002 = vmatmul.bf16.gmra.mxu1 %v2812_v23  ;;  %v980_v14 = vshrl.u32 %v12474_v38, 16  ;;  %v2309_v19 = vshrl.u32 %v2117_v42, 16  ;;  %v2312_v53 = vshll.u32 %v2117_v42, 16  ;;  %v944_v48 = vsub.s32 %v12417_v44, %v943_v12 }
 0x149   : > { %v966_v20 = vsel %vm965_vm11, 1, %v16685_v18  ;;  %v982_v47 = vmul.u32 14564, %v979_v33  ;;  %v983_v7 = vmul.u32 58254, %v979_v33  ;;  %v3637_v42 = vrot.slane %v12483_v26, 1 }
 0x14a   : > { %v968_v58 = vadd.s32 %v966_v20, %v964_v37  ;;  %v984_v11 = vmul.u32 14564, %v980_v14  ;;  %v2311_v16 = vrot.slane %v2309_v19, 6  ;;  %v2314_v32 = vrot.slane %v2312_v53, 7  ;;  %v2968_v37 = vpop.f32.mrf.mxu1 }
 0x14b   : > { %vm1458_vm5 = vcmp.ne.s32.totalorder %v944_v48, 0  ;;  %vm1494_vm9 = vcmp.lt.s32.totalorder %v944_v48, 0  ;;  %v1566_v13 = vadd.s32 18, %v944_v48  ;;  %v985_v52 = vmul.u32 58254, %v980_v14 }
 0x14c   : > { %vm1530_vm1 = vmand %vm1494_vm9, %vm1458_vm5  ;;  %v969_v1 = vadd.s32 %v968_v58, %v958_v3  ;;  %v986_v49 = vshll.u32 %v983_v7, 16  ;;  %v2315_v44 = vor.u32 %v2314_v32, %v2311_v16  ;;  %v988_v45 = vshll.u32 %v984_v11, 16 }
 0x14d   : > { %v1602_v12 = vsel %vm1530_vm1, %v1566_v13, %v944_v48  ;;  %v16900_v19 = vmov 0  ;;  %v987_v3 = vshrl.u32 %v983_v7, 16  ;;  %v1975_v58 = vmax.f32 %v12459_v34, 0.0 }
 0x14e   : > { %v970_v23 = vadd.s32 %v969_v1, %v960_v57  ;;  %vm990_vm11 = vc.u32 %v982_v47, %v986_v49  ;;  %v992_v39 = vadd.s32 %v986_v49, %v982_v47  ;;  %v2316_v33 = vsel %vm11941_vm4, %v2307_v31, %v2315_v44  ;;  %v3133_v57 = vpop.f32.mrf.mxu2 }
 0x14f   : > { %vm12488_vm0 = vcmp.lt.s32.totalorder %v1602_v12, 16  ;;  %v991_v14 = vsel %vm990_vm11, 1, %v16685_v18  ;;  %2557 = vst [vmem:[#allocation2 + $0x4c] sm:$0xf] %v2316_v33  ;;  %v12499_v16 = vadd.f32 %v3133_v57, %v2968_v37  ;;  %v989_v32 = vshrl.u32 %v984_v11, 16 }
 0x150   : > { %v16901_v19 = vsel %vm12488_vm0, 4294967295, %v16900_v19  ;;  %v2082_v4 = vsel %vm12488_vm0, %v1974_v27, 0.0  ;;  %v971_v53 = vshrl.u32 %v970_v23, 4  ;;  %v993_v48 = vadd.s32 %v991_v14, %v985_v52 }
 0x151   : > { %16902 = vst [vmem:[#allocation27_spill] sm:$0xff] %v16901_v19  ;;  %vm994_vm1 = vc.u32 %v992_v39, %v988_v45  ;;  %v2118_v20 = vpack.c.bf16 %v2082_v4, %v2082_v4  ;;  %vm16903_vm5 = vcmask 1046528   ;;  %v12507_v52 = vadd.f32 %v12234_v30, %v1916_v41  ;;  %v1918_v39 = vpop.f32.mrf.mxu0 }
 0x152   : > { %v995_v47 = vsel %vm994_vm1, 1, %v16685_v18  ;;  %v972_v7 = vmul.u32 18, %v971_v53  ;;  %v3638_v63 = vsel %vm16903_vm5, %v3635_v6, %v3637_v42  ;;  %v12510_v34 = vadd.s32 168, %v11627_v9 }
 0x153   : > { %v997_v13 = vadd.s32 %v995_v47, %v993_v48  ;;  %v2319_v27 = vshrl.u32 %v2118_v20, 16  ;;  %v2322_v1 = vshll.u32 %v2118_v20, 16  ;;  %3756 = vmatmul.bf16.gmra.mxu0 %v3638_v63  ;;  %v2317_v49 = vrot.slane %v2315_v44, 4 }
 0x154   : > { %v973_v31 = vsub.s32 %v12450_v8, %v972_v7  ;;  %v2813_v45 = vshrl.u32 %v12456_v24, 16  ;;  %v1008_v60 = vand.u32 65535, %v12510_v34  ;;  %v1009_v6 = vshrl.u32 %v12510_v34, 16 }
 0x155   : > { %v998_v11 = vadd.s32 %v997_v13, %v987_v3  ;;  %v2321_v12 = vrot.slane %v2319_v27, 6  ;;  %v2324_v23 = vrot.slane %v2322_v1, 7  ;;  %v1976_v44 = vmax.f32 %v12507_v52, 0.0 }
 0x156   : > { %vm1459_vm9 = vcmp.ne.s32.totalorder %v973_v31, 0  ;;  %vm1495_vm11 = vcmp.lt.s32.totalorder %v973_v31, 0  ;;  %v1567_v41 = vadd.s32 18, %v973_v31  ;;  %v12517_v14 = vld [vmem:[#allocation2 + $0x48] sm:$0xff]  ;;  %v1012_v8 = vmul.u32 58254, %v1008_v60 }
 0x157   : > { %v999_v37 = vadd.s32 %v998_v11, %v989_v32  ;;  %v2325_v33 = vor.u32 %v2324_v23, %v2321_v12  ;;  %vm1531_vm1 = vmand %vm1495_vm11, %vm1459_vm9  ;;  %v12519_v3 = vmul.u32 14564, %v1009_v6  ;;  %v2815_v57 = vor.u32 %v2813_v45, %v12469_v21  ;;  %3177 = vmatmul.bf16.gmra.mxu2 %v12517_v14  ;;  %v12541_v23 = vpop.f32.mrf.mxu1 }
 0x158   : > { %v1603_v24 = vsel %vm1531_vm1, %v1567_v41, %v973_v31  ;;  %v1011_v53 = vmul.u32 14564, %v1008_v60  ;;  %v16904_v20 = vmov 0  ;;  %v2817_v47 = vshll.u32 %v12517_v14, 16  ;;  %v12538_v31 = vpop.f32.mrf.mxu2  ;;  %16908 = vst [vmem:[#allocation30_spill] sm:$0xff] %v12541_v23  ;;  %v12543_v60 = vld [vmem:[#allocation2 + $0x30] sm:$0xff] }
 0x159   : > { %v1000_v4 = vshrl.u32 %v999_v37, 4  ;;  %v2326_v48 = vsel %vm11941_vm4, %v2317_v49, %v2325_v33  ;;  %vm12524_vm5 = vcmp.lt.s32.totalorder %v1603_v24, 16  ;;  %v12531_v7 = vadd.f32 %v12234_v30, %v1918_v39  ;;  %16907 = vst [vmem:[#allocation29_spill] sm:$0xff] %v12538_v31 }
 0x15a   : > { %v16905_v20 = vsel %vm12524_vm5, 4294967295, %v16904_v20  ;;  %2558 = vst [vmem:[#allocation2 + $0x50] sm:$0xf] %v2326_v48  ;;  %v2083_v32 = vsel %vm12524_vm5, %v1975_v58, 0.0  ;;  %v1014_v13 = vmul.u32 58254, %v1009_v6  ;;  %v1015_v63 = vshll.u32 %v1012_v8, 16 }
 0x15b   : > { %16906 = vst [vmem:[#allocation28_spill] sm:$0xff] %v16905_v20  ;;  %v1001_v21 = vmul.u32 18, %v1000_v4  ;;  %v2327_v27 = vrot.slane %v2325_v33, 4  ;;  %v2119_v1 = vpack.c.bf16 %v2083_v32, %v2083_v32  ;;  %v12535_v52 = vrot.slane %v2817_v47, 1  ;;  %v1921_v4 = vpop.f32.mrf.mxu0 }
 0x15c   : > { %v1017_v49 = vshll.u32 %v12519_v3, 16  ;;  %v1016_v45 = vshrl.u32 %v1012_v8, 16  ;;  %vm1019_vm9 = vc.u32 %v1011_v53, %v1015_v63  ;;  %v1021_v12 = vadd.s32 %v1015_v63, %v1011_v53 }
 0x15d   : > { %v1002_v11 = vsub.s32 %v12474_v38, %v1001_v21  ;;  %v2329_v58 = vshrl.u32 %v2119_v1, 16  ;;  %v2332_v6 = vshll.u32 %v2119_v1, 16  ;;  %vm16909_vm11 = vsmask.f32 7424 }
 0x15e   : > { %v2820_v39 = vsel %vm16909_vm11, %v2815_v57, %v12535_v52  ;;  %v1020_v41 = vsel %vm1019_vm9, 1, %v16685_v18  ;;  %vm1023_vm3 = vc.u32 %v1021_v12, %v1017_v49  ;;  %v12549_v24 = vadd.s32 176, %v11627_v9 }
 0x15f   : > { %vm1460_vm1 = vcmp.ne.s32.totalorder %v1002_v11, 0  ;;  %vm1496_vm5 = vcmp.lt.s32.totalorder %v1002_v11, 0  ;;  %v1568_v37 = vadd.s32 18, %v1002_v11  ;;  %3007 = vmatmul.bf16.gmra.mxu1 %v2820_v39  ;;  %v1022_v33 = vadd.s32 %v1020_v41, %v1014_v13 }
 0x160   : > { %v2331_v38 = vrot.slane %v2329_v58, 6  ;;  %v2334_v8 = vrot.slane %v2332_v6, 7  ;;  %vm1532_vm0 = vmand %vm1496_vm5, %vm1460_vm1  ;;  %v1018_v48 = vshrl.u32 %v12519_v3, 16  ;;  %v1024_v57 = vsel %vm1023_vm3, 1, %v16685_v18 }
 0x161   : > { %v1604_v53 = vsel %vm1532_vm0, %v1568_v37, %v1002_v11  ;;  %v16660_v47 = vrot.slane %v12543_v60, 1  ;;  %v16910_v21 = vmov 0  ;;  %v1026_v13 = vadd.s32 %v1024_v57, %v1022_v33 }
 0x162   : > { %v2335_v32 = vor.u32 %v2334_v8, %v2331_v38  ;;  %vm12554_vm9 = vcmp.lt.s32.totalorder %v1604_v53, 16  ;;  %v1037_v63 = vand.u32 65535, %v12549_v24  ;;  %v1038_v49 = vshrl.u32 %v12549_v24, 16  ;;  %v3138_v8 = vpop.f32.mrf.mxu2 }
 0x163   : > { %v16911_v21 = vsel %vm12554_vm9, 4294967295, %v16910_v21  ;;  %v2084_v1 = vsel %vm12554_vm9, %v1976_v44, 0.0  ;;  %v12563_v11 = vadd.f32 %v12234_v30, %v1921_v4  ;;  %vm16913_vm3 = vcmask 1046528  }
 0x164   : > { %16912 = vst [vmem:[#allocation31_spill] sm:$0xff] %v16911_v21  ;;  %v3640_v3 = vsel %vm16913_vm3, %v3637_v42, %v16660_v47  ;;  %v2336_v12 = vsel %vm11941_vm4, %v2327_v27, %v2335_v32  ;;  %v2120_v58 = vpack.c.bf16 %v2084_v1, %v2084_v1  ;;  %v1027_v6 = vadd.s32 %v1026_v13, %v1016_v45  ;;  %v11034_v27 = vld [vmem:[%s16627_s3 + $0x138] sm:$0xff]  ;;  %v2973_v45 = vpop.f32.mrf.mxu1 }
 0x165   : > { %3761 = vmatmul.bf16.gmra.mxu0 %v3640_v3  ;;  %2559 = vst [vmem:[#allocation2 + $0x54] sm:$0xf] %v2336_v12  ;;  %v1040_v39 = vmul.u32 14564, %v1037_v63  ;;  %v1041_v44 = vmul.u32 58254, %v1037_v63  ;;  %v1042_v41 = vmul.u32 14564, %v1038_v49  ;;  %v1977_v38 = vmax.f32 %v12531_v7, 0.0  ;;  %4126 = vmatpush.bf16.msrb.mxu1 %v11034_v27  ;;  %v1923_v27 = vpop.f32.mrf.mxu0 }
 0x166   : > { %v2339_v37 = vshrl.u32 %v2120_v58, 16  ;;  %v2342_v33 = vshll.u32 %v2120_v58, 16  ;;  %v1028_v30 = vadd.s32 %v1027_v6, %v1018_v48  ;;  %v1043_v4 = vmul.u32 58254, %v1038_v49 }
 0x167   : > { %v1044_v26 = vshll.u32 %v1041_v44, 16  ;;  %v1046_v53 = vshll.u32 %v1042_v41, 16  ;;  %v12577_v1 = vadd.f32 %v3138_v8, %v2973_v45  ;;  %v2337_v3 = vrot.slane %v2335_v32, 4 }
 0x168   : > { %v2341_v57 = vrot.slane %v2339_v37, 6  ;;  %v2344_v13 = vrot.slane %v2342_v33, 7  ;;  %v1029_v63 = vshrl.u32 %v1028_v30, 4  ;;  %v12580_v7 = vadd.s32 184, %v11627_v9  ;;  %v12586_v33 = vld [vmem:[#allocation2 + $0x38] sm:$0xff] }
 0x169   : > { %vm1048_vm0 = vc.u32 %v1040_v39, %v1044_v26  ;;  %v1050_v48 = vadd.s32 %v1044_v26, %v1040_v39  ;;  %v1045_v58 = vshrl.u32 %v1041_v44, 16  ;;  %v1047_v35 = vshrl.u32 %v1042_v41, 16 }
 0x16a   : > { %v12582_v49 = vor.u32 %v2344_v13, %v2341_v57  ;;  %v1030_v12 = vmul.u32 18, %v1029_v63  ;;  %v1049_v6 = vsel %vm1048_vm0, 1, %v16685_v18  ;;  %v1066_v37 = vand.u32 65535, %v12580_v7 }
 0x16b   : > { %v1051_v42 = vadd.s32 %v1049_v6, %v1043_v4  ;;  %vm1052_vm5 = vc.u32 %v1050_v48, %v1046_v53  ;;  %v2821_v44 = vshrl.u32 %v12517_v14, 16  ;;  %v1067_v4 = vshrl.u32 %v12580_v7, 16 }
 0x16c   : > { %v2346_v32 = vsel %vm11941_vm4, %v2337_v3, %v12582_v49  ;;  %v1031_v39 = vsub.s32 %v12510_v34, %v1030_v12  ;;  %v1053_v30 = vsel %vm1052_vm5, 1, %v16685_v18  ;;  %v12593_v8 = vld [vmem:[#allocation2 + $0x50] sm:$0xff]  ;;  %v1069_v26 = vmul.u32 14564, %v1066_v37 }
 0x16d   : > { %2560 = vst [vmem:[#allocation2 + $0x58] sm:$0xf] %v2346_v32  ;;  %v1055_v41 = vadd.s32 %v1053_v30, %v1051_v42  ;;  %v1070_v53 = vmul.u32 58254, %v1066_v37  ;;  %3182 = vmatmul.bf16.gmra.mxu2 %v12593_v8  ;;  %v2825_v34 = vshll.u32 %v12593_v8, 16  ;;  %v1071_v13 = vmul.u32 14564, %v1067_v4 }
 0x16e   : > { %vm1461_vm11 = vcmp.ne.s32.totalorder %v1031_v39, 0  ;;  %vm1497_vm1 = vcmp.lt.s32.totalorder %v1031_v39, 0  ;;  %v1569_v45 = vadd.s32 18, %v1031_v39  ;;  %v2823_v42 = vor.u32 %v2821_v44, %v12535_v52  ;;  %v12619_v44 = vpop.f32.mrf.mxu2 }
 0x16f   : > { %vm1533_vm3 = vmand %vm1497_vm1, %vm1461_vm11  ;;  %v1056_v57 = vadd.s32 %v1055_v41, %v1045_v58  ;;  %v1073_v63 = vshll.u32 %v1070_v53, 16  ;;  %v12601_v48 = vrot.slane %v2825_v34, 1  ;;  %v1072_v12 = vmul.u32 58254, %v1067_v4  ;;  %v12610_v58 = vld [vmem:[%s16626_s2] ss:$0 sm:$0xff]  ;;  %16918 = vst [vmem:[#allocation34_spill] sm:$0xff] %v12619_v44 }
 0x170   : > { %v1605_v3 = vsel %vm1533_vm3, %v1569_v45, %v1031_v39  ;;  %v16914_v6 = vmov 0  ;;  %v1075_v32 = vshll.u32 %v1071_v13, 16  ;;  %v12613_v30 = vadd.f32 %v12610_v58, %v1923_v27  ;;  %v12615_v39 = vpop.f32.mrf.mxu1 }
 0x171   : > { %vm12603_vm0 = vcmp.lt.s32.totalorder %v1605_v3, 16  ;;  %v1057_v37 = vadd.s32 %v1056_v57, %v1047_v35  ;;  %16917 = vst [vmem:[#allocation33_spill] sm:$0xff] %v12615_v39  ;;  %vm16919_vm5 = vsmask.f32 7424  ;;  %vm1077_vm11 = vc.u32 %v1069_v26, %v1073_v63  ;;  %v13282_v39 = vld [vmem:[#allocation2 + $0x38] sm:$0xff] }
 0x172   : > { %v16915_v6 = vsel %vm12603_vm0, 4294967295, %v16914_v6  ;;  %v2085_v52 = vsel %vm12603_vm0, %v1977_v38, 0.0  ;;  %v2828_v41 = vsel %vm16919_vm5, %v2823_v42, %v12601_v48  ;;  %v1079_v35 = vadd.s32 %v1073_v63, %v1069_v26 }
 0x173   : > { %16916 = vst [vmem:[#allocation32_spill] sm:$0xff] %v16915_v6  ;;  %v2347_v4 = vrot.slane %v12582_v49, 4  ;;  %v2121_v45 = vpack.c.bf16 %v2085_v52, %v2085_v52  ;;  %v1058_v34 = vshrl.u32 %v1057_v37, 4  ;;  %3012 = vmatmul.bf16.gmra.mxu1 %v2828_v41  ;;  %v1078_v27 = vsel %vm1077_vm11, 1, %v16685_v18 }
 0x174   : > { %v1074_v57 = vshrl.u32 %v1070_v53, 16  ;;  %v1080_v3 = vadd.s32 %v1078_v27, %v1072_v12  ;;  %vm1081_vm1 = vc.u32 %v1079_v35, %v1075_v32  ;;  %v12626_v47 = vadd.s32 192, %v11627_v9  ;;  %v1926_v12 = vpop.f32.mrf.mxu0 }
 0x175   : > { %v2349_v38 = vshrl.u32 %v2121_v45, 16  ;;  %v2352_v14 = vshll.u32 %v2121_v45, 16  ;;  %v1059_v6 = vmul.u32 18, %v1058_v34  ;;  %v1082_v42 = vsel %vm1081_vm1, 1, %v16685_v18 }
 0x176   : > { %v1076_v21 = vshrl.u32 %v1071_v13, 16  ;;  %v1084_v26 = vadd.s32 %v1082_v42, %v1080_v3  ;;  %v1095_v49 = vand.u32 65535, %v12626_v47  ;;  %v1096_v63 = vshrl.u32 %v12626_v47, 16 }
 0x177   : > { %v2351_v37 = vrot.slane %v2349_v38, 6  ;;  %v2354_v52 = vrot.slane %v2352_v14, 7  ;;  %v1060_v53 = vsub.s32 %v12549_v24, %v1059_v6  ;;  %v16920_v32 = vrot.slane %v12586_v33, 1 }
 0x178   : > { %v16921_v41 = vrot.slane %v12543_v60, 1  ;;  %vm16922_vm3 = vcmask 1046528   ;;  %v1085_v45 = vadd.s32 %v1084_v26, %v1074_v57  ;;  %v1098_v34 = vmul.u32 14564, %v1095_v49  ;;  %v2978_v26 = vpop.f32.mrf.mxu1 }
 0x179   : > { %v1099_v27 = vmul.u32 58254, %v1095_v49  ;;  %v1100_v13 = vmul.u32 14564, %v1096_v63  ;;  %v2355_v3 = vor.u32 %v2354_v52, %v2351_v37  ;;  %vm1462_vm5 = vcmp.ne.s32.totalorder %v1060_v53, 0  ;;  %v3143_v37 = vpop.f32.mrf.mxu2 }
 0x17a   : > { %v3642_v35 = vsel %vm16922_vm3, %v16921_v41, %v16920_v32  ;;  %vm1498_vm11 = vcmp.lt.s32.totalorder %v1060_v53, 0  ;;  %v1570_v42 = vadd.s32 18, %v1060_v53  ;;  %v1086_v14 = vadd.s32 %v1085_v45, %v1076_v21 }
 0x17b   : > { %3766 = vmatmul.bf16.gmra.mxu0 %v3642_v35  ;;  %vm1534_vm1 = vmand %vm1498_vm11, %vm1462_vm5  ;;  %v1101_v38 = vmul.u32 58254, %v1096_v63  ;;  %v1102_v24 = vshll.u32 %v1099_v27, 16  ;;  %v12638_v6 = vadd.f32 %v12610_v58, %v1926_v12  ;;  %v2356_v60 = vsel %vm11941_vm4, %v2347_v4, %v2355_v3 }
 0x17c   : > { %v1606_v32 = vsel %vm1534_vm1, %v1570_v42, %v1060_v53  ;;  %v1104_v57 = vshll.u32 %v1100_v13, 16  ;;  %2561 = vst [vmem:[#allocation2 + $0x5c] sm:$0xf] %v2356_v60  ;;  %v16923_v49 = vmov 0  ;;  %v1087_v52 = vshrl.u32 %v1086_v14, 4 }
 0x17d   : > { %vm12642_vm3 = vcmp.lt.s32.totalorder %v1606_v32, 16  ;;  %v1979_v21 = vmax.f32 %v12613_v30, 0.0  ;;  %vm1106_vm5 = vc.u32 %v1098_v34, %v1102_v24  ;;  %v16926_v63 = vmax.f32 %v12563_v11, 0.0 }
 0x17e   : > { %v16924_v49 = vsel %vm12642_vm3, 4294967295, %v16923_v49  ;;  %v1107_v4 = vsel %vm1106_vm5, 1, %v16685_v18  ;;  %v1108_v53 = vadd.s32 %v1102_v24, %v1098_v34  ;;  %v12652_v41 = vadd.f32 %v3143_v37, %v2978_v26  ;;  %v1928_v37 = vpop.f32.mrf.mxu0 }
 0x17f   : > { %16925 = vst [vmem:[#allocation35_spill] sm:$0xff] %v16924_v49  ;;  %v2086_v12 = vsel %vm12642_vm3, %v16926_v63, 0.0  ;;  %v1088_v45 = vmul.u32 18, %v1087_v52  ;;  %v1109_v42 = vadd.s32 %v1107_v4, %v1101_v38  ;;  %v2357_v32 = vrot.slane %v2355_v3, 4 }
 0x180   : > { %v2122_v35 = vpack.c.bf16 %v2086_v12, %v2086_v12  ;;  %v1103_v14 = vshrl.u32 %v1099_v27, 16  ;;  %vm1110_vm11 = vc.u32 %v1108_v53, %v1104_v57  ;;  %v12656_v30 = vadd.s32 200, %v11627_v9 }
 0x181   : > { %v1089_v63 = vsub.s32 %v12580_v7, %v1088_v45  ;;  %v1111_v49 = vsel %vm1110_vm11, 1, %v16685_v18  ;;  %v1105_v34 = vshrl.u32 %v1100_v13, 16  ;;  %v2829_v13 = vshrl.u32 %v12593_v8, 16 }
 0x182   : > { %v2359_v11 = vshrl.u32 %v2122_v35, 16  ;;  %v2362_v20 = vshll.u32 %v2122_v35, 16  ;;  %v1113_v24 = vadd.s32 %v1111_v49, %v1109_v42  ;;  %v1124_v26 = vand.u32 65535, %v12656_v30 }
 0x183   : > { %v1125_v38 = vshrl.u32 %v12656_v30, 16  ;;  %vm1463_vm1 = vcmp.ne.s32.totalorder %v1089_v63, 0  ;;  %vm1499_vm5 = vcmp.lt.s32.totalorder %v1089_v63, 0  ;;  %v1571_v57 = vadd.s32 18, %v1089_v63  ;;  %v12666_v7 = vld [vmem:[#allocation2 + $0x58] sm:$0xff] }
 0x184   : > { %v2361_v52 = vrot.slane %v2359_v11, 6  ;;  %v2364_v3 = vrot.slane %v2362_v20, 7  ;;  %vm12662_vm3 = vmand %vm1499_vm5, %vm1463_vm1  ;;  %v1114_v12 = vadd.s32 %v1113_v24, %v1103_v14  ;;  %v1128_v49 = vmul.u32 58254, %v1124_v26  ;;  %3187 = vmatmul.bf16.gmra.mxu2 %v12666_v7 }
 0x185   : > { %v1127_v53 = vmul.u32 14564, %v1124_v26  ;;  %v1129_v35 = vmul.u32 14564, %v1125_v38  ;;  %v12670_v45 = vadd.f32 %v12610_v58, %v1928_v37  ;;  %v1607_v20 = vsel %vm12662_vm3, %v1571_v57, %v1089_v63 }
 0x186   : > { %v2365_v4 = vor.u32 %v2364_v3, %v2361_v52  ;;  %v1115_v42 = vadd.s32 %v1114_v12, %v1105_v34  ;;  %v2833_v11 = vshll.u32 %v12666_v7, 16  ;;  %v1131_v14 = vshll.u32 %v1128_v49, 16 }
 0x187   : > { %vm12678_vm11 = vcmp.lt.s32.totalorder %v1607_v20, 16  ;;  %v16929_v8 = vmov 0  ;;  %v2831_v26 = vor.u32 %v2829_v13, %v12601_v48  ;;  %v1130_v37 = vmul.u32 58254, %v1125_v38 }
 0x188   : > { %v2366_v24 = vsel %vm11941_vm4, %v2357_v32, %v2365_v4  ;;  %v16930_v8 = vsel %vm12678_vm11, 4294967295, %v16929_v8  ;;  %v2087_v63 = vsel %vm12678_vm11, %v1979_v21, 0.0  ;;  %v1116_v34 = vshrl.u32 %v1115_v42, 4 }
 0x189   : > { %16931 = vst [vmem:[#allocation36_spill] sm:$0xff] %v16930_v8  ;;  %v12685_v52 = vrot.slane %v2833_v11, 1  ;;  %v1133_v3 = vshll.u32 %v1129_v35, 16  ;;  %v2123_v27 = vpack.c.bf16 %v2087_v63, %v2087_v63  ;;  %v1132_v57 = vshrl.u32 %v1128_v49, 16 }
 0x18a   : > { %2562 = vst [vmem:[#allocation2 + $0x60] sm:$0xf] %v2366_v24  ;;  %vm1135_vm3 = vc.u32 %v1127_v53, %v1131_v14  ;;  %v1137_v12 = vadd.s32 %v1131_v14, %v1127_v53  ;;  %v1117_v32 = vmul.u32 18, %v1116_v34  ;;  %vm16932_vm1 = vsmask.f32 7424 }
 0x18b   : > { %v2836_v20 = vsel %vm16932_vm1, %v2831_v26, %v12685_v52  ;;  %v1136_v60 = vsel %vm1135_vm3, 1, %v16685_v18  ;;  %v12691_v48 = vadd.s32 240, %v11627_v9  ;;  %v2369_v38 = vshrl.u32 %v2123_v27, 16 }
 0x18c   : > { %v2372_v13 = vshll.u32 %v2123_v27, 16  ;;  %3017 = vmatmul.bf16.gmra.mxu1 %v2836_v20  ;;  %v1138_v21 = vadd.s32 %v1136_v60, %v1130_v37  ;;  %vm1139_vm5 = vc.u32 %v1137_v12, %v1133_v3  ;;  %v1118_v42 = vsub.s32 %v12626_v47, %v1117_v32 }
 0x18d   : > { %v1140_v49 = vsel %vm1139_vm5, 1, %v16685_v18  ;;  %v1269_v53 = vand.u32 65535, %v12691_v48  ;;  %v1270_v11 = vshrl.u32 %v12691_v48, 16  ;;  %v2371_v14 = vrot.slane %v2369_v38, 6 }
 0x18e   : > { %v2374_v24 = vrot.slane %v2372_v13, 7  ;;  %v1134_v26 = vshrl.u32 %v1129_v35, 16  ;;  %v1142_v63 = vadd.s32 %v1140_v49, %v1138_v21  ;;  %v2367_v34 = vrot.slane %v2365_v4, 4 }
 0x18f   : > { %vm1464_vm3 = vcmp.ne.s32.totalorder %v1118_v42, 0  ;;  %vm1500_vm1 = vcmp.lt.s32.totalorder %v1118_v42, 0  ;;  %v1572_v8 = vadd.s32 18, %v1118_v42  ;;  %v1273_v37 = vmul.u32 58254, %v1269_v53 }
 0x190   : > { %v2375_v27 = vor.u32 %v2374_v24, %v2371_v14  ;;  %vm1536_vm11 = vmand %vm1500_vm1, %vm1464_vm3  ;;  %v1143_v60 = vadd.s32 %v1142_v63, %v1132_v57  ;;  %v1274_v3 = vmul.u32 14564, %v1270_v11  ;;  %v1981_v12 = vmax.f32 %v12670_v45, 0.0  ;;  %v11033_v57 = vld [vmem:[%s16627_s3 + $0x130] sm:$0xff] }
 0x191   : > { %v1608_v47 = vsel %vm1536_vm11, %v1572_v8, %v1118_v42  ;;  %v1272_v32 = vmul.u32 14564, %v1269_v53  ;;  %v12699_v20 = vadd.s32 208, %v11627_v9  ;;  %v16933_v4 = vmov 0  ;;  %4127 = vmatpush.bf16.msrb.mxu1 %v11033_v57 }
 0x192   : > { %v2376_v35 = vsel %vm11941_vm4, %v2367_v34, %v2375_v27  ;;  %vm12703_vm5 = vcmp.lt.s32.totalorder %v1608_v47, 16  ;;  %v1144_v38 = vadd.s32 %v1143_v60, %v1134_v26  ;;  %v1275_v13 = vmul.u32 58254, %v1270_v11 }
 0x193   : > { %v16934_v4 = vsel %vm12703_vm5, 4294967295, %v16933_v4  ;;  %v2377_v8 = vrot.slane %v2375_v27, 4  ;;  %2563 = vst [vmem:[#allocation2 + $0x64] sm:$0xf] %v2376_v35  ;;  %v16936_v45 = vmax.f32 %v12638_v6, 0.0  ;;  %v1276_v42 = vshll.u32 %v1273_v37, 16 }
 0x194   : > { %16935 = vst [vmem:[#allocation37_spill] sm:$0xff] %v16934_v4  ;;  %v1278_v49 = vshll.u32 %v1274_v3, 16  ;;  %v1145_v14 = vshrl.u32 %v1144_v38, 4  ;;  %v1277_v24 = vshrl.u32 %v1273_v37, 16  ;;  %v1279_v63 = vshrl.u32 %v1274_v3, 16 }
 0x195   : > { %v2088_v21 = vsel %vm12703_vm5, %v16936_v45, 0.0  ;;  %vm1280_vm11 = vc.u32 %v1272_v32, %v1276_v42  ;;  %v1282_v11 = vadd.s32 %v1276_v42, %v1272_v32  ;;  %v1153_v26 = vand.u32 65535, %v12699_v20 }
 0x196   : > { %v2124_v53 = vpack.c.bf16 %v2088_v21, %v2088_v21  ;;  %v1154_v34 = vshrl.u32 %v12699_v20, 16  ;;  %v1146_v47 = vmul.u32 18, %v1145_v14  ;;  %v1281_v6 = vsel %vm1280_vm11, 1, %v16685_v18  ;;  %v12721_v14 = vld [vmem:[#allocation2 + $0x40] sm:$0xff] }
 0x197   : > { %v1283_v35 = vadd.s32 %v1281_v6, %v1275_v13  ;;  %vm1284_vm3 = vc.u32 %v1282_v11, %v1278_v49  ;;  %v1156_v45 = vmul.u32 14564, %v1153_v26  ;;  %v1157_v4 = vmul.u32 58254, %v1153_v26  ;;  %v1941_v49 = vpop.f32.mrf.mxu3 }
 0x198   : > { %v2379_v27 = vshrl.u32 %v2124_v53, 16  ;;  %v2382_v60 = vshll.u32 %v2124_v53, 16  ;;  %v1147_v37 = vsub.s32 %v12656_v30, %v1146_v47  ;;  %v1285_v3 = vsel %vm1284_vm3, 1, %v16685_v18 }
 0x199   : > { %v1287_v32 = vadd.s32 %v1285_v3, %v1283_v35  ;;  %v1158_v57 = vmul.u32 14564, %v1154_v34  ;;  %v1159_v42 = vmul.u32 58254, %v1154_v34  ;;  %v1160_v19 = vshll.u32 %v1157_v4, 16  ;;  %v12729_v34 = vpop.f32.mrf.mxu1 }
 0x19a   : > { %v2381_v21 = vrot.slane %v2379_v27, 6  ;;  %v2384_v38 = vrot.slane %v2382_v60, 7  ;;  %vm1465_vm1 = vcmp.ne.s32.totalorder %v1147_v37, 0  ;;  %vm1501_vm5 = vcmp.lt.s32.totalorder %v1147_v37, 0  ;;  %16937 = vst [vmem:[#allocation38_spill] sm:$0xff] %v12729_v34  ;;  %v12736_v35 = vld [vmem:[#allocation2 + $0x60] sm:$0xff] }
 0x19b   : > { %v1573_v53 = vadd.s32 18, %v1147_v37  ;;  %vm1537_vm11 = vmand %vm1501_vm5, %vm1465_vm1  ;;  %v1288_v13 = vadd.s32 %v1287_v32, %v1277_v24  ;;  %v1162_v11 = vshll.u32 %v1158_v57, 16  ;;  %v12727_v27 = vadd.f32 %v12610_v58, %v1941_v49  ;;  %3192 = vmatmul.bf16.gmra.mxu2 %v12736_v35 }
 0x19c   : > { %v12719_v51 = vor.u32 %v2384_v38, %v2381_v21  ;;  %vm1164_vm3 = vc.u32 %v1156_v45, %v1160_v19  ;;  %v16938_v60 = vmov 0  ;;  %v1166_v6 = vadd.s32 %v1160_v19, %v1156_v45  ;;  %v12738_v21 = vpop.f32.mrf.mxu2 }
 0x19d   : > { %v1609_v26 = vsel %vm1537_vm11, %v1573_v53, %v1147_v37  ;;  %v1289_v47 = vadd.s32 %v1288_v13, %v1279_v63  ;;  %v1165_v24 = vsel %vm1164_vm3, 1, %v16685_v18  ;;  %16941 = vst [vmem:[#allocation40_spill] sm:$0xff] %v12738_v21  ;;  %v12743_v37 = vadd.s32 248, %v11627_v9 }
 0x19e   : > { %v2386_v30 = vsel %vm11941_vm4, %v2377_v8, %v12719_v51  ;;  %vm12731_vm0 = vcmp.lt.s32.totalorder %v1609_v26, 16  ;;  %v1167_v38 = vadd.s32 %v1165_v24, %v1159_v42  ;;  %v1161_v49 = vshrl.u32 %v1157_v4, 16 }
 0x19f   : > { %2564 = vst [vmem:[#allocation2 + $0x68] sm:$0xf] %v2386_v30  ;;  %v16939_v60 = vsel %vm12731_vm0, 4294967295, %v16938_v60  ;;  %v2089_v8 = vsel %vm12731_vm0, %v1981_v12, 0.0  ;;  %v1290_v53 = vshrl.u32 %v1289_v47, 4  ;;  %vm1168_vm5 = vc.u32 %v1166_v6, %v1162_v11 }
 0x1a0   : > { %16940 = vst [vmem:[#allocation39_spill] sm:$0xff] %v16939_v60  ;;  %v2125_v32 = vpack.c.bf16 %v2089_v8, %v2089_v8  ;;  %v1986_v19 = vmax.f32 %v12727_v27, 0.0  ;;  %v1169_v63 = vsel %vm1168_vm5, 1, %v16685_v18  ;;  %v1298_v45 = vand.u32 65535, %v12743_v37  ;;  %v1931_v60 = vpop.f32.mrf.mxu0 }
 0x1a1   : > { %v1299_v12 = vshrl.u32 %v12743_v37, 16  ;;  %v1291_v30 = vmul.u32 18, %v1290_v53  ;;  %v1171_v26 = vadd.s32 %v1169_v63, %v1167_v38  ;;  %v1163_v24 = vshrl.u32 %v1158_v57, 16  ;;  %v11042_v38 = vld [vmem:[%s16627_s3 + $0x178] sm:$0xff] }
 0x1a2   : > { %v2389_v42 = vshrl.u32 %v2125_v32, 16  ;;  %v2392_v13 = vshll.u32 %v2125_v32, 16  ;;  %v1301_v3 = vmul.u32 14564, %v1298_v45  ;;  %v1302_v8 = vmul.u32 58254, %v1298_v45  ;;  %4386 = vmatpush.bf16.msrb.mxu2 %v11042_v38 }
 0x1a3   : > { %v12751_v47 = vmul.u32 14564, %v1299_v12  ;;  %v1292_v6 = vsub.s32 %v12691_v48, %v1291_v30  ;;  %v1172_v27 = vadd.s32 %v1171_v26, %v1161_v49  ;;  %v2387_v18 = vrot.slane %v12719_v51, 4  ;;  %v2983_v49 = vpop.f32.mrf.mxu1 }
 0x1a4   : > { %v2391_v4 = vrot.slane %v2389_v42, 6  ;;  %v2394_v11 = vrot.slane %v2392_v13, 7  ;;  %v1304_v15 = vmul.u32 58254, %v1299_v12  ;;  %v1305_v10 = vshll.u32 %v1302_v8, 16  ;;  %v11041_v13 = vld [vmem:[%s16627_s3 + $0x170] sm:$0xff]  ;;  %v3148_v30 = vpop.f32.mrf.mxu2 }
 0x1a5   : > { %v1307_v56 = vshll.u32 %v12751_v47, 16  ;;  %vm1470_vm1 = vcmp.ne.s32.totalorder %v1292_v6, 0  ;;  %vm1506_vm11 = vcmp.lt.s32.totalorder %v1292_v6, 0  ;;  %v1578_v57 = vadd.s32 18, %v1292_v6 }
 0x1a6   : > { %v12756_v32 = vor.u32 %v2394_v11, %v2391_v4  ;;  %vm1542_vm3 = vmand %vm1506_vm11, %vm1470_vm1  ;;  %v1173_v53 = vadd.s32 %v1172_v27, %v1163_v24  ;;  %vm1309_vm5 = vc.u32 %v1301_v3, %v1305_v10  ;;  %v1311_v48 = vadd.s32 %v1305_v10, %v1301_v3  ;;  %v12782_v27 = vld [vmem:[#allocation2 + $0x8] sm:$0xc]  ;;  %4387 = vmatpush.bf16.msrb.mxu2 %v11041_v13 }
 0x1a7   : > { %v1614_v63 = vsel %vm1542_vm3, %v1578_v57, %v1292_v6  ;;  %v1306_v45 = vshrl.u32 %v1302_v8, 16  ;;  %v16942_v12 = vmov 0   ;;  %v16943_v26 = vmov 0  ;;  %v12801_v13 = vld [vmem:[#allocation2 + $0x48] sm:$0xff] }
 0x1a8   : > { %v2396_v51 = vsel %vm11941_vm4, %v2387_v18, %v12756_v32  ;;  %v1310_v42 = vsel %vm1309_vm5, 1, %v16942_v12  ;;  %vm12768_vm1 = vcmp.lt.s32.totalorder %v1614_v63, 16  ;;  %v1174_v10 = vshrl.u32 %v1173_v53, 4  ;;  %v1943_v53 = vpop.f32.mrf.mxu3 }
 0x1a9   : > { %2565 = vst [vmem:[#allocation2 + $0x6c] sm:$0xf] %v2396_v51  ;;  %v16944_v26 = vsel %vm12768_vm1, 4294967295, %v16943_v26  ;;  %v1312_v3 = vadd.s32 %v1310_v42, %v1304_v15  ;;  %vm1313_vm11 = vc.u32 %v1311_v48, %v1307_v56  ;;  %v2094_v18 = vsel %vm12768_vm1, %v1986_v19, 0.0 }
 0x1aa   : > { %16945 = vst [vmem:[#allocation41_spill] sm:$0xff] %v16944_v26  ;;  %v1314_v24 = vsel %vm1313_vm11, 1, %v16942_v12  ;;  %v12775_v8 = vadd.f32 %v3148_v30, %v2983_v49  ;;  %v16946_v4 = vrot.slane %v12721_v14, 1  ;;  %v16947_v11 = vrot.slane %v12586_v33, 1 }
 0x1ab   : > { %vm16948_vm3 = vcmask 1046528   ;;  %v2130_v57 = vpack.c.bf16 %v2094_v18, %v2094_v18  ;;  %v1175_v38 = vmul.u32 18, %v1174_v10  ;;  %v1932_v15 = vadd.f32 %v12610_v58, %v1931_v60 }
 0x1ac   : > { %v3644_v6 = vsel %vm16948_vm3, %v16947_v11, %v16946_v4  ;;  %v1316_v56 = vadd.s32 %v1314_v24, %v1312_v3  ;;  %v1308_v19 = vshrl.u32 %v12751_v47, 16  ;;  %v2837_v48 = vshrl.u32 %v12666_v7, 16  ;;  %v12864_v0 = vpop.f32.mrf.mxu2 }
 0x1ad   : > { %3771 = vmatmul.bf16.gmra.mxu0 %v3644_v6  ;;  %v2841_v49 = vshll.u32 %v12736_v35, 16  ;;  %v12789_v33 = vadd.s32 216, %v11627_v9  ;;  %v1176_v51 = vsub.s32 %v12699_v20, %v1175_v38  ;;  %v12793_v42 = vadd.f32 %v12610_v58, %v1943_v53  ;;  %16959 = vst [vmem:[#allocation44_spill] sm:$0xff] %v12864_v0 }
 0x1ae   : > { %v1317_v63 = vadd.s32 %v1316_v56, %v1306_v45  ;;  %v2839_v30 = vor.u32 %v2837_v48, %v12685_v52  ;;  %v2439_v3 = vshrl.u32 %v2130_v57, 16  ;;  %v1982_v20 = vmax.f32 %v1932_v15, 0.0  ;;  %v1933_v45 = vpop.f32.mrf.mxu0 }
 0x1af   : > { %v12797_v47 = vrot.slane %v2841_v49, 1  ;;  %v1182_v7 = vand.u32 65535, %v12789_v33  ;;  %v1183_v10 = vshrl.u32 %v12789_v33, 16  ;;  %vm1466_vm5 = vcmp.ne.s32.totalorder %v1176_v51, 0 }
 0x1b0   : > { %vm1502_vm11 = vcmp.lt.s32.totalorder %v1176_v51, 0  ;;  %v2442_v18 = vshll.u32 %v2130_v57, 16  ;;  %v1574_v24 = vadd.s32 18, %v1176_v51  ;;  %v1318_v4 = vadd.s32 %v1317_v63, %v1308_v19 }
 0x1b1   : > { %vm1538_vm3 = vmand %vm1502_vm11, %vm1466_vm5  ;;  %vm16949_vm1 = vsmask.f32 7424  ;;  %v1987_v11 = vmax.f32 %v12793_v42, 0.0  ;;  %v1185_v6 = vmul.u32 14564, %v1182_v7  ;;  %v1186_v38 = vmul.u32 58254, %v1182_v7 }
 0x1b2   : > { %v2844_v52 = vsel %vm16949_vm1, %v2839_v30, %v12797_v47  ;;  %v1187_v56 = vmul.u32 14564, %v1183_v10  ;;  %v1610_v53 = vsel %vm1538_vm3, %v1574_v24, %v1176_v51  ;;  %v1319_v48 = vshrl.u32 %v1318_v4, 4 }
 0x1b3   : > { %3022 = vmatmul.bf16.gmra.mxu1 %v2844_v52  ;;  %v12807_v49 = vadd.f32 %v12610_v58, %v1933_v45  ;;  %v2441_v57 = vrot.slane %v2439_v3, 6  ;;  %vm12810_vm5 = vcmp.lt.s32.totalorder %v1610_v53, 16  ;;  %v16950_v60 = vmov 0 }
 0x1b4   : > { %v16951_v60 = vsel %vm12810_vm5, 4294967295, %v16950_v60  ;;  %v1188_v19 = vmul.u32 58254, %v1183_v10  ;;  %v1189_v63 = vshll.u32 %v1186_v38, 16  ;;  %v2444_v30 = vrot.slane %v2442_v18, 7 }
 0x1b5   : > { %16952 = vst [vmem:[#allocation42_spill] sm:$0xff] %v16951_v60  ;;  %v2090_v42 = vsel %vm12810_vm5, %v1982_v20, 0.0  ;;  %v1320_v7 = vmul.u32 18, %v1319_v48  ;;  %v1191_v52 = vshll.u32 %v1187_v56, 16  ;;  %v12817_v45 = vadd.s32 256, %v11627_v9 }
 0x1b6   : > { %v2126_v51 = vpack.c.bf16 %v2090_v42, %v2090_v42  ;;  %vm1193_vm1 = vc.u32 %v1185_v6, %v1189_v63  ;;  %v1195_v24 = vadd.s32 %v1189_v63, %v1185_v6  ;;  %v1190_v4 = vshrl.u32 %v1186_v38, 16 }
 0x1b7   : > { %v1321_v3 = vsub.s32 %v12743_v37, %v1320_v7  ;;  %v1192_v53 = vshrl.u32 %v1187_v56, 16  ;;  %v1194_v15 = vsel %vm1193_vm1, 1, %v16942_v12  ;;  %v1327_v60 = vand.u32 65535, %v12817_v45 }
 0x1b8   : > { %v2399_v10 = vshrl.u32 %v2126_v51, 16  ;;  %v2402_v26 = vshll.u32 %v2126_v51, 16  ;;  %v1196_v18 = vadd.s32 %v1194_v15, %v1188_v19  ;;  %vm1197_vm11 = vc.u32 %v1195_v24, %v1191_v52 }
 0x1b9   : > { %vm1471_vm3 = vcmp.ne.s32.totalorder %v1321_v3, 0  ;;  %vm1507_vm5 = vcmp.lt.s32.totalorder %v1321_v3, 0  ;;  %v1579_v20 = vadd.s32 18, %v1321_v3  ;;  %v1198_v48 = vsel %vm1197_vm11, 1, %v16942_v12 }
 0x1ba   : > { %v2401_v42 = vrot.slane %v2399_v10, 6  ;;  %v2404_v6 = vrot.slane %v2402_v26, 7  ;;  %vm1543_vm0 = vmand %vm1507_vm5, %vm1471_vm3  ;;  %v1200_v63 = vadd.s32 %v1198_v48, %v1196_v18  ;;  %v12823_v37 = vor.u32 %v2444_v30, %v2441_v57 }
 0x1bb   : > { %v1615_v38 = vsel %vm1543_vm0, %v1579_v20, %v1321_v3  ;;  %v1328_v56 = vshrl.u32 %v12817_v45, 16  ;;  %v16953_v7 = vrot.slane %v12801_v13, 1  ;;  %v16954_v15 = vrot.slane %v12721_v14, 1 }
 0x1bc   : > { %vm16955_vm1 = vcmask 1046528   ;;  %v2397_v52 = vrot.slane %v12756_v32, 4  ;;  %v12832_v51 = vor.u32 %v2404_v6, %v2401_v42  ;;  %vm12834_vm11 = vcmp.lt.s32.totalorder %v1615_v38, 16 }
 0x1bd   : > { %v3646_v19 = vsel %vm16955_vm1, %v16954_v15, %v16953_v7  ;;  %v16956_v26 = vmov 0  ;;  %v1201_v24 = vadd.s32 %v1200_v63, %v1190_v4  ;;  %v2095_v57 = vsel %vm12834_vm11, %v1987_v11, 0.0  ;;  %v1946_v63 = vpop.f32.mrf.mxu3  ;;  %v11040_v15 = vld [vmem:[%s16627_s3 + $0x168] sm:$0xff] }
 0x1be   : > { %v16957_v26 = vsel %vm12834_vm11, 4294967295, %v16956_v26  ;;  %3776 = vmatmul.bf16.gmra.mxu0 %v3646_v19  ;;  %v1330_v30 = vmul.u32 14564, %v1327_v60  ;;  %v1331_v3 = vmul.u32 58254, %v1327_v60  ;;  %v1332_v10 = vmul.u32 14564, %v1328_v56  ;;  %4388 = vmatpush.bf16.msrb.mxu2 %v11040_v15 }
 0x1bf   : > { %16958 = vst [vmem:[#allocation43_spill] sm:$0xff] %v16957_v26  ;;  %v2406_v14 = vsel %vm11941_vm4, %v2397_v52, %v12832_v51  ;;  %v2131_v18 = vpack.c.bf16 %v2095_v57, %v2095_v57  ;;  %v1202_v32 = vadd.s32 %v1201_v24, %v1192_v53  ;;  %v1983_v20 = vmax.f32 %v12807_v49, 0.0 }
 0x1c0   : > { %v2447_v48 = vrot.slane %v12823_v37, 4  ;;  %2566 = vst [vmem:[#allocation2 + $0x70] sm:$0xf] %v2406_v14  ;;  %v1333_v42 = vmul.u32 58254, %v1328_v56  ;;  %v1334_v4 = vshll.u32 %v1331_v3, 16  ;;  %v1336_v6 = vshll.u32 %v1332_v10, 16 }
 0x1c1   : > { %v2449_v38 = vshrl.u32 %v2131_v18, 16  ;;  %v2452_v11 = vshll.u32 %v2131_v18, 16  ;;  %v1203_v7 = vshrl.u32 %v1202_v32, 4  ;;  %v12846_v60 = vadd.f32 %v12610_v58, %v1946_v63  ;;  %v11039_v14 = vld [vmem:[%s16627_s3 + $0x160] sm:$0xff] }
 0x1c2   : > { %v1335_v53 = vshrl.u32 %v1331_v3, 16  ;;  %vm1338_vm0 = vc.u32 %v1330_v30, %v1334_v4  ;;  %v1340_v49 = vadd.s32 %v1334_v4, %v1330_v30  ;;  %v12852_v19 = vadd.s32 224, %v11627_v9  ;;  %4389 = vmatpush.bf16.msrb.mxu2 %v11039_v14 }
 0x1c3   : > { %v2451_v56 = vrot.slane %v2449_v38, 6  ;;  %v2454_v52 = vrot.slane %v2452_v11, 7  ;;  %v1204_v24 = vmul.u32 18, %v1203_v7  ;;  %v1339_v57 = vsel %vm1338_vm0, 1, %v16942_v12 }
 0x1c4   : > { %v1341_v18 = vadd.s32 %v1339_v57, %v1333_v42  ;;  %vm1342_vm5 = vc.u32 %v1340_v49, %v1336_v6  ;;  %v1211_v32 = vand.u32 65535, %v12852_v19  ;;  %v1212_v3 = vshrl.u32 %v12852_v19, 16 }
 0x1c5   : > { %v12860_v30 = vor.u32 %v2454_v52, %v2451_v56  ;;  %v1205_v4 = vsub.s32 %v12789_v33, %v1204_v24  ;;  %v1337_v63 = vshrl.u32 %v1332_v10, 16  ;;  %v1343_v38 = vsel %vm1342_vm5, 1, %v16942_v12  ;;  %v12874_v24 = vld [vmem:[#allocation2 + $0x68] sm:$0xff] }
 0x1c6   : > { %v1345_v11 = vadd.s32 %v1343_v38, %v1341_v18  ;;  %v1214_v7 = vmul.u32 14564, %v1211_v32  ;;  %v1215_v15 = vmul.u32 58254, %v1211_v32  ;;  %v1216_v26 = vmul.u32 14564, %v1212_v3  ;;  %v12877_v18 = vpop.f32.mrf.mxu1  ;;  %3197 = vmatmul.bf16.gmra.mxu2 %v12874_v24 }
 0x1c7   : > { %v2456_v42 = vsel %vm11941_vm4, %v2447_v48, %v12860_v30  ;;  %vm1467_vm3 = vcmp.ne.s32.totalorder %v1205_v4, 0  ;;  %vm1503_vm1 = vcmp.lt.s32.totalorder %v1205_v4, 0  ;;  %v1575_v10 = vadd.s32 18, %v1205_v4  ;;  %16962 = vst [vmem:[#allocation45_spill] sm:$0xff] %v12877_v18  ;;  %v13215_v18 = vld [vmem:[#allocation2 + $0x20] sm:$0xff] }
 0x1c8   : > { %2571 = vst [vmem:[#allocation2 + $0x84] sm:$0xf] %v2456_v42  ;;  %vm12870_vm0 = vmand %vm1503_vm1, %vm1467_vm3  ;;  %v1346_v49 = vadd.s32 %v1345_v11, %v1335_v53  ;;  %v1217_v56 = vmul.u32 58254, %v1212_v3  ;;  %v1218_v52 = vshll.u32 %v1215_v15, 16  ;;  %v2407_v57 = vrot.slane %v12832_v51, 4 }
 0x1c9   : > { %v1219_v48 = vshrl.u32 %v1215_v15, 16  ;;  %v1220_v32 = vshll.u32 %v1216_v26, 16  ;;  %v12880_v38 = vadd.s32 264, %v11627_v9  ;;  %v1611_v14 = vsel %vm12870_vm0, %v1575_v10, %v1205_v4 }
 0x1ca   : > { %v1347_v42 = vadd.s32 %v1346_v49, %v1337_v63  ;;  %vm1222_vm5 = vc.u32 %v1214_v7, %v1218_v52  ;;  %v1224_v6 = vadd.s32 %v1218_v52, %v1214_v7  ;;  %vm12885_vm3 = vcmp.lt.s32.totalorder %v1611_v14, 16  ;;  %v1936_v63 = vpop.f32.mrf.mxu0 }
 0x1cb   : > { %v16963_v53 = vmov 0  ;;  %v1223_v51 = vsel %vm1222_vm5, 1, %v16942_v12  ;;  %v1356_v3 = vand.u32 65535, %v12880_v38  ;;  %v1357_v11 = vshrl.u32 %v12880_v38, 16 }
 0x1cc   : > { %v16964_v53 = vsel %vm12885_vm3, 4294967295, %v16963_v53  ;;  %v2091_v15 = vsel %vm12885_vm3, %v1983_v20, 0.0  ;;  %v1348_v33 = vshrl.u32 %v1347_v42, 4  ;;  %v1225_v4 = vadd.s32 %v1223_v51, %v1217_v56  ;;  %v11038_v42 = vld [vmem:[%s16627_s3 + $0x158] sm:$0xff]  ;;  %v3153_v51 = vpop.f32.mrf.mxu2 }
 0x1cd   : > { %16965 = vst [vmem:[#allocation46_spill] sm:$0xff] %v16964_v53  ;;  %vm1226_vm1 = vc.u32 %v1224_v6, %v1220_v32  ;;  %v2127_v7 = vpack.c.bf16 %v2091_v15, %v2091_v15  ;;  %v1359_v49 = vmul.u32 14564, %v1356_v3  ;;  %v1360_v52 = vmul.u32 58254, %v1356_v3  ;;  %4390 = vmatpush.bf16.msrb.mxu2 %v11038_v42 }
 0x1ce   : > { %v1227_v10 = vsel %vm1226_vm1, 1, %v16942_v12  ;;  %v1349_v14 = vmul.u32 18, %v1348_v33  ;;  %v1221_v29 = vshrl.u32 %v1216_v26, 16  ;;  %v1361_v61 = vmul.u32 14564, %v1357_v11 }
 0x1cf   : > { %v1229_v17 = vadd.s32 %v1227_v10, %v1225_v4  ;;  %v2409_v40 = vshrl.u32 %v2127_v7, 16  ;;  %v2412_v36 = vshll.u32 %v2127_v7, 16  ;;  %v12896_v62 = vadd.f32 %v12610_v58, %v1936_v63 }
 0x1d0   : > { %v1363_v53 = vshll.u32 %v1360_v52, 16  ;;  %v1350_v20 = vsub.s32 %v12817_v45, %v1349_v14  ;;  %v1362_v6 = vmul.u32 58254, %v1357_v11  ;;  %v1365_v32 = vshll.u32 %v1361_v61, 16 }
 0x1d1   : > { %v1230_v56 = vadd.s32 %v1229_v17, %v1219_v48  ;;  %v2411_v3 = vrot.slane %v2409_v40, 6  ;;  %v2414_v26 = vrot.slane %v2412_v36, 7  ;;  %v11037_v17 = vld [vmem:[%s16627_s3 + $0x150] sm:$0xff]  ;;  %v1364_v48 = vshrl.u32 %v1360_v52, 16  ;;  %v2988_v40 = vpop.f32.mrf.mxu1 }
 0x1d2   : > { %vm1367_vm0 = vc.u32 %v1359_v49, %v1363_v53  ;;  %v1369_v15 = vadd.s32 %v1363_v53, %v1359_v49  ;;  %vm1472_vm5 = vcmp.ne.s32.totalorder %v1350_v20, 0  ;;  %vm1508_vm1 = vcmp.lt.s32.totalorder %v1350_v20, 0  ;;  %4391 = vmatpush.bf16.msrb.mxu2 %v11037_v17 }
 0x1d3   : > { %v1580_v33 = vadd.s32 18, %v1350_v20  ;;  %v1231_v4 = vadd.s32 %v1230_v56, %v1221_v29  ;;  %v12905_v45 = vor.u32 %v2414_v26, %v2411_v3  ;;  %vm1544_vm11 = vmand %vm1508_vm1, %vm1472_vm5  ;;  %v1368_v11 = vsel %vm1367_vm0, 1, %v16942_v12 }
 0x1d4   : > { %vm1371_vm3 = vc.u32 %v1369_v15, %v1365_v32  ;;  %v1370_v53 = vadd.s32 %v1368_v11, %v1362_v6  ;;  %v16966_v10 = vmov 0  ;;  %v1984_v49 = vmax.f32 %v12896_v62, 0.0 }
 0x1d5   : > { %v1616_v36 = vsel %vm1544_vm11, %v1580_v33, %v1350_v20  ;;  %v1232_v63 = vshrl.u32 %v1231_v4, 4  ;;  %v1372_v7 = vsel %vm1371_vm3, 1, %v16942_v12  ;;  %v2416_v29 = vsel %vm11941_vm4, %v2407_v57, %v12905_v45  ;;  %v1948_v57 = vpop.f32.mrf.mxu3 }
 0x1d6   : > { %vm12912_vm9 = vcmp.lt.s32.totalorder %v1616_v36, 16  ;;  %v1366_v52 = vshrl.u32 %v1361_v61, 16  ;;  %2567 = vst [vmem:[#allocation2 + $0x74] sm:$0xf] %v2416_v29  ;;  %v16969_v14 = vmax.f32 %v12846_v60, 0.0  ;;  %v1374_v6 = vadd.s32 %v1372_v7, %v1370_v53  ;;  %v12936_v53 = vpop.f32.mrf.mxu2 }
 0x1d7   : > { %v16967_v10 = vsel %vm12912_vm9, 4294967295, %v16966_v10  ;;  %v1233_v56 = vmul.u32 18, %v1232_v63  ;;  %v12921_v32 = vadd.f32 %v3153_v51, %v2988_v40  ;;  %v2845_v3 = vshrl.u32 %v12736_v35, 16 }
 0x1d8   : > { %16968 = vst [vmem:[#allocation47_spill] sm:$0xff] %v16967_v10  ;;  %v2096_v20 = vsel %vm12912_vm9, %v16969_v14, 0.0  ;;  %v2849_v26 = vshll.u32 %v12874_v24, 16  ;;  %v12926_v62 = vadd.s32 232, %v11627_v9  ;;  %v2457_v61 = vrot.slane %v12860_v30, 4 }
 0x1d9   : > { %v2132_v42 = vpack.c.bf16 %v2096_v20, %v2096_v20  ;;  %v1234_v60 = vsub.s32 %v12852_v19, %v1233_v56  ;;  %v1375_v15 = vadd.s32 %v1374_v6, %v1364_v48  ;;  %v12931_v33 = vadd.f32 %v12610_v58, %v1948_v57 }
 0x1da   : > { %v2847_v17 = vor.u32 %v2845_v3, %v12797_v47  ;;  %v12934_v11 = vrot.slane %v2849_v26, 1  ;;  %vm16970_vm5 = vsmask.f32 7424  ;;  %v1240_v58 = vand.u32 65535, %v12926_v62 }
 0x1db   : > { %v2459_v51 = vshrl.u32 %v2132_v42, 16  ;;  %v2462_v4 = vshll.u32 %v2132_v42, 16  ;;  %vm1468_vm11 = vcmp.ne.s32.totalorder %v1234_v60, 0  ;;  %vm1504_vm3 = vcmp.lt.s32.totalorder %v1234_v60, 0 }
 0x1dc   : > { %v1576_v35 = vadd.s32 18, %v1234_v60  ;;  %v1376_v40 = vadd.s32 %v1375_v15, %v1366_v52  ;;  %vm1540_vm0 = vmand %vm1504_vm3, %vm1468_vm11  ;;  %v2852_v19 = vsel %vm16970_vm5, %v2847_v17, %v12934_v11  ;;  %v2417_v30 = vrot.slane %v12905_v45, 4 }
 0x1dd   : > { %v2461_v36 = vrot.slane %v2459_v51, 6  ;;  %v2464_v63 = vrot.slane %v2462_v4, 7  ;;  %3027 = vmatmul.bf16.gmra.mxu1 %v2852_v19  ;;  %v1241_v7 = vshrl.u32 %v12926_v62, 16  ;;  %v16971_v52 = vmov 0 }
 0x1de   : > { %v1612_v48 = vsel %vm1540_vm0, %v1576_v35, %v1234_v60  ;;  %v1377_v47 = vshrl.u32 %v1376_v40, 4  ;;  %v1243_v14 = vmul.u32 14564, %v1240_v58  ;;  %v1244_v20 = vmul.u32 58254, %v1240_v58  ;;  %v11032_v40 = vld [vmem:[%s16627_s3 + $0x128] sm:$0xff] }
 0x1df   : > { %v12943_v29 = vor.u32 %v2464_v63, %v2461_v36  ;;  %vm12945_vm1 = vcmp.lt.s32.totalorder %v1612_v48, 16  ;;  %v1989_v42 = vmax.f32 %v12931_v33, 0.0  ;;  %v1245_v45 = vmul.u32 14564, %v1241_v7  ;;  %4128 = vmatpush.bf16.msrb.mxu1 %v11032_v40 }
 0x1e0   : > { %v16972_v52 = vsel %vm12945_vm1, 4294967295, %v16971_v52  ;;  %v2092_v56 = vsel %vm12945_vm1, %v1984_v49, 0.0  ;;  %v1378_v6 = vmul.u32 18, %v1377_v47  ;;  %v1246_v26 = vmul.u32 58254, %v1241_v7 }
 0x1e1   : > { %16973 = vst [vmem:[#allocation48_spill] sm:$0xff] %v16972_v52  ;;  %v2466_v57 = vsel %vm11941_vm4, %v2457_v61, %v12943_v29  ;;  %v2128_v3 = vpack.c.bf16 %v2092_v56, %v2092_v56  ;;  %v1247_v60 = vshll.u32 %v1244_v20, 16  ;;  %v1248_v51 = vshrl.u32 %v1244_v20, 16  ;;  %v11036_v61 = vld [vmem:[%s16627_s3 + $0x148] sm:$0xff] }
 0x1e2   : > { %2572 = vst [vmem:[#allocation2 + $0x88] sm:$0xf] %v2466_v57  ;;  %v1379_v15 = vsub.s32 %v12880_v38, %v1378_v6  ;;  %v1249_v4 = vshll.u32 %v1245_v45, 16  ;;  %v12957_v17 = vadd.s32 272, %v11627_v9  ;;  %4392 = vmatpush.bf16.msrb.mxu2 %v11036_v61  ;;  %v16974_v56 = vmov 0  ;;  %v12975_v6 = vpop.f32.mrf.mxu2 }
 0x1e3   : > { %v2419_v49 = vshrl.u32 %v2128_v3, 16  ;;  %v2422_v35 = vshll.u32 %v2128_v3, 16  ;;  %vm1251_vm11 = vc.u32 %v1243_v14, %v1247_v60  ;;  %v1253_v33 = vadd.s32 %v1247_v60, %v1243_v14 }
 0x1e4   : > { %vm1473_vm3 = vcmp.ne.s32.totalorder %v1379_v15, 0  ;;  %vm1509_vm0 = vcmp.lt.s32.totalorder %v1379_v15, 0  ;;  %v1581_v38 = vadd.s32 18, %v1379_v15  ;;  %v1252_v36 = vsel %vm1251_vm11, 1, %v16942_v12 }
 0x1e5   : > { %v2421_v63 = vrot.slane %v2419_v49, 6  ;;  %v2424_v19 = vrot.slane %v2422_v35, 7  ;;  %vm1545_vm5 = vmand %vm1509_vm0, %vm1473_vm3  ;;  %v1254_v58 = vadd.s32 %v1252_v36, %v1246_v26  ;;  %vm1255_vm9 = vc.u32 %v1253_v33, %v1249_v4  ;;  %v11035_v26 = vld [vmem:[%s16627_s3 + $0x140] sm:$0xff] }
 0x1e6   : > { %v1617_v48 = vsel %vm1545_vm5, %v1581_v38, %v1379_v15  ;;  %v1256_v47 = vsel %vm1255_vm9, 1, %v16942_v12  ;;  %v1385_v7 = vand.u32 65535, %v12957_v17  ;;  %v1386_v14 = vshrl.u32 %v12957_v17, 16  ;;  %v1938_v15 = vpop.f32.mrf.mxu0  ;;  %4393 = vmatpush.bf16.msrb.mxu2 %v11035_v26 }
 0x1e7   : > { %v12969_v20 = vor.u32 %v2424_v19, %v2421_v63  ;;  %vm12971_vm1 = vcmp.lt.s32.totalorder %v1617_v48, 16  ;;  %v1250_v57 = vshrl.u32 %v1245_v45, 16  ;;  %v1258_v3 = vadd.s32 %v1256_v47, %v1254_v58 }
 0x1e8   : > { %v16975_v56 = vsel %vm12971_vm1, 4294967295, %v16974_v56  ;;  %v2097_v60 = vsel %vm12971_vm1, %v1989_v42, 0.0  ;;  %v1388_v4 = vmul.u32 14564, %v1385_v7  ;;  %v1389_v49 = vmul.u32 58254, %v1385_v7 }
 0x1e9   : > { %16976 = vst [vmem:[#allocation49_spill] sm:$0xff] %v16975_v56  ;;  %v1390_v35 = vmul.u32 14564, %v1386_v14  ;;  %v2426_v33 = vsel %vm11941_vm4, %v2417_v30, %v12969_v20  ;;  %v2133_v40 = vpack.c.bf16 %v2097_v60, %v2097_v60  ;;  %v1259_v61 = vadd.s32 %v1258_v3, %v1248_v51  ;;  %v12992_v30 = vld [vmem:[%s16626_s2] ss:$0 sm:$0xff] }
 0x1ea   : > { %v16977_v45 = vunpack.c.l.b16 %v12782_v27  ;;  %v16978_v38 = vunpack.c.l.b16 %v12292_v55  ;;  %2568 = vst [vmem:[#allocation2 + $0x78] sm:$0xf] %v2426_v33  ;;  %v1391_v63 = vmul.u32 58254, %v1386_v14  ;;  %v1392_v19 = vshll.u32 %v1389_v49, 16 }
 0x1eb   : > { %v1394_v42 = vshll.u32 %v1390_v35, 16  ;;  %vm16736_vm9 = vcmask 1045504   ;;  %v2469_v58 = vshrl.u32 %v2133_v40, 16  ;;  %v2472_v48 = vshll.u32 %v2133_v40, 16  ;;  %v12997_v40 = vld [vmem:[#allocation2 + $0x10] sm:$0xff] }
 0x1ec   : > { %v4281_v36 = vpack.c.b16 %v16978_v38, %v16977_v45  ;;  %v1260_v47 = vadd.s32 %v1259_v61, %v1250_v57  ;;  %v1939_v51 = vadd.f32 %v12992_v30, %v1938_v15  ;;  %v2467_v27 = vrot.slane %v12943_v29, 4 }
 0x1ed   : > { %v1393_v7 = vshrl.u32 %v1389_v49, 16  ;;  %vm1396_vm11 = vc.u32 %v1388_v4, %v1392_v19  ;;  %v1398_v55 = vadd.s32 %v1392_v19, %v1388_v4  ;;  %v2471_v3 = vrot.slane %v2469_v58, 6  ;;  %v13015_v58 = vpop.f32.mrf.mxu2 }
 0x1ee   : > { %v2474_v14 = vrot.slane %v2472_v48, 7  ;;  %v1261_v26 = vshrl.u32 %v1260_v47, 4  ;;  %v1397_v60 = vsel %vm1396_vm11, 1, %v16942_v12  ;;  %v4283_v57 = vrot.slane %v4281_v36, 2  ;;  %v13018_v48 = vpop.f32.mrf.mxu0 }
 0x1ef   : > { %v1399_v33 = vadd.s32 %v1397_v60, %v1391_v63  ;;  %vm1400_vm3 = vc.u32 %v1398_v55, %v1394_v42  ;;  %v16733_v61 = vrot.slane %v12997_v40, 2  ;;  %v13004_v49 = vadd.s32 280, %v11627_v9  ;;  %v13013_v42 = vpop.f32.mrf.mxu1  ;;  %16979 = vst [vmem:[#allocation50_spill] sm:$0xff] %v13018_v48  ;;  %v13352_v48 = vld [vmem:[#allocation2 + $0x48] sm:$0xff] }
 0x1f0   : > { %v13000_v45 = vor.u32 %v2474_v14, %v2471_v3  ;;  %v1262_v15 = vmul.u32 18, %v1261_v26  ;;  %v1401_v29 = vsel %vm1400_vm3, 1, %v16942_v12  ;;  %v1395_v4 = vshrl.u32 %v1390_v35, 16 }
 0x1f1   : > { %v1403_v38 = vadd.s32 %v1401_v29, %v1399_v33  ;;  %v4285_v63 = vsel %vm16736_vm9, %v4283_v57, %v16733_v61  ;;  %v1414_v9 = vand.u32 65535, %v13004_v49  ;;  %v1415_v47 = vshrl.u32 %v13004_v49, 16  ;;  %v1951_v57 = vpop.f32.mrf.mxu3 }
 0x1f2   : > { %v2476_v36 = vsel %vm11941_vm4, %v2467_v27, %v13000_v45  ;;  %v1263_v19 = vsub.s32 %v12926_v62, %v1262_v15  ;;  %4394 = vmatmul.bf16.vlgmr.msrb.gmra.mxu2 %v4285_v63  ;;  %v1985_v3 = vmax.f32 %v1939_v51, 0.0  ;;  %v16980_v33 = vmov 0 }
 0x1f3   : > { %2573 = vst [vmem:[#allocation2 + $0x8c] sm:$0xf] %v2476_v36  ;;  %v1404_v35 = vadd.s32 %v1403_v38, %v1393_v7  ;;  %v1417_v62 = vmul.u32 14564, %v1414_v9  ;;  %v1418_v14 = vmul.u32 58254, %v1414_v9  ;;  %v13021_v26 = vmul.u32 14564, %v1415_v47 }
 0x1f4   : > { %vm1469_vm0 = vcmp.ne.s32.totalorder %v1263_v19, 0  ;;  %vm1505_vm5 = vcmp.lt.s32.totalorder %v1263_v19, 0  ;;  %v1577_v55 = vadd.s32 18, %v1263_v19  ;;  %v1420_v15 = vmul.u32 58254, %v1415_v47 }
 0x1f5   : > { %vm1541_vm11 = vmand %vm1505_vm5, %vm1469_vm0  ;;  %v1405_v27 = vadd.s32 %v1404_v35, %v1395_v4  ;;  %v1421_v29 = vshll.u32 %v1418_v14, 16  ;;  %v1952_v51 = vadd.f32 %v12992_v30, %v1951_v57  ;;  %v1423_v4 = vshll.u32 %v13021_v26, 16  ;;  %v13034_v57 = vld [vmem:[#allocation2 + $0x50] sm:$0xff] }
 0x1f6   : > { %v1613_v60 = vsel %vm1541_vm11, %v1577_v55, %v1263_v19  ;;  %v2427_v19 = vrot.slane %v12969_v20, 4  ;;  %v1422_v56 = vshrl.u32 %v1418_v14, 16  ;;  %v13041_v20 = vld [vmem:[#allocation2 + $0x70] sm:$0xff]  ;;  %v13046_v14 = vpop.f32.mrf.mxu0  ;;  %vm17007_vm1 = vcmask 1045504  }
 0x1f7   : > { %vm13023_vm3 = vcmp.lt.s32.totalorder %v1613_v60, 16  ;;  %v1406_v7 = vshrl.u32 %v1405_v27, 4  ;;  %vm1425_vm0 = vc.u32 %v1417_v62, %v1421_v29  ;;  %v1427_v9 = vadd.s32 %v1421_v29, %v1417_v62  ;;  %v13039_v62 = vpop.f32.mrf.mxu2  ;;  %v13043_v29 = vld [vmem:[#allocation2 + $0x18] sm:$0xff]  ;;  %16983 = vst [vmem:[#allocation52_spill] sm:$0xff] %v13046_v14 }
 0x1f8   : > { %v16981_v33 = vsel %vm13023_vm3, 4294967295, %v16980_v33  ;;  %v2093_v38 = vsel %vm13023_vm3, %v1985_v3, 0.0  ;;  %v1426_v35 = vsel %vm1425_vm0, 1, %v16942_v12  ;;  %v1990_v61 = vmax.f32 %v1952_v51, 0.0  ;;  %v2993_v3 = vpop.f32.mrf.mxu1 }
 0x1f9   : > { %16982 = vst [vmem:[#allocation51_spill] sm:$0xff] %v16981_v33  ;;  %v2129_v63 = vpack.c.bf16 %v2093_v38, %v2093_v38  ;;  %v1407_v36 = vmul.u32 18, %v1406_v7  ;;  %v1428_v60 = vadd.s32 %v1426_v35, %v1420_v15  ;;  %vm1429_vm5 = vc.u32 %v1427_v9, %v1423_v4  ;;  %v11031_v7 = vld [vmem:[%s16627_s3 + $0x120] sm:$0xff]  ;;  %v11030_v35 = vld [vmem:[%s16627_s3 + $0x118] sm:$0xff] }
 0x1fa   : > { %v16741_v9 = vrot.slane %v13034_v57, 1  ;;  %4129 = vmatpush.bf16.msrb.mxu1 %v11031_v7  ;;  %v2857_v10 = vshll.u32 %v13041_v20, 16  ;;  %v16988_v7 = vrot.slane %v13043_v29, 2 }
 0x1fb   : > { %v2429_v55 = vshrl.u32 %v2129_v63, 16  ;;  %v2432_v27 = vshll.u32 %v2129_v63, 16  ;;  %v1408_v47 = vsub.s32 %v12957_v17, %v1407_v36  ;;  %v1430_v63 = vsel %vm1429_vm5, 1, %v16942_v12 }
 0x1fc   : > { %v13054_v36 = vadd.f32 %v12975_v6, %v2993_v3  ;;  %v1432_v38 = vadd.s32 %v1430_v63, %v1428_v60  ;;  %v16986_v12 = vrot.slane %v12801_v13, 1  ;;  %vm16987_vm5 = vcmask 1046528   ;;  %v11029_v63 = vld [vmem:[%s16627_s3 + $0x110] sm:$0xff] }
 0x1fd   : > { %v2431_v17 = vrot.slane %v2429_v55, 6  ;;  %v2434_v15 = vrot.slane %v2432_v27, 7  ;;  %vm1474_vm11 = vcmp.ne.s32.totalorder %v1408_v47, 0  ;;  %vm1510_vm0 = vcmp.lt.s32.totalorder %v1408_v47, 0 }
 0x1fe   : > { %vm13048_vm9 = vmand %vm1510_vm0, %vm1474_vm11  ;;  %v1582_v4 = vadd.s32 18, %v1408_v47  ;;  %v1424_v27 = vshrl.u32 %v13021_v26, 16  ;;  %v3648_v6 = vsel %vm16987_vm5, %v16986_v12, %v16741_v9  ;;  %v2853_v3 = vshrl.u32 %v12874_v24, 16  ;;  %4130 = vmatpush.bf16.msrb.mxu1 %v11030_v35 }
 0x1ff   : > { %v2435_v55 = vor.u32 %v2434_v15, %v2431_v17  ;;  %v16989_v17 = vrot.slane %v12997_v40, 2  ;;  %vm16990_vm11 = vcmask 1045504   ;;  %v1433_v51 = vadd.s32 %v1432_v38, %v1422_v56  ;;  %3781 = vmatmul.bf16.gmra.mxu0 %v3648_v6  ;;  %v1953_v38 = vpop.f32.mrf.mxu3  ;;  %v13091_v12 = vpop.f32.mrf.mxu2 }
 0x200   : > { %v1618_v33 = vsel %vm13048_vm9, %v1582_v4, %v1408_v47  ;;  %v16991_v47 = vmov 0  ;;  %v2855_v24 = vor.u32 %v2853_v3, %v12934_v11  ;;  %v2859_v4 = vrot.slane %v2857_v10, 1  ;;  %v13096_v3 = vpop.f32.mrf.mxu0 }
 0x201   : > { %v4287_v26 = vsel %vm16990_vm11, %v16989_v17, %v16988_v7  ;;  %v2436_v60 = vsel %vm11941_vm4, %v2427_v19, %v2435_v55  ;;  %v2437_v15 = vrot.slane %v2435_v55, 4  ;;  %vm13077_vm0 = vcmp.lt.s32.totalorder %v1618_v33, 16  ;;  %16995 = vst [vmem:[#allocation54_spill] sm:$0xff] %v13096_v3 }
 0x202   : > { %v16992_v47 = vsel %vm13077_vm0, 4294967295, %v16991_v47  ;;  %2569 = vst [vmem:[#allocation2 + $0x7c] sm:$0xf] %v2436_v60  ;;  %v2098_v13 = vsel %vm13077_vm0, %v1990_v61, 0.0  ;;  %4399 = vmatmul.bf16.gmra.mxu2 %v4287_v26  ;;  %v1434_v56 = vadd.s32 %v1433_v51, %v1424_v27  ;;  %vm16994_vm9 = vsmask.f32 7424  ;;  %v2995_v61 = vpop.f32.mrf.mxu1  ;;  %4131 = vmatpush.bf16.msrb.mxu1 %v11029_v63 }
 0x203   : > { %16993 = vst [vmem:[#allocation53_spill] sm:$0xff] %v16992_v47  ;;  %v2446_v33 = vsel %vm11941_vm4, %v2437_v15, %v12823_v37  ;;  %v2134_v19 = vpack.c.bf16 %v2098_v13, %v2098_v13  ;;  %v2860_v55 = vsel %vm16994_vm9, %v2855_v24, %v2859_v4  ;;  %v13094_v6 = vadd.f32 %v13015_v58, %v2995_v61  ;;  %v11028_v27 = vld [vmem:[%s16627_s3 + $0x108] sm:$0xff]  ;;  %v13104_v51 = vld [vmem:[#allocation2 + $0x58] sm:$0xff] }
 0x204   : > { %2570 = vst [vmem:[#allocation2 + $0x80] sm:$0xf] %v2446_v33  ;;  %v1435_v35 = vshrl.u32 %v1434_v56, 4  ;;  %3032 = vmatmul.bf16.gmra.mxu1 %v2860_v55  ;;  %v1954_v37 = vadd.f32 %v12992_v30, %v1953_v38  ;;  %v3899_v7 = vshrl.u32 %v12997_v40, 16  ;;  %v2477_v17 = vrot.slane %v13000_v45, 4  ;;  %v11027_v45 = vld [vmem:[%s16627_s3 + $0x100] sm:$0xff] }
 0x205   : > { %v2479_v10 = vshrl.u32 %v2134_v19, 16  ;;  %v2482_v11 = vshll.u32 %v2134_v19, 16  ;;  %v3902_v58 = vshll.u32 %v12997_v40, 16  ;;  %v3891_v63 = vshrl.u32 %v12313_v25, 16 }
 0x206   : > { %v1436_v15 = vmul.u32 18, %v1435_v35  ;;  %v1991_v33 = vmax.f32 %v1954_v37, 0.0  ;;  %4132 = vmatpush.bf16.msrb.mxu1 %v11028_v27  ;;  %v3894_v19 = vshll.u32 %v12313_v25, 16  ;;  %v3901_v56 = vrot.slane %v3899_v7, 1 }
 0x207   : > { %v2481_v26 = vrot.slane %v2479_v10, 6  ;;  %v2484_v60 = vrot.slane %v2482_v11, 7  ;;  %v13125_v10 = vpop.f32.mrf.mxu2  ;;  %v2861_v25 = vshrl.u32 %v13041_v20, 16  ;;  %v3904_v35 = vrot.slane %v3902_v58, 2 }
 0x208   : > { %v1437_v30 = vsub.s32 %v13004_v49, %v1436_v15  ;;  %v3893_v27 = vrot.slane %v3891_v63, 1  ;;  %v13132_v7 = vpop.f32.mrf.mxu0  ;;  %v3896_v9 = vrot.slane %v3894_v19, 2  ;;  %v16999_v49 = vmov 0 }
 0x209   : > { %v13107_v13 = vor.u32 %v2484_v60, %v2481_v26  ;;  %v13110_v24 = vld [vmem:[#allocation2 + $0x78] sm:$0xff]  ;;  %16998 = vst [vmem:[#allocation55_spill] sm:$0xff] %v13132_v7  ;;  %v2863_v15 = vor.u32 %v2861_v25, %v2859_v4  ;;  %v17002_v58 = vrot.slane %v13104_v51, 1  ;;  %v17003_v63 = vrot.slane %v13034_v57, 1 }
 0x20a   : > { %vm1475_vm5 = vcmp.ne.s32.totalorder %v1437_v30, 0  ;;  %vm1511_vm11 = vcmp.lt.s32.totalorder %v1437_v30, 0  ;;  %v1583_v55 = vadd.s32 18, %v1437_v30  ;;  %v2998_v61 = vpop.f32.mrf.mxu1  ;;  %v2865_v11 = vshll.u32 %v13110_v24, 16  ;;  %4133 = vmatpush.bf16.msrb.mxu1 %v11027_v45 }
 0x20b   : > { %v2486_v40 = vsel %vm11941_vm4, %v2477_v17, %v13107_v13  ;;  %vm13121_vm9 = vmand %vm1511_vm11, %vm1475_vm5  ;;  %v13130_v37 = vadd.f32 %v13039_v62, %v2998_v61  ;;  %v13134_v17 = vld [vmem:[#allocation2 + $0x20] sm:$0xff]  ;;  %vm17004_vm11 = vcmask 1046528   ;;  %vm17005_vm0 = vsmask.f32 7424 }
 0x20c   : > { %2574 = vst [vmem:[#allocation2 + $0x90] sm:$0xf] %v2486_v40  ;;  %v16746_v26 = vrot.slane %v13134_v17, 2  ;;  %v1619_v60 = vsel %vm13121_vm9, %v1583_v55, %v1437_v30  ;;  %v2867_v40 = vrot.slane %v2865_v11, 1  ;;  %v3650_v61 = vsel %vm17004_vm11, %v17003_v63, %v17002_v58  ;;  %v4522_v55 = vld [vmem:[#allocation2 + $0x14] sm:$0xf] }
 0x20d   : > { %vm13139_vm5 = vcmp.lt.s32.totalorder %v1619_v60, 16  ;;  %v13151_v30 = vor.u32 %v3904_v35, %v3901_v56  ;;  %vm16759_vm9 = vsmask.f32 6400  ;;  %v17006_v45 = vrot.slane %v13043_v29, 2  ;;  %v4521_v58 = vld [vmem:[#allocation2 + $0x10] sm:$0xc] }
 0x20e   : > { %v17000_v49 = vsel %vm13139_vm5, 4294967295, %v16999_v49  ;;  %v2099_v62 = vsel %vm13139_vm5, %v1991_v33, 0.0  ;;  %v2868_v38 = vsel %vm17005_vm0, %v2863_v15, %v2867_v40  ;;  %v3897_v19 = vor.u32 %v3896_v9, %v3893_v27 }
 0x20f   : > { %17001 = vst [vmem:[#allocation56_spill] sm:$0xff] %v17000_v49  ;;  %v2135_v4 = vpack.c.bf16 %v2099_v62, %v2099_v62  ;;  %3786 = vmatmul.bf16.gmra.mxu0 %v3650_v61  ;;  %3037 = vmatmul.bf16.vlgmr.msrb.gmra.mxu3 %v2868_v38  ;;  %v4289_v33 = vsel %vm17007_vm1, %v17006_v45, %v16746_v26  ;;  %v2487_v60 = vrot.slane %v13107_v13, 4  ;;  %vm2576_vm0 = vcmask 1041408   ;;  %v3170_v15 = vpop.f32.mrf.mxu2  ;;  %v13161_v62 = vld [vmem:[#allocation2 + $0x80] sm:$0xff]  ;;  %v5299_v26 = vld [vmem:[#allocation2 + $0x10] sm:$0x8] }
 0x210   : > { %v3906_v56 = vsel %vm16759_vm9, %v3897_v19, %v13151_v30  ;;  %v13166_v27 = vpop.f32.mrf.mxu0  ;;  %v4613_v38 = vunpack.c.l.b16 %v4522_v55  ;;  %v13168_v13 = vld [vmem:[#allocation2 + $0x60] sm:$0xff]  ;;  %v3908_v45 = vshrl.u32 %v13043_v29, 16  ;;  %v4612_v19 = vunpack.c.l.b16 %v4521_v58 }
 0x211   : > { %v2489_v25 = vshrl.u32 %v2135_v4, 16  ;;  %v2492_v11 = vshll.u32 %v2135_v4, 16  ;;  %17008 = vst [vmem:[#allocation57_spill] sm:$0xff] %v13166_v27  ;;  %vm17009_vm1 = vsmask.f32 1280  ;;  %v5318_v58 = vunpack.c.l.b16 %v5299_v26  ;;  %v13195_v26 = vld [vmem:[#allocation2 + $0x28] sm:$0xff] }
 0x212   : > { %4404 = vmatmul.bf16.gmra.mxu2 %v4289_v33  ;;  %v3000_v35 = vpop.f32.mrf.mxu1  ;;  %v3911_v33 = vshll.u32 %v13043_v29, 16  ;;  %vm13174_vm11 = vmand %vm2576_vm0, %vm17009_vm1  ;;  %v2869_v29 = vshrl.u32 %v13110_v24, 16  ;;  %v3651_v49 = vrot.slane %v13168_v13, 1  ;;  %v3910_v47 = vrot.slane %v3908_v45, 1  ;;  %v13242_v27 = vld [vmem:[#allocation2 + $0x30] sm:$0xff] }
 0x213   : > { %v2491_v63 = vrot.slane %v2489_v25, 6  ;;  %v2494_v61 = vrot.slane %v2492_v11, 7  ;;  %v13164_v9 = vadd.f32 %v13091_v12, %v3000_v35  ;;  %v17010_v25 = vmov 0  ;;  %v2578_v12 = vld [vmem:[#allocation2 + $0x98] sm:$0x3] }
 0x214   : > { %4134 = vmatmul.bf16.vlgmr.msrb.gmra.mxu1 %v3906_v56  ;;  %v17011_v25 = vsel %vm13174_vm11, 4294967295, %v17010_v25  ;;  %v2873_v11 = vshll.u32 %v13161_v62, 16  ;;  %v13179_v56 = vld [vmem:[#allocation2 + $0x18] sm:$0xff]  ;;  %v3913_v52 = vrot.slane %v3911_v33, 2  ;;  %v2871_v2 = vor.u32 %v2869_v29, %v2867_v40  ;;  %v2633_v43 = vld [vmem:[#allocation2 + $0x90] sm:$0x1] }
 0x215   : > { %v2495_v4 = vor.u32 %v2494_v61, %v2491_v63  ;;  %17012 = vst [vmem:[#allocation58_spill] sm:$0xff] %v17011_v25  ;;  %v13183_v63 = vpack.c.b16 %v4613_v38, %v4612_v19  ;;  %v4669_v33 = vrot.slane %v13179_v56, 2  ;;  %vm16787_vm0 = vcmask 1044480  }
 0x216   : > { %v2875_v0 = vrot.slane %v2873_v11, 1  ;;  %vm17014_vm1 = vcmask 1045504   ;;  %vm17017_vm9 = vcmask 1046528   ;;  %v3914_v11 = vor.u32 %v3913_v52, %v3910_v47  ;;  %v13221_v47 = vld [vmem:[#allocation2 + $0x88] sm:$0xff] }
 0x217   : > { %v2496_v55 = vsel %vm11941_vm4, %v2487_v60, %v2495_v4  ;;  %v2497_v35 = vrot.slane %v2495_v4, 4  ;;  %v3173_v59 = vpop.f32.mrf.mxu2  ;;  %v5319_v60 = vpack.c.b16 %v4613_v38, %v5318_v58  ;;  %v5322_v4 = vrot.slane %v13179_v56, 3  ;;  %vm17020_vm5 = vmmov %vm17014_vm1 }
 0x218   : > { %2575 = vst [vmem:[#allocation2 + $0x94] sm:$0xf] %v2496_v55  ;;  %v13193_v55 = vpop.f32.mrf.mxu0  ;;  %v4668_v45 = vrot.slane %v13183_v63, 2  ;;  %v17016_v38 = vrot.slane %v13104_v51, 1  ;;  %v17019_v58 = vrot.slane %v13134_v17, 2  ;;  %v2724_v7 = vunpack.c.l.b16 %v2633_v43 }
 0x219   : > { %v2579_v61 = vsel %vm13174_vm11, %v2497_v35, %v2578_v12  ;;  %17013 = vst [vmem:[#allocation59_spill] sm:$0xff] %v13193_v55  ;;  %v4290_v12 = vrot.slane %v13195_v26, 2  ;;  %v5321_v35 = vrot.slane %v5319_v60, 3  ;;  %vm17018_vm11 = vsmask.f32 7424 }
 0x21a   : > { %2580 = vst [vmem:[#allocation2 + $0x98] sm:$0x3] %v2579_v61  ;;  %v3003_v46 = vpop.f32.mrf.mxu1  ;;  %v13201_v40 = vsel %vm17014_vm1, %v4668_v45, %v4669_v33  ;;  %vm17021_vm1 = vsmask.f32 6400  ;;  %v4294_v3 = vrot.slane %v13282_v39, 2 }
 0x21b   : > { %v13191_v19 = vadd.f32 %v13125_v10, %v3003_v46  ;;  %17015 = vst [vmem:[#allocation60_spill] sm:$0xff] %v13201_v40  ;;  %v3652_v46 = vsel %vm17017_vm9, %v17016_v38, %v3651_v49  ;;  %v2876_v10 = vsel %vm17018_vm11, %v2871_v2, %v2875_v0  ;;  %v13208_v29 = vsel %vm16787_vm0, %v5321_v35, %v5322_v4  ;;  %v13224_v38 = vld [vmem:[#allocation2 + $0x68] sm:$0xff]  ;;  %v11283_v40 = vld [vmem:[#allocation2] sm:$0xf0] }
 0x21c   : > { %v4291_v61 = vsel %vm17020_vm5, %v17019_v58, %v4290_v12  ;;  %v3915_v60 = vsel %vm17021_vm1, %v13151_v30, %v3914_v11  ;;  %v3917_v35 = vshrl.u32 %v13134_v17, 16  ;;  %v5324_v30 = vrot.slane %v13215_v18, 3  ;;  %vm17025_vm1 = vmmov %vm17020_vm5 }
 0x21d   : > { %v4671_v58 = vrot.slane %v13215_v18, 2  ;;  %v3653_v5 = vrot.slane %v13224_v38, 1 }
 0x21f   : > { %3791 = vmatmul.bf16.gmra.mxu0 %v3652_v46  ;;  %3042 = vmatmul.bf16.gmra.mxu3 %v2876_v10  ;;  %v3175_v25 = vpop.f32.mrf.mxu2  ;;  %v2881_v46 = vshll.u32 %v13221_v47, 16  ;;  %v3920_v10 = vshll.u32 %v13134_v17, 16 }
 0x220   : > { %v13219_v52 = vpop.f32.mrf.mxu0 }
 0x221   : > { %17022 = vst [vmem:[#allocation61_spill] sm:$0xff] %v13219_v52  ;;  %v2883_v28 = vrot.slane %v2881_v46, 1  ;;  %v3922_v50 = vrot.slane %v3920_v10, 2  ;;  %v13252_v10 = vpack.c.b16 %v2724_v7, %v2724_v7  ;;  %v2885_v7 = vshrl.u32 %v13221_v47, 16 }
 0x222   : > { %4409 = vmatmul.bf16.gmra.mxu2 %v4291_v61  ;;  %v3005_v45 = vpop.f32.mrf.mxu1  ;;  %v2877_v61 = vshrl.u32 %v13161_v62, 16 }
 0x223   : > { %v13217_v2 = vadd.f32 %v3170_v15, %v3005_v45  ;;  %v13232_v15 = vsel %vm16787_vm0, %v5322_v4, %v5324_v30  ;;  %v3919_v45 = vrot.slane %v3917_v35, 1  ;;  %v4292_v4 = vrot.slane %v13242_v27, 2  ;;  %17027 = vst [vmem:[#allocation64_spill] sm:$0xff] %v13252_v10 }
 0x224   : > { %4139 = vmatmul.bf16.gmra.mxu1 %v3915_v60  ;;  %v13235_v60 = vsel %vm17020_vm5, %v4669_v33, %v4671_v58  ;;  %v2879_v55 = vor.u32 %v2877_v61, %v2875_v0  ;;  %v3654_v33 = vsel %vm17017_vm9, %v3651_v49, %v3653_v5  ;;  %vm17026_vm5 = vsmask.f32 6400  ;;  %v13254_v49 = vld [vmem:[#allocation2 + $0x28] sm:$0xff]  ;;  %vm17030_vm9 = vmmov %vm17025_vm1 }
 0x225   : > { %17023 = vst [vmem:[#allocation62_spill] sm:$0xff] %v13235_v60  ;;  %v3923_v22 = vor.u32 %v3922_v50, %v3919_v45  ;;  %v4293_v0 = vsel %vm17025_vm1, %v4290_v12, %v4292_v4  ;;  %v3926_v61 = vshrl.u32 %v13195_v26, 16  ;;  %v3929_v45 = vshll.u32 %v13195_v26, 16 }
 0x226   : > { %v2884_v35 = vsel %vm17018_vm11, %v2879_v55, %v2883_v28  ;;  %v11000_v55 = vld [vmem:[%s16627_s3 + $0xb0] sm:$0xff]  ;;  %vm17034_vm11 = vcmask 1046528   ;;  %vm17035_vm1 = vsmask.f32 7424 }
 0x227   : > { %v3178_v21 = vpop.f32.mrf.mxu2 }
 0x228   : > { %v13240_v34 = vpop.f32.mrf.mxu0 }
 0x229   : > { %17024 = vst [vmem:[#allocation63_spill] sm:$0xff] %v13240_v34  ;;  %v3931_v34 = vrot.slane %v3929_v45, 2 }
 0x22a   : > { %v3008_v52 = vpop.f32.mrf.mxu1 }
 0x22b   : > { %v13238_v17 = vadd.f32 %v3173_v59, %v3008_v52  ;;  %v11001_v59 = vld [vmem:[%s16627_s3 + $0xb8] sm:$0xff]  ;;  %v3924_v52 = vsel %vm17026_vm5, %v3914_v11, %v3923_v22  ;;  %v13265_v11 = vld [vmem:[#allocation2 + $0x70] sm:$0xff]  ;;  %vm17036_vm5 = vmmov %vm17030_vm9 }
 0x22c   : > { %3348 = vmatpush.bf16.msrb.mxu3 %v11001_v59  ;;  %v3655_v26 = vrot.slane %v13265_v11, 1 }
 0x22f   : > { %3796 = vmatmul.bf16.gmra.mxu0 %v3654_v33  ;;  %3047 = vmatmul.bf16.gmra.mxu3 %v2884_v35  ;;  %v3180_v12 = vpop.f32.mrf.mxu2  ;;  %v2889_v33 = vshll.u32 %v13252_v10, 16  ;;  %v4673_v35 = vrot.slane %v13254_v49, 2 }
 0x230   : > { %v13258_v43 = vpop.f32.mrf.mxu0  ;;  %3349 = vmatpush.bf16.msrb.mxu3 %v11000_v55  ;;  %v2887_v55 = vor.u32 %v2885_v7, %v2883_v28  ;;  %v4295_v28 = vsel %vm17036_vm5, %v4292_v4, %v4294_v3  ;;  %v10998_v4 = vld [vmem:[%s16627_s3 + $0xa0] sm:$0xff] }
 0x231   : > { %17029 = vst [vmem:[#allocation66_spill] sm:$0xff] %v13258_v43  ;;  %v13275_v59 = vsel %vm17030_vm9, %v4671_v58, %v4673_v35  ;;  %v2891_v43 = vrot.slane %v2889_v33, 1  ;;  %vm17037_vm9 = vsmask.f32 6400  ;;  %v13292_v33 = vld [vmem:[#allocation2 + $0x30] sm:$0xff] }
 0x232   : > { %4414 = vmatmul.bf16.gmra.mxu2 %v4293_v0  ;;  %v3010_v46 = vpop.f32.mrf.mxu1  ;;  %17031 = vst [vmem:[#allocation67_spill] sm:$0xff] %v13275_v59 }
 0x233   : > { %v13256_v50 = vadd.f32 %v3175_v25, %v3010_v46  ;;  %v5326_v25 = vrot.slane %v13254_v49, 3  ;;  %v2892_v58 = vsel %vm17035_vm1, %v2887_v55, %v2891_v43  ;;  %v13301_v43 = vld [vmem:[#allocation2 + $0x78] sm:$0xff]  ;;  %v4675_v55 = vrot.slane %v13292_v33, 2 }
 0x234   : > { %4144 = vmatmul.bf16.gmra.mxu1 %v3924_v52  ;;  %v3928_v52 = vrot.slane %v3926_v61, 1  ;;  %vm17044_vm1 = vcmask 1046528  }
 0x235   : > { %17028 = vst [vmem:[#allocation65_spill] sm:$0xff] %v13256_v50  ;;  %v13272_v0 = vsel %vm16787_vm0, %v5324_v30, %v5326_v25  ;;  %v3656_v30 = vsel %vm17034_vm11, %v3653_v5, %v3655_v26  ;;  %vm17040_vm11 = vmmov %vm17036_vm5 }
 0x236   : > { %v3932_v14 = vor.u32 %v3931_v34, %v3928_v52  ;;  %v3935_v52 = vshrl.u32 %v13242_v27, 16 }
 0x237   : > { %v3183_v61 = vpop.f32.mrf.mxu2 }
 0x238   : > { %v13280_v44 = vpop.f32.mrf.mxu0  ;;  %v3933_v45 = vsel %vm17037_vm9, %v3923_v22, %v3932_v14  ;;  %v5328_v22 = vrot.slane %v13292_v33, 3 }
 0x239   : > { %17033 = vst [vmem:[#allocation69_spill] sm:$0xff] %v13280_v44 }
 0x23a   : > { %v3013_v46 = vpop.f32.mrf.mxu1 }
 0x23b   : > { %v13278_v54 = vadd.f32 %v3178_v21, %v3013_v46  ;;  %v10999_v21 = vld [vmem:[%s16627_s3 + $0xa8] sm:$0xff]  ;;  %v3938_v46 = vshll.u32 %v13242_v27, 16  ;;  %v13318_v27 = vld [vmem:[#allocation2 + $0x40] sm:$0xff] }
 0x23c   : > { %3350 = vmatpush.bf16.msrb.mxu3 %v10999_v21  ;;  %v3657_v21 = vrot.slane %v13301_v43, 1  ;;  %v4296_v44 = vrot.slane %v13318_v27, 2 }
 0x23d   : > { %17032 = vst [vmem:[#allocation68_spill] sm:$0xff] %v13278_v54  ;;  %v13451_v54 = vld [vmem:[#allocation2 + $0x50] sm:$0xff] }
 0x23f   : > { %3801 = vmatmul.bf16.gmra.mxu0 %v3656_v30  ;;  %3052 = vmatmul.bf16.gmra.mxu3 %v2892_v58  ;;  %v13311_v30 = vsel %vm17040_vm11, %v4673_v35, %v4675_v55  ;;  %v3185_v58 = vpop.f32.mrf.mxu2  ;;  %v4297_v35 = vsel %vm17036_vm5, %v4294_v3, %v4296_v44  ;;  %vm17047_vm11 = vmmov %vm17036_vm5 }
 0x240   : > { %v13296_v34 = vpop.f32.mrf.mxu0  ;;  %3351 = vmatpush.bf16.msrb.mxu3 %v10998_v4  ;;  %17041 = vst [vmem:[#allocation72_spill] sm:$0xff] %v13311_v30 }
 0x241   : > { %17039 = vst [vmem:[#allocation71_spill] sm:$0xff] %v13296_v34 }
 0x242   : > { %4419 = vmatmul.bf16.gmra.mxu2 %v4295_v28  ;;  %v3015_v7 = vpop.f32.mrf.mxu1 }
 0x243   : > { %v13294_v5 = vadd.f32 %v3180_v12, %v3015_v7  ;;  %v13308_v12 = vsel %vm16787_vm0, %v5326_v25, %v5328_v22  ;;  %v3940_v7 = vrot.slane %v3938_v46, 2  ;;  %v3658_v25 = vsel %vm17044_vm1, %v3655_v26, %v3657_v21 }
 0x244   : > { %4149 = vmatmul.bf16.gmra.mxu1 %v3933_v45  ;;  %v3937_v45 = vrot.slane %v3935_v52, 1  ;;  %v10997_v52 = vld [vmem:[%s16627_s3 + $0x98] sm:$0xff] }
 0x245   : > { %17038 = vst [vmem:[#allocation70_spill] sm:$0xff] %v13294_v5  ;;  %3352 = vmatpush.bf16.msrb.mxu3 %v10997_v52  ;;  %v11284_v5 = vld [vmem:[#allocation2] sm:$0xe] }
 0x246   : > { %v3941_v31 = vor.u32 %v3940_v7, %v3937_v45  ;;  %v13337_v45 = vld [vmem:[#allocation2 + $0x80] sm:$0xff]  ;;  %v3944_v7 = vshrl.u32 %v13282_v39, 16 }
 0x248   : > { %v13316_v34 = vpop.f32.mrf.mxu0 }
 0x249   : > { %17043 = vst [vmem:[#allocation74_spill] sm:$0xff] %v13316_v34  ;;  %v3188_v34 = vpop.f32.mrf.mxu2 }
 0x24a   : > { %v3018_v28 = vpop.f32.mrf.mxu1 }
 0x24b   : > { %v13314_v4 = vadd.f32 %v3183_v61, %v3018_v28  ;;  %v3942_v61 = vsel %vm17037_vm9, %v3932_v14, %v3941_v31  ;;  %v13328_v28 = vld [vmem:[#allocation2 + $0x38] sm:$0xff]  ;;  %v3947_v14 = vshll.u32 %v13282_v39, 16  ;;  %v4298_v39 = vrot.slane %v13352_v48, 2 }
 0x24d   : > { %17042 = vst [vmem:[#allocation73_spill] sm:$0xff] %v13314_v4 }
 0x24f   : > { %3806 = vmatmul.bf16.gmra.mxu0 %v3658_v25  ;;  %3202 = vmatmul.bf16.vlgmr.msra.gmra.mxu3 %v13041_v20  ;;  %v10996_v20 = vld [vmem:[%s16627_s3 + $0x90] sm:$0xff]  ;;  %v5330_v25 = vrot.slane %v13328_v28, 3 }
 0x250   : > { %v13335_v3 = vpop.f32.mrf.mxu0  ;;  %3353 = vmatpush.bf16.msrb.mxu3 %v10996_v20  ;;  %v3946_v20 = vrot.slane %v3944_v7, 1  ;;  %v10995_v7 = vld [vmem:[%s16627_s3 + $0x88] sm:$0xff] }
 0x251   : > { %17046 = vst [vmem:[#allocation76_spill] sm:$0xff] %v13335_v3  ;;  %v3949_v3 = vrot.slane %v3947_v14, 2  ;;  %v3190_v30 = vpop.f32.mrf.mxu2 }
 0x252   : > { %4424 = vmatmul.bf16.gmra.mxu2 %v4297_v35  ;;  %v3020_v46 = vpop.f32.mrf.mxu1  ;;  %v4677_v35 = vrot.slane %v13328_v28, 2 }
 0x253   : > { %v13330_v26 = vadd.f32 %v3185_v58, %v3020_v46  ;;  %v13344_v58 = vsel %vm16787_vm0, %v5328_v22, %v5330_v25  ;;  %v3659_v46 = vrot.slane %v13337_v45, 1  ;;  %v3950_v60 = vor.u32 %v3949_v3, %v3946_v20  ;;  %v13367_v3 = vld [vmem:[#allocation2 + $0x40] sm:$0xff] }
 0x254   : > { %4154 = vmatmul.bf16.gmra.mxu1 %v3942_v61  ;;  %v13347_v52 = vsel %vm17047_vm11, %v4675_v55, %v4677_v35  ;;  %v4299_v55 = vsel %vm17036_vm5, %v4296_v44, %v4298_v39  ;;  %3354 = vmatpush.bf16.msrb.mxu3 %v10995_v7  ;;  %v11074_v44 = vld [vmem:[%s16627_s3 + $0x1f0] sm:$0xff]  ;;  %v3956_v20 = vshll.u32 %v13318_v27, 16  ;;  %vm17053_vm11 = vmmov %vm17036_vm5 }
 0x255   : > { %17045 = vst [vmem:[#allocation75_spill] sm:$0xff] %v13330_v26  ;;  %v3660_v59 = vsel %vm17044_vm1, %v3657_v21, %v3659_v46  ;;  %v3951_v14 = vsel %vm17037_vm9, %v3941_v31, %v3950_v60  ;;  %v5332_v31 = vrot.slane %v13367_v3, 3 }
 0x256   : > { %17048 = vst [vmem:[#allocation77_spill] sm:$0xff] %v13347_v52 }
 0x258   : > { %v13356_v22 = vpop.f32.mrf.mxu0 }
 0x259   : > { %17050 = vst [vmem:[#allocation79_spill] sm:$0xff] %v13356_v22  ;;  %v3193_v22 = vpop.f32.mrf.mxu2 }
 0x25a   : > { %v3023_v61 = vpop.f32.mrf.mxu1 }
 0x25b   : > { %v13350_v23 = vadd.f32 %v3188_v34, %v3023_v61  ;;  %v11075_v34 = vld [vmem:[%s16627_s3 + $0x1f8] sm:$0xff]  ;;  %v3953_v61 = vshrl.u32 %v13318_v27, 16  ;;  %v10994_v27 = vld [vmem:[%s16627_s3 + $0x80] sm:$0xff] }
 0x25c   : > { %5164 = vmatpush.bf16.msra.mxu0 %v11075_v34  ;;  %v13383_v34 = vsel %vm16787_vm0, %v5330_v25, %v5332_v31  ;;  %v4300_v25 = vrot.slane %v13034_v57, 2  ;;  %3355 = vmatpush.bf16.msrb.mxu3 %v10994_v27 }
 0x25d   : > { %17049 = vst [vmem:[#allocation78_spill] sm:$0xff] %v13350_v23 }
 0x25e   : > { %v4301_v26 = vsel %vm17036_vm5, %v4298_v39, %v4300_v25  ;;  %v13420_v39 = vld [vmem:[#allocation2 + $0x90] sm:$0xff] }
 0x25f   : > { %3811 = vmatmul.bf16.gmra.mxu0 %v3660_v59  ;;  %3207 = vmatmul.bf16.gmra.mxu3 %v13110_v24  ;;  %v13374_v24 = vld [vmem:[#allocation2 + $0x88] sm:$0xff] }
 0x260   : > { %5165 = vmatpush.bf16.msra.mxu0 %v11074_v44  ;;  %v3661_v52 = vrot.slane %v13374_v24, 1  ;;  %v3955_v44 = vrot.slane %v3953_v61, 1 }
 0x261   : > { %v3195_v61 = vpop.f32.mrf.mxu2 }
 0x262   : > { %4429 = vmatmul.bf16.gmra.mxu2 %v4299_v55  ;;  %v3025_v21 = vpop.f32.mrf.mxu1  ;;  %v4679_v55 = vrot.slane %v13367_v3, 2 }
 0x263   : > { %v13369_v59 = vadd.f32 %v3190_v30, %v3025_v21  ;;  %v13380_v30 = vpop.f32.mrf.mxu0 }
 0x264   : > { %4159 = vmatmul.bf16.gmra.mxu1 %v3951_v14  ;;  %17052 = vst [vmem:[#allocation81_spill] sm:$0xff] %v13380_v30  ;;  %v13386_v7 = vsel %vm17053_vm11, %v4677_v35, %v4679_v55  ;;  %v11073_v14 = vld [vmem:[%s16627_s3 + $0x1e8] sm:$0xff]  ;;  %v11072_v35 = vld [vmem:[%s16627_s3 + $0x1e0] sm:$0xff]  ;;  %vm17058_vm11 = vmmov %vm17036_vm5 }
 0x265   : > { %17051 = vst [vmem:[#allocation80_spill] sm:$0xff] %v13369_v59  ;;  %v3958_v59 = vrot.slane %v3956_v20, 2  ;;  %5166 = vmatpush.bf16.msra.mxu0 %v11073_v14 }
 0x266   : > { %17054 = vst [vmem:[#allocation82_spill] sm:$0xff] %v13386_v7  ;;  %v3662_v7 = vsel %vm17044_vm1, %v3659_v46, %v3661_v52 }
 0x267   : > { %v3959_v23 = vor.u32 %v3958_v59, %v3955_v44  ;;  %v3965_v59 = vshll.u32 %v13352_v48, 16 }
 0x269   : > { %5167 = vmatpush.bf16.msra.mxu0 %v11072_v35  ;;  %v3960_v20 = vsel %vm17037_vm9, %v3950_v60, %v3959_v23  ;;  %v3962_v60 = vshrl.u32 %v13352_v48, 16  ;;  %v11069_v35 = vld [vmem:[%s16627_s3 + $0x1c8] sm:$0xff]  ;;  %v4302_v48 = vrot.slane %v13104_v51, 2 }
 0x26a   : > { %v3028_v21 = vpop.f32.mrf.mxu1 }
 0x26b   : > { %v13395_v30 = vadd.f32 %v3193_v22, %v3028_v21  ;;  %v11071_v22 = vld [vmem:[%s16627_s3 + $0x1d8] sm:$0xff]  ;;  %v13408_v14 = vpop.f32.mrf.mxu0  ;;  %v13410_v21 = vld [vmem:[#allocation2 + $0x48] sm:$0xff] }
 0x26c   : > { %17056 = vst [vmem:[#allocation84_spill] sm:$0xff] %v13408_v14  ;;  %v4681_v44 = vrot.slane %v13410_v21, 2 }
 0x26d   : > { %17055 = vst [vmem:[#allocation83_spill] sm:$0xff] %v13395_v30  ;;  %5168 = vmatpush.bf16.msra.mxu0 %v11071_v22  ;;  %v3519_v30 = vld [vmem:[#allocation2 + $0x98] sm:$0x1] }
 0x26f   : > { %3816 = vmatmul.bf16.gmra.mxu0 %v3662_v7  ;;  %3212 = vmatmul.bf16.gmra.mxu3 %v13161_v62  ;;  %v11067_v62 = vld [vmem:[%s16627_s3 + $0x1b8] sm:$0xff]  ;;  %v5334_v7 = vrot.slane %v13410_v21, 3 }
 0x270   : > { %4771 = vmatpush.bf16.msra.mxu3 %v11067_v62  ;;  %v3967_v62 = vrot.slane %v3965_v59, 2 }
 0x271   : > { %v13430_v22 = vsel %vm16787_vm0, %v5332_v31, %v5334_v7  ;;  %v11083_v31 = vld [vmem:[%s16627_s3 + $0x238] sm:$0xff] }
 0x272   : > { %4434 = vmatmul.bf16.gmra.mxu2 %v4301_v26  ;;  %v3030_v27 = vpop.f32.mrf.mxu1  ;;  %v11070_v26 = vld [vmem:[%s16627_s3 + $0x1d0] sm:$0xff]  ;;  %5424 = vmatpush.bf16.msra.mxu1 %v11083_v31 }
 0x273   : > { %v13412_v46 = vadd.f32 %v3195_v61, %v3030_v27  ;;  %5169 = vmatpush.bf16.msra.mxu0 %v11070_v26  ;;  %v13433_v61 = vsel %vm17058_vm11, %v4679_v55, %v4681_v44  ;;  %v3964_v27 = vrot.slane %v3962_v60, 1  ;;  %v11068_v26 = vld [vmem:[%s16627_s3 + $0x1c0] sm:$0xff]  ;;  %v4303_v60 = vsel %vm17036_vm5, %v4300_v25, %v4302_v48  ;;  %vm17064_vm11 = vmmov %vm17036_vm5 }
 0x274   : > { %4164 = vmatmul.bf16.gmra.mxu1 %v3960_v20  ;;  %17059 = vst [vmem:[#allocation86_spill] sm:$0xff] %v13433_v61  ;;  %v3663_v20 = vrot.slane %v13420_v39, 1  ;;  %v3974_v25 = vshll.u32 %v13034_v57, 16  ;;  %vm17068_vm5 = vmmov %vm17044_vm1 }
 0x275   : > { %17057 = vst [vmem:[#allocation85_spill] sm:$0xff] %v13412_v46  ;;  %v3198_v46 = vpop.f32.mrf.mxu2  ;;  %v3968_v61 = vor.u32 %v3967_v62, %v3964_v27  ;;  %v11285_v62 = vor.u32 %v11284_v5, %v11283_v40 }
 0x276   : > { %v3664_v55 = vsel %vm17044_vm1, %v3661_v52, %v3663_v20 }
 0x277   : > { %5170 = vmatpush.bf16.msra.mxu0 %v11069_v35  ;;  %v3969_v4 = vsel %vm17037_vm9, %v3959_v23, %v3968_v61  ;;  %vm17069_vm9 = vmmov %vm17064_vm11 }
 0x27b   : > { %5171 = vmatpush.bf16.msra.mxu0 %v11068_v26  ;;  %v5336_v26 = vrot.slane %v13451_v54, 3 }
 0x27c   : > { %v13437_v14 = vpop.f32.mrf.mxu0 }
 0x27d   : > { %17060 = vst [vmem:[#allocation87_spill] sm:$0xff] %v13437_v14  ;;  %v3610_v14 = vunpack.c.l.b16 %v3519_v30  ;;  %v3200_v30 = vpop.f32.mrf.mxu2  ;;  %v13460_v23 = vsel %vm16787_vm0, %v5334_v7, %v5336_v26 }
 0x27e   : > { %17063 = vst [vmem:[#allocation90_spill] sm:$0xff] %v13460_v23 }
 0x27f   : > { %3821 = vmatmul.bf16.gmra.mxu0 %v3664_v55  ;;  %3217 = vmatmul.bf16.gmra.mxu3 %v13221_v47  ;;  %v3629_v27 = vpack.c.b16 %v3610_v14, %v3610_v14  ;;  %v3971_v47 = vshrl.u32 %v13034_v57, 16  ;;  %v11399_v14 = vld [vmem:[#allocation2 + $0x8] sm:$0xff]  ;;  %v3976_v57 = vrot.slane %v3974_v25, 2 }
 0x280   : > { %v3246_v40 = vrot.slane %v11399_v14, 1  ;;  %v11066_v14 = vld [vmem:[%s16627_s3 + $0x1b0] sm:$0xff] }
 0x281   : > { %v3033_v59 = vpop.f32.mrf.mxu1  ;;  %v3665_v5 = vrot.slane %v3629_v27, 1  ;;  %v4937_v27 = vshrl.u32 %v13179_v56, 16  ;;  %4772 = vmatpush.bf16.msra.mxu3 %v11066_v14  ;;  %v11400_v14 = vld [vmem:[#allocation2 + $0x10] sm:$0xff] }
 0x282   : > { %4439 = vmatmul.bf16.gmra.mxu2 %v4303_v60  ;;  %v13448_v35 = vadd.f32 %v3198_v46, %v3033_v59  ;;  %v4683_v46 = vrot.slane %v13451_v54, 2  ;;  %v3245_v60 = vrot.slane %v11285_v62, 1  ;;  %v3973_v59 = vrot.slane %v3971_v47, 1 }
 0x283   : > { %v3666_v50 = vsel %vm17044_vm1, %v3663_v20, %v3665_v5  ;;  %v4940_v62 = vshll.u32 %v13179_v56, 16  ;;  %v13482_v20 = vld [vmem:[#allocation2 + $0x58] sm:$0xff]  ;;  %v4939_v5 = vrot.slane %v4937_v27, 2  ;;  %v3980_v56 = vshrl.u32 %v13104_v51, 16  ;;  %vm17076_vm1 = vmmov %vm17069_vm9 }
 0x284   : > { %17061 = vst [vmem:[#allocation88_spill] sm:$0xff] %v13448_v35  ;;  %4169 = vmatmul.bf16.gmra.mxu1 %v3969_v4  ;;  %v13453_v52 = vpop.f32.mrf.mxu0  ;;  %v13463_v55 = vsel %vm17064_vm11, %v4681_v44, %v4683_v46  ;;  %v3247_v7 = vsel %vm17068_vm5, %v3245_v60, %v3246_v40  ;;  %v3977_v23 = vor.u32 %v3976_v57, %v3973_v59  ;;  %vm17072_vm11 = vsmask.f32 6400 }
 0x285   : > { %17062 = vst [vmem:[#allocation89_spill] sm:$0xff] %v13453_v52  ;;  %v4304_v52 = vrot.slane %v13168_v13, 2  ;;  %v13477_v47 = vpop.f32.mrf.mxu2  ;;  %v4942_v60 = vrot.slane %v4940_v62, 3  ;;  %v3983_v59 = vshll.u32 %v13104_v51, 16  ;;  %v4685_v57 = vrot.slane %v13482_v20, 2 }
 0x286   : > { %17065 = vst [vmem:[#allocation91_spill] sm:$0xff] %v13463_v55  ;;  %v3978_v25 = vsel %vm17072_vm11, %v3968_v61, %v3977_v23  ;;  %v5338_v61 = vrot.slane %v13482_v20, 3  ;;  %vm16785_vm5 = vsmask.f32 5376  ;;  %vm17080_vm11 = vmmov %vm17076_vm1 }
 0x287   : > { %v4305_v44 = vsel %vm17069_vm9, %v4302_v48, %v4304_v52  ;;  %17071 = vst [vmem:[#allocation95_spill] sm:$0xff] %v13477_v47  ;;  %v4932_v48 = vshll.u32 %v13183_v63, 16  ;;  %v13501_v27 = vsel %vm17076_vm1, %v4683_v46, %v4685_v57  ;;  %v4943_v51 = vor.u32 %v4942_v60, %v4939_v5  ;;  %v11082_v60 = vld [vmem:[%s16627_s3 + $0x230] sm:$0xff] }
 0x288   : > { %17077 = vst [vmem:[#allocation99_spill] sm:$0xff] %v13501_v27  ;;  %v3248_v47 = vrot.slane %v11400_v14, 1  ;;  %v3985_v55 = vrot.slane %v3983_v59, 2  ;;  %vm17079_vm9 = vcmask 1046528   ;;  %v4946_v59 = vshrl.u32 %v13215_v18, 16  ;;  %5425 = vmatpush.bf16.msra.mxu1 %v11082_v60 }
 0x289   : > { %v3035_v31 = vpop.f32.mrf.mxu1  ;;  %vm17083_vm1 = vsmask.f32 6400 }
 0x28a   : > { %v13465_v4 = vadd.f32 %v3200_v30, %v3035_v31 }
 0x28c   : > { %17066 = vst [vmem:[#allocation92_spill] sm:$0xff] %v13465_v4  ;;  %v13468_v35 = vpop.f32.mrf.mxu0 }
 0x28d   : > { %17067 = vst [vmem:[#allocation93_spill] sm:$0xff] %v13468_v35  ;;  %v13498_v35 = vsel %vm16787_vm0, %v5336_v26, %v5338_v61  ;;  %v13506_v4 = vpop.f32.mrf.mxu2  ;;  %v3249_v26 = vsel %vm17079_vm9, %v3246_v40, %v3248_v47  ;;  %vm17087_vm9 = vmmov %vm17080_vm11 }
 0x28e   : > { %17075 = vst [vmem:[#allocation98_spill] sm:$0xff] %v13498_v35 }
 0x28f   : > { %3826 = vmatmul.bf16.gmra.mxu0 %v3666_v50  ;;  %3356 = vmatmul.bf16.vlgmr.msrb.gmra.mxu3 %v3247_v7  ;;  %v4929_v50 = vshrl.u32 %v13183_v63, 16  ;;  %17078 = vst [vmem:[#allocation100_spill] sm:$0xff] %v13506_v4  ;;  %v4308_v4 = vrot.slane %v13265_v11, 2 }
 0x291   : > { %v13473_v30 = vpop.f32.mrf.mxu1  ;;  %v4931_v63 = vrot.slane %v4929_v50, 2 }
 0x292   : > { %17070 = vst [vmem:[#allocation94_spill] sm:$0xff] %v13473_v30  ;;  %4444 = vmatmul.bf16.gmra.mxu2 %v4305_v44  ;;  %v13480_v31 = vpop.f32.mrf.mxu3  ;;  %v3982_v30 = vrot.slane %v3980_v56, 1 }
 0x294   : > { %4174 = vmatmul.bf16.gmra.mxu1 %v3978_v25  ;;  %v13493_v7 = vpop.f32.mrf.mxu0  ;;  %v4934_v25 = vrot.slane %v4932_v48, 3 }
 0x295   : > { %17073 = vst [vmem:[#allocation96_spill] sm:$0xff] %v13493_v7  ;;  %v4306_v7 = vrot.slane %v13224_v38, 2  ;;  %v13525_v14 = vpop.f32.mrf.mxu2 }
 0x296   : > { %v4935_v50 = vor.u32 %v4934_v25, %v4931_v63  ;;  %v4949_v63 = vshll.u32 %v13215_v18, 16  ;;  %17084 = vst [vmem:[#allocation103_spill] sm:$0xff] %v13525_v14 }
 0x297   : > { %v4307_v46 = vsel %vm17080_vm11, %v4304_v52, %v4306_v7  ;;  %v4948_v52 = vrot.slane %v4946_v59, 2  ;;  %vm17090_vm11 = vcmask 1046528  }
 0x298   : > { %v4944_v48 = vsel %vm16785_vm5, %v4935_v50, %v4943_v51  ;;  %v4951_v25 = vrot.slane %v4949_v63, 3  ;;  %v3989_v50 = vshrl.u32 %v13168_v13, 16 }
 0x299   : > { %v13495_v44 = vpop.f32.mrf.mxu1 }
 0x29a   : > { %17074 = vst [vmem:[#allocation97_spill] sm:$0xff] %v13495_v44  ;;  %v13503_v62 = vpop.f32.mrf.mxu3  ;;  %v3986_v44 = vor.u32 %v3985_v55, %v3982_v30  ;;  %v13523_v30 = vld [vmem:[#allocation2 + $0x60] sm:$0xff]  ;;  %v4952_v63 = vor.u32 %v4951_v25, %v4948_v52  ;;  %v3991_v14 = vrot.slane %v3989_v50, 1 }
 0x29b   : > { %v4687_v18 = vrot.slane %v13523_v30, 2 }
 0x29c   : > { %v13516_v56 = vpop.f32.mrf.mxu0  ;;  %v3987_v40 = vsel %vm17083_vm1, %v3977_v23, %v3986_v44  ;;  %v4953_v27 = vsel %vm16785_vm5, %v4943_v51, %v4952_v63  ;;  %vm17091_vm1 = vmmov %vm17087_vm9  ;;  %v4958_v51 = vshll.u32 %v13254_v49, 16 }
 0x29d   : > { %17082 = vst [vmem:[#allocation102_spill] sm:$0xff] %v13516_v56  ;;  %v13537_v60 = vsel %vm17087_vm9, %v4685_v57, %v4687_v18  ;;  %v4309_v57 = vsel %vm17091_vm1, %v4306_v7, %v4308_v4  ;;  %vm17094_vm9 = vsmask.f32 6400 }
 0x29e   : > { %17088 = vst [vmem:[#allocation106_spill] sm:$0xff] %v13537_v60  ;;  %v13547_v60 = vpop.f32.mrf.mxu2  ;;  %v4960_v7 = vrot.slane %v4958_v51, 3 }
 0x29f   : > { %5172 = vmatmul.bf16.vlgmr.msra.gmra.mxu0 %v4944_v48  ;;  %3361 = vmatmul.bf16.gmra.mxu3 %v3249_v26  ;;  %v3992_v48 = vshll.u32 %v13168_v13, 16  ;;  %v5340_v26 = vrot.slane %v13523_v30, 3  ;;  %17092 = vst [vmem:[#allocation108_spill] sm:$0xff] %v13547_v60 }
 0x2a1   : > { %v13511_v5 = vpop.f32.mrf.mxu1  ;;  %v13534_v23 = vsel %vm16787_vm0, %v5338_v61, %v5340_v26 }
 0x2a2   : > { %17081 = vst [vmem:[#allocation101_spill] sm:$0xff] %v13511_v5  ;;  %4449 = vmatmul.bf16.gmra.mxu2 %v4307_v46  ;;  %v13521_v55 = vpop.f32.mrf.mxu3  ;;  %v3994_v5 = vrot.slane %v3992_v48, 2  ;;  %v4955_v48 = vshrl.u32 %v13254_v49, 16  ;;  %v11065_v49 = vld [vmem:[%s16627_s3 + $0x1a8] sm:$0xff] }
 0x2a3   : > { %17086 = vst [vmem:[#allocation105_spill] sm:$0xff] %v13534_v23  ;;  %4773 = vmatpush.bf16.msra.mxu3 %v11065_v49 }
 0x2a4   : > { %4179 = vmatmul.bf16.gmra.mxu1 %v3987_v40  ;;  %v11401_v40 = vld [vmem:[#allocation2 + $0x18] sm:$0xff]  ;;  %v13541_v13 = vpop.f32.mrf.mxu0  ;;  %v3995_v61 = vor.u32 %v3994_v5, %v3991_v14  ;;  %v4957_v5 = vrot.slane %v4955_v48, 2  ;;  %v3998_v14 = vshrl.u32 %v13224_v38, 16 }
 0x2a5   : > { %v3250_v56 = vrot.slane %v11401_v40, 1  ;;  %17089 = vst [vmem:[#allocation107_spill] sm:$0xff] %v13541_v13  ;;  %v11402_v13 = vld [vmem:[#allocation2 + $0x20] sm:$0xff] }
 0x2a6   : > { %v3996_v25 = vsel %vm17094_vm9, %v3986_v44, %v3995_v61  ;;  %v13575_v51 = vpop.f32.mrf.mxu2  ;;  %v4000_v60 = vrot.slane %v3998_v14, 1  ;;  %v4007_v14 = vshrl.u32 %v13265_v11, 16 }
 0x2a7   : > { %17100 = vst [vmem:[#allocation114_spill] sm:$0xff] %v13575_v51 }
 0x2a9   : > { %v13531_v46 = vpop.f32.mrf.mxu1 }
 0x2aa   : > { %17085 = vst [vmem:[#allocation104_spill] sm:$0xff] %v13531_v46  ;;  %v13539_v59 = vpop.f32.mrf.mxu3  ;;  %v3251_v46 = vsel %vm17090_vm11, %v3248_v47, %v3250_v56  ;;  %v13556_v47 = vld [vmem:[#allocation2 + $0x68] sm:$0xff]  ;;  %vm17098_vm11 = vmmov %vm17091_vm1  ;;  %vm17101_vm1 = vcmask 1046528  }
 0x2ab   : > { %v5342_v40 = vrot.slane %v13556_v47, 3  ;;  %v4689_v44 = vrot.slane %v13556_v47, 2  ;;  %vm17103_vm9 = vmmov %vm17098_vm11 }
 0x2ad   : > { %v13573_v48 = vsel %vm17098_vm11, %v4687_v18, %v4689_v44  ;;  %vm17105_vm11 = vsmask.f32 6400 }
 0x2ae   : > { %17099 = vst [vmem:[#allocation113_spill] sm:$0xff] %v13573_v48 }
 0x2af   : > { %5177 = vmatmul.bf16.gmra.mxu0 %v4953_v27  ;;  %3366 = vmatmul.bf16.gmra.mxu3 %v3251_v46  ;;  %v13558_v27 = vpop.f32.mrf.mxu0  ;;  %v4001_v46 = vshll.u32 %v13224_v38, 16  ;;  %v4961_v38 = vor.u32 %v4960_v7, %v4957_v5  ;;  %v4964_v7 = vshrl.u32 %v13292_v33, 16 }
 0x2b0   : > { %17095 = vst [vmem:[#allocation110_spill] sm:$0xff] %v13558_v27 }
 0x2b1   : > { %v13549_v52 = vpop.f32.mrf.mxu1  ;;  %v4003_v23 = vrot.slane %v4001_v46, 2  ;;  %v4962_v35 = vsel %vm16785_vm5, %v4952_v63, %v4961_v38  ;;  %v4967_v63 = vshll.u32 %v13292_v33, 16 }
 0x2b2   : > { %17093 = vst [vmem:[#allocation109_spill] sm:$0xff] %v13549_v52  ;;  %4454 = vmatmul.bf16.gmra.mxu2 %v4309_v57  ;;  %v13552_v50 = vpop.f32.mrf.mxu3  ;;  %v3252_v52 = vrot.slane %v11402_v13, 1 }
 0x2b4   : > { %4184 = vmatmul.bf16.gmra.mxu1 %v3996_v25  ;;  %v13570_v25 = vsel %vm16787_vm0, %v5340_v26, %v5342_v40  ;;  %v3253_v26 = vsel %vm17101_vm1, %v3250_v56, %v3252_v52  ;;  %v13592_v56 = vpop.f32.mrf.mxu2  ;;  %vm17109_vm1 = vmmov %vm17103_vm9 }
 0x2b5   : > { %17097 = vst [vmem:[#allocation112_spill] sm:$0xff] %v13570_v25  ;;  %v4004_v25 = vor.u32 %v4003_v23, %v4000_v60  ;;  %v13597_v23 = vld [vmem:[#allocation2 + $0x70] sm:$0xff]  ;;  %v4969_v60 = vrot.slane %v4967_v63, 3 }
 0x2b6   : > { %17106 = vst [vmem:[#allocation117_spill] sm:$0xff] %v13592_v56  ;;  %v5344_v46 = vrot.slane %v13597_v23, 3  ;;  %v4691_v33 = vrot.slane %v13597_v23, 2  ;;  %v4312_v56 = vrot.slane %v13337_v45, 2 }
 0x2b7   : > { %v13582_v10 = vpop.f32.mrf.mxu0  ;;  %v4005_v13 = vsel %vm17105_vm11, %v3995_v61, %v4004_v25  ;;  %v4010_v61 = vshll.u32 %v13265_v11, 16  ;;  %vm17113_vm11 = vmmov %vm17109_vm1 }
 0x2b8   : > { %17102 = vst [vmem:[#allocation115_spill] sm:$0xff] %v13582_v10  ;;  %v11403_v10 = vld [vmem:[#allocation2 + $0x28] sm:$0xff] }
 0x2b9   : > { %v13564_v57 = vpop.f32.mrf.mxu1  ;;  %v3254_v11 = vrot.slane %v11403_v10, 1  ;;  %v4973_v10 = vshrl.u32 %v13328_v28, 16 }
 0x2ba   : > { %17096 = vst [vmem:[#allocation111_spill] sm:$0xff] %v13564_v57  ;;  %v13577_v27 = vpop.f32.mrf.mxu3  ;;  %v4310_v57 = vrot.slane %v13301_v43, 2 }
 0x2bc   : > { %v4311_v18 = vsel %vm17103_vm9, %v4308_v4, %v4310_v57  ;;  %v4966_v4 = vrot.slane %v4964_v7, 2  ;;  %v13616_v48 = vpop.f32.mrf.mxu2  ;;  %vm17112_vm9 = vcmask 1046528  }
 0x2bd   : > { %17111 = vst [vmem:[#allocation121_spill] sm:$0xff] %v13616_v48 }
 0x2be   : > { %v4970_v63 = vor.u32 %v4969_v60, %v4966_v4  ;;  %v4976_v4 = vshll.u32 %v13328_v28, 16 }
 0x2bf   : > { %5182 = vmatmul.bf16.gmra.mxu0 %v4962_v35  ;;  %3371 = vmatmul.bf16.gmra.mxu3 %v3253_v26  ;;  %v11081_v35 = vld [vmem:[%s16627_s3 + $0x228] sm:$0xff]  ;;  %v13605_v26 = vpop.f32.mrf.mxu0 }
 0x2c0   : > { %5426 = vmatpush.bf16.msra.mxu1 %v11081_v35  ;;  %17108 = vst [vmem:[#allocation119_spill] sm:$0xff] %v13605_v26  ;;  %v4009_v35 = vrot.slane %v4007_v14, 1  ;;  %v3255_v26 = vsel %vm17112_vm9, %v3252_v52, %v3254_v11 }
 0x2c1   : > { %v13585_v51 = vpop.f32.mrf.mxu1 }
 0x2c2   : > { %17104 = vst [vmem:[#allocation116_spill] sm:$0xff] %v13585_v51  ;;  %4459 = vmatmul.bf16.gmra.mxu2 %v4311_v18  ;;  %v13588_v5 = vpop.f32.mrf.mxu3  ;;  %v13608_v18 = vsel %vm16787_vm0, %v5342_v40, %v5344_v46  ;;  %v4012_v51 = vrot.slane %v4010_v61, 2 }
 0x2c4   : > { %4189 = vmatmul.bf16.gmra.mxu1 %v4005_v13  ;;  %v13611_v13 = vsel %vm17109_vm1, %v4689_v44, %v4691_v33  ;;  %v4013_v40 = vor.u32 %v4012_v51, %v4009_v35  ;;  %v4313_v44 = vsel %vm17113_vm11, %v4310_v57, %v4312_v56  ;;  %vm17115_vm1 = vsmask.f32 6400  ;;  %v13635_v35 = vpop.f32.mrf.mxu2 }
 0x2c5   : > { %17110 = vst [vmem:[#allocation120_spill] sm:$0xff] %v13611_v13  ;;  %v4975_v51 = vrot.slane %v4973_v10, 2  ;;  %v4016_v57 = vshrl.u32 %v13301_v43, 16 }
 0x2c6   : > { %v4014_v60 = vsel %vm17115_vm1, %v4004_v25, %v4013_v40  ;;  %17118 = vst [vmem:[#allocation125_spill] sm:$0xff] %v13635_v35  ;;  %vm17123_vm1 = vmmov %vm17113_vm11 }
 0x2c7   : > { %v13626_v61 = vpop.f32.mrf.mxu0 }
 0x2c8   : > { %17116 = vst [vmem:[#allocation123_spill] sm:$0xff] %v13626_v61  ;;  %v13645_v61 = vld [vmem:[#allocation2 + $0x80] sm:$0xff] }
 0x2c9   : > { %v13603_v49 = vpop.f32.mrf.mxu1 }
 0x2ca   : > { %17107 = vst [vmem:[#allocation118_spill] sm:$0xff] %v13603_v49  ;;  %v13613_v7 = vpop.f32.mrf.mxu3  ;;  %v4971_v49 = vsel %vm16785_vm5, %v4961_v38, %v4970_v63  ;;  %v4978_v38 = vrot.slane %v4976_v4, 3  ;;  %v4018_v4 = vrot.slane %v4016_v57, 1 }
 0x2cc   : > { %v13639_v25 = vor.u32 %v4978_v38, %v4975_v51  ;;  %v4314_v51 = vrot.slane %v13374_v24, 2  ;;  %v11064_v38 = vld [vmem:[%s16627_s3 + $0x1a0] sm:$0xff] }
 0x2cd   : > { %4774 = vmatpush.bf16.msra.mxu3 %v11064_v38 }
 0x2ce   : > { %v4980_v57 = vsel %vm16785_vm5, %v4970_v63, %v13639_v25  ;;  %v4315_v63 = vsel %vm17123_vm1, %v4312_v56, %v4314_v51 }
 0x2cf   : > { %5187 = vmatmul.bf16.gmra.mxu0 %v4971_v49  ;;  %3376 = vmatmul.bf16.gmra.mxu3 %v3255_v26  ;;  %v13631_v49 = vld [vmem:[#allocation2 + $0x78] sm:$0xff]  ;;  %v4019_v26 = vshll.u32 %v13301_v43, 16 }
 0x2d0   : > { %v4693_v43 = vrot.slane %v13631_v49, 2 }
 0x2d1   : > { %v13621_v13 = vpop.f32.mrf.mxu1 }
 0x2d2   : > { %17114 = vst [vmem:[#allocation122_spill] sm:$0xff] %v13621_v13  ;;  %4464 = vmatmul.bf16.gmra.mxu2 %v4313_v44  ;;  %v3203_v14 = vpop.f32.mrf.mxu3  ;;  %v13641_v44 = vld [vmem:[#allocation2 + $0x30] sm:$0xff]  ;;  %v13647_v13 = vld [vmem:[#allocation2 + $0x88] sm:$0xff] }
 0x2d3   : > { %v13629_v52 = vadd.f32 %v3203_v14, %v13480_v31  ;;  %v5346_v31 = vrot.slane %v13631_v49, 3  ;;  %v4021_v14 = vrot.slane %v4019_v26, 2 }
 0x2d4   : > { %4194 = vmatmul.bf16.gmra.mxu1 %v4014_v60  ;;  %v3256_v60 = vrot.slane %v13641_v44, 1  ;;  %v13657_v44 = vpop.f32.mrf.mxu0 }
 0x2d5   : > { %17117 = vst [vmem:[#allocation124_spill] sm:$0xff] %v13629_v52  ;;  %v4022_v48 = vor.u32 %v4021_v14, %v4018_v4  ;;  %v13670_v52 = vsel %vm17113_vm11, %v4691_v33, %v4693_v43  ;;  %vm17130_vm11 = vsmask.f32 6400 }
 0x2d6   : > { %17121 = vst [vmem:[#allocation128_spill] sm:$0xff] %v13657_v44  ;;  %v3257_v26 = vsel %vm17112_vm9, %v3254_v11, %v3256_v60  ;;  %v4695_v11 = vrot.slane %v13645_v61, 2  ;;  %vm17127_vm9 = vmmov %vm17123_vm1 }
 0x2d7   : > { %17122 = vst [vmem:[#allocation129_spill] sm:$0xff] %v13670_v52  ;;  %v4023_v56 = vsel %vm17130_vm11, %v4013_v40, %v4022_v48  ;;  %v4982_v52 = vshrl.u32 %v13367_v3, 16  ;;  %vm17139_vm11 = vcmask 1046528  }
 0x2d8   : > { %v13685_v38 = vsel %vm17127_vm9, %v4693_v43, %v4695_v11  ;;  %vm17134_vm9 = vmmov %vm17123_vm1 }
 0x2d9   : > { %v13637_v28 = vpop.f32.mrf.mxu1  ;;  %17128 = vst [vmem:[#allocation133_spill] sm:$0xff] %v13685_v38  ;;  %v4984_v40 = vrot.slane %v4982_v52, 2 }
 0x2da   : > { %17119 = vst [vmem:[#allocation126_spill] sm:$0xff] %v13637_v28  ;;  %v3205_v10 = vpop.f32.mrf.mxu3  ;;  %v13663_v28 = vsel %vm16787_vm0, %v5344_v46, %v5346_v31  ;;  %v4697_v46 = vrot.slane %v13647_v13, 2 }
 0x2db   : > { %v13651_v35 = vadd.f32 %v3205_v10, %v13503_v62  ;;  %v13665_v62 = vld [vmem:[#allocation2 + $0x90] sm:$0xff]  ;;  %v5348_v10 = vrot.slane %v13645_v61, 3 }
 0x2dc   : > { %v5352_v33 = vrot.slane %v13665_v62, 3  ;;  %v4699_v43 = vrot.slane %v13665_v62, 2 }
 0x2dd   : > { %17120 = vst [vmem:[#allocation127_spill] sm:$0xff] %v13651_v35  ;;  %v5350_v35 = vrot.slane %v13647_v13, 3  ;;  %v13678_v4 = vsel %vm16787_vm0, %v5346_v31, %v5348_v10 }
 0x2de   : > { %17125 = vst [vmem:[#allocation131_spill] sm:$0xff] %v13678_v4  ;;  %v13703_v38 = vsel %vm17134_vm9, %v4697_v46, %v4699_v43  ;;  %v13723_v4 = vld [vmem:[#allocation2 + $0x98] sm:$0xff]  ;;  %vm17143_vm9 = vsmask.f32 6400 }
 0x2df   : > { %5192 = vmatmul.bf16.gmra.mxu0 %v4980_v57  ;;  %3381 = vmatmul.bf16.gmra.mxu3 %v3257_v26  ;;  %v13681_v14 = vsel %vm16787_vm0, %v5348_v10, %v5350_v35  ;;  %v13687_v57 = vpop.f32.mrf.mxu2  ;;  %v13696_v10 = vsel %vm16787_vm0, %v5350_v35, %v5352_v33  ;;  %17135 = vst [vmem:[#allocation138_spill] sm:$0xff] %v13703_v38  ;;  %v11080_v35 = vld [vmem:[%s16627_s3 + $0x220] sm:$0xff] }
 0x2e0   : > { %17126 = vst [vmem:[#allocation132_spill] sm:$0xff] %v13681_v14  ;;  %v4025_v14 = vshrl.u32 %v13337_v45, 16  ;;  %5427 = vmatpush.bf16.msra.mxu1 %v11080_v35 }
 0x2e1   : > { %v13675_v44 = vpop.f32.mrf.mxu1  ;;  %17129 = vst [vmem:[#allocation134_spill] sm:$0xff] %v13687_v57 }
 0x2e2   : > { %17124 = vst [vmem:[#allocation130_spill] sm:$0xff] %v13675_v44  ;;  %4469 = vmatmul.bf16.gmra.mxu2 %v4315_v63  ;;  %v3208_v26 = vpop.f32.mrf.mxu3  ;;  %v4985_v63 = vshll.u32 %v13367_v3, 16  ;;  %v13699_v44 = vsel %vm17123_vm1, %v4695_v11, %v4697_v46  ;;  %v4028_v3 = vshll.u32 %v13337_v45, 16  ;;  %v4027_v46 = vrot.slane %v4025_v14, 1 }
 0x2e3   : > { %v13693_v31 = vadd.f32 %v3208_v26, %v13521_v55  ;;  %17132 = vst [vmem:[#allocation136_spill] sm:$0xff] %v13696_v10  ;;  %v4316_v45 = vrot.slane %v13420_v39, 2 }
 0x2e4   : > { %4199 = vmatmul.bf16.gmra.mxu1 %v4023_v56  ;;  %17133 = vst [vmem:[#allocation137_spill] sm:$0xff] %v13699_v44  ;;  %v4987_v57 = vrot.slane %v4985_v63, 3  ;;  %v13707_v56 = vpop.f32.mrf.mxu0  ;;  %v11405_v44 = vld [vmem:[#allocation2 + $0x38] sm:$0xff]  ;;  %v4030_v38 = vrot.slane %v4028_v3, 2 }
 0x2e5   : > { %17131 = vst [vmem:[#allocation135_spill] sm:$0xff] %v13693_v31  ;;  %v3258_v10 = vrot.slane %v11405_v44, 1  ;;  %v4317_v44 = vsel %vm17123_vm1, %v4314_v51, %v4316_v45 }
 0x2e6   : > { %17136 = vst [vmem:[#allocation139_spill] sm:$0xff] %v13707_v56  ;;  %v4988_v26 = vor.u32 %v4987_v57, %v4984_v40  ;;  %v4031_v31 = vor.u32 %v4030_v38, %v4027_v46  ;;  %v5354_v57 = vrot.slane %v13723_v4, 3  ;;  %v16776_v40 = vrot.slane %v13723_v4, 2 }
 0x2e7   : > { %v13718_v63 = vpop.f32.mrf.mxu2  ;;  %17140 = vst [vmem:[#allocation142_spill] sm:$0xff] %v13723_v4 }
 0x2e8   : > { %17138 = vst [vmem:[#allocation141_spill] sm:$0xff] %v13718_v63  ;;  %v4989_v56 = vsel %vm16785_vm5, %v13639_v25, %v4988_v26  ;;  %v4991_v25 = vshrl.u32 %v13410_v21, 16 }
 0x2e9   : > { %v13709_v55 = vpop.f32.mrf.mxu1 }
 0x2ea   : > { %17137 = vst [vmem:[#allocation140_spill] sm:$0xff] %v13709_v55  ;;  %v3210_v11 = vpop.f32.mrf.mxu3  ;;  %v3259_v55 = vsel %vm17139_vm11, %v3256_v60, %v3258_v10  ;;  %v4032_v60 = vsel %vm17143_vm9, %v4022_v48, %v4031_v31  ;;  %vm17144_vm11 = vmmov %vm17123_vm1  ;;  %vm17147_vm1 = vcmask 1046528  }
 0x2eb   : > { %v13715_v52 = vadd.f32 %v3210_v11, %v13539_v59  ;;  %v3868_v59 = vld [vmem:[#allocation2 + $0x98] sm:$0x3]  ;;  %v13741_v51 = vsel %vm17144_vm11, %v4699_v43, %v16776_v40  ;;  %v11406_v40 = vld [vmem:[#allocation2 + $0x40] sm:$0xff]  ;;  %vm17148_vm9 = vmmov %vm17144_vm11  ;;  %vm17150_vm11 = vsmask.f32 6400 }
 0x2ec   : > { %v13730_v3 = vpop.f32.mrf.mxu0  ;;  %17145 = vst [vmem:[#allocation145_spill] sm:$0xff] %v13741_v51  ;;  %v3887_v11 = vunpack.c.l.b16 %v3868_v59 }
 0x2ed   : > { %17142 = vst [vmem:[#allocation144_spill] sm:$0xff] %v13730_v3  ;;  %v4034_v3 = vshrl.u32 %v13374_v24, 16 }
 0x2ef   : > { %5197 = vmatmul.bf16.gmra.mxu0 %v4989_v56  ;;  %3386 = vmatmul.bf16.gmra.mxu3 %v3259_v55  ;;  %v4994_v56 = vshll.u32 %v13410_v21, 16  ;;  %v13736_v55 = vsel %vm16787_vm0, %v5352_v33, %v5354_v57  ;;  %v13746_v46 = vpop.f32.mrf.mxu2  ;;  %v4037_v21 = vshll.u32 %v13374_v24, 16  ;;  %v13750_v33 = vpack.c.b16 %v3887_v11, %v3887_v11 }
 0x2f0   : > { %v4036_v51 = vrot.slane %v4034_v3, 1  ;;  %v4906_v3 = vld [vmem:[#allocation2 + $0xa0] sm:$0x7] }
 0x2f1   : > { %v13726_v14 = vpop.f32.mrf.mxu1  ;;  %v4996_v48 = vrot.slane %v4994_v56, 3 }
 0x2f2   : > { %17141 = vst [vmem:[#allocation143_spill] sm:$0xff] %v13726_v14  ;;  %4474 = vmatmul.bf16.gmra.mxu2 %v4317_v44  ;;  %v3213_v38 = vpop.f32.mrf.mxu3  ;;  %v4993_v44 = vrot.slane %v4991_v25, 2  ;;  %v4318_v25 = vrot.slane %v13750_v33, 2 }
 0x2f3   : > { %v13744_v35 = vadd.f32 %v3213_v38, %v13552_v50  ;;  %v4039_v50 = vrot.slane %v4037_v21, 2  ;;  %v4925_v21 = vunpack.c.l.b16 %v4906_v3 }
 0x2f4   : > { %4204 = vmatmul.bf16.gmra.mxu1 %v4032_v60  ;;  %v4997_v43 = vor.u32 %v4996_v48, %v4993_v44  ;;  %v3260_v60 = vrot.slane %v11406_v40, 1  ;;  %v13754_v38 = vpop.f32.mrf.mxu0  ;;  %v4319_v44 = vsel %vm17148_vm9, %v4316_v45, %v4318_v25  ;;  %v11063_v45 = vld [vmem:[%s16627_s3 + $0x198] sm:$0xff]  ;;  %vm17155_vm9 = vmmov %vm17150_vm11 }
 0x2f5   : > { %17146 = vst [vmem:[#allocation146_spill] sm:$0xff] %v13754_v38  ;;  %v4040_v11 = vor.u32 %v4039_v50, %v4036_v51  ;;  %v5000_v38 = vshrl.u32 %v13451_v54, 16  ;;  %v11079_v51 = vld [vmem:[%s16627_s3 + $0x218] sm:$0xff]  ;;  %v13779_v50 = vpack.c.b16 %v4925_v21, %v4925_v21  ;;  %4775 = vmatpush.bf16.msra.mxu3 %v11063_v45  ;;  %v11078_v21 = vld [vmem:[%s16627_s3 + $0x210] sm:$0xff]  ;;  %v11407_v45 = vld [vmem:[#allocation2 + $0x48] sm:$0xff] }
 0x2f6   : > { %v4998_v56 = vsel %vm16785_vm5, %v4988_v26, %v4997_v43  ;;  %v3261_v24 = vsel %vm17147_vm1, %v3258_v10, %v3260_v60  ;;  %v5003_v26 = vshll.u32 %v13451_v54, 16  ;;  %5428 = vmatpush.bf16.msra.mxu1 %v11079_v51  ;;  %v3262_v51 = vrot.slane %v11407_v45, 1 }
 0x2f7   : > { %v13763_v48 = vpop.f32.mrf.mxu2  ;;  %v5356_v54 = vrot.slane %v13779_v50, 3  ;;  %v5002_v25 = vrot.slane %v5000_v38, 2  ;;  %v4055_v45 = vshll.u32 %v13750_v33, 16 }
 0x2f9   : > { %v13752_v14 = vpop.f32.mrf.mxu1 }
 0x2fa   : > { %v3215_v63 = vpop.f32.mrf.mxu3  ;;  %5429 = vmatpush.bf16.msra.mxu1 %v11078_v21 }
 0x2fb   : > { %v13757_v59 = vadd.f32 %v3215_v63, %v13577_v27  ;;  %v4041_v27 = vsel %vm17150_vm11, %v4031_v31, %v4040_v11  ;;  %vm17158_vm11 = vmmov %vm17147_vm1 }
 0x2fc   : > { %v13781_v31 = vpop.f32.mrf.mxu0 }
 0x2fd   : > { %17151 = vst [vmem:[#allocation148_spill] sm:$0xff] %v13781_v31 }
 0x2ff   : > { %5202 = vmatmul.bf16.gmra.mxu0 %v4998_v56  ;;  %3391 = vmatmul.bf16.gmra.mxu3 %v3261_v24  ;;  %v5005_v56 = vrot.slane %v5003_v26, 3  ;;  %v4046_v24 = vshll.u32 %v13420_v39, 16 }
 0x301   : > { %v13765_v40 = vpop.f32.mrf.mxu1  ;;  %v4048_v38 = vrot.slane %v4046_v24, 2  ;;  %v5009_v24 = vshrl.u32 %v13482_v20, 16 }
 0x302   : > { %17149 = vst [vmem:[#allocation147_spill] sm:$0xff] %v13765_v40  ;;  %4479 = vmatmul.bf16.gmra.mxu2 %v4319_v44  ;;  %v3218_v63 = vpop.f32.mrf.mxu3  ;;  %v13787_v44 = vsel %vm16787_vm0, %v5354_v57, %v5356_v54  ;;  %v3263_v54 = vsel %vm17147_vm1, %v3260_v60, %v3262_v51  ;;  %vm17160_vm1 = vmmov %vm17155_vm9 }
 0x303   : > { %v13771_v10 = vadd.f32 %v3218_v63, %v13588_v5  ;;  %v4043_v5 = vshrl.u32 %v13420_v39, 16  ;;  %v5006_v63 = vor.u32 %v5005_v56, %v5002_v25  ;;  %v11077_v39 = vld [vmem:[%s16627_s3 + $0x208] sm:$0xff]  ;;  %v11076_v56 = vld [vmem:[%s16627_s3 + $0x200] sm:$0xff] }
 0x304   : > { %4209 = vmatmul.bf16.gmra.mxu1 %v4041_v27  ;;  %v13802_v40 = vpop.f32.mrf.mxu0 }
 0x305   : > { %v4045_v31 = vrot.slane %v4043_v5, 1  ;;  %v5007_v26 = vsel %vm16785_vm5, %v4997_v43, %v5006_v63  ;;  %5430 = vmatpush.bf16.msra.mxu1 %v11077_v39  ;;  %17153 = vst [vmem:[#allocation150_spill] sm:$0xff] %v13802_v40  ;;  %v5012_v43 = vshll.u32 %v13482_v20, 16 }
 0x307   : > { %v5014_v21 = vrot.slane %v5012_v43, 3 }
 0x309   : > { %v13789_v3 = vpop.f32.mrf.mxu1  ;;  %5431 = vmatpush.bf16.msra.mxu1 %v11076_v56 }
 0x30a   : > { %17152 = vst [vmem:[#allocation149_spill] sm:$0xff] %v13789_v3  ;;  %v3220_v27 = vpop.f32.mrf.mxu3  ;;  %v4049_v3 = vor.u32 %v4048_v38, %v4045_v31  ;;  %v5011_v31 = vrot.slane %v5009_v24, 2 }
 0x30b   : > { %v13798_v57 = vadd.f32 %v3220_v27, %v13613_v7  ;;  %v4052_v27 = vshrl.u32 %v13750_v33, 16  ;;  %v11116_v33 = vld [vmem:[%s16629_s5 + $0x78] sm:$0xff] }
 0x30c   : > { %v4050_v5 = vsel %vm17155_vm9, %v4040_v11, %v4049_v3  ;;  %v13819_v39 = vpop.f32.mrf.mxu0  ;;  %6521 = vmatpush.bf16.msra.mxu2 %v11116_v33  ;;  %vm17164_vm9 = vmmov %vm17158_vm11 }
 0x30d   : > { %17157 = vst [vmem:[#allocation153_spill] sm:$0xff] %v13819_v39  ;;  %v4054_v56 = vrot.slane %v4052_v27, 1  ;;  %v5021_v27 = vshll.u32 %v13523_v30, 16 }
 0x30f   : > { %5207 = vmatmul.bf16.gmra.mxu0 %v5007_v26  ;;  %3396 = vmatmul.bf16.gmra.mxu3 %v3263_v54  ;;  %v5015_v26 = vor.u32 %v5014_v21, %v5011_v31  ;;  %v11408_v54 = vld [vmem:[#allocation2 + $0x50] sm:$0xff]  ;;  %v5018_v21 = vshrl.u32 %v13523_v30, 16  ;;  %v11409_v30 = vld [vmem:[#allocation2 + $0x58] sm:$0xff] }
 0x310   : > { %v3264_v20 = vrot.slane %v11408_v54, 1 }
 0x311   : > { %v13804_v25 = vpop.f32.mrf.mxu1  ;;  %v5020_v54 = vrot.slane %v5018_v21, 2  ;;  %v5027_v21 = vshrl.u32 %v13556_v47, 16 }
 0x312   : > { %17154 = vst [vmem:[#allocation151_spill] sm:$0xff] %v13804_v25  ;;  %v3357_v7 = vpop.f32.mrf.mxu3 }
 0x313   : > { %v13813_v60 = vadd.f32 %v3357_v7, %v12499_v16  ;;  %v5016_v16 = vsel %vm16785_vm5, %v5006_v63, %v5015_v26  ;;  %v3265_v7 = vsel %vm17158_vm11, %v3262_v51, %v3264_v20  ;;  %vm17168_vm11 = vmmov %vm17164_vm9 }
 0x314   : > { %4214 = vmatmul.bf16.gmra.mxu1 %v4050_v5  ;;  %v4057_v5 = vrot.slane %v4055_v45, 2  ;;  %v13833_v63 = vpop.f32.mrf.mxu0  ;;  %v11062_v45 = vld [vmem:[%s16627_s3 + $0x190] sm:$0xff] }
 0x315   : > { %17161 = vst [vmem:[#allocation155_spill] sm:$0xff] %v13833_v63  ;;  %4776 = vmatpush.bf16.msra.mxu3 %v11062_v45 }
 0x316   : > { %v4058_v24 = vor.u32 %v4057_v5, %v4054_v56  ;;  %v5023_v56 = vrot.slane %v5021_v27, 3  ;;  %v5030_v27 = vshll.u32 %v13556_v47, 16 }
 0x318   : > { %v4059_v39 = vsel %vm17160_vm1, %v4049_v3, %v4058_v24  ;;  %vm17171_vm1 = vmmov %vm17164_vm9 }
 0x319   : > { %v13817_v38 = vpop.f32.mrf.mxu1 }
 0x31a   : > { %17156 = vst [vmem:[#allocation152_spill] sm:$0xff] %v13817_v38  ;;  %v13821_v11 = vpop.f32.mrf.mxu3 }
 0x31c   : > { %v13845_v24 = vpop.f32.mrf.mxu0 }
 0x31d   : > { %17163 = vst [vmem:[#allocation157_spill] sm:$0xff] %v13845_v24 }
 0x31f   : > { %5212 = vmatmul.bf16.gmra.mxu0 %v5016_v16  ;;  %3401 = vmatmul.bf16.gmra.mxu3 %v3265_v7  ;;  %v5024_v16 = vor.u32 %v5023_v56, %v5020_v54  ;;  %v3266_v7 = vrot.slane %v11409_v30, 1  ;;  %v5029_v54 = vrot.slane %v5027_v21, 2  ;;  %v5032_v56 = vrot.slane %v5030_v27, 3 }
 0x320   : > { %v5036_v21 = vshrl.u32 %v13597_v23, 16  ;;  %v5039_v27 = vshll.u32 %v13597_v23, 16 }
 0x321   : > { %v13825_v43 = vpop.f32.mrf.mxu1 }
 0x322   : > { %17159 = vst [vmem:[#allocation154_spill] sm:$0xff] %v13825_v43  ;;  %v3362_v31 = vpop.f32.mrf.mxu3 }
 0x323   : > { %v13836_v51 = vadd.f32 %v3362_v31, %v12577_v1  ;;  %v3267_v1 = vsel %vm17164_vm9, %v3264_v20, %v3266_v7  ;;  %vm17174_vm9 = vmmov %vm17171_vm1 }
 0x324   : > { %4219 = vmatmul.bf16.gmra.mxu1 %v4059_v39  ;;  %v5025_v39 = vsel %vm16785_vm5, %v5015_v26, %v5024_v16  ;;  %v13857_v30 = vpop.f32.mrf.mxu0 }
 0x325   : > { %17166 = vst [vmem:[#allocation159_spill] sm:$0xff] %v13857_v30  ;;  %v5045_v30 = vshrl.u32 %v13631_v49, 16 }
 0x329   : > { %v13841_v3 = vpop.f32.mrf.mxu1 }
 0x32a   : > { %17162 = vst [vmem:[#allocation156_spill] sm:$0xff] %v13841_v3  ;;  %v13843_v5 = vpop.f32.mrf.mxu3  ;;  %v17210_v3 = vld [vmem:[#allocation67_spill] sm:$0xff] }
 0x32f   : > { %5217 = vmatmul.bf16.gmra.mxu0 %v5025_v39  ;;  %3406 = vmatmul.bf16.gmra.mxu3 %v3267_v1  ;;  %v5033_v39 = vor.u32 %v5032_v56, %v5029_v54  ;;  %v11410_v1 = vld [vmem:[#allocation2 + $0x60] sm:$0xff] }
 0x330   : > { %v3268_v24 = vrot.slane %v11410_v1, 1  ;;  %v11061_v1 = vld [vmem:[%s16627_s3 + $0x188] sm:$0xff] }
 0x331   : > { %v13849_v33 = vpop.f32.mrf.mxu1  ;;  %v5034_v63 = vsel %vm16785_vm5, %v5024_v16, %v5033_v39  ;;  %v11115_v16 = vld [vmem:[%s16629_s5 + $0x70] sm:$0xff]  ;;  %4777 = vmatpush.bf16.msra.mxu3 %v11061_v1  ;;  %v5047_v1 = vrot.slane %v5045_v30, 2 }
 0x332   : > { %17165 = vst [vmem:[#allocation158_spill] sm:$0xff] %v13849_v33  ;;  %v3367_v31 = vpop.f32.mrf.mxu3  ;;  %v3269_v47 = vsel %vm17168_vm11, %v3266_v7, %v3268_v24  ;;  %v5041_v7 = vrot.slane %v5039_v27, 3  ;;  %6522 = vmatpush.bf16.msra.mxu2 %v11115_v16  ;;  %vm17177_vm11 = vmmov %vm17171_vm1  ;;  %v17206_v33 = vld [vmem:[#allocation78_spill] sm:$0xff] }
 0x333   : > { %v13855_v45 = vadd.f32 %v3367_v31, %v12652_v41  ;;  %v13867_v41 = vpop.f32.mrf.mxu0 }
 0x334   : > { %5432 = vmatmul.bf16.vlgmr.msra.gmra.mxu1 %v13208_v29 }
 0x339   : > { %v13859_v26 = vpop.f32.mrf.mxu1 }
 0x33a   : > { %17167 = vst [vmem:[#allocation160_spill] sm:$0xff] %v13859_v26  ;;  %v13861_v20 = vpop.f32.mrf.mxu3 }
 0x33f   : > { %5222 = vmatmul.bf16.gmra.mxu0 %v5034_v63  ;;  %3411 = vmatmul.bf16.gmra.mxu3 %v3269_v47  ;;  %v5038_v63 = vrot.slane %v5036_v21, 2 }
 0x341   : > { %v13865_v29 = vpop.f32.mrf.mxu1  ;;  %v5042_v23 = vor.u32 %v5041_v7, %v5038_v63 }
 0x342   : > { %17169 = vst [vmem:[#allocation161_spill] sm:$0xff] %v13865_v29  ;;  %v3372_v31 = vpop.f32.mrf.mxu3 }
 0x343   : > { %v13873_v54 = vadd.f32 %v3372_v31, %v12775_v8  ;;  %v13885_v8 = vpop.f32.mrf.mxu0  ;;  %v5043_v31 = vsel %vm16785_vm5, %v5033_v39, %v5042_v23 }
 0x344   : > { %5437 = vmatmul.bf16.gmra.mxu1 %v13232_v15  ;;  %v11411_v15 = vld [vmem:[#allocation2 + $0x68] sm:$0xff] }
 0x345   : > { %v3270_v40 = vrot.slane %v11411_v15, 1 }
 0x347   : > { %v3271_v21 = vsel %vm17171_vm1, %v3268_v24, %v3270_v40  ;;  %v3156_v24 = vadd.f32 %v12936_v53, %v13013_v42  ;;  %v5057_v53 = vshll.u32 %v13645_v61, 16 }
 0x349   : > { %v13878_v56 = vpop.f32.mrf.mxu1 }
 0x34a   : > { %17170 = vst [vmem:[#allocation162_spill] sm:$0xff] %v13878_v56  ;;  %v13883_v47 = vpop.f32.mrf.mxu3  ;;  %v5048_v56 = vshll.u32 %v13631_v49, 16 }
 0x34b   : > { %v13897_v7 = vpop.f32.mrf.mxu0 }
 0x34c   : > { %v5050_v39 = vrot.slane %v5048_v56, 3 }
 0x34f   : > { %5227 = vmatmul.bf16.gmra.mxu0 %v5043_v31  ;;  %3416 = vmatmul.bf16.gmra.mxu3 %v3271_v21  ;;  %v5051_v21 = vor.u32 %v5050_v39, %v5047_v1 }
 0x351   : > { %v13889_v27 = vpop.f32.mrf.mxu1 }
 0x352   : > { %17172 = vst [vmem:[#allocation163_spill] sm:$0xff] %v13889_v27  ;;  %v3377_v16 = vpop.f32.mrf.mxu3  ;;  %v11412_v27 = vld [vmem:[#allocation2 + $0x70] sm:$0xff] }
 0x353   : > { %v13895_v63 = vadd.f32 %v3377_v16, %v12921_v32  ;;  %v3272_v29 = vrot.slane %v11412_v27, 1  ;;  %v13907_v49 = vpop.f32.mrf.mxu0  ;;  %v5054_v16 = vshrl.u32 %v13645_v61, 16 }
 0x354   : > { %5442 = vmatmul.bf16.gmra.mxu1 %v13272_v0  ;;  %v5052_v0 = vsel %vm16785_vm5, %v5042_v23, %v5051_v21  ;;  %v5059_v23 = vrot.slane %v5057_v53, 3 }
 0x355   : > { %v3273_v32 = vsel %vm17174_vm9, %v3270_v40, %v3272_v29  ;;  %v5056_v27 = vrot.slane %v5054_v16, 2  ;;  %v11114_v40 = vld [vmem:[%s16629_s5 + $0x68] sm:$0xff]  ;;  %vm17183_vm9 = vmmov %vm17171_vm1 }
 0x356   : > { %6523 = vmatpush.bf16.msra.mxu2 %v11114_v40 }
 0x359   : > { %v13899_v15 = vpop.f32.mrf.mxu1 }
 0x35a   : > { %17173 = vst [vmem:[#allocation164_spill] sm:$0xff] %v13899_v15  ;;  %v3379_v31 = vpop.f32.mrf.mxu3 }
 0x35b   : > { %v13903_v26 = vadd.f32 %v3379_v31, %v3156_v24  ;;  %v13922_v39 = vpop.f32.mrf.mxu0  ;;  %v5060_v31 = vor.u32 %v5059_v23, %v5056_v27  ;;  %v5063_v27 = vshrl.u32 %v13647_v13, 16  ;;  %v5066_v23 = vshll.u32 %v13647_v13, 16 }
 0x35d   : > { %v5061_v61 = vsel %vm16785_vm5, %v5051_v21, %v5060_v31  ;;  %v5065_v21 = vrot.slane %v5063_v27, 2  ;;  %v5072_v27 = vshrl.u32 %v13665_v62, 16 }
 0x35f   : > { %5232 = vmatmul.bf16.gmra.mxu0 %v5052_v0  ;;  %3421 = vmatmul.bf16.gmra.mxu3 %v3273_v32  ;;  %v11413_v0 = vld [vmem:[#allocation2 + $0x78] sm:$0xff] }
 0x360   : > { %v3274_v32 = vrot.slane %v11413_v0, 1 }
 0x361   : > { %v13909_v30 = vpop.f32.mrf.mxu1 }
 0x362   : > { %17175 = vst [vmem:[#allocation165_spill] sm:$0xff] %v13909_v30  ;;  %v3382_v56 = vpop.f32.mrf.mxu3 }
 0x363   : > { %v13915_v42 = vadd.f32 %v3382_v56, %v13054_v36  ;;  %v11060_v36 = vld [vmem:[%s16627_s3 + $0x180] sm:$0xff]  ;;  %v3275_v56 = vsel %vm17177_vm11, %v3272_v29, %v3274_v32  ;;  %vm17190_vm11 = vmmov %vm17171_vm1 }
 0x364   : > { %5447 = vmatmul.bf16.gmra.mxu1 %v13308_v12  ;;  %4778 = vmatpush.bf16.msra.mxu3 %v11060_v36 }
 0x369   : > { %v13917_v1 = vpop.f32.mrf.mxu1 }
 0x36a   : > { %17176 = vst [vmem:[#allocation166_spill] sm:$0xff] %v13917_v1  ;;  %v3384_v24 = vpop.f32.mrf.mxu3 }
 0x36b   : > { %v13925_v12 = vadd.f32 %v3384_v24, %v13094_v6  ;;  %v13936_v6 = vpop.f32.mrf.mxu0  ;;  %v5068_v24 = vrot.slane %v5066_v23, 3  ;;  %v5075_v23 = vshll.u32 %v13665_v62, 16 }
 0x36f   : > { %5237 = vmatmul.bf16.gmra.mxu0 %v5061_v61  ;;  %3426 = vmatmul.bf16.gmra.mxu3 %v3275_v56  ;;  %v5069_v61 = vor.u32 %v5068_v24, %v5065_v21  ;;  %v11414_v56 = vld [vmem:[#allocation2 + $0x80] sm:$0xff]  ;;  %v5074_v21 = vrot.slane %v5072_v27, 2  ;;  %v5077_v24 = vrot.slane %v5075_v23, 3 }
 0x370   : > { %v3276_v36 = vrot.slane %v11414_v56, 1 }
 0x371   : > { %v13932_v16 = vpop.f32.mrf.mxu1  ;;  %v5070_v13 = vsel %vm16785_vm5, %v5060_v31, %v5069_v61  ;;  %v5078_v56 = vor.u32 %v5077_v24, %v5074_v21  ;;  %v5081_v21 = vshrl.u32 %v13723_v4, 16 }
 0x372   : > { %17178 = vst [vmem:[#allocation167_spill] sm:$0xff] %v13932_v16  ;;  %v3387_v53 = vpop.f32.mrf.mxu3 }
 0x373   : > { %v13940_v40 = vadd.f32 %v3387_v53, %v13130_v37  ;;  %v13947_v1 = vpop.f32.mrf.mxu0 }
 0x374   : > { %5452 = vmatmul.bf16.gmra.mxu1 %v13344_v58  ;;  %v3277_v58 = vsel %vm17171_vm1, %v3274_v32, %v3276_v36 }
 0x379   : > { %v13942_v29 = vpop.f32.mrf.mxu1 }
 0x37a   : > { %17179 = vst [vmem:[#allocation168_spill] sm:$0xff] %v13942_v29  ;;  %v3389_v0 = vpop.f32.mrf.mxu3 }
 0x37b   : > { %v13945_v16 = vadd.f32 %v3389_v0, %v13164_v9  ;;  %v13959_v0 = vpop.f32.mrf.mxu0 }
 0x37f   : > { %5242 = vmatmul.bf16.gmra.mxu0 %v5070_v13  ;;  %3431 = vmatmul.bf16.gmra.mxu3 %v3277_v58  ;;  %v11415_v13 = vld [vmem:[#allocation2 + $0x88] sm:$0xff] }
 0x380   : > { %v3278_v58 = vrot.slane %v11415_v13, 1 }
 0x381   : > { %v13951_v37 = vpop.f32.mrf.mxu1 }
 0x382   : > { %17180 = vst [vmem:[#allocation169_spill] sm:$0xff] %v13951_v37  ;;  %v3392_v53 = vpop.f32.mrf.mxu3  ;;  %v3279_v62 = vsel %vm17183_vm9, %v3276_v36, %v3278_v58 }
 0x383   : > { %v13957_v9 = vadd.f32 %v3392_v53, %v13191_v19  ;;  %v5079_v19 = vsel %vm16785_vm5, %v5069_v61, %v5078_v56  ;;  %v13973_v27 = vpop.f32.mrf.mxu0  ;;  %v5083_v61 = vrot.slane %v5081_v21, 2  ;;  %v5090_v21 = vshrl.u32 %v13779_v50, 16 }
 0x384   : > { %5457 = vmatmul.bf16.gmra.mxu1 %v13383_v34  ;;  %v11113_v34 = vld [vmem:[%s16629_s5 + $0x60] sm:$0xff] }
 0x385   : > { %6524 = vmatpush.bf16.msra.mxu2 %v11113_v34 }
 0x389   : > { %v13961_v31 = vpop.f32.mrf.mxu1 }
 0x38a   : > { %17181 = vst [vmem:[#allocation170_spill] sm:$0xff] %v13961_v31  ;;  %v3394_v32 = vpop.f32.mrf.mxu3  ;;  %v17188_v31 = vld [vmem:[#allocation65_spill] sm:$0xff] }
 0x38b   : > { %v13964_v37 = vadd.f32 %v3394_v32, %v13217_v2  ;;  %v5084_v2 = vshll.u32 %v13723_v4, 16  ;;  %v17219_v4 = vld [vmem:[#allocation92_spill] sm:$0xff] }
 0x38d   : > { %17182 = vst [vmem:[#allocation171_spill] sm:$0xff] %v13964_v37  ;;  %v5086_v32 = vrot.slane %v5084_v2, 3  ;;  %v5093_v2 = vshll.u32 %v13779_v50, 16  ;;  %v17198_v50 = vld [vmem:[#allocation60_spill] sm:$0xff] }
 0x38f   : > { %5247 = vmatmul.bf16.gmra.mxu0 %v5079_v19  ;;  %3436 = vmatmul.bf16.gmra.mxu3 %v3279_v62  ;;  %v5087_v19 = vor.u32 %v5086_v32, %v5083_v61  ;;  %v17187_v62 = vld [vmem:[#allocation64_spill] sm:$0xff]  ;;  %v17192_v61 = vld [vmem:[#allocation90_spill] sm:$0xff] }
 0x390   : > { %v3280_v34 = vrot.slane %v17187_v62, 1  ;;  %v17193_v32 = vld [vmem:[#allocation68_spill] sm:$0xff] }
 0x391   : > { %v13971_v53 = vpop.f32.mrf.mxu1  ;;  %v5088_v30 = vsel %vm16785_vm5, %v5078_v56, %v5087_v19  ;;  %v5095_v56 = vrot.slane %v5093_v2, 3 }
 0x392   : > { %17184 = vst [vmem:[#allocation172_spill] sm:$0xff] %v13971_v53  ;;  %v3397_v23 = vpop.f32.mrf.mxu3  ;;  %v13984_v53 = vpop.f32.mrf.mxu0 }
 0x393   : > { %v13979_v24 = vadd.f32 %v3397_v23, %v13238_v17 }
 0x394   : > { %5462 = vmatmul.bf16.gmra.mxu1 %v13430_v22  ;;  %v3281_v22 = vsel %vm17190_vm11, %v3278_v58, %v3280_v34  ;;  %v17196_v34 = vld [vmem:[#allocation70_spill] sm:$0xff]  ;;  %vm17313_vm11 = vmmov %vm17183_vm9 }
 0x395   : > { %17185 = vst [vmem:[#allocation173_spill] sm:$0xff] %v13979_v24 }
 0x399   : > { %v13981_v36 = vpop.f32.mrf.mxu1 }
 0x39a   : > { %17186 = vst [vmem:[#allocation174_spill] sm:$0xff] %v13981_v36  ;;  %v3399_v13 = vpop.f32.mrf.mxu3 }
 0x39b   : > { %v13987_v29 = vadd.f32 %v3399_v13, %v17188_v31  ;;  %v13999_v31 = vpop.f32.mrf.mxu0  ;;  %v5092_v13 = vrot.slane %v5090_v21, 2  ;;  %v11112_v21 = vld [vmem:[%s16629_s5 + $0x58] sm:$0xff] }
 0x39c   : > { %6525 = vmatpush.bf16.msra.mxu2 %v11112_v21 }
 0x39d   : > { %17189 = vst [vmem:[#allocation64_spill] sm:$0xff] %v13987_v29  ;;  %v5096_v58 = vor.u32 %v5095_v56, %v5092_v13  ;;  %v17230_v29 = vld [vmem:[#allocation135_spill] sm:$0xff] }
 0x39f   : > { %5252 = vmatmul.bf16.gmra.mxu0 %v5088_v30  ;;  %3441 = vmatmul.bf16.gmra.mxu3 %v3281_v22 }
 0x3a1   : > { %v13991_v17 = vpop.f32.mrf.mxu1 }
 0x3a2   : > { %17191 = vst [vmem:[#allocation65_spill] sm:$0xff] %v13991_v17  ;;  %v3402_v23 = vpop.f32.mrf.mxu3  ;;  %v5097_v17 = vsel %vm16785_vm5, %v5087_v19, %v5096_v58  ;;  %v17204_v58 = vld [vmem:[#allocation62_spill] sm:$0xff] }
 0x3a3   : > { %v13997_v62 = vadd.f32 %v3402_v23, %v17193_v32  ;;  %v14007_v15 = vpop.f32.mrf.mxu0  ;;  %v17200_v32 = vld [vmem:[#allocation73_spill] sm:$0xff] }
 0x3a4   : > { %5467 = vmatmul.bf16.gmra.mxu1 %v17192_v61  ;;  %v17199_v61 = vld [vmem:[#allocation98_spill] sm:$0xff] }
 0x3a5   : > { %17194 = vst [vmem:[#allocation90_spill] sm:$0xff] %v13997_v62 }
 0x3a9   : > { %v14001_v36 = vpop.f32.mrf.mxu1 }
 0x3aa   : > { %17195 = vst [vmem:[#allocation68_spill] sm:$0xff] %v14001_v36  ;;  %v3404_v30 = vpop.f32.mrf.mxu3  ;;  %v17205_v36 = vld [vmem:[#allocation105_spill] sm:$0xff] }
 0x3ab   : > { %v14004_v22 = vadd.f32 %v3404_v30, %v17196_v34  ;;  %v17202_v30 = vld [vmem:[#allocation75_spill] sm:$0xff] }
 0x3ad   : > { %17197 = vst [vmem:[#allocation70_spill] sm:$0xff] %v14004_v22 }
 0x3af   : > { %5257 = vmatmul.bf16.gmra.mxu0 %v5097_v17  ;;  %4779 = vmatmul.bf16.vlgmr.msra.gmra.mxu3 %v17198_v50 }
 0x3b1   : > { %v14010_v23 = vpop.f32.mrf.mxu1 }
 0x3b2   : > { %v3407_v2 = vpop.f32.mrf.mxu3 }
 0x3b3   : > { %v14017_v13 = vadd.f32 %v3407_v2, %v17200_v32  ;;  %v17208_v32 = vld [vmem:[#allocation80_spill] sm:$0xff] }
 0x3b4   : > { %5472 = vmatmul.bf16.gmra.mxu1 %v17199_v61 }
 0x3b5   : > { %17201 = vst [vmem:[#allocation60_spill] sm:$0xff] %v14017_v13 }
 0x3b9   : > { %v14019_v56 = vpop.f32.mrf.mxu1 }
 0x3ba   : > { %v3409_v19 = vpop.f32.mrf.mxu3 }
 0x3bb   : > { %v14022_v17 = vadd.f32 %v3409_v19, %v17202_v30 }
 0x3bd   : > { %17203 = vst [vmem:[#allocation98_spill] sm:$0xff] %v14022_v17  ;;  %v17212_v17 = vld [vmem:[#allocation83_spill] sm:$0xff] }
 0x3bf   : > { %4784 = vmatmul.bf16.gmra.mxu3 %v17204_v58  ;;  %v17211_v58 = vld [vmem:[#allocation112_spill] sm:$0xff] }
 0x3c1   : > { %v14025_v34 = vpop.f32.mrf.mxu1 }
 0x3c2   : > { %v3412_v50 = vpop.f32.mrf.mxu3 }
 0x3c3   : > { %v14029_v21 = vadd.f32 %v3412_v50, %v17206_v33  ;;  %v11111_v33 = vld [vmem:[%s16629_s5 + $0x50] sm:$0xff] }
 0x3c4   : > { %5477 = vmatmul.bf16.gmra.mxu1 %v17205_v36  ;;  %6526 = vmatpush.bf16.msra.mxu2 %v11111_v33 }
 0x3c5   : > { %17207 = vst [vmem:[#allocation73_spill] sm:$0xff] %v14029_v21 }
 0x3c9   : > { %v14031_v61 = vpop.f32.mrf.mxu1 }
 0x3ca   : > { %v3414_v2 = vpop.f32.mrf.mxu3 }
 0x3cb   : > { %v14034_v13 = vadd.f32 %v3414_v2, %v17208_v32  ;;  %v17214_v2 = vld [vmem:[#allocation85_spill] sm:$0xff] }
 0x3cd   : > { %17209 = vst [vmem:[#allocation75_spill] sm:$0xff] %v14034_v13 }
 0x3cf   : > { %4789 = vmatmul.bf16.gmra.mxu3 %v17210_v3  ;;  %v17216_v3 = vld [vmem:[#allocation72_spill] sm:$0xff] }
 0x3d1   : > { %v14037_v19 = vpop.f32.mrf.mxu1 }
 0x3d2   : > { %v3417_v30 = vpop.f32.mrf.mxu3 }
 0x3d3   : > { %v14041_v22 = vadd.f32 %v3417_v30, %v17212_v17  ;;  %v17217_v17 = vld [vmem:[#allocation88_spill] sm:$0xff] }
 0x3d4   : > { %5482 = vmatmul.bf16.gmra.mxu1 %v17211_v58 }
 0x3d5   : > { %17213 = vst [vmem:[#allocation62_spill] sm:$0xff] %v14041_v22  ;;  %v14060_v22 = vpop.f32.mrf.mxu0 }
 0x3d9   : > { %v14046_v36 = vpop.f32.mrf.mxu1 }
 0x3da   : > { %v3419_v50 = vpop.f32.mrf.mxu3 }
 0x3db   : > { %v14049_v32 = vadd.f32 %v3419_v50, %v17214_v2  ;;  %v17221_v50 = vld [vmem:[#allocation77_spill] sm:$0xff] }
 0x3dd   : > { %17215 = vst [vmem:[#allocation105_spill] sm:$0xff] %v14049_v32 }
 0x3df   : > { %4794 = vmatmul.bf16.gmra.mxu3 %v17216_v3  ;;  %v14068_v3 = vpop.f32.mrf.mxu2 }
 0x3e1   : > { %v14052_v13 = vpop.f32.mrf.mxu1 }
 0x3e2   : > { %v3422_v21 = vpop.f32.mrf.mxu3 }
 0x3e3   : > { %v14056_v30 = vadd.f32 %v3422_v21, %v17217_v17  ;;  %v14074_v17 = vpop.f32.mrf.mxu0 }
 0x3e4   : > { %5487 = vmatmul.bf16.gmra.mxu1 %v13608_v18  ;;  %v17222_v18 = vld [vmem:[#allocation124_spill] sm:$0xff]  ;;  %17224 = vst [vmem:[#allocation112_spill] sm:$0xff] %v14074_v17 }
 0x3e5   : > { %17218 = vst [vmem:[#allocation78_spill] sm:$0xff] %v14056_v30  ;;  %v17245_v17 = vld [vmem:[#allocation136_spill] sm:$0xff] }
 0x3e7   : > { %v14084_v62 = vpop.f32.mrf.mxu2 }
 0x3e9   : > { %v14058_v58 = vpop.f32.mrf.mxu1 }
 0x3ea   : > { %v3424_v33 = vpop.f32.mrf.mxu3 }
 0x3eb   : > { %v14063_v43 = vadd.f32 %v3424_v33, %v17219_v4  ;;  %v11110_v4 = vld [vmem:[%s16629_s5 + $0x48] sm:$0xff]  ;;  %v14086_v38 = vpop.f32.mrf.mxu0 }
 0x3ec   : > { %6527 = vmatpush.bf16.msra.mxu2 %v11110_v4  ;;  %17227 = vst [vmem:[#allocation85_spill] sm:$0xff] %v14086_v38  ;;  %v17235_v38 = vld [vmem:[#allocation86_spill] sm:$0xff] }
 0x3ed   : > { %17220 = vst [vmem:[#allocation80_spill] sm:$0xff] %v14063_v43 }
 0x3ef   : > { %4799 = vmatmul.bf16.gmra.mxu3 %v17221_v50  ;;  %v17225_v50 = vld [vmem:[#allocation127_spill] sm:$0xff]  ;;  %v14095_v24 = vpop.f32.mrf.mxu2 }
 0x3f0   : > { %17232 = vst [vmem:[#allocation88_spill] sm:$0xff] %v14095_v24 }
 0x3f1   : > { %v14066_v2 = vpop.f32.mrf.mxu1 }
 0x3f2   : > { %v3427_v32 = vpop.f32.mrf.mxu3 }
 0x3f3   : > { %v14072_v21 = vadd.f32 %v3427_v32, %v17222_v18  ;;  %v14097_v4 = vpop.f32.mrf.mxu0 }
 0x3f4   : > { %5492 = vmatmul.bf16.gmra.mxu1 %v13663_v28  ;;  %v17228_v28 = vld [vmem:[#allocation82_spill] sm:$0xff]  ;;  %17233 = vst [vmem:[#allocation92_spill] sm:$0xff] %v14097_v4 }
 0x3f5   : > { %17223 = vst [vmem:[#allocation67_spill] sm:$0xff] %v14072_v21  ;;  %v17229_v21 = vld [vmem:[#allocation131_spill] sm:$0xff] }
 0x3f9   : > { %v14076_v30 = vpop.f32.mrf.mxu1 }
 0x3fa   : > { %v3429_v33 = vpop.f32.mrf.mxu3 }
 0x3fb   : > { %v14082_v43 = vadd.f32 %v3429_v33, %v17225_v50 }
 0x3fd   : > { %17226 = vst [vmem:[#allocation83_spill] sm:$0xff] %v14082_v43 }
 0x3ff   : > { %4804 = vmatmul.bf16.gmra.mxu3 %v17228_v28  ;;  %v14105_v28 = vpop.f32.mrf.mxu2 }
 0x400   : > { %17236 = vst [vmem:[#allocation124_spill] sm:$0xff] %v14105_v28 }
 0x401   : > { %v14089_v32 = vpop.f32.mrf.mxu1 }
 0x402   : > { %v3432_v18 = vpop.f32.mrf.mxu3 }
 0x403   : > { %v14093_v25 = vadd.f32 %v3432_v18, %v17230_v29  ;;  %v17238_v18 = vld [vmem:[#allocation132_spill] sm:$0xff] }
 0x404   : > { %5497 = vmatmul.bf16.gmra.mxu1 %v17229_v21  ;;  %v14109_v21 = vpop.f32.mrf.mxu0 }
 0x405   : > { %17231 = vst [vmem:[#allocation72_spill] sm:$0xff] %v14093_v25 }
 0x406   : > { %17237 = vst [vmem:[#allocation127_spill] sm:$0xff] %v14109_v21 }
 0x407   : > { %v14117_v24 = vpop.f32.mrf.mxu2 }
 0x408   : > { %17240 = vst [vmem:[#allocation131_spill] sm:$0xff] %v14117_v24 }
 0x409   : > { %v14099_v33 = vpop.f32.mrf.mxu1 }
 0x40a   : > { %v3434_v50 = vpop.f32.mrf.mxu3 }
 0x40b   : > { %v14102_v43 = vadd.f32 %v3434_v50, %v13715_v52 }
 0x40d   : > { %17234 = vst [vmem:[#allocation77_spill] sm:$0xff] %v14102_v43  ;;  %v17243_v43 = vld [vmem:[#allocation91_spill] sm:$0xff] }
 0x40f   : > { %4809 = vmatmul.bf16.gmra.mxu3 %v17235_v38  ;;  %v14122_v38 = vpop.f32.mrf.mxu0 }
 0x410   : > { %17242 = vst [vmem:[#allocation86_spill] sm:$0xff] %v14122_v38  ;;  %v17250_v38 = vld [vmem:[#allocation30_spill] sm:$0xff] }
 0x411   : > { %v14107_v37 = vpop.f32.mrf.mxu1 }
 0x412   : > { %v3437_v29 = vpop.f32.mrf.mxu3 }
 0x413   : > { %v14113_v25 = vadd.f32 %v3437_v29, %v13744_v35  ;;  %v14131_v29 = vpop.f32.mrf.mxu2 }
 0x414   : > { %5502 = vmatmul.bf16.gmra.mxu1 %v17238_v18  ;;  %17247 = vst [vmem:[#allocation136_spill] sm:$0xff] %v14131_v29 }
 0x415   : > { %17239 = vst [vmem:[#allocation82_spill] sm:$0xff] %v14113_v25 }
 0x417   : > { %v14133_v18 = vpop.f32.mrf.mxu0 }
 0x418   : > { %17248 = vst [vmem:[#allocation175_spill] sm:$0xff] %v14133_v18 }
 0x419   : > { %v14115_v4 = vpop.f32.mrf.mxu1 }
 0x41a   : > { %v3439_v52 = vpop.f32.mrf.mxu3 }
 0x41b   : > { %v14120_v50 = vadd.f32 %v3439_v52, %v13757_v59  ;;  %v11108_v59 = vld [vmem:[%s16629_s5 + $0x38] sm:$0xff]  ;;  %v14149_v29 = vpop.f32.mrf.mxu2 }
 0x41c   : > { %6686 = vmatpush.bf16.msrb.mxu3 %v11108_v59  ;;  %17254 = vst [vmem:[#allocation30_spill] sm:$0xff] %v14149_v29  ;;  %v11124_v59 = vld [vmem:[%s16629_s5 + $0xb8] sm:$0xff] }
 0x41d   : > { %17241 = vst [vmem:[#allocation135_spill] sm:$0xff] %v14120_v50  ;;  %6909 = vmatpush.bf16.msrb.mxu0 %v11124_v59 }
 0x41f   : > { %4814 = vmatmul.bf16.gmra.mxu3 %v17243_v43  ;;  %v17249_v43 = vld [vmem:[#allocation50_spill] sm:$0xff] }
 0x420   : > { %v3832_v50 = vadd.f32 %v17249_v43, %v13813_v60  ;;  %v11109_v60 = vld [vmem:[%s16629_s5 + $0x40] sm:$0xff] }
 0x421   : > { %v14125_v28 = vpop.f32.mrf.mxu1  ;;  %6528 = vmatpush.bf16.msra.mxu2 %v11109_v60  ;;  %v11122_v60 = vld [vmem:[%s16629_s5 + $0xa8] sm:$0xff] }
 0x422   : > { %17244 = vst [vmem:[#allocation132_spill] sm:$0xff] %v14125_v28  ;;  %v3442_v21 = vpop.f32.mrf.mxu3  ;;  %v17255_v28 = vld [vmem:[#allocation99_spill] sm:$0xff] }
 0x423   : > { %v14129_v35 = vadd.f32 %v3442_v21, %v13771_v10  ;;  %v14179_v59 = vpop.f32.mrf.mxu2 }
 0x424   : > { %5507 = vmatmul.bf16.gmra.mxu1 %v17245_v17  ;;  %v17251_v17 = vld [vmem:[#allocation29_spill] sm:$0xff]  ;;  %17261 = vst [vmem:[#allocation99_spill] sm:$0xff] %v14179_v59 }
 0x425   : > { %17246 = vst [vmem:[#allocation91_spill] sm:$0xff] %v14129_v35  ;;  %v3136_v24 = vadd.f32 %v17251_v17, %v17250_v38  ;;  %v17253_v35 = vld [vmem:[#allocation94_spill] sm:$0xff]  ;;  %v14158_v38 = vpop.f32.mrf.mxu0 }
 0x426   : > { %v4225_v18 = vadd.f32 %v17253_v35, %v3832_v50  ;;  %17256 = vst [vmem:[#allocation29_spill] sm:$0xff] %v14158_v38 }
 0x427   : > { %v3448_v21 = vadd.f32 %v13821_v11, %v3136_v24  ;;  %v17259_v24 = vld [vmem:[#allocation95_spill] sm:$0xff] }
 0x428   : > { %v4485_v50 = vadd.f32 %v17259_v24, %v4225_v18 }
 0x429   : > { %v14138_v52 = vpop.f32.mrf.mxu1 }
 0x42a   : > { %v3444_v25 = vpop.f32.mrf.mxu3 }
 0x42b   : > { %v14145_v10 = vadd.f32 %v3444_v25, %v13798_v57  ;;  %v17258_v25 = vld [vmem:[#allocation52_spill] sm:$0xff] }
 0x42c   : > { %v3833_v11 = vadd.f32 %v17258_v25, %v3448_v21  ;;  %v17260_v21 = vld [vmem:[#allocation97_spill] sm:$0xff] }
 0x42d   : > { %17252 = vst [vmem:[#allocation50_spill] sm:$0xff] %v14145_v10  ;;  %v14172_v10 = vld [vmem:[%s16628_s4] ss:$0 sm:$0xff] }
 0x42e   : > { %v4226_v25 = vadd.f32 %v17260_v21, %v3833_v11  ;;  %v14190_v11 = vpop.f32.mrf.mxu0  ;;  %v17267_v21 = vld [vmem:[#allocation34_spill] sm:$0xff] }
 0x42f   : > { %4819 = vmatmul.bf16.gmra.mxu3 %v17255_v28  ;;  %v11123_v28 = vld [vmem:[%s16629_s5 + $0xb0] sm:$0xff]  ;;  %17265 = vst [vmem:[#allocation95_spill] sm:$0xff] %v14190_v11  ;;  %v17270_v11 = vld [vmem:[#allocation106_spill] sm:$0xff] }
 0x430   : > { %6910 = vmatpush.bf16.msrb.mxu0 %v11123_v28 }
 0x431   : > { %v14160_v57 = vpop.f32.mrf.mxu1 }
 0x432   : > { %17257 = vst [vmem:[#allocation94_spill] sm:$0xff] %v14160_v57  ;;  %v4780_v35 = vpop.f32.mrf.mxu3 }
 0x433   : > { %v4870_v43 = vadd.f32 %v4780_v35, %v4485_v50  ;;  %v17264_v35 = vld [vmem:[#allocation100_spill] sm:$0xff] }
 0x434   : > { %5512 = vmatmul.bf16.gmra.mxu1 %v13736_v55  ;;  %6911 = vmatpush.bf16.msrb.mxu0 %v11122_v60  ;;  %v17269_v60 = vld [vmem:[#allocation101_spill] sm:$0xff] }
 0x435   : > { %v5263_v17 = vadd.f32 %v13867_v41, %v4870_v43  ;;  %v17263_v41 = vld [vmem:[#allocation54_spill] sm:$0xff]  ;;  %v4486_v43 = vadd.f32 %v17264_v35, %v4226_v25 }
 0x436   : > { %v3834_v24 = vadd.f32 %v17263_v41, %v13836_v51 }
 0x437   : > { %v5523_v18 = vadd.f32 %v14010_v23, %v5263_v17  ;;  %v11121_v23 = vld [vmem:[%s16629_s5 + $0xa0] sm:$0xff] }
 0x438   : > { %v17266_v17 = vld [vmem:[#allocation33_spill] sm:$0xff]  ;;  %v4227_v41 = vadd.f32 %v17269_v60, %v3834_v24  ;;  %6912 = vmatpush.bf16.msrb.mxu0 %v11121_v23  ;;  %v17272_v23 = vld [vmem:[#allocation103_spill] sm:$0xff] }
 0x439   : > { %v14181_v55 = vpop.f32.mrf.mxu1  ;;  %v5563_v50 = vadd.f32 %v14172_v10, %v5523_v18  ;;  %v3141_v38 = vadd.f32 %v17267_v21, %v17266_v17  ;;  %v14218_v17 = vpop.f32.mrf.mxu2 }
 0x43a   : > { %17262 = vst [vmem:[#allocation52_spill] sm:$0xff] %v14181_v55  ;;  %v4782_v28 = vpop.f32.mrf.mxu3 }
 0x43b   : > { %v5599_v59 = vmax.f32 %v5563_v50, 0.0  ;;  %v4871_v29 = vadd.f32 %v4782_v28, %v4486_v43  ;;  %v3450_v55 = vadd.f32 %v13843_v5, %v3141_v38  ;;  %v11120_v50 = vld [vmem:[%s16629_s5 + $0x98] sm:$0xff]  ;;  %v11148_v28 = vld [vmem:[%s16629_s5 + $0xf0] sm:$0xff]  ;;  %17273 = vst [vmem:[#allocation97_spill] sm:$0xff] %v14218_v17 }
 0x43c   : > { %v11149_v5 = vld [vmem:[%s16629_s5 + $0xf8] sm:$0xff]  ;;  %6913 = vmatpush.bf16.msrb.mxu0 %v11120_v50 }
 0x43d   : > { %v5635_v18 = vsel %vm11795_vm15, %v5599_v59, 0.0  ;;  %v5264_v25 = vadd.f32 %v13885_v8, %v4871_v29  ;;  %v17271_v8 = vld [vmem:[#allocation55_spill] sm:$0xff]  ;;  %7294 = vmatpush.bf16.msrb.mxu1 %v11149_v5 }
 0x43e   : > { %v5671_v35 = vpack.c.bf16 %v5635_v18, %v5635_v18  ;;  %v3835_v29 = vadd.f32 %v17271_v8, %v3450_v55  ;;  %v6103_v55 = vld [vmem:[#allocation3 + $0x8] sm:$0xe] }
 0x43f   : > { %v5524_v57 = vadd.f32 %v14019_v56, %v5264_v25  ;;  %4824 = vmatmul.bf16.gmra.mxu3 %v17270_v11  ;;  %v4487_v56 = vadd.f32 %v17272_v23, %v4227_v41  ;;  %v11119_v11 = vld [vmem:[%s16629_s5 + $0x90] sm:$0xff]  ;;  %v14221_v41 = vpop.f32.mrf.mxu0 }
 0x440   : > { %v5708_v38 = vshrl.u32 %v5671_v35, 16  ;;  %v5711_v59 = vshll.u32 %v5671_v35, 16  ;;  %17274 = vst [vmem:[#allocation54_spill] sm:$0xff] %v14221_v41  ;;  %v17276_v23 = vld [vmem:[#allocation104_spill] sm:$0xff]  ;;  %6914 = vmatpush.bf16.msrb.mxu0 %v11119_v11 }
 0x441   : > { %v14207_v43 = vpop.f32.mrf.mxu1  ;;  %v5564_v24 = vadd.f32 %v14172_v10, %v5524_v57  ;;  %v4228_v51 = vadd.f32 %v17276_v23, %v3835_v29  ;;  %7295 = vmatpush.bf16.msrb.mxu1 %v11148_v28  ;;  %v17280_v23 = vld [vmem:[#allocation38_spill] sm:$0xff] }
 0x442   : > { %v5710_v21 = vrot.slane %v5708_v38, 6  ;;  %v5713_v18 = vrot.slane %v5711_v59, 7  ;;  %v4785_v25 = vpop.f32.mrf.mxu3 }
 0x443   : > { %v5600_v60 = vmax.f32 %v5564_v24, 0.0  ;;  %v4872_v57 = vadd.f32 %v4785_v25, %v4487_v56  ;;  %v11118_v24 = vld [vmem:[%s16629_s5 + $0x88] sm:$0xff]  ;;  %v17279_v25 = vld [vmem:[#allocation108_spill] sm:$0xff] }
 0x444   : > { %5517 = vmatmul.bf16.gmra.mxu1 %v13787_v44  ;;  %v5714_v35 = vor.u32 %v5713_v18, %v5710_v21  ;;  %v11147_v56 = vld [vmem:[%s16629_s5 + $0xe8] sm:$0xff]  ;;  %v17278_v21 = vld [vmem:[#allocation57_spill] sm:$0xff]  ;;  %6915 = vmatpush.bf16.msrb.mxu0 %v11118_v24 }
 0x445   : > { %v5636_v5 = vsel %vm11841_vm8, %v5600_v60, 0.0  ;;  %v5265_v8 = vadd.f32 %v13897_v7, %v4872_v57  ;;  %v11107_v7 = vld [vmem:[%s16629_s5 + $0x30] sm:$0xff]  ;;  %v3836_v18 = vadd.f32 %v17278_v21, %v13855_v45  ;;  %7296 = vmatpush.bf16.msrb.mxu1 %v11147_v56  ;;  %v11117_v60 = vld [vmem:[%s16629_s5 + $0x80] sm:$0xff] }
 0x446   : > { %v6104_v59 = vsel %vm11873_vm12, %v5714_v35, %v6103_v55  ;;  %v5672_v17 = vpack.c.bf16 %v5636_v5, %v5636_v5  ;;  %v4488_v55 = vadd.f32 %v17279_v25, %v4228_v51  ;;  %v11146_v57 = vld [vmem:[%s16629_s5 + $0xe0] sm:$0xff]  ;;  %6687 = vmatpush.bf16.msrb.mxu3 %v11107_v7  ;;  %v17281_v45 = vld [vmem:[#allocation40_spill] sm:$0xff]  ;;  %v14253_v51 = vpop.f32.mrf.mxu2  ;;  %v5715_v24 = vrot.slane %v5714_v35, 4  ;;  %vm17296_vm12 = vmmov %vm17171_vm1 }
 0x447   : > { %6105 = vst [vmem:[#allocation3 + $0x8] sm:$0xe] %v6104_v59  ;;  %v5525_v44 = vadd.f32 %v14025_v34, %v5265_v8  ;;  %v3146_v38 = vadd.f32 %v17281_v45, %v17280_v23  ;;  %v14260_v7 = vpop.f32.mrf.mxu0  ;;  %vm17299_vm1 = vsmask.f32 7424 }
 0x448   : > { %v5717_v29 = vshrl.u32 %v5672_v17, 16  ;;  %v5720_v11 = vshll.u32 %v5672_v17, 16  ;;  %17282 = vst [vmem:[#allocation100_spill] sm:$0xff] %v14253_v51  ;;  %6916 = vmatpush.bf16.msrb.mxu0 %v11117_v60  ;;  %v14271_v60 = vld [vmem:[#allocation3] sm:$0xff]  }
 0x449   : > { %v14239_v28 = vpop.f32.mrf.mxu1  ;;  %v5565_v34 = vadd.f32 %v14172_v10, %v5525_v44  ;;  %v3452_v21 = vadd.f32 %v13861_v20, %v3146_v38  ;;  %7297 = vmatpush.bf16.msrb.mxu1 %v11146_v57  ;;  %17285 = vst [vmem:[#allocation33_spill] sm:$0xff] %v14260_v7  ;;  %v11286_v20 = vld [vmem:[#allocation3] sm:$0xf0] }
 0x44a   : > { %v5719_v17 = vrot.slane %v5717_v29, 6  ;;  %v5722_v5 = vrot.slane %v5720_v11, 7  ;;  %v4787_v8 = vpop.f32.mrf.mxu3  ;;  %v17284_v29 = vld [vmem:[#allocation109_spill] sm:$0xff]  ;;  %v17288_v57 = vld [vmem:[#allocation59_spill] sm:$0xff]  ;;  %v17289_v38 = vld [vmem:[#allocation114_spill] sm:$0xff] }
 0x44b   : > { %v5601_v59 = vmax.f32 %v5565_v34, 0.0  ;;  %v4873_v44 = vadd.f32 %v4787_v8, %v4488_v55  ;;  %v4229_v11 = vadd.f32 %v17284_v29, %v3836_v18  ;;  %v11145_v18 = vld [vmem:[%s16629_s5 + $0xd8] sm:$0xff] }
 0x44c   : > { %v5723_v56 = vor.u32 %v5722_v5, %v5719_v17  ;;  %v17287_v17 = vld [vmem:[#allocation113_spill] sm:$0xff]  ;;  %v11287_v5 = vld [vmem:[#allocation3] sm:$0xe] }
 0x44d   : > { %v5637_v50 = vsel %vm11887_vm14, %v5601_v59, 0.0  ;;  %v5266_v41 = vadd.f32 %v13907_v49, %v4873_v44  ;;  %v4489_v59 = vadd.f32 %v17289_v38, %v4229_v11  ;;  %v6310_v44 = vshll.u32 %v14271_v60, 16  ;;  %7298 = vmatpush.bf16.msrb.mxu1 %v11145_v18  ;;  %v17297_v11 = vld [vmem:[#allocation45_spill] sm:$0xff] }
 0x44e   : > { %v5724_v34 = vsel %vm11941_vm4, %v5715_v24, %v5723_v56  ;;  %v5673_v55 = vpack.c.bf16 %v5637_v50, %v5637_v50  ;;  %v11157_v50 = vld [vmem:[%s16629_s5 + $0x138] sm:$0xff] }
 0x44f   : > { %6106 = vst [vmem:[#allocation3 + $0xc] sm:$0xf] %v5724_v34  ;;  %v5526_v35 = vadd.f32 %v14031_v61, %v5266_v41  ;;  %4829 = vmatmul.bf16.gmra.mxu3 %v17287_v17  ;;  %v3837_v61 = vadd.f32 %v17288_v57, %v3452_v21  ;;  %7686 = vmatpush.bf16.msrb.mxu2 %v11157_v50  ;;  %v11144_v17 = vld [vmem:[%s16629_s5 + $0xd0] sm:$0xff]  ;;  %v6308_v21 = vshrl.u32 %v14271_v60, 16  ;;  %v6312_v57 = vrot.slane %v6310_v44, 1 }
 0x450   : > { %v5727_v8 = vshrl.u32 %v5673_v55, 16  ;;  %v5730_v45 = vshll.u32 %v5673_v55, 16  ;;  %v11288_v55 = vor.u32 %v11287_v5, %v11286_v20  ;;  %v14288_v5 = vpop.f32.mrf.mxu2 }
 0x451   : > { %v14266_v49 = vpop.f32.mrf.mxu1  ;;  %v5566_v41 = vadd.f32 %v14172_v10, %v5526_v35  ;;  %v5725_v35 = vrot.slane %v5723_v56, 4  ;;  %17292 = vst [vmem:[#allocation34_spill] sm:$0xff] %v14288_v5  ;;  %7299 = vmatpush.bf16.msrb.mxu1 %v11144_v17  ;;  %v6313_v44 = vor.u32 %v6312_v57, %v6308_v21  ;;  %v17295_v21 = vld [vmem:[#allocation117_spill] sm:$0xff] }
 0x452   : > { %v5729_v24 = vrot.slane %v5727_v8, 6  ;;  %v5732_v29 = vrot.slane %v5730_v45, 7  ;;  %v4790_v34 = vpop.f32.mrf.mxu3  ;;  %v17291_v45 = vld [vmem:[#allocation111_spill] sm:$0xff] }
 0x453   : > { %v5602_v25 = vmax.f32 %v5566_v41, 0.0  ;;  %v4874_v7 = vadd.f32 %v4790_v34, %v4489_v59  ;;  %v4230_v20 = vadd.f32 %v17291_v45, %v3837_v61  ;;  %v6806_v59 = vrot.slane %v11288_v55, 1  ;;  %v17294_v55 = vld [vmem:[#allocation61_spill] sm:$0xff] }
 0x454   : > { %v5733_v51 = vor.u32 %v5732_v29, %v5729_v24  ;;  %v3838_v17 = vadd.f32 %v17294_v55, %v13873_v54  ;;  %v17298_v54 = vld [vmem:[#allocation44_spill] sm:$0xff] }
 0x455   : > { %v5638_v38 = vsel %vm11952_vm7, %v5602_v25, 0.0  ;;  %v5267_v8 = vadd.f32 %v13922_v39, %v4874_v7  ;;  %v11143_v39 = vld [vmem:[%s16629_s5 + $0xc8] sm:$0xff]  ;;  %v14298_v25 = vpop.f32.mrf.mxu0  ;;  %v4490_v57 = vadd.f32 %v17295_v21, %v4230_v20  ;;  %v3151_v55 = vadd.f32 %v17298_v54, %v17297_v11 }
 0x456   : > { %v5734_v18 = vsel %vm11941_vm4, %v5725_v35, %v5733_v51  ;;  %v5674_v50 = vpack.c.bf16 %v5638_v38, %v5638_v38  ;;  %v14292_v41 = vld [vmem:[#allocation3 + $0x8] sm:$0xff]  ;;  %17293 = vst [vmem:[#allocation101_spill] sm:$0xff] %v14298_v25  ;;  %7300 = vmatpush.bf16.msrb.mxu1 %v11143_v39  ;;  %v5735_v20 = vrot.slane %v5733_v51, 4 }
 0x457   : > { %6107 = vst [vmem:[#allocation3 + $0x10] sm:$0xf] %v5734_v18  ;;  %v5527_v56 = vadd.f32 %v14037_v19, %v5267_v8  ;;  %v16778_v29 = vrot.slane %v14292_v41, 1  ;;  %v6315_v34 = vshll.u32 %v14292_v41, 16 }
 0x458   : > { %v5737_v7 = vshrl.u32 %v5674_v50, 16  ;;  %v5740_v61 = vshll.u32 %v5674_v50, 16  ;;  %v11142_v50 = vld [vmem:[%s16629_s5 + $0xc0] sm:$0xff] }
 0x459   : > { %v14300_v24 = vpop.f32.mrf.mxu1  ;;  %v5567_v19 = vadd.f32 %v14172_v10, %v5527_v56  ;;  %v6808_v45 = vsel %vm17296_vm12, %v6806_v59, %v16778_v29  ;;  %v14311_v18 = vrot.slane %v6315_v34, 1  ;;  %v3454_v59 = vadd.f32 %v13883_v47, %v3151_v55  ;;  %v17301_v29 = vld [vmem:[#allocation116_spill] sm:$0xff]  ;;  %vm17315_vm12 = vmmov %vm17299_vm1 }
 0x45a   : > { %v5739_v35 = vrot.slane %v5737_v7, 6  ;;  %v5742_v38 = vrot.slane %v5740_v61, 7  ;;  %v4792_v8 = vpop.f32.mrf.mxu3  ;;  %6917 = vmatmul.bf16.vlgmr.msrb.gmra.mxu0 %v6808_v45  ;;  %v4231_v5 = vadd.f32 %v17301_v29, %v3838_v17  ;;  %7301 = vmatpush.bf16.msrb.mxu1 %v11142_v50  ;;  %v14329_v47 = vld [vmem:[#allocation3 + $0xc] sm:$0xf]  ;;  %v17305_v50 = vld [vmem:[#allocation121_spill] sm:$0xff] }
 0x45b   : > { %v5603_v56 = vmax.f32 %v5567_v19, 0.0  ;;  %v4875_v25 = vadd.f32 %v4792_v8, %v4490_v57  ;;  %v6318_v61 = vsel %vm17299_vm1, %v6313_v44, %v14311_v18  ;;  %v17302_v57 = vld [vmem:[#allocation120_spill] sm:$0xff]  ;;  %v7044_v44 = vld [vmem:[#allocation3 + $0x8] sm:$0xe]  ;;  %17303 = vst [vmem:[#allocation106_spill] sm:$0xff] %v14329_v47  ;;  %v16779_v29 = vunpack.c.l.b16 %v14329_v47  ;;  %vm17325_vm1 = vmmov %vm17183_vm9 }
 0x45c   : > { %v5743_v7 = vor.u32 %v5742_v38, %v5739_v35  ;;  %6529 = vmatmul.bf16.vlgmr.msra.gmra.mxu2 %v6318_v61  ;;  %v14331_v35 = vpop.f32.mrf.mxu2  ;;  %v17304_v17 = vld [vmem:[#allocation63_spill] sm:$0xff]  ;;  %v4491_v54 = vadd.f32 %v17305_v50, %v4231_v5  ;;  %v17309_v5 = vld [vmem:[#allocation118_spill] sm:$0xff] }
 0x45d   : > { %v5639_v39 = vsel %vm11981_vm13, %v5603_v56, 0.0  ;;  %v5268_v21 = vadd.f32 %v13936_v6, %v4875_v25  ;;  %v3839_v8 = vadd.f32 %v17304_v17, %v3454_v59  ;;  %v14339_v55 = vpop.f32.mrf.mxu0  ;;  %v17310_v50 = vld [vmem:[#allocation66_spill] sm:$0xff] }
 0x45e   : > { %v5744_v11 = vsel %vm11941_vm4, %v5735_v20, %v5743_v7  ;;  %v5675_v19 = vpack.c.bf16 %v5639_v39, %v5639_v39  ;;  %17306 = vst [vmem:[#allocation55_spill] sm:$0xff] %v14339_v55  ;;  %v17316_v55 = vld [vmem:[#allocation122_spill] sm:$0xff] }
 0x45f   : > { %6108 = vst [vmem:[#allocation3 + $0x14] sm:$0xf] %v5744_v11  ;;  %v5528_v51 = vadd.f32 %v14046_v36, %v5268_v21  ;;  %4834 = vmatmul.bf16.gmra.mxu3 %v17302_v57  ;;  %v7135_v36 = vunpack.c.l.b16 %v7044_v44  ;;  %v4232_v44 = vadd.f32 %v17309_v5, %v3839_v8 }
 0x460   : > { %v5747_v38 = vshrl.u32 %v5675_v19, 16  ;;  %v5750_v6 = vshll.u32 %v5675_v19, 16  ;;  %v5745_v19 = vrot.slane %v5743_v7, 4 }
 0x461   : > { %v14333_v25 = vpop.f32.mrf.mxu1  ;;  %v5568_v45 = vadd.f32 %v14172_v10, %v5528_v51  ;;  %v14343_v11 = vpack.c.b16 %v16779_v29, %v7135_v36 }
 0x462   : > { %v5749_v56 = vrot.slane %v5747_v38, 6  ;;  %v5752_v20 = vrot.slane %v5750_v6, 7  ;;  %v4795_v61 = vpop.f32.mrf.mxu3 }
 0x463   : > { %v5604_v39 = vmax.f32 %v5568_v45, 0.0  ;;  %v4876_v21 = vadd.f32 %v4795_v61, %v4491_v54  ;;  %17307 = vst [vmem:[#allocation103_spill] sm:$0xff] %v14343_v11  ;;  %v3840_v54 = vadd.f32 %v17310_v50, %v13895_v63  ;;  %v7191_v36 = vrot.slane %v14343_v11, 1 }
 0x464   : > { %v5753_v57 = vor.u32 %v5752_v20, %v5749_v56  ;;  %v14367_v5 = vpop.f32.mrf.mxu2 }
 0x465   : > { %v5640_v59 = vsel %vm12028_vm10, %v5604_v39, 0.0  ;;  %v5269_v51 = vadd.f32 %v13947_v1, %v4876_v21  ;;  %v17311_v21 = vld [vmem:[#allocation125_spill] sm:$0xff] }
 0x466   : > { %v5754_v38 = vsel %vm11941_vm4, %v5745_v19, %v5753_v57  ;;  %v5676_v6 = vpack.c.bf16 %v5640_v59, %v5640_v59  ;;  %v14351_v17 = vld [vmem:[#allocation3 + $0x10] sm:$0xff]  ;;  %v4492_v19 = vadd.f32 %v17311_v21, %v4232_v44  ;;  %v6319_v59 = vshrl.u32 %v14292_v41, 16 }
 0x467   : > { %v14353_v45 = vld [vmem:[#allocation3 + $0x10] sm:$0xff]  ;;  %6109 = vst [vmem:[#allocation3 + $0x18] sm:$0xf] %v5754_v38  ;;  %v5529_v7 = vadd.f32 %v14052_v13, %v5269_v51  ;;  %v16783_v8 = vrot.slane %v14351_v17, 1  ;;  %v6323_v63 = vshll.u32 %v14351_v17, 16 }
 0x468   : > { %v5757_v56 = vshrl.u32 %v5676_v6, 16  ;;  %v5760_v1 = vshll.u32 %v5676_v6, 16  ;;  %v7192_v20 = vrot.slane %v14353_v45, 1  ;;  %v17312_v6 = vrot.slane %v14292_v41, 1  ;;  %v17329_v45 = vld [vmem:[#allocation130_spill] sm:$0xff] }
 0x469   : > { %v5569_v61 = vadd.f32 %v14172_v10, %v5529_v7  ;;  %v14362_v39 = vpop.f32.mrf.mxu1  ;;  %v6321_v29 = vor.u32 %v6319_v59, %v14311_v18  ;;  %v6325_v34 = vrot.slane %v6323_v63, 1  ;;  %v17317_v59 = vld [vmem:[#allocation129_spill] sm:$0xff] }
 0x46a   : > { %v5759_v13 = vrot.slane %v5757_v56, 6  ;;  %v5762_v51 = vrot.slane %v5760_v1, 7  ;;  %v4797_v38 = vpop.f32.mrf.mxu3  ;;  %v6810_v50 = vsel %vm17183_vm9, %v17312_v6, %v16783_v8  ;;  %v7193_v7 = vsel %vm17313_vm11, %v7191_v36, %v7192_v20  ;;  %v14378_v56 = vpop.f32.mrf.mxu0  ;;  %vm17326_vm9 = vmmov %vm17325_vm1 }
 0x46b   : > { %v5605_v44 = vmax.f32 %v5569_v61, 0.0  ;;  %v4877_v21 = vadd.f32 %v4797_v38, %v4492_v19  ;;  %6922 = vmatmul.bf16.gmra.mxu0 %v6810_v50  ;;  %7302 = vmatmul.bf16.vlgmr.msrb.gmra.mxu1 %v7193_v7  ;;  %v5755_v1 = vrot.slane %v5753_v57, 4  ;;  %v6326_v8 = vsel %vm17315_vm12, %v6321_v29, %v6325_v34  ;;  %v11106_v57 = vld [vmem:[%s16629_s5 + $0x28] sm:$0xff]  ;;  %v17318_v29 = vld [vmem:[#allocation69_spill] sm:$0xff] }
 0x46c   : > { %v5763_v47 = vor.u32 %v5762_v51, %v5759_v13  ;;  %v4233_v36 = vadd.f32 %v17316_v55, %v3840_v54  ;;  %6534 = vmatmul.bf16.gmra.mxu2 %v6326_v8  ;;  %v3841_v13 = vadd.f32 %v17318_v29, %v13903_v26  ;;  %v17319_v54 = vld [vmem:[#allocation134_spill] sm:$0xff]  ;;  %6688 = vmatpush.bf16.msrb.mxu3 %v11106_v57 }
 0x46d   : > { %v5641_v41 = vsel %vm12056_vm6, %v5605_v44, 0.0  ;;  %v5270_v6 = vadd.f32 %v13959_v0, %v4877_v21  ;;  %v14398_v21 = vpop.f32.mrf.mxu2 }
 0x46e   : > { %v5764_v61 = vsel %vm11941_vm4, %v5755_v1, %v5763_v47  ;;  %v5677_v19 = vpack.c.bf16 %v5641_v41, %v5641_v41  ;;  %v4493_v51 = vadd.f32 %v17319_v54, %v4233_v36  ;;  %v5765_v1 = vrot.slane %v5763_v47, 4  ;;  %v17322_v47 = vld [vmem:[#allocation71_spill] sm:$0xff] }
 0x46f   : > { %6110 = vst [vmem:[#allocation3 + $0x1c] sm:$0xf] %v5764_v61  ;;  %v5530_v18 = vadd.f32 %v14058_v58, %v5270_v6  ;;  %4839 = vmatmul.bf16.gmra.mxu3 %v17317_v59  ;;  %v3842_v29 = vadd.f32 %v17322_v47, %v13915_v42 }
 0x470   : > { %v5767_v63 = vshrl.u32 %v5677_v19, 16  ;;  %v5770_v0 = vshll.u32 %v5677_v19, 16  ;;  %v17321_v19 = vld [vmem:[#allocation126_spill] sm:$0xff] }
 0x471   : > { %v5570_v55 = vadd.f32 %v14172_v10, %v5530_v18  ;;  %v14396_v7 = vpop.f32.mrf.mxu1  ;;  %v4234_v18 = vadd.f32 %v17321_v19, %v3841_v13  ;;  %v4235_v6 = vadd.f32 %v17329_v45, %v3842_v29  ;;  %v17334_v45 = vld [vmem:[#allocation140_spill] sm:$0xff] }
 0x472   : > { %v5769_v8 = vrot.slane %v5767_v63, 6  ;;  %v5772_v38 = vrot.slane %v5770_v0, 7  ;;  %v4800_v50 = vpop.f32.mrf.mxu3  ;;  %v14404_v36 = vpop.f32.mrf.mxu0 }
 0x473   : > { %v5606_v58 = vmax.f32 %v5570_v55, 0.0  ;;  %v4878_v44 = vadd.f32 %v4800_v50, %v4493_v51  ;;  %v17323_v50 = vld [vmem:[#allocation141_spill] sm:$0xff] }
 0x474   : > { %v5773_v41 = vor.u32 %v5772_v38, %v5769_v8 }
 0x475   : > { %v5642_v61 = vsel %vm12105_vm2, %v5606_v58, 0.0  ;;  %v5271_v26 = vadd.f32 %v13973_v27, %v4878_v44  ;;  %v11156_v27 = vld [vmem:[%s16629_s5 + $0x130] sm:$0xff]  ;;  %v4494_v58 = vadd.f32 %v17323_v50, %v4234_v18  ;;  %v6327_v44 = vshrl.u32 %v14351_v17, 16 }
 0x476   : > { %v5774_v59 = vsel %vm11941_vm4, %v5765_v1, %v5773_v41  ;;  %v5678_v57 = vpack.c.bf16 %v5642_v61, %v5642_v61  ;;  %v14408_v63 = vld [vmem:[#allocation3 + $0x18] sm:$0xff]  ;;  %7687 = vmatpush.bf16.msrb.mxu2 %v11156_v27  ;;  %v5775_v27 = vrot.slane %v5773_v41, 4 }
 0x477   : > { %v14410_v0 = vld [vmem:[#allocation3 + $0x18] sm:$0xff]  ;;  %6111 = vst [vmem:[#allocation3 + $0x20] sm:$0xf] %v5774_v59  ;;  %v5531_v55 = vadd.f32 %v14066_v2, %v5271_v26  ;;  %v16784_v51 = vrot.slane %v14408_v63, 1  ;;  %v6331_v42 = vshll.u32 %v14408_v63, 16  ;;  %v17324_v26 = vrot.slane %v14351_v17, 1 }
 0x478   : > { %v5777_v13 = vshrl.u32 %v5678_v57, 16  ;;  %v5780_v54 = vshll.u32 %v5678_v57, 16  ;;  %v7194_v8 = vrot.slane %v14410_v0, 1  ;;  %v6329_v47 = vor.u32 %v6327_v44, %v6325_v34 }
 0x479   : > { %v5571_v38 = vadd.f32 %v14172_v10, %v5531_v55  ;;  %v6812_v19 = vsel %vm17325_vm1, %v17324_v26, %v16784_v51  ;;  %v6333_v55 = vrot.slane %v6331_v42, 1  ;;  %v14436_v17 = vpop.f32.mrf.mxu1 }
 0x47a   : > { %v5779_v2 = vrot.slane %v5777_v13, 6  ;;  %v5782_v1 = vrot.slane %v5780_v54, 7  ;;  %v4802_v61 = vpop.f32.mrf.mxu3  ;;  %v7195_v18 = vsel %vm17326_vm9, %v7192_v20, %v7194_v8  ;;  %v17327_v54 = vld [vmem:[#allocation17_spill] sm:$0xff]  ;;  %v14441_v20 = vpop.f32.mrf.mxu2 }
 0x47b   : > { %v5607_v59 = vmax.f32 %v5571_v38, 0.0  ;;  %v4879_v57 = vadd.f32 %v4802_v61, %v4494_v58  ;;  %6927 = vmatmul.bf16.gmra.mxu0 %v6812_v19  ;;  %7307 = vmatmul.bf16.gmra.mxu1 %v7195_v18  ;;  %vm17328_vm11 = vnez %v17327_v54  ;;  %v6334_v51 = vsel %vm17315_vm12, %v6329_v47, %v6333_v55  ;;  %v17330_v58 = vld [vmem:[#allocation133_spill] sm:$0xff]  ;;  %v14447_v44 = vpop.f32.mrf.mxu0  ;;  %vm17337_vm12 = vmmov %vm17326_vm9 }
 0x47c   : > { %v5783_v13 = vor.u32 %v5782_v1, %v5779_v2  ;;  %6539 = vmatmul.bf16.gmra.mxu2 %v6334_v51  ;;  %v17331_v2 = vld [vmem:[#allocation74_spill] sm:$0xff]  ;;  %v4495_v61 = vadd.f32 %v13746_v46, %v4235_v6  ;;  %v17335_v6 = vld [vmem:[#allocation76_spill] sm:$0xff]  ;;  %v17391_v54 = vld [vmem:[#allocation25_spill] sm:$0xff] }
 0x47d   : > { %v5643_v50 = vsel %vm17328_vm11, %v5607_v59, 0.0  ;;  %v5272_v26 = vadd.f32 %v13984_v53, %v4879_v57  ;;  %v3843_v1 = vadd.f32 %v17331_v2, %v13925_v12 }
 0x47e   : > { %v5784_v38 = vsel %vm11941_vm4, %v5775_v27, %v5783_v13  ;;  %v5679_v34 = vpack.c.bf16 %v5643_v50, %v5643_v50  ;;  %v5785_v47 = vrot.slane %v5783_v13, 4  ;;  %v17332_v27 = vld [vmem:[#allocation18_spill] sm:$0xff] }
 0x47f   : > { %6112 = vst [vmem:[#allocation3 + $0x24] sm:$0xf] %v5784_v38  ;;  %v5532_v41 = vadd.f32 %v14076_v30, %v5272_v26  ;;  %4844 = vmatmul.bf16.gmra.mxu3 %v17330_v58  ;;  %vm17333_vm1 = vnez %v17332_v27  ;;  %v4236_v38 = vadd.f32 %v17334_v45, %v3843_v1  ;;  %v3844_v58 = vadd.f32 %v17335_v6, %v13940_v40 }
 0x480   : > { %v5787_v42 = vshrl.u32 %v5679_v34, 16  ;;  %v5790_v53 = vshll.u32 %v5679_v34, 16 }
 0x481   : > { %v5572_v29 = vadd.f32 %v14172_v10, %v5532_v41  ;;  %v14465_v13 = vpop.f32.mrf.mxu1 }
 0x482   : > { %v5789_v19 = vrot.slane %v5787_v42, 6  ;;  %v5792_v18 = vrot.slane %v5790_v53, 7  ;;  %v4805_v59 = vpop.f32.mrf.mxu3  ;;  %v14468_v53 = vpop.f32.mrf.mxu2 }
 0x483   : > { %v5608_v51 = vmax.f32 %v5572_v29, 0.0  ;;  %v4880_v57 = vadd.f32 %v4805_v59, %v4495_v61  ;;  %v14476_v59 = vpop.f32.mrf.mxu0 }
 0x484   : > { %v5793_v30 = vor.u32 %v5792_v18, %v5789_v19  ;;  %v4496_v19 = vadd.f32 %v13763_v48, %v4236_v38  ;;  %v6335_v18 = vshrl.u32 %v14408_v63, 16 }
 0x485   : > { %v5644_v50 = vsel %vm17333_vm1, %v5608_v51, 0.0  ;;  %v5273_v26 = vadd.f32 %v13999_v31, %v4880_v57 }
 0x486   : > { %v5794_v12 = vsel %vm11941_vm4, %v5785_v47, %v5793_v30  ;;  %v5680_v34 = vpack.c.bf16 %v5644_v50, %v5644_v50  ;;  %v14459_v41 = vld [vmem:[#allocation3 + $0x20] sm:$0xff]  ;;  %v17336_v47 = vrot.slane %v14408_v63, 1  ;;  %v6337_v38 = vor.u32 %v6335_v18, %v6333_v55 }
 0x487   : > { %v14461_v46 = vld [vmem:[#allocation3 + $0x20] sm:$0xff]  ;;  %6113 = vst [vmem:[#allocation3 + $0x28] sm:$0xf] %v5794_v12  ;;  %v5533_v42 = vadd.f32 %v14089_v32, %v5273_v26  ;;  %v16786_v1 = vrot.slane %v14459_v41, 1  ;;  %v6339_v40 = vshll.u32 %v14459_v41, 16 }
 0x488   : > { %v5797_v31 = vshrl.u32 %v5680_v34, 16  ;;  %v5800_v2 = vshll.u32 %v5680_v34, 16  ;;  %v7196_v29 = vrot.slane %v14461_v46, 1  ;;  %v5795_v34 = vrot.slane %v5793_v30, 4  ;;  %v11105_v30 = vld [vmem:[%s16629_s5 + $0x20] sm:$0xff]  ;;  %v17343_v18 = vld [vmem:[#allocation79_spill] sm:$0xff] }
 0x489   : > { %v5573_v61 = vadd.f32 %v14172_v10, %v5533_v42  ;;  %v6814_v50 = vsel %vm17326_vm9, %v17336_v47, %v16786_v1  ;;  %v6341_v12 = vrot.slane %v6339_v40, 1  ;;  %v17338_v42 = vld [vmem:[#allocation19_spill] sm:$0xff]  ;;  %vm17340_vm9 = vsmask.f32 7424  ;;  %6689 = vmatpush.bf16.msrb.mxu3 %v11105_v30 }
 0x48a   : > { %v5799_v51 = vrot.slane %v5797_v31, 6  ;;  %v5802_v32 = vrot.slane %v5800_v2, 7  ;;  %v4807_v57 = vpop.f32.mrf.mxu3  ;;  %v7197_v48 = vsel %vm17337_vm12, %v7194_v8, %v7196_v29  ;;  %vm17339_vm5 = vnez %v17338_v42  ;;  %v17341_v47 = vld [vmem:[#allocation143_spill] sm:$0xff] }
 0x48b   : > { %v5609_v26 = vmax.f32 %v5573_v61, 0.0  ;;  %v4881_v45 = vadd.f32 %v4807_v57, %v4496_v19  ;;  %6932 = vmatmul.bf16.gmra.mxu0 %v6814_v50  ;;  %7312 = vmatmul.bf16.gmra.mxu1 %v7197_v48  ;;  %v6342_v2 = vsel %vm17340_vm9, %v6337_v38, %v6341_v12  ;;  %v4237_v1 = vadd.f32 %v17341_v47, %v3844_v58  ;;  %v17342_v61 = vld [vmem:[#allocation137_spill] sm:$0xff]  ;;  %v14502_v58 = vpop.f32.mrf.mxu1  ;;  %v14506_v57 = vpop.f32.mrf.mxu2 }
 0x48c   : > { %v5803_v6 = vor.u32 %v5802_v32, %v5799_v51  ;;  %6544 = vmatmul.bf16.gmra.mxu2 %v6342_v2  ;;  %v3845_v40 = vadd.f32 %v17343_v18, %v13945_v16  ;;  %v14508_v38 = vpop.f32.mrf.mxu0  ;;  %vm17348_vm9 = vcmask 1046528  }
 0x48d   : > { %v5645_v31 = vsel %vm17339_vm5, %v5609_v26, 0.0  ;;  %v5274_v63 = vadd.f32 %v14007_v15, %v4881_v45  ;;  %v4497_v32 = vadd.f32 %v14068_v3, %v4237_v1  ;;  %vm17349_vm0 = vmmov %vm17348_vm9 }
 0x48e   : > { %v5804_v0 = vsel %vm11941_vm4, %v5795_v34, %v5803_v6  ;;  %v5681_v8 = vpack.c.bf16 %v5645_v31, %v5645_v31  ;;  %v5805_v34 = vrot.slane %v5803_v6, 4  ;;  %v4238_v47 = vadd.f32 %v13752_v14, %v3845_v40 }
 0x48f   : > { %6114 = vst [vmem:[#allocation3 + $0x2c] sm:$0xf] %v5804_v0  ;;  %v5534_v55 = vadd.f32 %v14099_v33, %v5274_v63  ;;  %4849 = vmatmul.bf16.gmra.mxu3 %v17342_v61  ;;  %v17344_v63 = vld [vmem:[#allocation20_spill] sm:$0xff] }
 0x490   : > { %v5807_v19 = vshrl.u32 %v5681_v8, 16  ;;  %v5810_v15 = vshll.u32 %v5681_v8, 16  ;;  %vm17345_vm12 = vnez %v17344_v63  ;;  %v4498_v40 = vadd.f32 %v14084_v62, %v4238_v47  ;;  %v17373_v63 = vld [vmem:[#allocation151_spill] sm:$0xff] }
 0x491   : > { %v5574_v51 = vadd.f32 %v14172_v10, %v5534_v55  ;;  %v17346_v55 = vld [vmem:[#allocation81_spill] sm:$0xff] }
 0x492   : > { %v5809_v33 = vrot.slane %v5807_v19, 6  ;;  %v5812_v50 = vrot.slane %v5810_v15, 7  ;;  %v4810_v48 = vpop.f32.mrf.mxu3  ;;  %v3846_v61 = vadd.f32 %v17346_v55, %v13957_v9 }
 0x493   : > { %v5610_v26 = vmax.f32 %v5574_v51, 0.0  ;;  %v4882_v45 = vadd.f32 %v4810_v48, %v4497_v32  ;;  %v6343_v51 = vshrl.u32 %v14459_v41, 16  ;;  %v14544_v47 = vpop.f32.mrf.mxu2 }
 0x494   : > { %v5813_v31 = vor.u32 %v5812_v50, %v5809_v33  ;;  %v17347_v50 = vrot.slane %v14459_v41, 1 }
 0x495   : > { %v5646_v16 = vsel %vm17345_vm12, %v5610_v26, 0.0  ;;  %v5275_v2 = vadd.f32 %v14060_v22, %v4882_v45  ;;  %v11155_v22 = vld [vmem:[%s16629_s5 + $0x128] sm:$0xff]  ;;  %v14542_v26 = vpop.f32.mrf.mxu1  ;;  %vm17353_vm12 = vsmask.f32 7424 }
 0x496   : > { %v5814_v3 = vsel %vm11941_vm4, %v5805_v34, %v5813_v31  ;;  %v5682_v1 = vpack.c.bf16 %v5646_v16, %v5646_v16  ;;  %v14516_v0 = vld [vmem:[#allocation3 + $0x28] sm:$0xff]  ;;  %7688 = vmatpush.bf16.msrb.mxu2 %v11155_v22  ;;  %v6345_v16 = vor.u32 %v6343_v51, %v6341_v12 }
 0x497   : > { %v14518_v8 = vld [vmem:[#allocation3 + $0x28] sm:$0xff]  ;;  %6115 = vst [vmem:[#allocation3 + $0x30] sm:$0xf] %v5814_v3  ;;  %v5535_v6 = vadd.f32 %v14107_v37, %v5275_v2  ;;  %v6815_v19 = vrot.slane %v14516_v0, 1  ;;  %v6347_v9 = vshll.u32 %v14516_v0, 16  ;;  %v5815_v3 = vrot.slane %v5813_v31, 4 }
 0x498   : > { %v5817_v30 = vshrl.u32 %v5682_v1, 16  ;;  %v5820_v14 = vshll.u32 %v5682_v1, 16  ;;  %v7198_v15 = vrot.slane %v14518_v8, 1  ;;  %v17350_v1 = vld [vmem:[#allocation21_spill] sm:$0xff] }
 0x499   : > { %v5575_v18 = vadd.f32 %v14172_v10, %v5535_v6  ;;  %v6816_v48 = vsel %vm17348_vm9, %v17347_v50, %v6815_v19  ;;  %v6349_v2 = vrot.slane %v6347_v9, 1  ;;  %vm17351_vm9 = vnez %v17350_v1  ;;  %v17352_v6 = vld [vmem:[#allocation112_spill] sm:$0xff]  ;;  %v17369_v1 = vld [vmem:[#allocation23_spill] sm:$0xff] }
 0x49a   : > { %v5819_v37 = vrot.slane %v5817_v30, 6  ;;  %v5822_v32 = vrot.slane %v5820_v14, 7  ;;  %v4812_v33 = vpop.f32.mrf.mxu3  ;;  %v7199_v62 = vsel %vm17349_vm0, %v7196_v29, %v7198_v15  ;;  %v17354_v29 = vld [vmem:[#allocation147_spill] sm:$0xff]  ;;  %v14551_v14 = vpop.f32.mrf.mxu0 }
 0x49b   : > { %v5611_v45 = vmax.f32 %v5575_v18, 0.0  ;;  %v4883_v34 = vadd.f32 %v4812_v33, %v4498_v40  ;;  %6937 = vmatmul.bf16.gmra.mxu0 %v6816_v48  ;;  %7317 = vmatmul.bf16.gmra.mxu1 %v7199_v62  ;;  %v6350_v46 = vsel %vm17353_vm12, %v6345_v16, %v6349_v2  ;;  %v4239_v30 = vadd.f32 %v17354_v29, %v3846_v61  ;;  %v17355_v40 = vld [vmem:[#allocation138_spill] sm:$0xff]  ;;  %v17358_v61 = vld [vmem:[#allocation88_spill] sm:$0xff]  ;;  %v17361_v29 = vld [vmem:[#allocation85_spill] sm:$0xff] }
 0x49c   : > { %v5823_v41 = vor.u32 %v5822_v32, %v5819_v37  ;;  %6549 = vmatmul.bf16.gmra.mxu2 %v6350_v46  ;;  %v17356_v37 = vld [vmem:[#allocation171_spill] sm:$0xff]  ;;  %v17357_v32 = vld [vmem:[#allocation84_spill] sm:$0xff]  ;;  %vm17367_vm12 = vcmask 1046528  }
 0x49d   : > { %v5647_v55 = vsel %vm17351_vm9, %v5611_v45, 0.0  ;;  %v5276_v22 = vadd.f32 %v17352_v6, %v4883_v34  ;;  %v3847_v33 = vadd.f32 %v17357_v32, %v17356_v37  ;;  %v4499_v48 = vadd.f32 %v17358_v61, %v4239_v30  ;;  %v14561_v46 = vpop.f32.mrf.mxu1  ;;  %v14567_v37 = vpop.f32.mrf.mxu2  ;;  %v17364_v32 = vld [vmem:[#allocation87_spill] sm:$0xff]  ;;  %v17365_v61 = vld [vmem:[#allocation132_spill] sm:$0xff] }
 0x49e   : > { %v5824_v18 = vsel %vm11941_vm4, %v5815_v3, %v5823_v41  ;;  %v5683_v12 = vpack.c.bf16 %v5647_v55, %v5647_v55  ;;  %v5825_v55 = vrot.slane %v5823_v41, 4  ;;  %v17363_v41 = vld [vmem:[#allocation173_spill] sm:$0xff]  ;;  %vm17370_vm9 = vnez %v17369_v1  ;;  %v17380_v1 = vld [vmem:[#allocation127_spill] sm:$0xff] }
 0x49f   : > { %6116 = vst [vmem:[#allocation3 + $0x34] sm:$0xf] %v5824_v18  ;;  %v5536_v31 = vadd.f32 %v14115_v4, %v5276_v22  ;;  %4854 = vmatmul.bf16.gmra.mxu3 %v17355_v40  ;;  %v17359_v4 = vld [vmem:[#allocation22_spill] sm:$0xff] }
 0x4a0   : > { %v5827_v51 = vshrl.u32 %v5683_v12, 16  ;;  %v5830_v9 = vshll.u32 %v5683_v12, 16  ;;  %vm17360_vm0 = vnez %v17359_v4  ;;  %v17362_v12 = vld [vmem:[#allocation149_spill] sm:$0xff] }
 0x4a1   : > { %v5576_v50 = vadd.f32 %v14172_v10, %v5536_v31  ;;  %v4240_v40 = vadd.f32 %v17362_v12, %v3847_v33  ;;  %v4557_v4 = vld [vmem:[#allocation2 + $0xa0] sm:$0x3] }
 0x4a2   : > { %v5829_v62 = vrot.slane %v5827_v51, 6  ;;  %v5832_v45 = vrot.slane %v5830_v9, 7  ;;  %v4815_v34 = vpop.f32.mrf.mxu3 }
 0x4a3   : > { %v5612_v16 = vmax.f32 %v5576_v50, 0.0  ;;  %v4884_v3 = vadd.f32 %v4815_v34, %v4499_v48  ;;  %v3848_v50 = vadd.f32 %v17364_v32, %v17363_v41 }
 0x4a4   : > { %v5833_v6 = vor.u32 %v5832_v45, %v5829_v62  ;;  %v14578_v62 = vpop.f32.mrf.mxu0 }
 0x4a5   : > { %v5648_v22 = vsel %vm17360_vm0, %v5612_v16, 0.0  ;;  %v5277_v18 = vadd.f32 %v17361_v29, %v4884_v3  ;;  %v6351_v29 = vshrl.u32 %v14516_v0, 16  ;;  %vm17368_vm0 = vmmov %vm17367_vm12 }
 0x4a6   : > { %v5834_v30 = vsel %vm11941_vm4, %v5825_v55, %v5833_v6  ;;  %v5684_v31 = vpack.c.bf16 %v5648_v22, %v5648_v22  ;;  %v14571_v51 = vld [vmem:[#allocation3 + $0x30] sm:$0xff] }
 0x4a7   : > { %v14573_v9 = vld [vmem:[#allocation3 + $0x30] sm:$0xff]  ;;  %6117 = vst [vmem:[#allocation3 + $0x38] sm:$0xf] %v5834_v30  ;;  %v5537_v48 = vadd.f32 %v17365_v61, %v5277_v18  ;;  %v16788_v34 = vrot.slane %v14571_v51, 1  ;;  %v6355_v12 = vshll.u32 %v14571_v51, 16 }
 0x4a8   : > { %v5837_v45 = vshrl.u32 %v5684_v31, 16  ;;  %v5840_v33 = vshll.u32 %v5684_v31, 16  ;;  %v16789_v16 = vrot.slane %v14573_v9, 1  ;;  %v17366_v55 = vld [vmem:[#allocation124_spill] sm:$0xff] }
 0x4a9   : > { %v5577_v3 = vadd.f32 %v14172_v10, %v5537_v48  ;;  %v4500_v22 = vadd.f32 %v17366_v55, %v4240_v40  ;;  %v6818_v18 = vsel %vm17367_vm12, %v6815_v19, %v16788_v34  ;;  %v6353_v48 = vor.u32 %v6351_v29, %v6349_v2  ;;  %v17371_v19 = vld [vmem:[#allocation92_spill] sm:$0xff]  ;;  %v14606_v2 = vpop.f32.mrf.mxu1  ;;  %v17374_v29 = vld [vmem:[#allocation145_spill] sm:$0xff] }
 0x4aa   : > { %v5839_v41 = vrot.slane %v5837_v45, 6  ;;  %v5842_v30 = vrot.slane %v5840_v33, 7  ;;  %v4817_v32 = vpop.f32.mrf.mxu3  ;;  %v7201_v31 = vsel %vm17368_vm0, %v7198_v15, %v16789_v16  ;;  %v14596_v45 = vrot.slane %v6355_v12, 1  ;;  %v17378_v16 = vld [vmem:[#allocation24_spill] sm:$0xff] }
 0x4ab   : > { %v5613_v40 = vmax.f32 %v5577_v3, 0.0  ;;  %v4885_v61 = vadd.f32 %v4817_v32, %v4500_v22  ;;  %6942 = vmatmul.bf16.gmra.mxu0 %v6818_v18  ;;  %7322 = vmatmul.bf16.gmra.mxu1 %v7201_v31  ;;  %v5835_v33 = vrot.slane %v5833_v6, 4  ;;  %vm17372_vm12 = vsmask.f32 7424  ;;  %v17375_v32 = vld [vmem:[#allocation64_spill] sm:$0xff]  ;;  %v17376_v18 = vld [vmem:[#allocation89_spill] sm:$0xff] }
 0x4ac   : > { %v5843_v55 = vor.u32 %v5842_v30, %v5839_v41  ;;  %v6358_v8 = vsel %vm17372_vm12, %v6353_v48, %v14596_v45  ;;  %v4241_v15 = vadd.f32 %v17373_v63, %v3848_v50  ;;  %v4648_v12 = vunpack.c.l.b16 %v4557_v4  ;;  %v11104_v41 = vld [vmem:[%s16629_s5 + $0x18] sm:$0xff]  ;;  %v14613_v30 = vpop.f32.mrf.mxu2 }
 0x4ad   : > { %v5649_v0 = vsel %vm17370_vm9, %v5613_v40, 0.0  ;;  %v5278_v34 = vadd.f32 %v17371_v19, %v4885_v61  ;;  %6554 = vmatmul.bf16.gmra.mxu2 %v6358_v8  ;;  %v3849_v31 = vadd.f32 %v17376_v18, %v17375_v32  ;;  %v17377_v61 = vld [vmem:[#allocation131_spill] sm:$0xff]  ;;  %6690 = vmatpush.bf16.msrb.mxu3 %v11104_v41  ;;  %vm17379_vm0 = vnez %v17378_v16  ;;  %v17381_v18 = vld [vmem:[#allocation152_spill] sm:$0xff] }
 0x4ae   : > { %v5844_v3 = vsel %vm11941_vm4, %v5835_v33, %v5843_v55  ;;  %v5685_v22 = vpack.c.bf16 %v5649_v0, %v5649_v0  ;;  %v4501_v48 = vadd.f32 %v17377_v61, %v4241_v15  ;;  %v4667_v8 = vpack.c.b16 %v4648_v12, %v4648_v12 }
 0x4af   : > { %6118 = vst [vmem:[#allocation3 + $0x3c] sm:$0xf] %v5844_v3  ;;  %v5538_v6 = vadd.f32 %v14138_v52, %v5278_v34  ;;  %4859 = vmatmul.bf16.gmra.mxu3 %v17374_v29  ;;  %v14619_v52 = vpop.f32.mrf.mxu0  ;;  %v5845_v3 = vrot.slane %v5843_v55, 4  ;;  %v17384_v55 = vld [vmem:[#allocation94_spill] sm:$0xff]  ;;  %vm17387_vm12 = vcmask 1046528  }
 0x4b0   : > { %v5847_v63 = vshrl.u32 %v5685_v22, 16  ;;  %v5850_v50 = vshll.u32 %v5685_v22, 16  ;;  %vm17394_vm9 = vsmask.f32 7424 }
 0x4b1   : > { %v5578_v40 = vadd.f32 %v14172_v10, %v5538_v6  ;;  %v4242_v6 = vadd.f32 %v17381_v18, %v3849_v31 }
 0x4b2   : > { %v5849_v34 = vrot.slane %v5847_v63, 6  ;;  %v5852_v4 = vrot.slane %v5850_v50, 7  ;;  %v4820_v33 = vpop.f32.mrf.mxu3  ;;  %v17382_v50 = vld [vmem:[#allocation90_spill] sm:$0xff] }
 0x4b3   : > { %v5614_v0 = vmax.f32 %v5578_v40, 0.0  ;;  %v4886_v19 = vadd.f32 %v4820_v33, %v4501_v48  ;;  %v17383_v40 = vld [vmem:[#allocation93_spill] sm:$0xff] }
 0x4b4   : > { %v5853_v29 = vor.u32 %v5852_v4, %v5849_v34  ;;  %v3850_v12 = vadd.f32 %v17383_v40, %v17382_v50  ;;  %v4703_v34 = vrot.slane %v4667_v8, 2 }
 0x4b5   : > { %v5650_v22 = vsel %vm17379_vm0, %v5614_v0, 0.0  ;;  %v5279_v32 = vadd.f32 %v17380_v1, %v4886_v19  ;;  %v11103_v1 = vld [vmem:[%s16629_s5 + $0x10] sm:$0xff]  ;;  %v14639_v19 = vpop.f32.mrf.mxu1  ;;  %vm17389_vm0 = vmmov %vm17387_vm12 }
 0x4b6   : > { %v5854_v15 = vsel %vm11941_vm4, %v5845_v3, %v5853_v29  ;;  %v5686_v41 = vpack.c.bf16 %v5650_v22, %v5650_v22  ;;  %v14627_v61 = vld [vmem:[#allocation3 + $0x38] sm:$0xff]  ;;  %v17385_v22 = vld [vmem:[#allocation136_spill] sm:$0xff]  ;;  %6691 = vmatpush.bf16.msrb.mxu3 %v11103_v1  ;;  %v5855_v27 = vrot.slane %v5853_v29, 4 }
 0x4b7   : > { %v14629_v63 = vld [vmem:[#allocation3 + $0x38] sm:$0xff]  ;;  %6119 = vst [vmem:[#allocation3 + $0x40] sm:$0xf] %v5854_v15  ;;  %v5539_v48 = vadd.f32 %v17384_v55, %v5279_v32  ;;  %v16790_v33 = vrot.slane %v14627_v61, 1  ;;  %v4502_v18 = vadd.f32 %v17385_v22, %v4242_v6  ;;  %v6359_v15 = vshrl.u32 %v14571_v51, 16  ;;  %v11102_v32 = vld [vmem:[%s16629_s5 + $0x8] sm:$0xff]  ;;  %v14663_v42 = vpop.f32.mrf.mxu0 }
 0x4b8   : > { %v5857_v31 = vshrl.u32 %v5686_v41, 16  ;;  %v5860_v4 = vshll.u32 %v5686_v41, 16  ;;  %v16791_v0 = vrot.slane %v14629_v63, 1  ;;  %v6363_v8 = vshll.u32 %v14627_v61, 16  ;;  %v14648_v41 = vpop.f32.mrf.mxu2  ;;  %17390 = vst [vmem:[#allocation104_spill] sm:$0xff] %v14663_v42 }
 0x4b9   : > { %v5579_v3 = vadd.f32 %v14172_v10, %v5539_v48  ;;  %v17386_v10 = vrot.slane %v14571_v51, 1  ;;  %v17388_v48 = vrot.slane %v14573_v9, 1 }
 0x4ba   : > { %v5859_v50 = vrot.slane %v5857_v31, 6  ;;  %v5862_v40 = vrot.slane %v5860_v4, 7  ;;  %v4822_v55 = vpop.f32.mrf.mxu3  ;;  %v6361_v31 = vor.u32 %v6359_v15, %v14596_v45  ;;  %v14661_v4 = vrot.slane %v6363_v8, 1  ;;  %6692 = vmatpush.bf16.msrb.mxu3 %v11102_v32  ;;  %v17396_v8 = vld [vmem:[#allocation142_spill] sm:$0xff] }
 0x4bb   : > { %v6820_v6 = vsel %vm17387_vm12, %v17386_v10, %v16790_v33  ;;  %v7203_v1 = vsel %vm17389_vm0, %v17388_v48, %v16791_v0  ;;  %v5615_v22 = vmax.f32 %v5579_v3, 0.0  ;;  %v4887_v16 = vadd.f32 %v4822_v55, %v4502_v18  ;;  %v17393_v33 = vld [vmem:[#allocation86_spill] sm:$0xff]  ;;  %v17407_v0 = vld [vmem:[#allocation156_spill] sm:$0xff] }
 0x4bc   : > { %6947 = vmatmul.bf16.gmra.mxu0 %v6820_v6  ;;  %7327 = vmatmul.bf16.gmra.mxu1 %v7203_v1  ;;  %v5863_v51 = vor.u32 %v5862_v40, %v5859_v50  ;;  %vm17392_vm12 = vnez %v17391_v54  ;;  %v6366_v9 = vsel %vm17394_vm9, %v6361_v31, %v14661_v4  ;;  %v17395_v3 = vld [vmem:[#allocation154_spill] sm:$0xff]  ;;  %v17397_v55 = vrot.slane %v17396_v8, 2  ;;  %v17399_v50 = vld [vmem:[#allocation52_spill] sm:$0xff] }
 0x4bd   : > { %v5651_v10 = vsel %vm17392_vm12, %v5615_v22, 0.0  ;;  %v5280_v11 = vadd.f32 %v17393_v33, %v4887_v16  ;;  %v4243_v18 = vadd.f32 %v17395_v3, %v3850_v12  ;;  %6559 = vmatmul.bf16.gmra.mxu2 %v6366_v9  ;;  %vm17398_vm0 = vcmask 1045504   ;;  %v11154_v16 = vld [vmem:[%s16629_s5 + $0x120] sm:$0xff]  ;;  %v17401_v6 = vld [vmem:[#allocation96_spill] sm:$0xff]  ;;  %v14692_v3 = vpop.f32.mrf.mxu1 }
 0x4be   : > { %v5864_v45 = vsel %vm11941_vm4, %v5855_v27, %v5863_v51  ;;  %v5687_v15 = vpack.c.bf16 %v5651_v10, %v5651_v10  ;;  %v4704_v29 = vsel %vm17398_vm0, %v17397_v55, %v4703_v34  ;;  %v11101_v12 = vld [vmem:[%s16629_s5] sm:$0xff]  ;;  %7689 = vmatpush.bf16.msrb.mxu2 %v11154_v16  ;;  %v5865_v55 = vrot.slane %v5863_v51, 4 }
 0x4bf   : > { %6120 = vst [vmem:[#allocation3 + $0x44] sm:$0xf] %v5864_v45  ;;  %v5540_v40 = vadd.f32 %v17399_v50, %v5280_v11  ;;  %4864 = vmatmul.bf16.gmra.mxu3 %v4704_v29  ;;  %v17400_v32 = vld [vmem:[#allocation70_spill] sm:$0xff]  ;;  %v14688_v34 = vld [vmem:[%s16628_s4] ss:$0 sm:$0xff]  ;;  %v14700_v16 = vpop.f32.mrf.mxu0  ;;  %vm17413_vm0 = vcmask 1046528  }
 0x4c0   : > { %v5867_v33 = vshrl.u32 %v5687_v15, 16  ;;  %v5870_v27 = vshll.u32 %v5687_v15, 16  ;;  %v3851_v48 = vadd.f32 %v17401_v6, %v17400_v32  ;;  %v17402_v1 = vld [vmem:[#allocation30_spill] sm:$0xff]  ;;  %6693 = vmatpush.bf16.msrb.mxu3 %v11101_v12  ;;  %v14694_v8 = vpop.f32.mrf.mxu2  ;;  %v17406_v6 = vld [vmem:[#allocation175_spill] sm:$0xff]  ;;  %17408 = vst [vmem:[#allocation57_spill] sm:$0xff] %v14700_v16 }
 0x4c1   : > { %v5580_v11 = vadd.f32 %v14688_v34, %v5540_v40  ;;  %v4503_v22 = vadd.f32 %v17402_v1, %v4243_v18  ;;  %17403 = vst [vmem:[#allocation9_spill] sm:$0xff] %v14694_v8  ;;  %v17404_v50 = vld [vmem:[#allocation26_spill] sm:$0xff]  ;;  %v17409_v1 = vld [vmem:[#allocation60_spill] sm:$0xff] }
 0x4c2   : > { %v5869_v31 = vrot.slane %v5867_v33, 6  ;;  %v5872_v10 = vrot.slane %v5870_v27, 7  ;;  %v4825_v9 = vpop.f32.mrf.mxu3  ;;  %vm17405_vm9 = vnez %v17404_v50  ;;  %v4244_v18 = vadd.f32 %v17407_v0, %v3851_v48  ;;  %v17410_v51 = vld [vmem:[#allocation102_spill] sm:$0xff] }
 0x4c3   : > { %v5616_v45 = vmax.f32 %v5580_v11, 0.0  ;;  %v4888_v15 = vadd.f32 %v4825_v9, %v4503_v22  ;;  %v3852_v22 = vadd.f32 %v17410_v51, %v17409_v1  ;;  %v17420_v8 = vld [vmem:[#allocation158_spill] sm:$0xff] }
 0x4c4   : > { %v5873_v29 = vor.u32 %v5872_v10, %v5869_v31 }
 0x4c5   : > { %v5652_v32 = vsel %vm17405_vm9, %v5616_v45, 0.0  ;;  %v5281_v40 = vadd.f32 %v17406_v6, %v4888_v15  ;;  %v17411_v15 = vld [vmem:[#allocation99_spill] sm:$0xff]  ;;  %vm17415_vm9 = vmmov %vm17413_vm0  ;;  %v14728_v16 = vpop.f32.mrf.mxu1 }
 0x4c6   : > { %v5874_v12 = vsel %vm11941_vm4, %v5865_v55, %v5873_v29  ;;  %v5688_v33 = vpack.c.bf16 %v5652_v32, %v5652_v32  ;;  %v14704_v27 = vld [vmem:[#allocation3 + $0x40] sm:$0xff]  ;;  %v4504_v55 = vadd.f32 %v17411_v15, %v4244_v18  ;;  %v6367_v32 = vshrl.u32 %v14627_v61, 16 }
 0x4c7   : > { %v14706_v11 = vld [vmem:[#allocation3 + $0x40] sm:$0xff]  ;;  %6121 = vst [vmem:[#allocation3 + $0x48] sm:$0xf] %v5874_v12  ;;  %v5541_v31 = vadd.f32 %v14207_v43, %v5281_v40  ;;  %v16792_v0 = vrot.slane %v14704_v27, 1  ;;  %v6371_v6 = vshll.u32 %v14704_v27, 16  ;;  %v17412_v43 = vrot.slane %v14627_v61, 1 }
 0x4c8   : > { %v5877_v10 = vshrl.u32 %v5688_v33, 16  ;;  %v5880_v9 = vshll.u32 %v5688_v33, 16  ;;  %v16793_v48 = vrot.slane %v14706_v11, 1  ;;  %v17414_v12 = vrot.slane %v14629_v63, 1  ;;  %v17416_v61 = vld [vmem:[#allocation27_spill] sm:$0xff] }
 0x4c9   : > { %v5581_v45 = vadd.f32 %v14688_v34, %v5541_v31  ;;  %v6822_v40 = vsel %vm17413_vm0, %v17412_v43, %v16792_v0  ;;  %v6369_v31 = vor.u32 %v6367_v32, %v14661_v4  ;;  %vm17417_vm12 = vnez %v17416_v61  ;;  %v17418_v0 = vld [vmem:[#allocation29_spill] sm:$0xff]  ;;  %v17423_v32 = vld [vmem:[#allocation98_spill] sm:$0xff] }
 0x4ca   : > { %v5879_v50 = vrot.slane %v5877_v10, 6  ;;  %v5882_v54 = vrot.slane %v5880_v9, 7  ;;  %v4827_v1 = vpop.f32.mrf.mxu3  ;;  %v7205_v33 = vsel %vm17415_vm9, %v17414_v12, %v16793_v48  ;;  %v6373_v10 = vrot.slane %v6371_v6, 1  ;;  %v17424_v6 = vld [vmem:[#allocation107_spill] sm:$0xff] }
 0x4cb   : > { %v5617_v18 = vmax.f32 %v5581_v45, 0.0  ;;  %v4889_v51 = vadd.f32 %v4827_v1, %v4504_v55  ;;  %v5875_v9 = vrot.slane %v5873_v29, 4  ;;  %vm17419_vm0 = vsmask.f32 7424  ;;  %v14735_v45 = vpop.f32.mrf.mxu2  ;;  %v14741_v29 = vpop.f32.mrf.mxu0 }
 0x4cc   : > { %6952 = vmatmul.bf16.gmra.mxu0 %v6822_v40  ;;  %7332 = vmatmul.bf16.gmra.mxu1 %v7205_v33  ;;  %v5883_v15 = vor.u32 %v5882_v54, %v5879_v50  ;;  %v6374_v63 = vsel %vm17419_vm0, %v6369_v31, %v6373_v10  ;;  %v4245_v12 = vadd.f32 %v17420_v8, %v3852_v22  ;;  %v17425_v22 = vld [vmem:[#allocation97_spill] sm:$0xff]  ;;  %vm17436_vm0 = vcmask 1046528  }
 0x4cd   : > { %v5653_v43 = vsel %vm17417_vm12, %v5617_v18, 0.0  ;;  %v5282_v42 = vadd.f32 %v17418_v0, %v4889_v51  ;;  %17421 = vst [vmem:[#allocation108_spill] sm:$0xff] %v14735_v45  ;;  %6564 = vmatmul.bf16.gmra.mxu2 %v6374_v63  ;;  %v3853_v1 = vadd.f32 %v17424_v6, %v17423_v32  ;;  %v17428_v63 = vld [vmem:[#allocation95_spill] sm:$0xff] }
 0x4ce   : > { %v5884_v55 = vsel %vm11941_vm4, %v5875_v9, %v5883_v15  ;;  %v5689_v4 = vpack.c.bf16 %v5653_v43, %v5653_v43  ;;  %17422 = vst [vmem:[#allocation38_spill] sm:$0xff] %v14741_v29  ;;  %v4505_v40 = vadd.f32 %v17425_v22, %v4245_v12  ;;  %v5885_v43 = vrot.slane %v5883_v15, 4  ;;  %v14759_v15 = vpop.f32.mrf.mxu1 }
 0x4cf   : > { %6122 = vst [vmem:[#allocation3 + $0x4c] sm:$0xf] %v5884_v55  ;;  %v5542_v54 = vadd.f32 %v14239_v28, %v5282_v42  ;;  %6694 = vmatmul.bf16.vlgmr.msrb.gmra.mxu3 %v14271_v60  ;;  %v17426_v42 = vld [vmem:[#allocation28_spill] sm:$0xff] }
 0x4d0   : > { %v5887_v50 = vshrl.u32 %v5689_v4, 16  ;;  %v5890_v0 = vshll.u32 %v5689_v4, 16  ;;  %vm17427_vm9 = vnez %v17426_v42  ;;  %v17429_v4 = vld [vmem:[#allocation160_spill] sm:$0xff]  ;;  %17432 = vst [vmem:[#allocation40_spill] sm:$0xff] %v14759_v15 }
 0x4d1   : > { %v5582_v8 = vadd.f32 %v14688_v34, %v5542_v54  ;;  %v4246_v48 = vadd.f32 %v17429_v4, %v3853_v1 }
 0x4d2   : > { %v5889_v33 = vrot.slane %v5887_v50, 6  ;;  %v5892_v18 = vrot.slane %v5890_v0, 7  ;;  %v4830_v51 = vpop.f32.mrf.mxu3  ;;  %v17430_v50 = vld [vmem:[#allocation73_spill] sm:$0xff]  ;;  %v17431_v0 = vld [vmem:[#allocation110_spill] sm:$0xff] }
 0x4d3   : > { %v5618_v31 = vmax.f32 %v5582_v8, 0.0  ;;  %v4890_v9 = vadd.f32 %v4830_v51, %v4505_v40  ;;  %v3854_v8 = vadd.f32 %v17431_v0, %v17430_v50  ;;  %v14762_v40 = vpop.f32.mrf.mxu2  ;;  %v17437_v0 = vrot.slane %v14706_v11, 1 }
 0x4d4   : > { %v5893_v28 = vor.u32 %v5892_v18, %v5889_v33 }
 0x4d5   : > { %v5654_v60 = vsel %vm17427_vm9, %v5618_v31, 0.0  ;;  %v5283_v55 = vadd.f32 %v17428_v63, %v4890_v9  ;;  %v6375_v63 = vshrl.u32 %v14704_v27, 16  ;;  %vm17438_vm9 = vmmov %vm17436_vm0 }
 0x4d6   : > { %v5894_v32 = vsel %vm11941_vm4, %v5885_v43, %v5893_v28  ;;  %v5690_v54 = vpack.c.bf16 %v5654_v60, %v5654_v60  ;;  %v14753_v6 = vld [vmem:[#allocation3 + $0x48] sm:$0xff] }
 0x4d7   : > { %v14755_v12 = vld [vmem:[#allocation3 + $0x48] sm:$0xff]  ;;  %6123 = vst [vmem:[#allocation3 + $0x50] sm:$0xf] %v5894_v32  ;;  %v5543_v22 = vadd.f32 %v14266_v49, %v5283_v55  ;;  %v14764_v18 = vpop.f32.mrf.mxu0  ;;  %v16794_v51 = vrot.slane %v14753_v6, 1  ;;  %v6379_v4 = vshll.u32 %v14753_v6, 16  ;;  %v6377_v42 = vor.u32 %v6375_v63, %v6373_v10 }
 0x4d8   : > { %v5897_v33 = vshrl.u32 %v5690_v54, 16  ;;  %v5900_v1 = vshll.u32 %v5690_v54, 16  ;;  %17433 = vst [vmem:[#allocation109_spill] sm:$0xff] %v14764_v18  ;;  %v16795_v31 = vrot.slane %v14755_v12, 1  ;;  %v17434_v43 = vld [vmem:[#allocation100_spill] sm:$0xff]  ;;  %v17435_v54 = vrot.slane %v14704_v27, 1 }
 0x4d9   : > { %v5583_v9 = vadd.f32 %v14688_v34, %v5543_v22  ;;  %v4506_v60 = vadd.f32 %v17434_v43, %v4246_v48  ;;  %v17439_v18 = vld [vmem:[#allocation31_spill] sm:$0xff]  ;;  %v17441_v27 = vld [vmem:[#allocation54_spill] sm:$0xff] }
 0x4da   : > { %v5899_v32 = vrot.slane %v5897_v33, 6  ;;  %v5902_v49 = vrot.slane %v5900_v1, 7  ;;  %v4832_v55 = vpop.f32.mrf.mxu3  ;;  %v6824_v50 = vsel %vm17436_vm0, %v17435_v54, %v16794_v51  ;;  %v7207_v22 = vsel %vm17438_vm9, %v17437_v0, %v16795_v31  ;;  %v17443_v51 = vld [vmem:[#allocation161_spill] sm:$0xff] }
 0x4db   : > { %v5619_v48 = vmax.f32 %v5583_v9, 0.0  ;;  %v4891_v43 = vadd.f32 %v4832_v55, %v4506_v60  ;;  %v6381_v33 = vrot.slane %v6379_v4, 1  ;;  %v5895_v1 = vrot.slane %v5893_v28, 4  ;;  %v11417_v60 = vld [vmem:[#allocation3 + $0x8] sm:$0xff]  ;;  %v11153_v28 = vld [vmem:[%s16629_s5 + $0x118] sm:$0xff] }
 0x4dc   : > { %6957 = vmatmul.bf16.gmra.mxu0 %v6824_v50  ;;  %7337 = vmatmul.bf16.gmra.mxu1 %v7207_v22  ;;  %v5903_v61 = vor.u32 %v5902_v49, %v5899_v32  ;;  %vm17440_vm12 = vnez %v17439_v18  ;;  %vm17442_vm0 = vsmask.f32 7424  ;;  %v4247_v45 = vadd.f32 %v17443_v51, %v3854_v8  ;;  %v17445_v8 = vld [vmem:[#allocation75_spill] sm:$0xff] }
 0x4dd   : > { %v5655_v29 = vsel %vm17440_vm12, %v5619_v48, 0.0  ;;  %v5284_v15 = vadd.f32 %v17441_v27, %v4891_v43  ;;  %v6382_v54 = vsel %vm17442_vm0, %v6377_v42, %v6381_v33  ;;  %v17446_v51 = vld [vmem:[#allocation115_spill] sm:$0xff]  ;;  %7690 = vmatpush.bf16.msrb.mxu2 %v11153_v28  ;;  %vm17457_vm0 = vcmask 1046528  }
 0x4de   : > { %v5904_v11 = vsel %vm11941_vm4, %v5895_v1, %v5903_v61  ;;  %v5691_v9 = vpack.c.bf16 %v5655_v29, %v5655_v29  ;;  %6569 = vmatmul.bf16.gmra.mxu2 %v6382_v54  ;;  %v3855_v49 = vadd.f32 %v17446_v51, %v17445_v8  ;;  %v14799_v29 = vpop.f32.mrf.mxu1  ;;  %v5905_v1 = vrot.slane %v5903_v61, 4  ;;  %v17448_v54 = vld [vmem:[#allocation32_spill] sm:$0xff]  ;;  %v17451_v8 = vld [vmem:[#allocation162_spill] sm:$0xff]  ;;  %v17460_v18 = vld [vmem:[#allocation35_spill] sm:$0xff] }
 0x4df   : > { %6124 = vst [vmem:[#allocation3 + $0x54] sm:$0xf] %v5904_v11  ;;  %v5544_v10 = vadd.f32 %v14300_v24, %v5284_v15  ;;  %6699 = vmatmul.bf16.gmra.mxu3 %v11417_v60  ;;  %v14793_v32 = vpop.f32.mrf.mxu2  ;;  %v14795_v42 = vpop.f32.mrf.mxu0  ;;  %v17447_v24 = vld [vmem:[#allocation34_spill] sm:$0xff]  ;;  %vm17449_vm9 = vnez %v17448_v54  ;;  %vm17461_vm12 = vnez %v17460_v18  ;;  %v17480_v18 = vld [vmem:[#allocation165_spill] sm:$0xff] }
 0x4e0   : > { %v5907_v63 = vshrl.u32 %v5691_v9, 16  ;;  %v5910_v4 = vshll.u32 %v5691_v9, 16  ;;  %17444 = vst [vmem:[#allocation11_spill] sm:$0xff] %v14795_v42  ;;  %v4507_v15 = vadd.f32 %v17447_v24, %v4247_v45  ;;  %v17450_v9 = vld [vmem:[#allocation33_spill] sm:$0xff]  ;;  %v4248_v51 = vadd.f32 %v17451_v8, %v3855_v49 }
 0x4e1   : > { %v5584_v55 = vadd.f32 %v14688_v34, %v5544_v10  ;;  %v17456_v8 = vrot.slane %v14753_v6, 1 }
 0x4e2   : > { %v5909_v50 = vrot.slane %v5907_v63, 6  ;;  %v5912_v0 = vrot.slane %v5910_v4, 7  ;;  %v4835_v22 = vpop.f32.mrf.mxu3  ;;  %v17452_v63 = vld [vmem:[#allocation62_spill] sm:$0xff]  ;;  %v17453_v4 = vld [vmem:[#allocation119_spill] sm:$0xff] }
 0x4e3   : > { %v5620_v48 = vmax.f32 %v5584_v55, 0.0  ;;  %v4892_v43 = vadd.f32 %v4835_v22, %v4507_v15  ;;  %v3856_v55 = vadd.f32 %v17453_v4, %v17452_v63  ;;  %v17458_v63 = vrot.slane %v14755_v12, 1 }
 0x4e4   : > { %v5913_v27 = vor.u32 %v5912_v0, %v5909_v50 }
 0x4e5   : > { %v5656_v11 = vsel %vm17449_vm9, %v5620_v48, 0.0  ;;  %v5285_v60 = vadd.f32 %v17450_v9, %v4892_v43  ;;  %vm17459_vm9 = vmmov %vm17457_vm0 }
 0x4e6   : > { %v5914_v10 = vsel %vm11941_vm4, %v5905_v1, %v5913_v27  ;;  %v5692_v31 = vpack.c.bf16 %v5656_v11, %v5656_v11  ;;  %v14809_v45 = vld [vmem:[#allocation3 + $0x50] sm:$0xff]  ;;  %v4508_v1 = vadd.f32 %v14331_v35, %v4248_v51  ;;  %v6383_v11 = vshrl.u32 %v14753_v6, 16 }
 0x4e7   : > { %v14811_v28 = vld [vmem:[#allocation3 + $0x50] sm:$0xff]  ;;  %6125 = vst [vmem:[#allocation3 + $0x58] sm:$0xf] %v5914_v10  ;;  %v5545_v61 = vadd.f32 %v14333_v25, %v5285_v60  ;;  %v14816_v50 = vpop.f32.mrf.mxu2  ;;  %v16796_v49 = vrot.slane %v14809_v45, 1  ;;  %v6387_v25 = vshll.u32 %v14809_v45, 16 }
 0x4e8   : > { %v5917_v24 = vshrl.u32 %v5692_v31, 16  ;;  %v5920_v15 = vshll.u32 %v5692_v31, 16  ;;  %v14818_v0 = vpop.f32.mrf.mxu0  ;;  %v7208_v22 = vrot.slane %v14811_v28, 1  ;;  %v14823_v43 = vpop.f32.mrf.mxu1  ;;  %v17462_v6 = vld [vmem:[#allocation101_spill] sm:$0xff] }
 0x4e9   : > { %17454 = vst [vmem:[#allocation113_spill] sm:$0xff] %v14818_v0  ;;  %v5585_v48 = vadd.f32 %v14688_v34, %v5545_v61  ;;  %v6826_v10 = vsel %vm17457_vm0, %v17456_v8, %v16796_v49  ;;  %v6385_v61 = vor.u32 %v6383_v11, %v6381_v33  ;;  %vm17463_vm0 = vsmask.f32 7424  ;;  %v17464_v49 = vld [vmem:[#allocation163_spill] sm:$0xff] }
 0x4ea   : > { %17455 = vst [vmem:[#allocation59_spill] sm:$0xff] %v14823_v43  ;;  %v5919_v9 = vrot.slane %v5917_v24, 6  ;;  %v5922_v31 = vrot.slane %v5920_v15, 7  ;;  %v4837_v60 = vpop.f32.mrf.mxu3  ;;  %v7209_v4 = vsel %vm17459_vm9, %v17458_v63, %v7208_v22  ;;  %v6389_v24 = vrot.slane %v6387_v25, 1 }
 0x4eb   : > { %v5621_v35 = vmax.f32 %v5585_v48, 0.0  ;;  %v4893_v51 = vadd.f32 %v4837_v60, %v4508_v1  ;;  %v5915_v15 = vrot.slane %v5913_v27, 4  ;;  %v4249_v43 = vadd.f32 %v17464_v49, %v3856_v55  ;;  %v11418_v1 = vld [vmem:[#allocation3 + $0x10] sm:$0xff] }
 0x4ec   : > { %6962 = vmatmul.bf16.gmra.mxu0 %v6826_v10  ;;  %7342 = vmatmul.bf16.gmra.mxu1 %v7209_v4  ;;  %v5923_v54 = vor.u32 %v5922_v31, %v5919_v9  ;;  %v6390_v8 = vsel %vm17463_vm0, %v6385_v61, %v6389_v24  ;;  %v17465_v9 = vld [vmem:[#allocation105_spill] sm:$0xff]  ;;  %v17466_v31 = vld [vmem:[#allocation123_spill] sm:$0xff]  ;;  %vm17477_vm0 = vcmask 1046528  }
 0x4ed   : > { %v5657_v0 = vsel %vm17461_vm12, %v5621_v35, 0.0  ;;  %v5286_v42 = vadd.f32 %v17462_v6, %v4893_v51  ;;  %v3857_v60 = vadd.f32 %v17466_v31, %v17465_v9  ;;  %vm17483_vm12 = vsmask.f32 7424 }
 0x4ee   : > { %v5924_v12 = vsel %vm11941_vm4, %v5915_v15, %v5923_v54  ;;  %v5693_v48 = vpack.c.bf16 %v5657_v0, %v5657_v0  ;;  %6574 = vmatmul.bf16.gmra.mxu2 %v6390_v8  ;;  %v4509_v0 = vadd.f32 %v14367_v5, %v4249_v43  ;;  %v5925_v51 = vrot.slane %v5923_v54, 4  ;;  %v17467_v15 = vld [vmem:[#allocation36_spill] sm:$0xff]  ;;  %v17469_v8 = vld [vmem:[#allocation55_spill] sm:$0xff]  ;;  %v17471_v43 = vld [vmem:[#allocation78_spill] sm:$0xff] }
 0x4ef   : > { %6126 = vst [vmem:[#allocation3 + $0x5c] sm:$0xf] %v5924_v12  ;;  %v5546_v33 = vadd.f32 %v14362_v39, %v5286_v42  ;;  %6704 = vmatmul.bf16.gmra.mxu3 %v11418_v1  ;;  %v14851_v55 = vpop.f32.mrf.mxu2  ;;  %vm17468_vm9 = vnez %v17467_v15  ;;  %v17473_v54 = vld [vmem:[#allocation50_spill] sm:$0xff] }
 0x4f0   : > { %v5927_v27 = vshrl.u32 %v5693_v48, 16  ;;  %v5930_v11 = vshll.u32 %v5693_v48, 16  ;;  %v14846_v25 = vpop.f32.mrf.mxu0  ;;  %v14853_v49 = vpop.f32.mrf.mxu1  ;;  %v17470_v48 = vld [vmem:[#allocation164_spill] sm:$0xff] }
 0x4f1   : > { %v5586_v10 = vadd.f32 %v14688_v34, %v5546_v33  ;;  %v4250_v33 = vadd.f32 %v17470_v48, %v3857_v60 }
 0x4f2   : > { %v5929_v63 = vrot.slane %v5927_v27, 6  ;;  %v5932_v4 = vrot.slane %v5930_v11, 7  ;;  %v4840_v39 = vpop.f32.mrf.mxu3  ;;  %v17472_v27 = vld [vmem:[#allocation128_spill] sm:$0xff] }
 0x4f3   : > { %v5622_v42 = vmax.f32 %v5586_v10, 0.0  ;;  %v4894_v35 = vadd.f32 %v4840_v39, %v4509_v0  ;;  %v3858_v11 = vadd.f32 %v17472_v27, %v17471_v43  ;;  %v17474_v10 = vld [vmem:[#allocation159_spill] sm:$0xff] }
 0x4f4   : > { %v5933_v61 = vor.u32 %v5932_v4, %v5929_v63  ;;  %v3867_v0 = vadd.f32 %v17474_v10, %v17473_v54  ;;  %v6391_v4 = vshrl.u32 %v14809_v45, 16  ;;  %v17476_v54 = vrot.slane %v14809_v45, 1 }
 0x4f5   : > { %v5658_v6 = vsel %vm17468_vm9, %v5622_v42, 0.0  ;;  %v5287_v12 = vadd.f32 %v17469_v8, %v4894_v35  ;;  %vm17478_vm9 = vmmov %vm17477_vm0  ;;  %v4251_v45 = vadd.f32 %v17480_v18, %v3858_v11  ;;  %v11419_v18 = vld [vmem:[#allocation3 + $0x18] sm:$0xff] }
 0x4f6   : > { %v5934_v1 = vsel %vm11941_vm4, %v5925_v51, %v5933_v61  ;;  %v5694_v9 = vpack.c.bf16 %v5658_v6, %v5658_v6  ;;  %v14862_v31 = vld [vmem:[#allocation3 + $0x58] sm:$0xff]  ;;  %v6393_v43 = vor.u32 %v6391_v4, %v6389_v24 }
 0x4f7   : > { %v14864_v5 = vld [vmem:[#allocation3 + $0x58] sm:$0xff]  ;;  %6127 = vst [vmem:[#allocation3 + $0x60] sm:$0xf] %v5934_v1  ;;  %v5547_v63 = vadd.f32 %v14396_v7, %v5287_v12  ;;  %v16797_v35 = vrot.slane %v14862_v31, 1  ;;  %v14877_v8 = vpop.f32.mrf.mxu2  ;;  %v4510_v1 = vadd.f32 %v14398_v21, %v4250_v33  ;;  %v6395_v7 = vshll.u32 %v14862_v31, 16  ;;  %v17479_v33 = vld [vmem:[#allocation68_spill] sm:$0xff] }
 0x4f8   : > { %v5937_v60 = vshrl.u32 %v5694_v9, 16  ;;  %v5940_v39 = vshll.u32 %v5694_v9, 16  ;;  %v14872_v42 = vpop.f32.mrf.mxu0  ;;  %v7210_v51 = vrot.slane %v14864_v5, 1  ;;  %v14879_v48 = vpop.f32.mrf.mxu1  ;;  %v4260_v4 = vadd.f32 %v17479_v33, %v3867_v0 }
 0x4f9   : > { %17475 = vst [vmem:[#allocation114_spill] sm:$0xff] %v14872_v42  ;;  %v5587_v6 = vadd.f32 %v14688_v34, %v5547_v63  ;;  %v6828_v10 = vsel %vm17477_vm0, %v17476_v54, %v16797_v35  ;;  %v14893_v24 = vrot.slane %v6395_v7, 1  ;;  %v17481_v42 = vld [vmem:[#allocation37_spill] sm:$0xff]  ;;  %v17485_v7 = vld [vmem:[#allocation139_spill] sm:$0xff] }
 0x4fa   : > { %v5939_v12 = vrot.slane %v5937_v60, 6  ;;  %v5942_v27 = vrot.slane %v5940_v39, 7  ;;  %v4842_v9 = vpop.f32.mrf.mxu3  ;;  %v7211_v63 = vsel %vm17478_vm9, %v7208_v22, %v7210_v51  ;;  %v5935_v60 = vrot.slane %v5933_v61, 4 }
 0x4fb   : > { %v5623_v15 = vmax.f32 %v5587_v6, 0.0  ;;  %v4895_v21 = vadd.f32 %v4842_v9, %v4510_v1  ;;  %vm17482_vm0 = vnez %v17481_v42  ;;  %v6398_v28 = vsel %vm17483_vm12, %v6393_v43, %v14893_v24  ;;  %v17497_v42 = vld [vmem:[#allocation167_spill] sm:$0xff] }
 0x4fc   : > { %6967 = vmatmul.bf16.gmra.mxu0 %v6828_v10  ;;  %7347 = vmatmul.bf16.gmra.mxu1 %v7211_v63  ;;  %v5943_v39 = vor.u32 %v5942_v27, %v5939_v12  ;;  %v14903_v22 = vadd.f32 %v14762_v40, %v4260_v4  ;;  %v4511_v9 = vadd.f32 %v14441_v20, %v4251_v45  ;;  %v17489_v45 = vld [vmem:[#allocation67_spill] sm:$0xff] }
 0x4fd   : > { %v5659_v54 = vsel %vm17482_vm0, %v5623_v15, 0.0  ;;  %v5288_v35 = vadd.f32 %v14378_v56, %v4895_v21  ;;  %v17484_v56 = vld [vmem:[#allocation80_spill] sm:$0xff] }
 0x4fe   : > { %v5944_v6 = vsel %vm11941_vm4, %v5935_v60, %v5943_v39  ;;  %v5695_v1 = vpack.c.bf16 %v5659_v54, %v5659_v54  ;;  %6579 = vmatmul.bf16.gmra.mxu2 %v6398_v28  ;;  %v3859_v43 = vadd.f32 %v17485_v7, %v17484_v56  ;;  %v5945_v33 = vrot.slane %v5943_v39, 4  ;;  %v17486_v60 = vld [vmem:[#allocation39_spill] sm:$0xff] }
 0x4ff   : > { %6128 = vst [vmem:[#allocation3 + $0x64] sm:$0xf] %v5944_v6  ;;  %v5548_v61 = vadd.f32 %v14436_v17, %v5288_v35  ;;  %6709 = vmatmul.bf16.gmra.mxu3 %v11419_v18  ;;  %v14913_v12 = vpop.f32.mrf.mxu2  ;;  %vm17487_vm12 = vnez %v17486_v60  ;;  %v17488_v6 = vld [vmem:[#allocation166_spill] sm:$0xff] }
 0x500   : > { %v5947_v11 = vshrl.u32 %v5695_v1, 16  ;;  %v5950_v15 = vshll.u32 %v5695_v1, 16  ;;  %v14908_v0 = vpop.f32.mrf.mxu0  ;;  %v14915_v27 = vpop.f32.mrf.mxu1  ;;  %v4252_v1 = vadd.f32 %v17488_v6, %v3859_v43 }
 0x501   : > { %v5588_v40 = vadd.f32 %v14688_v34, %v5548_v61 }
 0x502   : > { %v5949_v10 = vrot.slane %v5947_v11, 6  ;;  %v5952_v63 = vrot.slane %v5950_v15, 7  ;;  %v4845_v17 = vpop.f32.mrf.mxu3  ;;  %v17490_v11 = vld [vmem:[#allocation144_spill] sm:$0xff] }
 0x503   : > { %v5624_v35 = vmax.f32 %v5588_v40, 0.0  ;;  %v4896_v21 = vadd.f32 %v4845_v17, %v4511_v9  ;;  %v3860_v15 = vadd.f32 %v17490_v11, %v17489_v45 }
 0x504   : > { %v5953_v4 = vor.u32 %v5952_v63, %v5949_v10 }
 0x505   : > { %v5660_v54 = vsel %vm17487_vm12, %v5624_v35, 0.0  ;;  %v5289_v28 = vadd.f32 %v14404_v36, %v4896_v21  ;;  %v11152_v36 = vld [vmem:[%s16629_s5 + $0x110] sm:$0xff]  ;;  %v6399_v21 = vshrl.u32 %v14862_v31, 16  ;;  %vm17493_vm12 = vmmov %vm17478_vm9  ;;  %v4253_v5 = vadd.f32 %v17497_v42, %v3860_v15 }
 0x506   : > { %v5954_v61 = vsel %vm11941_vm4, %v5945_v33, %v5953_v4  ;;  %v5696_v18 = vpack.c.bf16 %v5660_v54, %v5660_v54  ;;  %v14924_v56 = vld [vmem:[#allocation3 + $0x60] sm:$0xff]  ;;  %7691 = vmatpush.bf16.msrb.mxu2 %v11152_v36  ;;  %v5955_v36 = vrot.slane %v5953_v4, 4 }
 0x507   : > { %v14926_v20 = vld [vmem:[#allocation3 + $0x60] sm:$0xff]  ;;  %6129 = vst [vmem:[#allocation3 + $0x68] sm:$0xf] %v5954_v61  ;;  %v5549_v39 = vadd.f32 %v14465_v13, %v5289_v28  ;;  %v16798_v9 = vrot.slane %v14924_v56, 1  ;;  %v14939_v17 = vpop.f32.mrf.mxu2  ;;  %v4512_v13 = vadd.f32 %v14468_v53, %v4252_v1  ;;  %v6403_v33 = vshll.u32 %v14924_v56, 16 }
 0x508   : > { %v5957_v7 = vshrl.u32 %v5696_v18, 16  ;;  %v5960_v43 = vshll.u32 %v5696_v18, 16  ;;  %v14934_v40 = vpop.f32.mrf.mxu0  ;;  %v7212_v10 = vrot.slane %v14926_v20, 1  ;;  %v14941_v35 = vpop.f32.mrf.mxu1  ;;  %v17492_v61 = vrot.slane %v14862_v31, 1 }
 0x509   : > { %17491 = vst [vmem:[#allocation111_spill] sm:$0xff] %v14934_v40  ;;  %v5589_v63 = vadd.f32 %v14688_v34, %v5549_v39  ;;  %v6401_v11 = vor.u32 %v6399_v21, %v14893_v24  ;;  %v6405_v39 = vrot.slane %v6403_v33, 1 }
 0x50a   : > { %v5959_v54 = vrot.slane %v5957_v7, 6  ;;  %v5962_v28 = vrot.slane %v5960_v43, 7  ;;  %v4847_v6 = vpop.f32.mrf.mxu3  ;;  %v6830_v18 = vsel %vm17478_vm9, %v17492_v61, %v16798_v9  ;;  %v7213_v53 = vsel %vm17493_vm12, %v7210_v51, %v7212_v10  ;;  %v17494_v43 = vld [vmem:[#allocation42_spill] sm:$0xff] }
 0x50b   : > { %v5625_v1 = vmax.f32 %v5589_v63, 0.0  ;;  %v4897_v45 = vadd.f32 %v4847_v6, %v4512_v13  ;;  %vm17495_vm0 = vnez %v17494_v43  ;;  %vm17496_vm9 = vsmask.f32 7424  ;;  %v11420_v13 = vld [vmem:[#allocation3 + $0x20] sm:$0xff] }
 0x50c   : > { %6972 = vmatmul.bf16.gmra.mxu0 %v6830_v18  ;;  %7352 = vmatmul.bf16.gmra.mxu1 %v7213_v53  ;;  %v5963_v7 = vor.u32 %v5962_v28, %v5959_v54  ;;  %v6406_v9 = vsel %vm17496_vm9, %v6401_v11, %v6405_v39  ;;  %v17499_v54 = vld [vmem:[#allocation83_spill] sm:$0xff]  ;;  %vm17510_vm9 = vcmask 1046528  }
 0x50d   : > { %v5661_v60 = vsel %vm17495_vm0, %v5625_v1, 0.0  ;;  %v5290_v61 = vadd.f32 %v14447_v44, %v4897_v45  ;;  %v17500_v44 = vld [vmem:[#allocation146_spill] sm:$0xff] }
 0x50e   : > { %v5964_v51 = vsel %vm11941_vm4, %v5955_v36, %v5963_v7  ;;  %v5697_v63 = vpack.c.bf16 %v5661_v60, %v5661_v60  ;;  %6584 = vmatmul.bf16.gmra.mxu2 %v6406_v9  ;;  %v3861_v28 = vadd.f32 %v17500_v44, %v17499_v54  ;;  %v4513_v60 = vadd.f32 %v14506_v57, %v4253_v5  ;;  %v17501_v36 = vld [vmem:[#allocation46_spill] sm:$0xff]  ;;  %v17504_v5 = vld [vmem:[#allocation72_spill] sm:$0xff] }
 0x50f   : > { %6130 = vst [vmem:[#allocation3 + $0x6c] sm:$0xf] %v5964_v51  ;;  %v5550_v24 = vadd.f32 %v14502_v58, %v5290_v61  ;;  %6714 = vmatmul.bf16.gmra.mxu3 %v11420_v13  ;;  %v14970_v42 = vpop.f32.mrf.mxu2  ;;  %v5965_v45 = vrot.slane %v5963_v7, 4  ;;  %vm17502_vm12 = vnez %v17501_v36  ;;  %v17512_v36 = vld [vmem:[#allocation48_spill] sm:$0xff] }
 0x510   : > { %v5967_v4 = vshrl.u32 %v5697_v63, 16  ;;  %v5970_v21 = vshll.u32 %v5697_v63, 16  ;;  %v14965_v33 = vpop.f32.mrf.mxu0  ;;  %v14972_v15 = vpop.f32.mrf.mxu1  ;;  %v17503_v63 = vld [vmem:[#allocation168_spill] sm:$0xff]  ;;  %vm17513_vm0 = vnez %v17512_v36 }
 0x511   : > { %17498 = vst [vmem:[#allocation61_spill] sm:$0xff] %v14965_v33  ;;  %v5590_v6 = vadd.f32 %v14688_v34, %v5550_v24  ;;  %v4254_v24 = vadd.f32 %v17503_v63, %v3861_v28 }
 0x512   : > { %v5969_v9 = vrot.slane %v5967_v4, 6  ;;  %v5972_v18 = vrot.slane %v5970_v21, 7  ;;  %v4850_v58 = vpop.f32.mrf.mxu3  ;;  %v17505_v4 = vld [vmem:[#allocation148_spill] sm:$0xff] }
 0x513   : > { %v5626_v53 = vmax.f32 %v5590_v6, 0.0  ;;  %v4898_v1 = vadd.f32 %v4850_v58, %v4513_v60  ;;  %v3862_v21 = vadd.f32 %v17505_v4, %v17504_v5 }
 0x514   : > { %v5973_v11 = vor.u32 %v5972_v18, %v5969_v9 }
 0x515   : > { %v5662_v61 = vsel %vm17502_vm12, %v5626_v53, 0.0  ;;  %v5291_v51 = vadd.f32 %v14476_v59, %v4898_v1  ;;  %v4514_v1 = vadd.f32 %v14544_v47, %v4254_v24  ;;  %vm17511_vm12 = vmmov %vm17510_vm9 }
 0x516   : > { %v5974_v13 = vsel %vm11941_vm4, %v5965_v45, %v5973_v11  ;;  %v5698_v54 = vpack.c.bf16 %v5662_v61, %v5662_v61  ;;  %v14981_v44 = vld [vmem:[#allocation3 + $0x68] sm:$0xff]  ;;  %v6407_v45 = vshrl.u32 %v14924_v56, 16 }
 0x517   : > { %v14983_v57 = vld [vmem:[#allocation3 + $0x68] sm:$0xff]  ;;  %6131 = vst [vmem:[#allocation3 + $0x70] sm:$0xf] %v5974_v13  ;;  %v5551_v7 = vadd.f32 %v14542_v26, %v5291_v51  ;;  %v16799_v59 = vrot.slane %v14981_v44, 1  ;;  %v14993_v58 = vpop.f32.mrf.mxu2  ;;  %v6411_v26 = vshll.u32 %v14981_v44, 16  ;;  %v17509_v13 = vrot.slane %v14924_v56, 1 }
 0x518   : > { %v5977_v6 = vshrl.u32 %v5698_v54, 16  ;;  %v5980_v60 = vshll.u32 %v5698_v54, 16  ;;  %v14988_v9 = vpop.f32.mrf.mxu0  ;;  %v7214_v28 = vrot.slane %v14983_v57, 1  ;;  %17507 = vst [vmem:[#allocation45_spill] sm:$0xff] %v14993_v58  ;;  %v14995_v53 = vpop.f32.mrf.mxu1  ;;  %v6409_v4 = vor.u32 %v6407_v45, %v6405_v39 }
 0x519   : > { %17506 = vst [vmem:[#allocation117_spill] sm:$0xff] %v14988_v9  ;;  %v5591_v18 = vadd.f32 %v14688_v34, %v5551_v7  ;;  %v6832_v54 = vsel %vm17510_vm9, %v17509_v13, %v16799_v59  ;;  %v6413_v7 = vrot.slane %v6411_v26, 1  ;;  %vm17514_vm9 = vsmask.f32 7424  ;;  %v17515_v59 = vld [vmem:[#allocation169_spill] sm:$0xff] }
 0x51a   : > { %17508 = vst [vmem:[#allocation44_spill] sm:$0xff] %v14995_v53  ;;  %v5979_v61 = vrot.slane %v5977_v6, 6  ;;  %v5982_v51 = vrot.slane %v5980_v60, 7  ;;  %v4852_v63 = vpop.f32.mrf.mxu3  ;;  %v7215_v5 = vsel %vm17511_vm12, %v7212_v10, %v7214_v28  ;;  %v5975_v6 = vrot.slane %v5973_v11, 4  ;;  %v17517_v26 = vld [vmem:[#allocation77_spill] sm:$0xff] }
 0x51b   : > { %v5627_v47 = vmax.f32 %v5591_v18, 0.0  ;;  %v4899_v24 = vadd.f32 %v4852_v63, %v4514_v1  ;;  %v6414_v13 = vsel %vm17514_vm9, %v6409_v4, %v6413_v7  ;;  %v4255_v33 = vadd.f32 %v17515_v59, %v3862_v21  ;;  %v11421_v18 = vld [vmem:[#allocation3 + $0x28] sm:$0xff]  ;;  %vm17529_vm9 = vmmov %vm17511_vm12 }
 0x51c   : > { %6977 = vmatmul.bf16.gmra.mxu0 %v6832_v54  ;;  %7357 = vmatmul.bf16.gmra.mxu1 %v7215_v5  ;;  %v5983_v60 = vor.u32 %v5982_v51, %v5979_v61 }
 0x51d   : > { %v5663_v43 = vsel %vm17513_vm0, %v5627_v47, 0.0  ;;  %v5292_v9 = vadd.f32 %v14508_v38, %v4899_v24  ;;  %v17518_v38 = vld [vmem:[#allocation150_spill] sm:$0xff] }
 0x51e   : > { %v5984_v20 = vsel %vm11941_vm4, %v5975_v6, %v5983_v60  ;;  %v5699_v10 = vpack.c.bf16 %v5663_v43, %v5663_v43  ;;  %6589 = vmatmul.bf16.gmra.mxu2 %v6414_v13  ;;  %v3863_v61 = vadd.f32 %v17518_v38, %v17517_v26  ;;  %v4515_v43 = vadd.f32 %v14567_v37, %v4255_v33  ;;  %v17523_v33 = vld [vmem:[#allocation82_spill] sm:$0xff] }
 0x51f   : > { %6132 = vst [vmem:[#allocation3 + $0x74] sm:$0xf] %v5984_v20  ;;  %v5552_v39 = vadd.f32 %v14561_v46, %v5292_v9  ;;  %6719 = vmatmul.bf16.gmra.mxu3 %v11421_v18  ;;  %v15023_v21 = vpop.f32.mrf.mxu2  ;;  %v5985_v47 = vrot.slane %v5983_v60, 4  ;;  %v17522_v20 = vld [vmem:[#allocation170_spill] sm:$0xff] }
 0x520   : > { %v5987_v11 = vshrl.u32 %v5699_v10, 16  ;;  %v5990_v1 = vshll.u32 %v5699_v10, 16  ;;  %v15018_v45 = vpop.f32.mrf.mxu0  ;;  %17519 = vst [vmem:[#allocation120_spill] sm:$0xff] %v15023_v21  ;;  %v15025_v59 = vpop.f32.mrf.mxu1  ;;  %v4256_v10 = vadd.f32 %v17522_v20, %v3863_v61 }
 0x521   : > { %17516 = vst [vmem:[#allocation116_spill] sm:$0xff] %v15018_v45  ;;  %v5592_v51 = vadd.f32 %v14688_v34, %v5552_v39 }
 0x522   : > { %17520 = vst [vmem:[#allocation63_spill] sm:$0xff] %v15025_v59  ;;  %v5989_v63 = vrot.slane %v5987_v11, 6  ;;  %v5992_v54 = vrot.slane %v5990_v1, 7  ;;  %v4855_v46 = vpop.f32.mrf.mxu3  ;;  %v17524_v11 = vld [vmem:[#allocation153_spill] sm:$0xff] }
 0x523   : > { %v5628_v9 = vmax.f32 %v5592_v51, 0.0  ;;  %v4900_v5 = vadd.f32 %v4855_v46, %v4515_v43  ;;  %v3864_v1 = vadd.f32 %v17524_v11, %v17523_v33 }
 0x524   : > { %v5993_v24 = vor.u32 %v5992_v54, %v5989_v63 }
 0x525   : > { %v5664_v6 = vsel %vm13023_vm3, %v5628_v9, 0.0  ;;  %v5293_v13 = vadd.f32 %v14551_v14, %v4900_v5  ;;  %v11151_v14 = vld [vmem:[%s16629_s5 + $0x108] sm:$0xff]  ;;  %v6415_v5 = vshrl.u32 %v14981_v44, 16 }
 0x526   : > { %v5994_v39 = vsel %vm11941_vm4, %v5985_v47, %v5993_v24  ;;  %v5700_v18 = vpack.c.bf16 %v5664_v6, %v5664_v6  ;;  %v15034_v26 = vld [vmem:[#allocation3 + $0x70] sm:$0xff]  ;;  %7692 = vmatpush.bf16.msrb.mxu2 %v11151_v14  ;;  %v5995_v14 = vrot.slane %v5993_v24, 4 }
 0x527   : > { %v15036_v37 = vld [vmem:[#allocation3 + $0x70] sm:$0xff]  ;;  %6133 = vst [vmem:[#allocation3 + $0x78] sm:$0xf] %v5994_v39  ;;  %v5553_v60 = vadd.f32 %v14606_v2, %v5293_v13  ;;  %v16801_v43 = vrot.slane %v15034_v26, 1  ;;  %v15049_v46 = vpop.f32.mrf.mxu2  ;;  %v4516_v2 = vadd.f32 %v14613_v30, %v4256_v10  ;;  %v6419_v47 = vshll.u32 %v15034_v26, 16 }
 0x528   : > { %v5997_v38 = vshrl.u32 %v5700_v18, 16  ;;  %v6000_v61 = vshll.u32 %v5700_v18, 16  ;;  %v15044_v51 = vpop.f32.mrf.mxu0  ;;  %v7216_v63 = vrot.slane %v15036_v37, 1  ;;  %17526 = vst [vmem:[#allocation118_spill] sm:$0xff] %v15049_v46  ;;  %v15051_v9 = vpop.f32.mrf.mxu1  ;;  %v17528_v39 = vrot.slane %v14981_v44, 1  ;;  %v17555_v37 = vld [vmem:[#allocation65_spill] sm:$0xff] }
 0x529   : > { %17525 = vst [vmem:[#allocation121_spill] sm:$0xff] %v15044_v51  ;;  %v5593_v54 = vadd.f32 %v14688_v34, %v5553_v60  ;;  %v6417_v11 = vor.u32 %v6415_v5, %v6413_v7  ;;  %v6421_v60 = vrot.slane %v6419_v47, 1  ;;  %v17535_v47 = vld [vmem:[#allocation135_spill] sm:$0xff] }
 0x52a   : > { %17527 = vst [vmem:[#allocation66_spill] sm:$0xff] %v15051_v9  ;;  %v5999_v6 = vrot.slane %v5997_v38, 6  ;;  %v6002_v13 = vrot.slane %v6000_v61, 7  ;;  %v4857_v20 = vpop.f32.mrf.mxu3  ;;  %v6834_v18 = vsel %vm17511_vm12, %v17528_v39, %v16801_v43  ;;  %v7217_v30 = vsel %vm17529_vm9, %v7214_v28, %v7216_v63  ;;  %v17530_v61 = vld [vmem:[#allocation41_spill] sm:$0xff]  ;;  %v17533_v43 = vld [vmem:[#allocation172_spill] sm:$0xff] }
 0x52b   : > { %v5629_v10 = vmax.f32 %v5593_v54, 0.0  ;;  %v4901_v33 = vadd.f32 %v4857_v20, %v4516_v2  ;;  %vm17531_vm3 = vnez %v17530_v61  ;;  %vm17532_vm12 = vsmask.f32 7424  ;;  %v11422_v54 = vld [vmem:[#allocation3 + $0x30] sm:$0xff] }
 0x52c   : > { %6982 = vmatmul.bf16.gmra.mxu0 %v6834_v18  ;;  %7362 = vmatmul.bf16.gmra.mxu1 %v7217_v30  ;;  %v6003_v38 = vor.u32 %v6002_v13, %v5999_v6  ;;  %v6422_v39 = vsel %vm17532_vm12, %v6417_v11, %v6421_v60  ;;  %v4257_v51 = vadd.f32 %v17533_v43, %v3864_v1  ;;  %v17539_v11 = vld [vmem:[#allocation43_spill] sm:$0xff]  ;;  %vm17549_vm12 = vcmask 1046528  }
 0x52d   : > { %v5665_v4 = vsel %vm17531_vm3, %v5629_v10, 0.0  ;;  %v5294_v36 = vadd.f32 %v14578_v62, %v4901_v33  ;;  %v17536_v62 = vld [vmem:[#allocation155_spill] sm:$0xff]  ;;  %vm17540_vm9 = vnez %v17539_v11 }
 0x52e   : > { %v6004_v57 = vsel %vm11941_vm4, %v5995_v14, %v6003_v38  ;;  %v5701_v28 = vpack.c.bf16 %v5665_v4, %v5665_v4  ;;  %6594 = vmatmul.bf16.gmra.mxu2 %v6422_v39  ;;  %v3865_v6 = vadd.f32 %v17536_v62, %v17535_v47  ;;  %v4517_v4 = vadd.f32 %v14648_v41, %v4257_v51  ;;  %v17542_v51 = vld [vmem:[#allocation91_spill] sm:$0xff] }
 0x52f   : > { %6134 = vst [vmem:[#allocation3 + $0x7c] sm:$0xf] %v6004_v57  ;;  %v5554_v7 = vadd.f32 %v14639_v19, %v5294_v36  ;;  %6724 = vmatmul.bf16.gmra.mxu3 %v11422_v54  ;;  %v6005_v10 = vrot.slane %v6003_v38, 4  ;;  %v17541_v57 = vld [vmem:[#allocation174_spill] sm:$0xff]  ;;  %v17551_v11 = vld [vmem:[#allocation47_spill] sm:$0xff] }
 0x530   : > { %v6007_v24 = vshrl.u32 %v5701_v28, 16  ;;  %v6010_v2 = vshll.u32 %v5701_v28, 16  ;;  %v15074_v5 = vpop.f32.mrf.mxu0  ;;  %v15079_v1 = vpop.f32.mrf.mxu2  ;;  %v4258_v28 = vadd.f32 %v17541_v57, %v3865_v6  ;;  %vm17552_vm3 = vnez %v17551_v11 }
 0x531   : > { %17534 = vst [vmem:[#allocation125_spill] sm:$0xff] %v15074_v5  ;;  %v5594_v13 = vadd.f32 %v14688_v34, %v5554_v7  ;;  %v15081_v43 = vpop.f32.mrf.mxu1 }
 0x532   : > { %17537 = vst [vmem:[#allocation122_spill] sm:$0xff] %v15079_v1  ;;  %v6009_v20 = vrot.slane %v6007_v24, 6  ;;  %v6012_v18 = vrot.slane %v6010_v2, 7  ;;  %v4860_v19 = vpop.f32.mrf.mxu3  ;;  %v17543_v24 = vld [vmem:[#allocation157_spill] sm:$0xff] }
 0x533   : > { %17538 = vst [vmem:[#allocation129_spill] sm:$0xff] %v15081_v43  ;;  %v5630_v36 = vmax.f32 %v5594_v13, 0.0  ;;  %v4902_v30 = vadd.f32 %v4860_v19, %v4517_v4  ;;  %v3866_v2 = vadd.f32 %v17543_v24, %v17542_v51  ;;  %v8080_v43 = vld [vmem:[#allocation3 + $0x10] sm:$0xc] }
 0x534   : > { %v6013_v33 = vor.u32 %v6012_v18, %v6009_v20 }
 0x535   : > { %v5666_v14 = vsel %vm17540_vm9, %v5630_v36, 0.0  ;;  %v5295_v39 = vadd.f32 %v14619_v52, %v4902_v30  ;;  %v17547_v36 = vld [vmem:[#allocation9_spill] sm:$0xff]  ;;  %vm17550_vm9 = vmmov %vm17549_vm12  ;;  %v4259_v5 = vadd.f32 %v17555_v37, %v3866_v2  ;;  %v17559_v2 = vld [vmem:[#allocation108_spill] sm:$0xff] }
 0x536   : > { %v6014_v7 = vsel %vm11941_vm4, %v6005_v10, %v6013_v33  ;;  %v5702_v54 = vpack.c.bf16 %v5666_v14, %v5666_v14  ;;  %v15090_v47 = vld [vmem:[#allocation3 + $0x78] sm:$0xff]  ;;  %v4518_v30 = vadd.f32 %v17547_v36, %v4258_v28  ;;  %v6423_v10 = vshrl.u32 %v15034_v26, 16  ;;  %v8857_v37 = vld [vmem:[#allocation3 + $0x10] sm:$0x8] }
 0x537   : > { %v15092_v41 = vld [vmem:[#allocation3 + $0x78] sm:$0xff]  ;;  %6135 = vst [vmem:[#allocation3 + $0x80] sm:$0xf] %v6014_v7  ;;  %v5555_v38 = vadd.f32 %v14692_v3, %v5295_v39  ;;  %v16802_v52 = vrot.slane %v15090_v47, 1  ;;  %v6427_v3 = vshll.u32 %v15090_v47, 16  ;;  %v17548_v7 = vrot.slane %v15034_v26, 1 }
 0x538   : > { %v6017_v62 = vshrl.u32 %v5702_v54, 16  ;;  %v6020_v13 = vshll.u32 %v5702_v54, 16  ;;  %v16803_v6 = vrot.slane %v15092_v41, 1  ;;  %v15102_v18 = vpop.f32.mrf.mxu2 }
 0x539   : > { %v15097_v4 = vpop.f32.mrf.mxu0  ;;  %v5595_v20 = vadd.f32 %v14688_v34, %v5555_v38  ;;  %17545 = vst [vmem:[#allocation134_spill] sm:$0xff] %v15102_v18  ;;  %v15104_v19 = vpop.f32.mrf.mxu1  ;;  %v6836_v54 = vsel %vm17549_vm12, %v17548_v7, %v16802_v52  ;;  %v6425_v38 = vor.u32 %v6423_v10, %v6421_v60  ;;  %vm17554_vm12 = vsmask.f32 7424 }
 0x53a   : > { %17544 = vst [vmem:[#allocation69_spill] sm:$0xff] %v15097_v4  ;;  %v6019_v14 = vrot.slane %v6017_v62, 6  ;;  %v6022_v39 = vrot.slane %v6020_v13, 7  ;;  %v4862_v57 = vpop.f32.mrf.mxu3  ;;  %v7219_v51 = vsel %vm17550_vm9, %v7216_v63, %v16803_v6  ;;  %v15119_v62 = vrot.slane %v6427_v3, 1  ;;  %v17553_v4 = vld [vmem:[#allocation104_spill] sm:$0xff] }
 0x53b   : > { %17546 = vst [vmem:[#allocation126_spill] sm:$0xff] %v15104_v19  ;;  %v5631_v28 = vmax.f32 %v5595_v20, 0.0  ;;  %v4903_v24 = vadd.f32 %v4862_v57, %v4518_v30  ;;  %v6015_v13 = vrot.slane %v6013_v33, 4  ;;  %v11423_v33 = vld [vmem:[#allocation3 + $0x38] sm:$0xff]  ;;  %v4519_v57 = vadd.f32 %v17559_v2, %v4259_v5 }
 0x53c   : > { %6987 = vmatmul.bf16.gmra.mxu0 %v6836_v54  ;;  %7367 = vmatmul.bf16.gmra.mxu1 %v7219_v51  ;;  %v6023_v36 = vor.u32 %v6022_v39, %v6019_v14  ;;  %v6430_v52 = vsel %vm17554_vm12, %v6425_v38, %v15119_v62  ;;  %vm17568_vm12 = vcmask 1046528  }
 0x53d   : > { %v5667_v61 = vsel %vm17552_vm3, %v5631_v28, 0.0  ;;  %v5296_v7 = vadd.f32 %v17553_v4, %v4903_v24  ;;  %v15147_v28 = vld [vmem:[#allocation3 + $0x14] sm:$0xf]  ;;  %vm17610_vm3 = vsmask.f32 7424 }
 0x53e   : > { %v6024_v63 = vsel %vm11941_vm4, %v6015_v13, %v6023_v36  ;;  %v5703_v20 = vpack.c.bf16 %v5667_v61, %v5667_v61  ;;  %6599 = vmatmul.bf16.gmra.mxu2 %v6430_v52  ;;  %v11165_v61 = vld [vmem:[%s16629_s5 + $0x178] sm:$0xff]  ;;  %v6025_v5 = vrot.slane %v6023_v36, 4 }
 0x53f   : > { %6136 = vst [vmem:[#allocation3 + $0x84] sm:$0xf] %v6024_v63  ;;  %v5556_v60 = vadd.f32 %v14728_v16, %v5296_v7  ;;  %6729 = vmatmul.bf16.gmra.mxu3 %v11423_v33  ;;  %v11150_v16 = vld [vmem:[%s16629_s5 + $0x100] sm:$0xff]  ;;  %v11190_v52 = vld [vmem:[%s16629_s5 + $0x1b8] sm:$0xff]  ;;  %v11189_v7 = vld [vmem:[%s16629_s5 + $0x1b0] sm:$0xff] }
 0x540   : > { %v6027_v30 = vshrl.u32 %v5703_v20, 16  ;;  %v6030_v10 = vshll.u32 %v5703_v20, 16  ;;  %v15133_v14 = vpop.f32.mrf.mxu2  ;;  %7945 = vmatpush.bf16.msra.mxu3 %v11165_v61  ;;  %7693 = vmatpush.bf16.msrb.mxu2 %v11150_v16  ;;  %v17560_v63 = vld [vmem:[#allocation49_spill] sm:$0xff]  ;;  %v8876_v16 = vunpack.c.l.b16 %v8857_v37 }
 0x541   : > { %v15130_v3 = vpop.f32.mrf.mxu0  ;;  %v5596_v4 = vadd.f32 %v14688_v34, %v5556_v60  ;;  %17557 = vst [vmem:[#allocation141_spill] sm:$0xff] %v15133_v14  ;;  %v15135_v39 = vpop.f32.mrf.mxu1  ;;  %8330 = vmatpush.bf16.msra.mxu0 %v11190_v52  ;;  %vm17561_vm9 = vnez %v17560_v63  ;;  %v17562_v60 = vld [vmem:[#allocation57_spill] sm:$0xff]  ;;  %v17567_v63 = vrot.slane %v15090_v47, 1 }
 0x542   : > { %17556 = vst [vmem:[#allocation71_spill] sm:$0xff] %v15130_v3  ;;  %v6029_v54 = vrot.slane %v6027_v30, 6  ;;  %v6032_v34 = vrot.slane %v6030_v10, 7  ;;  %v4865_v51 = vpop.f32.mrf.mxu3  ;;  %v16804_v30 = vunpack.c.l.b16 %v15147_v28 }
 0x543   : > { %17558 = vst [vmem:[#allocation130_spill] sm:$0xff] %v15135_v39  ;;  %v5632_v24 = vmax.f32 %v5596_v4, 0.0  ;;  %v4904_v38 = vadd.f32 %v4865_v51, %v4519_v57  ;;  %v17563_v57 = vld [vmem:[#allocation40_spill] sm:$0xff]  ;;  %v11183_v39 = vld [vmem:[%s16629_s5 + $0x180] sm:$0xff] }
 0x544   : > { %v6033_v13 = vor.u32 %v6032_v34, %v6029_v54 }
 0x545   : > { %v5668_v20 = vsel %vm17561_vm9, %v5632_v24, 0.0  ;;  %v5297_v33 = vadd.f32 %v17562_v60, %v4904_v38  ;;  %8331 = vmatpush.bf16.msra.mxu0 %v11189_v7  ;;  %v11188_v38 = vld [vmem:[%s16629_s5 + $0x1a8] sm:$0xff]  ;;  %v8877_v7 = vpack.c.b16 %v16804_v30, %v8876_v16  ;;  %vm17571_vm9 = vmmov %vm17568_vm12 }
 0x546   : > { %v6034_v10 = vsel %vm11941_vm4, %v6025_v5, %v6033_v13  ;;  %v5704_v4 = vpack.c.bf16 %v5668_v20, %v5668_v20  ;;  %v15158_v2 = vld [vmem:[#allocation3 + $0x80] sm:$0xff]  ;;  %v15170_v5 = vld [vmem:[#allocation3 + $0x18] sm:$0xff] }
 0x547   : > { %v15160_v36 = vld [vmem:[#allocation3 + $0x80] sm:$0xff]  ;;  %6137 = vst [vmem:[#allocation3 + $0x88] sm:$0xf] %v6034_v10  ;;  %v5557_v61 = vadd.f32 %v17563_v57, %v5297_v33  ;;  %v16805_v51 = vrot.slane %v15158_v2, 1  ;;  %v11424_v20 = vld [vmem:[%s16628_s4] ss:$0 sm:$0xff] }
 0x548   : > { %v6037_v52 = vshrl.u32 %v5704_v4, 16  ;;  %v6040_v54 = vshll.u32 %v5704_v4, 16  ;;  %v15175_v60 = vpop.f32.mrf.mxu2  ;;  %v6431_v10 = vshrl.u32 %v15090_v47, 16  ;;  %v6435_v4 = vshll.u32 %v15158_v2, 16 }
 0x549   : > { %v15163_v34 = vpop.f32.mrf.mxu0  ;;  %v5597_v37 = vadd.f32 %v11424_v20, %v5557_v61  ;;  %17565 = vst [vmem:[#allocation74_spill] sm:$0xff] %v15175_v60  ;;  %v15177_v33 = vpop.f32.mrf.mxu1  ;;  %v6838_v61 = vsel %vm17568_vm12, %v17567_v63, %v16805_v51  ;;  %v17569_v11 = vrot.slane %v15160_v36, 1  ;;  %8332 = vmatpush.bf16.msra.mxu0 %v11188_v38  ;;  %v11187_v63 = vld [vmem:[%s16629_s5 + $0x1a0] sm:$0xff]  ;;  %vm17575_vm12 = vsmask.f32 7424 }
 0x54a   : > { %17564 = vst [vmem:[#allocation133_spill] sm:$0xff] %v15163_v34  ;;  %v6039_v57 = vrot.slane %v6037_v52, 6  ;;  %v6042_v6 = vrot.slane %v6040_v54, 7  ;;  %v4867_v24 = vpop.f32.mrf.mxu3  ;;  %v17570_v34 = vrot.slane %v15092_v41, 1  ;;  %v6433_v16 = vor.u32 %v6431_v10, %v15119_v62  ;;  %v17572_v51 = vld [vmem:[#allocation53_spill] sm:$0xff] }
 0x54b   : > { %17566 = vst [vmem:[#allocation140_spill] sm:$0xff] %v15177_v33  ;;  %v5633_v33 = vmax.f32 %v5597_v37, 0.0  ;;  %v4905_v60 = vadd.f32 %v4867_v24, %v14903_v22  ;;  %v15195_v52 = vrot.slane %v6435_v4, 1  ;;  %v6035_v54 = vrot.slane %v6033_v13, 4  ;;  %v15209_v62 = vld [vmem:[%s16629_s5 + $0x1f8] sm:$0xff]  ;;  %v11425_v37 = vld [vmem:[#allocation3 + $0x40] sm:$0xff] }
 0x54c   : > { %v7221_v3 = vsel %vm17571_vm9, %v17570_v34, %v17569_v11  ;;  %6992 = vmatmul.bf16.gmra.mxu0 %v6838_v61  ;;  %v6043_v30 = vor.u32 %v6042_v6, %v6039_v57  ;;  %v16806_v41 = vrot.slane %v15170_v5, 3  ;;  %vm17573_vm9 = vnez %v17572_v51  ;;  %v17574_v34 = vld [vmem:[#allocation38_spill] sm:$0xff]  ;;  %8722 = vmatpush.bf16.msra.mxu1 %v15209_v62 }
 0x54d   : > { %7372 = vmatmul.bf16.gmra.mxu1 %v7221_v3  ;;  %v5669_v11 = vsel %vm17573_vm9, %v5633_v33, 0.0  ;;  %v5298_v22 = vadd.f32 %v17574_v34, %v4905_v60  ;;  %v6438_v3 = vsel %vm17575_vm12, %v6433_v16, %v15195_v52  ;;  %v8878_v6 = vrot.slane %v8877_v7, 3  ;;  %8333 = vmatpush.bf16.msra.mxu0 %v11187_v63  ;;  %v11186_v7 = vld [vmem:[%s16629_s5 + $0x198] sm:$0xff]  ;;  %v15232_v16 = vld [vmem:[%s16629_s5 + $0x1f0] sm:$0xff] }
 0x54e   : > { %v6044_v13 = vsel %vm11941_vm4, %v6035_v54, %v6043_v30  ;;  %v5705_v24 = vpack.c.bf16 %v5669_v11, %v5669_v11  ;;  %6604 = vmatmul.bf16.gmra.mxu2 %v6438_v3  ;;  %vm17576_vm12 = vcmask 1044480   ;;  %v6045_v63 = vrot.slane %v6043_v30, 4 }
 0x54f   : > { %6138 = vst [vmem:[#allocation3 + $0x8c] sm:$0xf] %v6044_v13  ;;  %v5558_v38 = vadd.f32 %v14799_v29, %v5298_v22  ;;  %6734 = vmatmul.bf16.gmra.mxu3 %v11425_v37  ;;  %v15218_v60 = vsel %vm17576_vm12, %v8878_v6, %v16806_v41  ;;  %v17581_v6 = vld [vmem:[#allocation56_spill] sm:$0xff]  ;;  %v8228_v59 = vrot.slane %v15170_v5, 2 }
 0x550   : > { %17577 = vst [vmem:[#allocation76_spill] sm:$0xff] %v15218_v60  ;;  %v6047_v33 = vshrl.u32 %v5705_v24, 16  ;;  %v6050_v10 = vshll.u32 %v5705_v24, 16  ;;  %v15225_v29 = vpop.f32.mrf.mxu2  ;;  %8723 = vmatpush.bf16.msra.mxu1 %v15232_v16  ;;  %vm17582_vm12 = vnez %v17581_v6  ;;  %v15245_v24 = vld [vmem:[%s16629_s5 + $0x1e8] sm:$0xff]  ;;  %v17587_v60 = vrot.slane %v15158_v2, 1 }
 0x551   : > { %v15220_v4 = vpop.f32.mrf.mxu0  ;;  %v5598_v57 = vadd.f32 %v11424_v20, %v5558_v38  ;;  %17579 = vst [vmem:[#allocation137_spill] sm:$0xff] %v15225_v29  ;;  %v15227_v61 = vpop.f32.mrf.mxu1  ;;  %8334 = vmatpush.bf16.msra.mxu0 %v11186_v7  ;;  %v11185_v20 = vld [vmem:[%s16629_s5 + $0x190] sm:$0xff] }
 0x552   : > { %17578 = vst [vmem:[#allocation143_spill] sm:$0xff] %v15220_v4  ;;  %v6049_v54 = vrot.slane %v6047_v33, 6  ;;  %v6052_v11 = vrot.slane %v6050_v10, 7  ;;  %v15234_v34 = vpop.f32.mrf.mxu3  ;;  %v11164_v38 = vld [vmem:[%s16629_s5 + $0x170] sm:$0xff] }
 0x553   : > { %17580 = vst [vmem:[#allocation79_spill] sm:$0xff] %v15227_v61  ;;  %v5634_v22 = vmax.f32 %v5598_v57, 0.0  ;;  %7946 = vmatpush.bf16.msra.mxu3 %v11164_v38  ;;  %v6439_v38 = vshrl.u32 %v15158_v2, 16 }
 0x554   : > { %v6053_v3 = vor.u32 %v6052_v11, %v6049_v54  ;;  %8724 = vmatpush.bf16.msra.mxu1 %v15245_v24  ;;  %v15275_v11 = vld [vmem:[%s16629_s5 + $0x1e0] sm:$0xff] }
 0x555   : > { %v5670_v13 = vsel %vm17582_vm12, %v5634_v22, 0.0  ;;  %8335 = vmatpush.bf16.msra.mxu0 %v11185_v20  ;;  %vm17588_vm12 = vcmask 1046528   ;;  %v6441_v61 = vor.u32 %v6439_v38, %v15195_v52  ;;  %v17596_v38 = vld [vmem:[#allocation58_spill] sm:$0xff] }
 0x556   : > { %v6054_v30 = vsel %vm11941_vm4, %v6045_v63, %v6053_v3  ;;  %v5706_v37 = vpack.c.bf16 %v5670_v13, %v5670_v13  ;;  %v15252_v33 = vld [vmem:[#allocation3 + $0x88] sm:$0xff]  ;;  %v15264_v13 = vld [vmem:[#allocation3 + $0x20] sm:$0xff]  ;;  %vm17591_vm9 = vmmov %vm17588_vm12 }
 0x557   : > { %v15254_v10 = vld [vmem:[#allocation3 + $0x88] sm:$0xff]  ;;  %6139 = vst [vmem:[#allocation3 + $0x90] sm:$0xf] %v6054_v30  ;;  %v17586_v51 = vrot.slane %v15252_v33, 1 }
 0x558   : > { %v6057_v7 = vshrl.u32 %v5706_v37, 16  ;;  %v6060_v57 = vshll.u32 %v5706_v37, 16  ;;  %v11184_v63 = vld [vmem:[%s16629_s5 + $0x188] sm:$0xff]  ;;  %v15266_v41 = vpop.f32.mrf.mxu2  ;;  %v6443_v37 = vshll.u32 %v15252_v33, 16  ;;  %v17589_v4 = vrot.slane %v15254_v10, 1  ;;  %8725 = vmatpush.bf16.msra.mxu1 %v15275_v11 }
 0x559   : > { %v15257_v54 = vpop.f32.mrf.mxu0  ;;  %17584 = vst [vmem:[#allocation112_spill] sm:$0xff] %v15266_v41  ;;  %v15268_v30 = vpop.f32.mrf.mxu1  ;;  %8336 = vmatpush.bf16.msra.mxu0 %v11184_v63  ;;  %v11426_v63 = vld [vmem:[#allocation3 + $0x48] sm:$0xff] }
 0x55a   : > { %17583 = vst [vmem:[#allocation81_spill] sm:$0xff] %v15257_v54  ;;  %v6059_v20 = vrot.slane %v6057_v7, 6  ;;  %v6062_v22 = vrot.slane %v6060_v57, 7  ;;  %v15277_v6 = vpop.f32.mrf.mxu3  ;;  %v6840_v54 = vsel %vm17588_vm12, %v17587_v60, %v17586_v51  ;;  %v6445_v7 = vrot.slane %v6443_v37, 1  ;;  %v6141_v60 = vld [vmem:[#allocation3 + $0x98] sm:$0x3] }
 0x55b   : > { %17585 = vst [vmem:[#allocation147_spill] sm:$0xff] %v15268_v30  ;;  %v17590_v30 = vrot.slane %v15160_v36, 1  ;;  %v6055_v57 = vrot.slane %v6053_v3, 4  ;;  %v8881_v51 = vrot.slane %v15264_v13, 3  ;;  %vm17592_vm12 = vsmask.f32 7424 }
 0x55c   : > { %6997 = vmatmul.bf16.gmra.mxu0 %v6840_v54  ;;  %v6063_v29 = vor.u32 %v6062_v22, %v6059_v20  ;;  %v6446_v36 = vsel %vm17592_vm12, %v6441_v61, %v6445_v7  ;;  %v15306_v54 = vld [vmem:[%s16629_s5 + $0x238] sm:$0xff]  ;;  %v17593_v22 = vrot.slane %v15170_v5, 3  ;;  %vm17597_vm12 = vnez %v17596_v38 }
 0x55d   : > { %v7223_v41 = vsel %vm17591_vm9, %v17590_v30, %v17589_v4  ;;  %vm17594_vm9 = vcmask 1044480   ;;  %8337 = vmatpush.bf16.msra.mxu0 %v11183_v39  ;;  %8981 = vmatpush.bf16.msra.mxu2 %v15306_v54 }
 0x55e   : > { %7377 = vmatmul.bf16.gmra.mxu1 %v7223_v41  ;;  %v15299_v41 = vld [vmem:[%s16629_s5 + $0x1d8] sm:$0xff]  ;;  %v6064_v52 = vsel %vm11941_vm4, %v6055_v57, %v6063_v29  ;;  %v6065_v4 = vrot.slane %v6063_v29, 4  ;;  %6609 = vmatmul.bf16.gmra.mxu2 %v6446_v36  ;;  %v6196_v3 = vld [vmem:[#allocation3 + $0x90] sm:$0x1]  ;;  %v15311_v61 = vsel %vm17594_vm9, %v17593_v22, %v8881_v51  ;;  %vm17604_vm4 = vmmov %vm17594_vm9  ;;  %vm17607_vm9 = vcmask 1046528  }
 0x55f   : > { %17595 = vst [vmem:[#allocation138_spill] sm:$0xff] %v15311_v61  ;;  %6739 = vmatmul.bf16.gmra.mxu3 %v11426_v63  ;;  %v6287_v30 = vunpack.c.l.b16 %v6196_v3  ;;  %8726 = vmatpush.bf16.msra.mxu1 %v15299_v41  ;;  %v15326_v36 = vld [vmem:[%s16629_s5 + $0x1d0] sm:$0xff] }
 0x560   : > { %6140 = vst [vmem:[#allocation3 + $0x94] sm:$0xf] %v6064_v52  ;;  %v6142_v23 = vsel %vm17597_vm12, %v6065_v4, %v6141_v60  ;;  %v15330_v60 = vld [vmem:[#allocation3 + $0x28] sm:$0xff]  ;;  %vm17609_vm12 = vmmov %vm17607_vm9 }
 0x561   : > { %v15315_v29 = vpop.f32.mrf.mxu0  ;;  %6143 = vst [vmem:[#allocation3 + $0x98] sm:$0x3] %v6142_v23  ;;  %v15318_v37 = vpop.f32.mrf.mxu2  ;;  %v6306_v57 = vpack.c.b16 %v6287_v30, %v6287_v30  ;;  %v15336_v4 = vld [vmem:[%s16629_s5 + $0x1c8] sm:$0xff]  ;;  %v8883_v63 = vrot.slane %v15330_v60, 3 }
 0x562   : > { %17598 = vst [vmem:[#allocation171_spill] sm:$0xff] %v15315_v29  ;;  %v15320_v20 = vpop.f32.mrf.mxu1  ;;  %v15328_v52 = vpop.f32.mrf.mxu3  ;;  %v6447_v29 = vshrl.u32 %v15252_v33, 16 }
 0x563   : > { %17599 = vst [vmem:[#allocation84_spill] sm:$0xff] %v15318_v37  ;;  %8727 = vmatpush.bf16.msra.mxu1 %v15326_v36  ;;  %v6451_v39 = vshll.u32 %v6306_v57, 16  ;;  %v6841_v3 = vrot.slane %v6306_v57, 1  ;;  %v15350_v37 = vld [vmem:[%s16629_s5 + $0x1c0] sm:$0xff]  ;;  %v15353_v57 = vsel %vm17604_vm4, %v8881_v51, %v8883_v63 }
 0x564   : > { %17600 = vst [vmem:[#allocation88_spill] sm:$0xff] %v15320_v20 }
 0x565   : > { %v6453_v20 = vrot.slane %v6451_v39, 1  ;;  %17605 = vst [vmem:[#allocation87_spill] sm:$0xff] %v15353_v57  ;;  %v6449_v39 = vor.u32 %v6447_v29, %v6445_v7  ;;  %v11427_v57 = vld [vmem:[#allocation3 + $0x50] sm:$0xff] }
 0x567   : > { %v11141_v22 = vld [vmem:[#allocation3 + $0x90] sm:$0xff]  ;;  %8728 = vmatpush.bf16.msra.mxu1 %v15336_v4  ;;  %v6454_v18 = vsel %vm17610_vm3, %v6449_v39, %v6453_v20  ;;  %v17615_v39 = vunpack.c.l.b16 %v15147_v28  ;;  %vm17616_vm3 = vmmov %vm17604_vm4 }
 0x568   : > { %v7224_v38 = vrot.slane %v11141_v22, 1  ;;  %v17606_v22 = vrot.slane %v15252_v33, 1  ;;  %v7080_v19 = vld [vmem:[#allocation3 + $0x98] sm:$0x1]  ;;  %v15375_v20 = vld [vmem:[#allocation3 + $0x30] sm:$0xff]  ;;  %vm17619_vm4 = vmmov %vm17607_vm9 }
 0x569   : > { %v15339_v30 = vpop.f32.mrf.mxu0  ;;  %v15342_v23 = vpop.f32.mrf.mxu2  ;;  %v7171_v51 = vunpack.c.l.b16 %v7080_v19  ;;  %v17614_v19 = vld [vmem:[#allocation103_spill] sm:$0xff]  ;;  %v8885_v46 = vrot.slane %v15375_v20, 3 }
 0x56a   : > { %17601 = vst [vmem:[#allocation85_spill] sm:$0xff] %v15339_v30  ;;  %v15344_v61 = vpop.f32.mrf.mxu1  ;;  %v15355_v14 = vpop.f32.mrf.mxu3  ;;  %v6842_v30 = vsel %vm17607_vm9, %v17606_v22, %v6841_v3  ;;  %v15367_v3 = vld [vmem:[#allocation3 + $0x10] sm:$0xff]  ;;  %v7454_v22 = vshll.u32 %v17614_v19, 16  ;;  %vm17620_vm9 = vcmask 1045504  }
 0x56b   : > { %17602 = vst [vmem:[#allocation149_spill] sm:$0xff] %v15342_v23  ;;  %v17608_v23 = vrot.slane %v15254_v10, 1  ;;  %8729 = vmatpush.bf16.msra.mxu1 %v15350_v37  ;;  %v7459_v10 = vshrl.u32 %v15367_v3, 16  ;;  %v7190_v29 = vpack.c.b16 %v7171_v51, %v7171_v51  ;;  %v15386_v21 = vsel %vm17616_vm3, %v8883_v63, %v8885_v46 }
 0x56c   : > { %17603 = vst [vmem:[#allocation173_spill] sm:$0xff] %v15344_v61  ;;  %7002 = vmatmul.bf16.gmra.mxu0 %v6842_v30  ;;  %v7462_v30 = vshll.u32 %v15367_v3, 16 }
 0x56d   : > { %v7225_v61 = vsel %vm17609_vm12, %v17608_v23, %v7224_v38  ;;  %v8171_v23 = vunpack.c.l.b16 %v8080_v43  ;;  %v7461_v45 = vrot.slane %v7459_v10, 1  ;;  %v7456_v43 = vrot.slane %v7454_v22, 2  ;;  %17617 = vst [vmem:[#allocation151_spill] sm:$0xff] %v15386_v21  ;;  %v15407_v22 = vld [vmem:[#allocation3 + $0x18] sm:$0xff] }
 0x56e   : > { %7382 = vmatmul.bf16.gmra.mxu1 %v7225_v61  ;;  %6614 = vmatmul.bf16.gmra.mxu2 %v6454_v18  ;;  %v7464_v9 = vrot.slane %v7462_v30, 2  ;;  %vm17623_vm12 = vsmask.f32 6400 }
 0x56f   : > { %6744 = vmatmul.bf16.gmra.mxu3 %v11427_v57  ;;  %v7451_v57 = vshrl.u32 %v17614_v19, 16 }
 0x570   : > { %v7465_v58 = vor.u32 %v7464_v9, %v7461_v45  ;;  %v8495_v45 = vshrl.u32 %v15170_v5, 16  ;;  %v8498_v9 = vshll.u32 %v15170_v5, 16 }
 0x571   : > { %v15365_v1 = vpop.f32.mrf.mxu2  ;;  %v15371_v61 = vpop.f32.mrf.mxu0  ;;  %v7453_v51 = vrot.slane %v7451_v57, 1  ;;  %v11163_v57 = vld [vmem:[%s16629_s5 + $0x168] sm:$0xff] }
 0x572   : > { %17611 = vst [vmem:[#allocation132_spill] sm:$0xff] %v15365_v1  ;;  %v15373_v7 = vpop.f32.mrf.mxu3  ;;  %v15377_v18 = vpop.f32.mrf.mxu1  ;;  %v8208_v1 = vpack.c.b16 %v17615_v39, %v8171_v23  ;;  %7947 = vmatpush.bf16.msra.mxu3 %v11163_v57  ;;  %v7468_v39 = vshrl.u32 %v15407_v22, 16 }
 0x573   : > { %17612 = vst [vmem:[#allocation124_spill] sm:$0xff] %v15371_v61  ;;  %v7226_v61 = vrot.slane %v7190_v29, 1  ;;  %v7457_v30 = vor.u32 %v7456_v43, %v7453_v51  ;;  %v7471_v51 = vshll.u32 %v15407_v22, 16 }
 0x574   : > { %17613 = vst [vmem:[#allocation92_spill] sm:$0xff] %v15377_v18  ;;  %v8227_v18 = vrot.slane %v8208_v1, 2 }
 0x575   : > { %v7227_v28 = vsel %vm17619_vm4, %v7224_v38, %v7226_v61  ;;  %v7466_v63 = vsel %vm17623_vm12, %v7457_v30, %v7465_v58  ;;  %v8487_v38 = vshrl.u32 %v8208_v1, 16  ;;  %v8490_v61 = vshll.u32 %v8208_v1, 16  ;;  %v15413_v30 = vld [vmem:[#allocation3 + $0x38] sm:$0xff]  ;;  %v15418_v1 = vld [vmem:[%s16629_s5 + $0x230] sm:$0xff]  ;;  %vm17630_vm4 = vmmov %vm17620_vm9 }
 0x576   : > { %v8229_v10 = vsel %vm17620_vm9, %v8227_v18, %v8228_v59  ;;  %v7473_v21 = vrot.slane %v7471_v51, 2  ;;  %v8887_v57 = vrot.slane %v15413_v30, 3  ;;  %8982 = vmatpush.bf16.msra.mxu2 %v15418_v1  ;;  %vm17631_vm9 = vsmask.f32 5376 }
 0x577   : > { %v8489_v5 = vrot.slane %v8487_v38, 2 }
 0x579   : > { %v15388_v53 = vpop.f32.mrf.mxu2  ;;  %v15394_v29 = vpop.f32.mrf.mxu0 }
 0x57a   : > { %17618 = vst [vmem:[#allocation145_spill] sm:$0xff] %v15388_v53  ;;  %v15390_v19 = vpop.f32.mrf.mxu3  ;;  %v15396_v23 = vpop.f32.mrf.mxu1 }
 0x57b   : > { %17621 = vst [vmem:[#allocation64_spill] sm:$0xff] %v15394_v29 }
 0x57c   : > { %8338 = vmatmul.bf16.vlgmr.msra.gmra.mxu0 %v8229_v10  ;;  %17622 = vst [vmem:[#allocation89_spill] sm:$0xff] %v15396_v23  ;;  %v8500_v10 = vrot.slane %v8498_v9, 3  ;;  %v15428_v9 = vsel %vm17616_vm3, %v8885_v46, %v8887_v57  ;;  %v8507_v46 = vshll.u32 %v15264_v13, 16 }
 0x57d   : > { %17627 = vst [vmem:[#allocation90_spill] sm:$0xff] %v15428_v9 }
 0x57e   : > { %7387 = vmatmul.bf16.gmra.mxu1 %v7227_v28  ;;  %7694 = vmatmul.bf16.vlgmr.msrb.gmra.mxu2 %v7466_v63  ;;  %v8497_v28 = vrot.slane %v8495_v45, 2  ;;  %v8492_v63 = vrot.slane %v8490_v61, 3 }
 0x57f   : > { %6749 = vmatmul.bf16.gmra.mxu3 %v14862_v31  ;;  %v7470_v31 = vrot.slane %v7468_v39, 1 }
 0x580   : > { %v8501_v23 = vor.u32 %v8500_v10, %v8497_v28  ;;  %v8493_v38 = vor.u32 %v8492_v63, %v8489_v5  ;;  %v8504_v10 = vshrl.u32 %v15264_v13, 16 }
 0x581   : > { %v15405_v18 = vpop.f32.mrf.mxu2  ;;  %v15421_v29 = vpop.f32.mrf.mxu0  ;;  %v7474_v39 = vor.u32 %v7473_v21, %v7470_v31 }
 0x582   : > { %17624 = vst [vmem:[#allocation131_spill] sm:$0xff] %v15405_v18  ;;  %v15411_v43 = vpop.f32.mrf.mxu3  ;;  %v8230_v18 = vrot.slane %v15264_v13, 2  ;;  %v15424_v45 = vpop.f32.mrf.mxu1  ;;  %v8506_v31 = vrot.slane %v8504_v10, 2 }
 0x583   : > { %17625 = vst [vmem:[#allocation127_spill] sm:$0xff] %v15421_v29  ;;  %v8502_v29 = vsel %vm17631_vm9, %v8493_v38, %v8501_v23  ;;  %v7475_v28 = vsel %vm17623_vm12, %v7465_v58, %v7474_v39  ;;  %v8509_v38 = vrot.slane %v8507_v46, 3 }
 0x584   : > { %17626 = vst [vmem:[#allocation152_spill] sm:$0xff] %v15424_v45  ;;  %v8231_v53 = vsel %vm17630_vm4, %v8228_v59, %v8230_v18  ;;  %v15446_v59 = vld [vmem:[#allocation3 + $0x20] sm:$0xff] }
 0x589   : > { %v15430_v61 = vpop.f32.mrf.mxu2  ;;  %v15440_v5 = vpop.f32.mrf.mxu0 }
 0x58a   : > { %17628 = vst [vmem:[#allocation93_spill] sm:$0xff] %v15430_v61  ;;  %v15432_v51 = vpop.f32.mrf.mxu3  ;;  %v15442_v21 = vpop.f32.mrf.mxu1 }
 0x58b   : > { %17629 = vst [vmem:[#allocation94_spill] sm:$0xff] %v15432_v51 }
 0x58c   : > { %8343 = vmatmul.bf16.gmra.mxu0 %v8231_v53  ;;  %17632 = vst [vmem:[#allocation136_spill] sm:$0xff] %v15440_v5  ;;  %v7477_v53 = vshrl.u32 %v15446_v59, 16  ;;  %v8232_v5 = vrot.slane %v15330_v60, 2 }
 0x58d   : > { %17633 = vst [vmem:[#allocation86_spill] sm:$0xff] %v15442_v21  ;;  %v8510_v21 = vor.u32 %v8509_v38, %v8506_v31  ;;  %v8516_v31 = vshll.u32 %v15330_v60, 16  ;;  %v11162_v38 = vld [vmem:[%s16629_s5 + $0x160] sm:$0xff] }
 0x58e   : > { %8730 = vmatmul.bf16.vlgmr.msra.gmra.mxu1 %v8502_v29  ;;  %7699 = vmatmul.bf16.gmra.mxu2 %v7475_v28  ;;  %v7480_v29 = vshll.u32 %v15446_v59, 16  ;;  %v15452_v28 = vld [vmem:[#allocation3 + $0x40] sm:$0xff]  ;;  %v7479_v13 = vrot.slane %v7477_v53, 1  ;;  %v8233_v10 = vsel %vm17630_vm4, %v8230_v18, %v8232_v5 }
 0x58f   : > { %6754 = vmatmul.bf16.gmra.mxu3 %v14924_v56  ;;  %v8889_v9 = vrot.slane %v15452_v28, 3  ;;  %v8511_v46 = vsel %vm17631_vm9, %v8501_v23, %v8510_v21  ;;  %v15478_v23 = vld [vmem:[#allocation3 + $0x28] sm:$0xff] }
 0x590   : > { %v7482_v56 = vrot.slane %v7480_v29, 2  ;;  %7948 = vmatpush.bf16.msra.mxu3 %v11162_v38 }
 0x591   : > { %v15444_v63 = vpop.f32.mrf.mxu2  ;;  %v15461_v51 = vpop.f32.mrf.mxu0 }
 0x592   : > { %17634 = vst [vmem:[#allocation154_spill] sm:$0xff] %v15444_v63  ;;  %v15450_v58 = vpop.f32.mrf.mxu3  ;;  %v15457_v63 = vsel %vm17616_vm3, %v8887_v57, %v8889_v9  ;;  %v7483_v45 = vor.u32 %v7482_v56, %v7479_v13  ;;  %v15467_v53 = vpop.f32.mrf.mxu1  ;;  %v8513_v57 = vshrl.u32 %v15330_v60, 16  ;;  %v7486_v13 = vshrl.u32 %v15478_v23, 16  ;;  %v15484_v60 = vld [vmem:[#allocation3 + $0x48] sm:$0xff] }
 0x593   : > { %17635 = vst [vmem:[#allocation142_spill] sm:$0xff] %v15450_v58 }
 0x594   : > { %17636 = vst [vmem:[#allocation52_spill] sm:$0xff] %v15457_v63  ;;  %v7484_v29 = vsel %vm17623_vm12, %v7474_v39, %v7483_v45  ;;  %v7489_v39 = vshll.u32 %v15478_v23, 16 }
 0x595   : > { %17638 = vst [vmem:[#allocation96_spill] sm:$0xff] %v15461_v51  ;;  %v8891_v51 = vrot.slane %v15484_v60, 3 }
 0x596   : > { %17640 = vst [vmem:[#allocation175_spill] sm:$0xff] %v15467_v53  ;;  %v7491_v38 = vrot.slane %v7489_v39, 2 }
 0x599   : > { %v15459_v61 = vpop.f32.mrf.mxu2 }
 0x59a   : > { %17637 = vst [vmem:[#allocation70_spill] sm:$0xff] %v15459_v61  ;;  %v15463_v58 = vpop.f32.mrf.mxu3  ;;  %v15488_v63 = vpop.f32.mrf.mxu1  ;;  %v8234_v61 = vrot.slane %v15375_v20, 2 }
 0x59b   : > { %17639 = vst [vmem:[#allocation30_spill] sm:$0xff] %v15463_v58 }
 0x59c   : > { %8348 = vmatmul.bf16.gmra.mxu0 %v8233_v10  ;;  %v8515_v10 = vrot.slane %v8513_v57, 2  ;;  %17644 = vst [vmem:[#allocation99_spill] sm:$0xff] %v15488_v63  ;;  %v15499_v57 = vsel %vm17616_vm3, %v8889_v9, %v8891_v51  ;;  %v8235_v39 = vsel %vm17630_vm4, %v8232_v5, %v8234_v61  ;;  %v8525_v9 = vshll.u32 %v15375_v20, 16  ;;  %v15517_v5 = vld [vmem:[#allocation3 + $0x30] sm:$0xff] }
 0x59d   : > { %17645 = vst [vmem:[#allocation29_spill] sm:$0xff] %v15499_v57 }
 0x59e   : > { %8735 = vmatmul.bf16.gmra.mxu1 %v8511_v46  ;;  %7704 = vmatmul.bf16.gmra.mxu2 %v7484_v29  ;;  %v8518_v46 = vrot.slane %v8516_v31, 3  ;;  %v15486_v29 = vpop.f32.mrf.mxu0 }
 0x59f   : > { %6759 = vmatmul.bf16.gmra.mxu3 %v14981_v44  ;;  %17643 = vst [vmem:[#allocation102_spill] sm:$0xff] %v15486_v29  ;;  %v7488_v44 = vrot.slane %v7486_v13, 1 }
 0x5a0   : > { %v8519_v53 = vor.u32 %v8518_v46, %v8515_v10  ;;  %v8522_v10 = vshrl.u32 %v15375_v20, 16 }
 0x5a1   : > { %v15476_v18 = vpop.f32.mrf.mxu2  ;;  %v7492_v29 = vor.u32 %v7491_v38, %v7488_v44 }
 0x5a2   : > { %17641 = vst [vmem:[#allocation156_spill] sm:$0xff] %v15476_v18  ;;  %v15482_v56 = vpop.f32.mrf.mxu3  ;;  %v15493_v18 = vld [vmem:[%s16629_s5 + $0x228] sm:$0xff]  ;;  %v8520_v63 = vsel %vm17631_vm9, %v8510_v21, %v8519_v53  ;;  %v15512_v46 = vpop.f32.mrf.mxu1  ;;  %v7495_v21 = vshrl.u32 %v15517_v5, 16  ;;  %v8524_v38 = vrot.slane %v8522_v10, 2 }
 0x5a3   : > { %17642 = vst [vmem:[#allocation60_spill] sm:$0xff] %v15482_v56  ;;  %8983 = vmatpush.bf16.msra.mxu2 %v15493_v18  ;;  %v7493_v56 = vsel %vm17623_vm12, %v7483_v45, %v7492_v29 }
 0x5a4   : > { %17649 = vst [vmem:[#allocation97_spill] sm:$0xff] %v15512_v46  ;;  %v7497_v57 = vrot.slane %v7495_v21, 1 }
 0x5a6   : > { %v15508_v58 = vpop.f32.mrf.mxu0 }
 0x5a7   : > { %17648 = vst [vmem:[#allocation107_spill] sm:$0xff] %v15508_v58 }
 0x5a9   : > { %v15501_v31 = vpop.f32.mrf.mxu2 }
 0x5aa   : > { %17646 = vst [vmem:[#allocation158_spill] sm:$0xff] %v15501_v31  ;;  %v15503_v13 = vpop.f32.mrf.mxu3 }
 0x5ab   : > { %17647 = vst [vmem:[#allocation98_spill] sm:$0xff] %v15503_v13  ;;  %v15532_v13 = vpop.f32.mrf.mxu1 }
 0x5ac   : > { %8353 = vmatmul.bf16.gmra.mxu0 %v8235_v39  ;;  %v15523_v39 = vld [vmem:[#allocation3 + $0x50] sm:$0xff]  ;;  %17653 = vst [vmem:[#allocation110_spill] sm:$0xff] %v15532_v13 }
 0x5ad   : > { %v8893_v58 = vrot.slane %v15523_v39, 3 }
 0x5ae   : > { %8740 = vmatmul.bf16.gmra.mxu1 %v8520_v63  ;;  %7709 = vmatmul.bf16.gmra.mxu2 %v7493_v56  ;;  %v7498_v63 = vshll.u32 %v15517_v5, 16  ;;  %v8527_v56 = vrot.slane %v8525_v9, 3  ;;  %v15530_v46 = vpop.f32.mrf.mxu0 }
 0x5af   : > { %6764 = vmatmul.bf16.gmra.mxu3 %v15034_v26  ;;  %v8236_v26 = vrot.slane %v15413_v30, 2  ;;  %17652 = vst [vmem:[#allocation73_spill] sm:$0xff] %v15530_v46 }
 0x5b0   : > { %v7500_v20 = vrot.slane %v7498_v63, 2  ;;  %v8528_v31 = vor.u32 %v8527_v56, %v8524_v38  ;;  %v8534_v56 = vshll.u32 %v15413_v30, 16 }
 0x5b1   : > { %v15515_v44 = vpop.f32.mrf.mxu2  ;;  %v8237_v21 = vsel %vm17630_vm4, %v8234_v61, %v8236_v26  ;;  %v15549_v61 = vld [vmem:[#allocation3 + $0x38] sm:$0xff] }
 0x5b2   : > { %17650 = vst [vmem:[#allocation95_spill] sm:$0xff] %v15515_v44  ;;  %v15521_v45 = vpop.f32.mrf.mxu3  ;;  %v15528_v44 = vsel %vm17616_vm3, %v8891_v51, %v8893_v58  ;;  %v7501_v10 = vor.u32 %v7500_v20, %v7497_v57  ;;  %v8529_v63 = vsel %vm17631_vm9, %v8519_v53, %v8528_v31  ;;  %v8531_v51 = vshrl.u32 %v15413_v30, 16  ;;  %v11161_v57 = vld [vmem:[%s16629_s5 + $0x158] sm:$0xff] }
 0x5b3   : > { %17651 = vst [vmem:[#allocation160_spill] sm:$0xff] %v15528_v44  ;;  %v7504_v53 = vshrl.u32 %v15549_v61, 16  ;;  %7949 = vmatpush.bf16.msra.mxu3 %v11161_v57  ;;  %v15559_v44 = vpop.f32.mrf.mxu1  ;;  %v8238_v57 = vrot.slane %v15452_v28, 2 }
 0x5b4   : > { %v7502_v38 = vsel %vm17623_vm12, %v7492_v29, %v7501_v10  ;;  %v8533_v30 = vrot.slane %v8531_v51, 2  ;;  %17659 = vst [vmem:[#allocation34_spill] sm:$0xff] %v15559_v44 }
 0x5b5   : > { %v8239_v44 = vsel %vm17630_vm4, %v8236_v26, %v8238_v57  ;;  %v15599_v26 = vld [vmem:[#allocation3 + $0x40] sm:$0xff] }
 0x5b6   : > { %v15553_v29 = vpop.f32.mrf.mxu0 }
 0x5b7   : > { %17657 = vst [vmem:[#allocation75_spill] sm:$0xff] %v15553_v29 }
 0x5b9   : > { %v15534_v40 = vpop.f32.mrf.mxu2 }
 0x5ba   : > { %17654 = vst [vmem:[#allocation100_spill] sm:$0xff] %v15534_v40  ;;  %v15536_v9 = vpop.f32.mrf.mxu3  ;;  %v7506_v40 = vrot.slane %v7504_v53, 1 }
 0x5bb   : > { %17655 = vst [vmem:[#allocation54_spill] sm:$0xff] %v15536_v9 }
 0x5bc   : > { %8358 = vmatmul.bf16.gmra.mxu0 %v8237_v21  ;;  %v7507_v21 = vshll.u32 %v15549_v61, 16 }
 0x5be   : > { %8745 = vmatmul.bf16.gmra.mxu1 %v8529_v63  ;;  %7714 = vmatmul.bf16.gmra.mxu2 %v7502_v38  ;;  %v8536_v38 = vrot.slane %v8534_v56, 3  ;;  %v7509_v46 = vrot.slane %v7507_v21, 2  ;;  %v11159_v56 = vld [vmem:[%s16629_s5 + $0x148] sm:$0xff] }
 0x5bf   : > { %6769 = vmatmul.bf16.gmra.mxu3 %v15090_v47  ;;  %v15557_v47 = vld [vmem:[#allocation3 + $0x58] sm:$0xff] }
 0x5c0   : > { %v16807_v13 = vrot.slane %v15557_v47, 3  ;;  %v8537_v9 = vor.u32 %v8536_v38, %v8533_v30  ;;  %v7510_v21 = vor.u32 %v7509_v46, %v7506_v40  ;;  %v15588_v38 = vld [vmem:[%s16629_s5 + $0x220] sm:$0xff]  ;;  %v8543_v46 = vshll.u32 %v15452_v28, 16 }
 0x5c1   : > { %v15547_v20 = vpop.f32.mrf.mxu2  ;;  %v11158_v40 = vld [vmem:[%s16629_s5 + $0x140] sm:$0xff]  ;;  %8984 = vmatpush.bf16.msra.mxu2 %v15588_v38 }
 0x5c2   : > { %17656 = vst [vmem:[#allocation161_spill] sm:$0xff] %v15547_v20  ;;  %v15555_v63 = vpop.f32.mrf.mxu3  ;;  %v11160_v20 = vld [vmem:[%s16629_s5 + $0x150] sm:$0xff]  ;;  %v15569_v51 = vsel %vm17616_vm3, %v8893_v58, %v16807_v13  ;;  %v15582_v58 = vpop.f32.mrf.mxu1  ;;  %v7511_v30 = vsel %vm17623_vm12, %v7501_v10, %v7510_v21  ;;  %v7513_v10 = vshrl.u32 %v15599_v26, 16  ;;  %v8545_v13 = vrot.slane %v8543_v46, 3  ;;  %vm17668_vm3 = vmmov %vm17630_vm4 }
 0x5c3   : > { %17658 = vst [vmem:[#allocation115_spill] sm:$0xff] %v15555_v63  ;;  %7950 = vmatpush.bf16.msra.mxu3 %v11160_v20  ;;  %v8538_v63 = vsel %vm17631_vm9, %v8528_v31, %v8537_v9  ;;  %v15580_v20 = vpop.f32.mrf.mxu0  ;;  %v8540_v31 = vshrl.u32 %v15452_v28, 16  ;;  %vm17669_vm4 = vmmov %vm17631_vm9 }
 0x5c4   : > { %17660 = vst [vmem:[#allocation33_spill] sm:$0xff] %v15569_v51  ;;  %v7515_v28 = vrot.slane %v7513_v10, 1  ;;  %vm17670_vm9 = vmmov %vm17623_vm12  ;;  %v8552_v10 = vshll.u32 %v15484_v60, 16  ;;  %vm17676_vm12 = vcmask 1044480  }
 0x5c5   : > { %17662 = vst [vmem:[#allocation62_spill] sm:$0xff] %v15580_v20 }
 0x5c6   : > { %17663 = vst [vmem:[#allocation119_spill] sm:$0xff] %v15582_v58 }
 0x5c7   : > { %7951 = vmatpush.bf16.msra.mxu3 %v11159_v56 }
 0x5c9   : > { %v15574_v53 = vpop.f32.mrf.mxu2 }
 0x5ca   : > { %17661 = vst [vmem:[#allocation162_spill] sm:$0xff] %v15574_v53  ;;  %v15576_v29 = vpop.f32.mrf.mxu3  ;;  %v15610_v53 = vpop.f32.mrf.mxu1 }
 0x5cb   : > { %7952 = vmatpush.bf16.msra.mxu3 %v11158_v40  ;;  %v8240_v40 = vrot.slane %v15484_v60, 2  ;;  %17666 = vst [vmem:[#allocation105_spill] sm:$0xff] %v15610_v53 }
 0x5cc   : > { %8363 = vmatmul.bf16.gmra.mxu0 %v8239_v44 }
 0x5ce   : > { %8750 = vmatmul.bf16.gmra.mxu1 %v8538_v63  ;;  %7719 = vmatmul.bf16.gmra.mxu2 %v7511_v30  ;;  %v7516_v63 = vshll.u32 %v15599_v26, 16  ;;  %v8542_v30 = vrot.slane %v8540_v31, 2  ;;  %v8241_v31 = vsel %vm17668_vm3, %v8238_v57, %v8240_v40 }
 0x5cf   : > { %6774 = vmatmul.bf16.gmra.mxu3 %v15158_v2  ;;  %v15607_v2 = vpop.f32.mrf.mxu0 }
 0x5d0   : > { %11324 = vmatpush.bf16.msrb.mxu3 %v15209_v62  ;;  %v7518_v51 = vrot.slane %v7516_v63, 2  ;;  %17665 = vst [vmem:[#allocation163_spill] sm:$0xff] %v15607_v2  ;;  %v15632_v63 = vld [vmem:[#allocation3 + $0x48] sm:$0xff]  ;;  %v17675_v2 = vrot.slane %v15557_v47, 3 }
 0x5d1   : > { %v15597_v44 = vpop.f32.mrf.mxu2 }
 0x5d2   : > { %17664 = vst [vmem:[#allocation101_spill] sm:$0xff] %v15597_v44  ;;  %v15604_v56 = vpop.f32.mrf.mxu3  ;;  %v8546_v44 = vor.u32 %v8545_v13, %v8542_v30  ;;  %v7519_v58 = vor.u32 %v7518_v51, %v7515_v28  ;;  %v8549_v13 = vshrl.u32 %v15484_v60, 16  ;;  %v15628_v57 = vpop.f32.mrf.mxu1  ;;  %v7821_v28 = vld [vmem:[#allocation3 + $0x8] sm:$0xc] }
 0x5d3   : > { %17672 = vst [vmem:[#allocation164_spill] sm:$0xff] %v15628_v57 }
 0x5d4   : > { %11325 = vmatpush.bf16.msrb.mxu3 %v15232_v16  ;;  %v8547_v46 = vsel %vm17669_vm4, %v8537_v9, %v8546_v44  ;;  %v7520_v16 = vsel %vm17670_vm9, %v7510_v21, %v7519_v58  ;;  %v7522_v21 = vshrl.u32 %v15632_v63, 16  ;;  %v8551_v60 = vrot.slane %v8549_v13, 2 }
 0x5d7   : > { %v15626_v51 = vpop.f32.mrf.mxu0 }
 0x5d8   : > { %11326 = vmatpush.bf16.msrb.mxu3 %v15245_v24  ;;  %v15624_v24 = vld [vmem:[#allocation3 + $0x60] sm:$0xff]  ;;  %17671 = vst [vmem:[#allocation55_spill] sm:$0xff] %v15626_v51  ;;  %v7840_v51 = vunpack.c.l.b16 %v7821_v28  ;;  %v8558_v28 = vshrl.u32 %v15523_v39, 16 }
 0x5d9   : > { %v15612_v20 = vpop.f32.mrf.mxu2 }
 0x5da   : > { %17667 = vst [vmem:[#allocation123_spill] sm:$0xff] %v15612_v20  ;;  %v15615_v62 = vpop.f32.mrf.mxu3 }
 0x5dc   : > { %8368 = vmatmul.bf16.gmra.mxu0 %v8241_v31  ;;  %11327 = vmatpush.bf16.msrb.mxu3 %v15275_v11  ;;  %v7525_v11 = vshll.u32 %v15632_v63, 16  ;;  %v8897_v31 = vrot.slane %v15624_v24, 3 }
 0x5de   : > { %8755 = vmatmul.bf16.gmra.mxu1 %v8547_v46  ;;  %7724 = vmatmul.bf16.gmra.mxu2 %v7520_v16  ;;  %v7524_v46 = vrot.slane %v7522_v21, 1  ;;  %v7527_v16 = vrot.slane %v7525_v11, 2  ;;  %v15645_v57 = vsel %vm17676_vm12, %v17675_v2, %v8897_v31  ;;  %v15659_v2 = vpop.f32.mrf.mxu1  ;;  %vm17683_vm12 = vmmov %vm17668_vm3 }
 0x5df   : > { %6779 = vmatmul.bf16.gmra.mxu3 %v15252_v33  ;;  %v8554_v33 = vrot.slane %v8552_v10, 3  ;;  %17677 = vst [vmem:[#allocation50_spill] sm:$0xff] %v15645_v57  ;;  %v15652_v21 = vpop.f32.mrf.mxu0 }
 0x5e0   : > { %11328 = vmatpush.bf16.msrb.mxu3 %v15299_v41  ;;  %v17678_v41 = vld [vmem:[#allocation106_spill] sm:$0xff]  ;;  %17681 = vst [vmem:[#allocation68_spill] sm:$0xff] %v15652_v21 }
 0x5e1   : > { %v15630_v9 = vpop.f32.mrf.mxu2  ;;  %v8555_v20 = vor.u32 %v8554_v33, %v8551_v60  ;;  %v17679_v53 = vunpack.c.l.b16 %v17678_v41  ;;  %v7843_v33 = vrot.slane %v15367_v3, 2  ;;  %17682 = vst [vmem:[#allocation165_spill] sm:$0xff] %v15659_v2  ;;  %v11202_v3 = vld [vmem:[%s16629_s5 + $0x218] sm:$0xff]  ;;  %v17786_v2 = vld [vmem:[#allocation79_spill] sm:$0xff] }
 0x5e2   : > { %17673 = vst [vmem:[#allocation78_spill] sm:$0xff] %v15630_v9  ;;  %v15637_v30 = vpop.f32.mrf.mxu3  ;;  %v8242_v9 = vrot.slane %v15523_v39, 2  ;;  %8985 = vmatpush.bf16.msra.mxu2 %v11202_v3 }
 0x5e3   : > { %17674 = vst [vmem:[#allocation128_spill] sm:$0xff] %v15637_v30  ;;  %v7841_v13 = vpack.c.b16 %v17679_v53, %v7840_v51  ;;  %v7528_v30 = vor.u32 %v7527_v16, %v7524_v46  ;;  %v8556_v60 = vsel %vm17669_vm4, %v8546_v44, %v8555_v20  ;;  %v15669_v44 = vld [vmem:[#allocation3 + $0x68] sm:$0xff]  ;;  %vm17690_vm4 = vmmov %vm17683_vm12 }
 0x5e4   : > { %11329 = vmatpush.bf16.msrb.mxu3 %v15326_v36  ;;  %v8243_v11 = vsel %vm17668_vm3, %v8240_v40, %v8242_v9  ;;  %v8561_v40 = vshll.u32 %v15523_v39, 16  ;;  %v8560_v39 = vrot.slane %v8558_v28, 2  ;;  %vm17687_vm3 = vcmask 1044480  }
 0x5e5   : > { %v7842_v53 = vrot.slane %v7841_v13, 2  ;;  %v7529_v51 = vsel %vm17670_vm9, %v7519_v58, %v7528_v30  ;;  %v6696_v28 = vadd.f32 %v15234_v34, %v14793_v32  ;;  %vm17691_vm9 = vsmask.f32 5376 }
 0x5e6   : > { %v8563_v13 = vrot.slane %v8561_v40, 3 }
 0x5e8   : > { %11330 = vmatpush.bf16.msrb.mxu3 %v15336_v4  ;;  %v7844_v4 = vsel %vm17683_vm12, %v7842_v53, %v7843_v33  ;;  %v15684_v53 = vpop.f32.mrf.mxu1  ;;  %v8564_v57 = vor.u32 %v8563_v13, %v8560_v39  ;;  %vm17693_vm12 = vsmask.f32 6400  ;;  %v8567_v13 = vshrl.u32 %v15557_v47, 16 }
 0x5e9   : > { %v15649_v10 = vpop.f32.mrf.mxu2  ;;  %17686 = vst [vmem:[#allocation166_spill] sm:$0xff] %v15684_v53  ;;  %v17773_v53 = vld [vmem:[#allocation130_spill] sm:$0xff] }
 0x5ea   : > { %17680 = vst [vmem:[#allocation159_spill] sm:$0xff] %v15649_v10  ;;  %v15654_v36 = vpop.f32.mrf.mxu3 }
 0x5ec   : > { %8373 = vmatmul.bf16.gmra.mxu0 %v8243_v11  ;;  %11331 = vmatpush.bf16.msrb.mxu3 %v15350_v37  ;;  %v15674_v37 = vld [vmem:[#allocation3 + $0x50] sm:$0xff]  ;;  %v8899_v11 = vrot.slane %v15669_v44, 3 }
 0x5ed   : > { %v7531_v46 = vshrl.u32 %v15674_v37, 16  ;;  %v7534_v16 = vshll.u32 %v15674_v37, 16 }
 0x5ee   : > { %8760 = vmatmul.bf16.gmra.mxu1 %v8556_v60  ;;  %7729 = vmatmul.bf16.gmra.mxu2 %v7529_v51  ;;  %v15681_v60 = vpop.f32.mrf.mxu0 }
 0x5ef   : > { %7953 = vmatmul.bf16.vlgmr.msra.gmra.mxu3 %v7844_v4  ;;  %17685 = vst [vmem:[#allocation139_spill] sm:$0xff] %v15681_v60  ;;  %v7536_v51 = vrot.slane %v7534_v16, 2  ;;  %v8244_v4 = vrot.slane %v15557_v47, 2  ;;  %v7845_v16 = vrot.slane %v15407_v22, 2  ;;  %v15710_v22 = vld [vmem:[#allocation3 + $0x70] sm:$0xff] }
 0x5f0   : > { %11332 = vmatpush.bf16.msra.mxu3 %v15306_v54  ;;  %v7533_v54 = vrot.slane %v7531_v46, 1  ;;  %v8565_v46 = vsel %vm17691_vm9, %v8555_v20, %v8564_v57  ;;  %v15708_v20 = vpop.f32.mrf.mxu1 }
 0x5f1   : > { %v15672_v58 = vpop.f32.mrf.mxu2  ;;  %17696 = vst [vmem:[#allocation83_spill] sm:$0xff] %v15708_v20 }
 0x5f2   : > { %17684 = vst [vmem:[#allocation80_spill] sm:$0xff] %v15672_v58  ;;  %v15678_v41 = vpop.f32.mrf.mxu3  ;;  %v15688_v58 = vsel %vm17687_vm3, %v8897_v31, %v8899_v11  ;;  %v7537_v10 = vor.u32 %v7536_v51, %v7533_v54  ;;  %v17692_v31 = vld [vmem:[#allocation109_spill] sm:$0xff]  ;;  %vm17695_vm3 = vmmov %vm17690_vm4  ;;  %v6698_v54 = vadd.f32 %v15277_v6, %v14816_v50 }
 0x5f3   : > { %17688 = vst [vmem:[#allocation67_spill] sm:$0xff] %v15688_v58  ;;  %v7008_v39 = vadd.f32 %v17692_v31, %v6696_v28  ;;  %v15715_v28 = vld [vmem:[#allocation3 + $0x58] sm:$0xff]  ;;  %v8569_v31 = vrot.slane %v8567_v13, 2  ;;  %v17698_v58 = vld [vmem:[#allocation11_spill] sm:$0xff]  ;;  %vm17703_vm9 = vmmov %vm17695_vm3 }
 0x5f4   : > { %11333 = vmatpush.bf16.msra.mxu3 %v15418_v1  ;;  %v8245_v1 = vsel %vm17690_vm4, %v8242_v9, %v8244_v4  ;;  %v7538_v32 = vsel %vm17693_vm12, %v7528_v30, %v7537_v10  ;;  %v8570_v9 = vshll.u32 %v15557_v47, 16  ;;  %v7009_v50 = vadd.f32 %v17698_v58, %v6698_v54 }
 0x5f5   : > { %vm17699_vm4 = vcmask 1044480   ;;  %vm17704_vm12 = vsmask.f32 5376 }
 0x5f6   : > { %v15703_v34 = vpop.f32.mrf.mxu0  ;;  %v7394_v13 = vadd.f32 %v14853_v49, %v7009_v50  ;;  %v15748_v50 = vld [vmem:[#allocation3 + $0x78] sm:$0xff] }
 0x5f7   : > { %17694 = vst [vmem:[#allocation167_spill] sm:$0xff] %v15703_v34 }
 0x5f8   : > { %11334 = vmatpush.bf16.msra.mxu3 %v15493_v18  ;;  %v7846_v18 = vsel %vm17695_vm3, %v7843_v33, %v7845_v16  ;;  %v7540_v33 = vshrl.u32 %v15715_v28, 16  ;;  %vm17706_vm3 = vsmask.f32 6400 }
 0x5f9   : > { %v15693_v40 = vpop.f32.mrf.mxu2 }
 0x5fa   : > { %17689 = vst [vmem:[#allocation144_spill] sm:$0xff] %v15693_v40  ;;  %v15695_v60 = vpop.f32.mrf.mxu3  ;;  %v7542_v6 = vrot.slane %v7540_v33, 1 }
 0x5fc   : > { %8378 = vmatmul.bf16.gmra.mxu0 %v8245_v1  ;;  %11335 = vmatpush.bf16.msra.mxu3 %v15588_v38  ;;  %v17697_v38 = vld [vmem:[#allocation59_spill] sm:$0xff]  ;;  %v7543_v1 = vshll.u32 %v15715_v28, 16 }
 0x5fd   : > { %v7393_v51 = vadd.f32 %v17697_v38, %v7008_v39 }
 0x5fe   : > { %8765 = vmatmul.bf16.gmra.mxu1 %v8565_v46  ;;  %7734 = vmatmul.bf16.gmra.mxu2 %v7538_v32  ;;  %v8572_v32 = vrot.slane %v8570_v9, 3  ;;  %v7545_v39 = vrot.slane %v7543_v1, 2  ;;  %v15734_v9 = vpop.f32.mrf.mxu1  ;;  %v7847_v1 = vrot.slane %v15446_v59, 2 }
 0x5ff   : > { %7958 = vmatmul.bf16.gmra.mxu3 %v7846_v18  ;;  %v8901_v18 = vrot.slane %v15710_v22, 3  ;;  %17702 = vst [vmem:[#allocation72_spill] sm:$0xff] %v15734_v9  ;;  %v17756_v9 = vld [vmem:[#allocation60_spill] sm:$0xff] }
 0x600   : > { %11336 = vmatpush.bf16.msra.mxu3 %v11202_v3  ;;  %v8246_v3 = vrot.slane %v15624_v24, 2  ;;  %v8573_v38 = vor.u32 %v8572_v32, %v8569_v31  ;;  %v7546_v20 = vor.u32 %v7545_v39, %v7542_v6  ;;  %v8579_v32 = vshll.u32 %v15624_v24, 16  ;;  %v15753_v6 = vld [vmem:[#allocation3 + $0x60] sm:$0xff] }
 0x601   : > { %v7695_v30 = vpop.f32.mrf.mxu2  ;;  %v15727_v40 = vsel %vm17699_vm4, %v8899_v11, %v8901_v18  ;;  %vm17707_vm4 = vmmov %vm17703_vm9  ;;  %v7552_v39 = vshll.u32 %v15753_v6, 16 }
 0x602   : > { %v15719_v46 = vadd.f32 %v7695_v30, %v7393_v51  ;;  %v15721_v47 = vpop.f32.mrf.mxu3  ;;  %17700 = vst [vmem:[#allocation146_spill] sm:$0xff] %v15727_v40  ;;  %v6701_v51 = vadd.f32 %v15328_v52, %v14851_v55  ;;  %v15731_v30 = vpop.f32.mrf.mxu0  ;;  %v8247_v33 = vsel %vm17703_vm9, %v8244_v4, %v8246_v3  ;;  %v8574_v11 = vsel %vm17704_vm12, %v8564_v57, %v8573_v38  ;;  %v17705_v55 = vld [vmem:[#allocation113_spill] sm:$0xff]  ;;  %vm17712_vm12 = vmmov %vm17707_vm4 }
 0x603   : > { %17701 = vst [vmem:[#allocation168_spill] sm:$0xff] %v15731_v30  ;;  %v7547_v49 = vsel %vm17706_vm3, %v7537_v10, %v7546_v20  ;;  %v7848_v31 = vsel %vm17707_vm4, %v7845_v16, %v7847_v1  ;;  %v6703_v57 = vadd.f32 %v15355_v14, %v14877_v8  ;;  %v7549_v10 = vshrl.u32 %v15753_v6, 16 }
 0x604   : > { %v7010_v52 = vadd.f32 %v17705_v55, %v6701_v51  ;;  %v8903_v8 = vrot.slane %v15748_v50, 3  ;;  %v7554_v55 = vrot.slane %v7552_v39, 2  ;;  %vm17710_vm9 = vcmask 1044480  }
 0x605   : > { %v7551_v14 = vrot.slane %v7549_v10, 1  ;;  %vm17713_vm3 = vsmask.f32 5376  ;;  %vm17717_vm4 = vsmask.f32 6400  ;;  %v8252_v40 = vrot.slane %v15748_v50, 2 }
 0x606   : > { %v7395_v59 = vadd.f32 %v14879_v48, %v7010_v52  ;;  %v7011_v48 = vadd.f32 %v14846_v25, %v6703_v57  ;;  %v11201_v52 = vld [vmem:[%s16629_s5 + $0x210] sm:$0xff] }
 0x607   : > { %8986 = vmatpush.bf16.msra.mxu2 %v11201_v52  ;;  %11337 = vmatpush.bf16.msra.mxu3 %v11201_v52  ;;  %v7555_v57 = vor.u32 %v7554_v55, %v7551_v14 }
 0x609   : > { %v7697_v34 = vpop.f32.mrf.mxu2 }
 0x60a   : > { %v15736_v58 = vadd.f32 %v7697_v34, %v7394_v13  ;;  %v15738_v54 = vpop.f32.mrf.mxu3  ;;  %v8576_v34 = vshrl.u32 %v15624_v24, 16  ;;  %v15757_v16 = vpop.f32.mrf.mxu0 }
 0x60b   : > { %17708 = vst [vmem:[#allocation148_spill] sm:$0xff] %v15757_v16 }
 0x60c   : > { %8383 = vmatmul.bf16.gmra.mxu0 %v8247_v33  ;;  %v8578_v13 = vrot.slane %v8576_v34, 2  ;;  %v8581_v33 = vrot.slane %v8579_v32, 3  ;;  %v15772_v34 = vsel %vm17710_vm9, %v8901_v18, %v8903_v8  ;;  %v6706_v32 = vadd.f32 %v15373_v7, %v14913_v12  ;;  %v17714_v18 = vld [vmem:[#allocation114_spill] sm:$0xff]  ;;  %vm17718_vm9 = vmmov %vm17712_vm12 }
 0x60d   : > { %17711 = vst [vmem:[#allocation77_spill] sm:$0xff] %v15772_v34 }
 0x60e   : > { %8770 = vmatmul.bf16.gmra.mxu1 %v8574_v11  ;;  %7739 = vmatmul.bf16.gmra.mxu2 %v7547_v49  ;;  %v15763_v11 = vpop.f32.mrf.mxu1  ;;  %v8248_v49 = vrot.slane %v15669_v44, 2  ;;  %v7012_v52 = vadd.f32 %v17714_v18, %v6706_v32  ;;  %v15798_v32 = vld [vmem:[#allocation3 + $0x68] sm:$0xff] }
 0x60f   : > { %7963 = vmatmul.bf16.gmra.mxu3 %v7848_v31  ;;  %17709 = vst [vmem:[#allocation169_spill] sm:$0xff] %v15763_v11  ;;  %v8582_v31 = vor.u32 %v8581_v33, %v8578_v13  ;;  %v7849_v33 = vrot.slane %v15478_v23, 2  ;;  %v6708_v23 = vadd.f32 %v15390_v19, %v14939_v17  ;;  %v17755_v11 = vld [vmem:[#allocation122_spill] sm:$0xff] }
 0x610   : > { %v8249_v39 = vsel %vm17712_vm12, %v8246_v3, %v8248_v49  ;;  %v8588_v3 = vshll.u32 %v15669_v44, 16  ;;  %v7397_v14 = vadd.f32 %v14941_v35, %v7012_v52  ;;  %v8250_v52 = vrot.slane %v15710_v22, 2 }
 0x611   : > { %v7700_v4 = vpop.f32.mrf.mxu2  ;;  %v8583_v13 = vsel %vm17713_vm3, %v8573_v38, %v8582_v31  ;;  %v7850_v7 = vsel %vm17718_vm9, %v7847_v1, %v7849_v33  ;;  %v15793_v38 = vld [vmem:[#allocation3 + $0x80] sm:$0xff]  ;;  %v7013_v18 = vadd.f32 %v14908_v0, %v6708_v23  ;;  %vm17721_vm12 = vcmask 1044480   ;;  %vm17723_vm3 = vmmov %vm17718_vm9 }
 0x612   : > { %v15759_v51 = vadd.f32 %v7700_v4, %v7395_v59  ;;  %v15761_v24 = vpop.f32.mrf.mxu3  ;;  %v7396_v59 = vadd.f32 %v14915_v27, %v7011_v48  ;;  %v15785_v34 = vpop.f32.mrf.mxu0  ;;  %v7556_v27 = vsel %vm17717_vm4, %v7546_v20, %v7555_v57  ;;  %v8585_v48 = vshrl.u32 %v15669_v44, 16 }
 0x613   : > { %17715 = vst [vmem:[#allocation150_spill] sm:$0xff] %v15785_v34  ;;  %v7558_v20 = vshrl.u32 %v15798_v32, 16  ;;  %vm17724_vm4 = vsmask.f32 5376  ;;  %vm17726_vm9 = vsmask.f32 6400 }
 0x614   : > { %v8587_v44 = vrot.slane %v8585_v48, 2  ;;  %v6711_v48 = vadd.f32 %v15411_v43, %v14970_v42  ;;  %v8594_v43 = vshrl.u32 %v15710_v22, 16 }
 0x615   : > { %v7560_v17 = vrot.slane %v7558_v20, 1 }
 0x616   : > { %v15787_v12 = vpop.f32.mrf.mxu1 }
 0x617   : > { %17716 = vst [vmem:[#allocation170_spill] sm:$0xff] %v15787_v12 }
 0x619   : > { %v7702_v25 = vpop.f32.mrf.mxu2 }
 0x61a   : > { %v15777_v4 = vadd.f32 %v7702_v25, %v7396_v59  ;;  %v15779_v10 = vpop.f32.mrf.mxu3  ;;  %v7561_v59 = vshll.u32 %v15798_v32, 16  ;;  %v15808_v35 = vpop.f32.mrf.mxu0 }
 0x61b   : > { %17719 = vst [vmem:[#allocation82_spill] sm:$0xff] %v15808_v35 }
 0x61c   : > { %8388 = vmatmul.bf16.gmra.mxu0 %v8249_v39  ;;  %v8590_v39 = vrot.slane %v8588_v3, 3  ;;  %v7563_v19 = vrot.slane %v7561_v59, 2  ;;  %v7398_v3 = vadd.f32 %v14972_v15, %v7013_v18  ;;  %v8251_v59 = vsel %vm17723_vm3, %v8248_v49, %v8250_v52  ;;  %v17729_v49 = vld [vmem:[#allocation94_spill] sm:$0xff] }
 0x61d   : > { %v8597_v18 = vshll.u32 %v15710_v22, 16 }
 0x61e   : > { %8775 = vmatmul.bf16.gmra.mxu1 %v8583_v13  ;;  %7744 = vmatmul.bf16.gmra.mxu2 %v7556_v27  ;;  %v16808_v13 = vrot.slane %v15793_v38, 3  ;;  %v8591_v27 = vor.u32 %v8590_v39, %v8587_v44  ;;  %v7564_v23 = vor.u32 %v7563_v19, %v7560_v17  ;;  %v7851_v39 = vrot.slane %v15517_v5, 2  ;;  %v17728_v17 = vld [vmem:[#allocation45_spill] sm:$0xff]  ;;  %v17731_v5 = vld [vmem:[#allocation44_spill] sm:$0xff] }
 0x61f   : > { %7968 = vmatmul.bf16.gmra.mxu3 %v7850_v7  ;;  %v15811_v7 = vpop.f32.mrf.mxu1  ;;  %v6713_v19 = vadd.f32 %v17729_v49, %v17728_v17 }
 0x620   : > { %17720 = vst [vmem:[#allocation153_spill] sm:$0xff] %v15811_v7  ;;  %v8592_v44 = vsel %vm17724_vm4, %v8582_v31, %v8591_v27  ;;  %v7565_v42 = vsel %vm17726_vm9, %v7555_v57, %v7564_v23  ;;  %v8253_v7 = vsel %vm17723_vm3, %v8250_v52, %v8252_v40 }
 0x621   : > { %v7705_v55 = vpop.f32.mrf.mxu2 }
 0x622   : > { %v15802_v1 = vadd.f32 %v7705_v55, %v7397_v14  ;;  %v15804_v25 = vpop.f32.mrf.mxu3  ;;  %v15816_v14 = vsel %vm17721_vm12, %v8903_v8, %v16808_v13  ;;  %v17725_v8 = vld [vmem:[#allocation111_spill] sm:$0xff]  ;;  %vm17727_vm12 = vmmov %vm17723_vm3  ;;  %v15835_v31 = vpop.f32.mrf.mxu0 }
 0x623   : > { %17722 = vst [vmem:[#allocation172_spill] sm:$0xff] %v15816_v14  ;;  %v7014_v13 = vadd.f32 %v17725_v8, %v6711_v48  ;;  %v7852_v15 = vsel %vm17727_vm12, %v7849_v33, %v7851_v39  ;;  %v8596_v8 = vrot.slane %v8594_v43, 2  ;;  %v17736_v43 = vld [vmem:[#allocation63_spill] sm:$0xff]  ;;  %vm17741_vm12 = vcmask 1044480  }
 0x624   : > { %17730 = vst [vmem:[#allocation135_spill] sm:$0xff] %v15835_v31 }
 0x629   : > { %v7707_v0 = vpop.f32.mrf.mxu2 }
 0x62a   : > { %v15821_v55 = vadd.f32 %v7707_v0, %v7398_v3  ;;  %v15823_v20 = vpop.f32.mrf.mxu3  ;;  %v7399_v3 = vadd.f32 %v17731_v5, %v7014_v13  ;;  %v15838_v0 = vpop.f32.mrf.mxu1  ;;  %v11200_v13 = vld [vmem:[%s16629_s5 + $0x208] sm:$0xff] }
 0x62b   : > { %17732 = vst [vmem:[#allocation155_spill] sm:$0xff] %v15838_v0  ;;  %v15852_v5 = vld [vmem:[#allocation3 + $0x88] sm:$0xff]  ;;  %8987 = vmatpush.bf16.msra.mxu2 %v11200_v13  ;;  %11338 = vmatpush.bf16.msra.mxu3 %v11200_v13 }
 0x62c   : > { %8393 = vmatmul.bf16.gmra.mxu0 %v8251_v59  ;;  %v15840_v59 = vld [vmem:[#allocation3 + $0x70] sm:$0xff] }
 0x62d   : > { %v7567_v57 = vshrl.u32 %v15840_v59, 16  ;;  %v7570_v33 = vshll.u32 %v15840_v59, 16 }
 0x62e   : > { %8780 = vmatmul.bf16.gmra.mxu1 %v8592_v44  ;;  %7749 = vmatmul.bf16.gmra.mxu2 %v7565_v42  ;;  %v8599_v42 = vrot.slane %v8597_v18, 3 }
 0x62f   : > { %7973 = vmatmul.bf16.gmra.mxu3 %v7852_v15  ;;  %v17733_v15 = vld [vmem:[#allocation61_spill] sm:$0xff]  ;;  %v7569_v49 = vrot.slane %v7567_v57, 1  ;;  %v7572_v14 = vrot.slane %v7570_v33, 2  ;;  %v8907_v57 = vrot.slane %v15852_v5, 3  ;;  %v15859_v33 = vpop.f32.mrf.mxu0 }
 0x630   : > { %v7015_v17 = vadd.f32 %v17733_v15, %v6713_v19  ;;  %v8600_v31 = vor.u32 %v8599_v42, %v8596_v8  ;;  %17737 = vst [vmem:[#allocation174_spill] sm:$0xff] %v15859_v33  ;;  %v7853_v42 = vrot.slane %v15549_v61, 2  ;;  %v8606_v61 = vshll.u32 %v15748_v50, 16 }
 0x631   : > { %v7710_v48 = vpop.f32.mrf.mxu2  ;;  %v7573_v19 = vor.u32 %v7572_v14, %v7569_v49 }
 0x632   : > { %v15844_v44 = vadd.f32 %v7710_v48, %v7399_v3  ;;  %v15846_v22 = vpop.f32.mrf.mxu3  ;;  %v17734_v3 = vld [vmem:[#allocation120_spill] sm:$0xff]  ;;  %v17735_v48 = vld [vmem:[#allocation142_spill] sm:$0xff]  ;;  %v7400_v18 = vadd.f32 %v17736_v43, %v7015_v17  ;;  %v8601_v8 = vsel %vm17724_vm4, %v8591_v27, %v8600_v31  ;;  %v15868_v13 = vpop.f32.mrf.mxu1  ;;  %v17739_v17 = vld [vmem:[#allocation117_spill] sm:$0xff]  ;;  %v7854_v52 = vsel %vm17723_vm3, %v7851_v39, %v7853_v42 }
 0x633   : > { %v6716_v35 = vadd.f32 %v17735_v48, %v17734_v3  ;;  %17738 = vst [vmem:[#allocation91_spill] sm:$0xff] %v15868_v13  ;;  %v7574_v49 = vsel %vm17726_vm9, %v7564_v23, %v7573_v19  ;;  %v8603_v3 = vshrl.u32 %v15748_v50, 16  ;;  %v15880_v27 = vld [vmem:[#allocation3 + $0x90] sm:$0xff]  ;;  %v17745_v43 = vld [vmem:[#allocation30_spill] sm:$0xff]  ;;  %vm17750_vm4 = vmmov %vm17741_vm12 }
 0x634   : > { %v15887_v13 = vld [vmem:[#allocation3 + $0x78] sm:$0xff]  ;;  %v8909_v16 = vrot.slane %v15880_v27, 3  ;;  %vm17753_vm9 = vmmov %vm17750_vm4 }
 0x635   : > { %v7016_v14 = vadd.f32 %v17739_v17, %v6716_v35  ;;  %v17744_v35 = vld [vmem:[#allocation118_spill] sm:$0xff]  ;;  %v8605_v33 = vrot.slane %v8603_v3, 2  ;;  %v7579_v39 = vshll.u32 %v15887_v13, 16 }
 0x636   : > { %v6718_v23 = vadd.f32 %v17745_v43, %v17744_v35  ;;  %v17748_v35 = vld [vmem:[#allocation116_spill] sm:$0xff]  ;;  %v15901_v3 = vsel %vm17750_vm4, %v8907_v57, %v8909_v16  ;;  %vm17762_vm4 = vsmask.f32 6400 }
 0x637   : > { %17751 = vst [vmem:[#allocation108_spill] sm:$0xff] %v15901_v3  ;;  %v7581_v30 = vrot.slane %v7579_v39, 2 }
 0x638   : > { %v7017_v43 = vadd.f32 %v17748_v35, %v6718_v23  ;;  %v6721_v23 = vadd.f32 %v17756_v9, %v17755_v11  ;;  %v17757_v35 = vld [vmem:[#allocation129_spill] sm:$0xff] }
 0x639   : > { %v7712_v0 = vpop.f32.mrf.mxu2 }
 0x63a   : > { %v15861_v15 = vadd.f32 %v7712_v0, %v7400_v18  ;;  %v15863_v34 = vpop.f32.mrf.mxu3  ;;  %v17740_v0 = vrot.slane %v15793_v38, 3  ;;  %v17746_v18 = vld [vmem:[#allocation66_spill] sm:$0xff] }
 0x63c   : > { %8398 = vmatmul.bf16.gmra.mxu0 %v8253_v7  ;;  %v15876_v48 = vsel %vm17741_vm12, %v17740_v0, %v8907_v57  ;;  %v15882_v7 = vld [vmem:[#allocation3 + $0x98] sm:$0xff]  ;;  %vm17759_vm12 = vmmov %vm17723_vm3  ;;  %vm17760_vm3 = vsmask.f32 5376 }
 0x63d   : > { %17742 = vst [vmem:[#allocation157_spill] sm:$0xff] %v15876_v48  ;;  %v8608_v48 = vrot.slane %v8606_v61, 3 }
 0x63e   : > { %8785 = vmatmul.bf16.gmra.mxu1 %v8601_v8  ;;  %7754 = vmatmul.bf16.gmra.mxu2 %v7574_v49  ;;  %17743 = vst [vmem:[#allocation9_spill] sm:$0xff] %v15882_v7  ;;  %v7401_v8 = vadd.f32 %v17746_v18, %v7016_v14  ;;  %v7576_v49 = vshrl.u32 %v15887_v13, 16  ;;  %v15898_v14 = vpop.f32.mrf.mxu0  ;;  %v15903_v18 = vpop.f32.mrf.mxu1 }
 0x63f   : > { %7978 = vmatmul.bf16.gmra.mxu3 %v7854_v52  ;;  %v16809_v52 = vrot.slane %v15882_v7, 3  ;;  %17749 = vst [vmem:[#allocation65_spill] sm:$0xff] %v15898_v14  ;;  %v7402_v14 = vadd.f32 %v17757_v35, %v7017_v43 }
 0x640   : > { %17752 = vst [vmem:[#allocation57_spill] sm:$0xff] %v15903_v18  ;;  %v7578_v12 = vrot.slane %v7576_v49, 1 }
 0x641   : > { %v7715_v17 = vpop.f32.mrf.mxu2  ;;  %v15909_v61 = vsel %vm17753_vm9, %v8909_v16, %v16809_v52  ;;  %v17761_v16 = vld [vmem:[#allocation121_spill] sm:$0xff]  ;;  %vm17764_vm9 = vmmov %vm17759_vm12 }
 0x642   : > { %v15891_v0 = vadd.f32 %v7715_v17, %v7401_v8  ;;  %v15893_v50 = vpop.f32.mrf.mxu3  ;;  %v8254_v8 = vrot.slane %v15793_v38, 2  ;;  %v8609_v17 = vor.u32 %v8608_v48, %v8605_v33  ;;  %17754 = vst [vmem:[#allocation40_spill] sm:$0xff] %v15909_v61  ;;  %v7582_v57 = vor.u32 %v7581_v30, %v7578_v12  ;;  %v17770_v52 = vld [vmem:[#allocation125_spill] sm:$0xff] }
 0x643   : > { %17747 = vst [vmem:[#allocation104_spill] sm:$0xff] %v15893_v50  ;;  %v7855_v48 = vrot.slane %v15599_v26, 2  ;;  %v7018_v39 = vadd.f32 %v17761_v16, %v6721_v23  ;;  %v8612_v30 = vshrl.u32 %v15793_v38, 16  ;;  %v8615_v12 = vshll.u32 %v15793_v38, 16  ;;  %v17767_v26 = vld [vmem:[#allocation98_spill] sm:$0xff] }
 0x644   : > { %v8255_v49 = vsel %vm17759_vm12, %v8252_v40, %v8254_v8  ;;  %v8610_v33 = vsel %vm17760_vm3, %v8600_v31, %v8609_v17  ;;  %v7583_v9 = vsel %vm17762_vm4, %v7573_v19, %v7582_v57  ;;  %v17766_v31 = vld [vmem:[#allocation134_spill] sm:$0xff]  ;;  %vm17776_vm12 = vmmov %vm17764_vm9 }
 0x645   : > { %v6723_v43 = vadd.f32 %v17767_v26, %v17766_v31  ;;  %v8614_v38 = vrot.slane %v8612_v30, 2  ;;  %v8256_v31 = vrot.slane %v15852_v5, 2  ;;  %v17771_v26 = vld [vmem:[#allocation141_spill] sm:$0xff] }
 0x646   : > { %v15923_v11 = vpop.f32.mrf.mxu0  ;;  %v15928_v40 = vpop.f32.mrf.mxu1 }
 0x647   : > { %17763 = vst [vmem:[#allocation58_spill] sm:$0xff] %v15923_v11 }
 0x648   : > { %17765 = vst [vmem:[#allocation103_spill] sm:$0xff] %v15928_v40 }
 0x649   : > { %v7717_v21 = vpop.f32.mrf.mxu2 }
 0x64a   : > { %v15914_v3 = vadd.f32 %v7717_v21, %v7402_v14  ;;  %v15916_v18 = vpop.f32.mrf.mxu3  ;;  %v7856_v21 = vsel %vm17764_vm9, %v7853_v42, %v7855_v48  ;;  %v17768_v14 = vld [vmem:[#allocation126_spill] sm:$0xff] }
 0x64b   : > { %17758 = vst [vmem:[#allocation38_spill] sm:$0xff] %v15916_v18  ;;  %v7403_v35 = vadd.f32 %v17768_v14, %v7018_v39  ;;  %v6726_v14 = vadd.f32 %v15521_v45, %v17771_v26  ;;  %v17777_v45 = vld [vmem:[#allocation69_spill] sm:$0xff]  ;;  %v15968_v26 = vld [vmem:[#allocation3 + $0x88] sm:$0xff] }
 0x64c   : > { %8403 = vmatmul.bf16.gmra.mxu0 %v8255_v49  ;;  %v15933_v49 = vld [vmem:[#allocation3 + $0x80] sm:$0xff] }
 0x64d   : > { %v7585_v19 = vshrl.u32 %v15933_v49, 16 }
 0x64e   : > { %8790 = vmatmul.bf16.gmra.mxu1 %v8610_v33  ;;  %7759 = vmatmul.bf16.gmra.mxu2 %v7583_v9  ;;  %v7588_v33 = vshll.u32 %v15933_v49, 16  ;;  %v8617_v9 = vrot.slane %v8615_v12, 3  ;;  %v15945_v40 = vpop.f32.mrf.mxu0 }
 0x64f   : > { %7983 = vmatmul.bf16.gmra.mxu3 %v7856_v21  ;;  %v7019_v21 = vadd.f32 %v17770_v52, %v6723_v43  ;;  %v7587_v61 = vrot.slane %v7585_v19, 1  ;;  %17772 = vst [vmem:[#allocation109_spill] sm:$0xff] %v15945_v40  ;;  %v8257_v52 = vsel %vm17776_vm12, %v8254_v8, %v8256_v31  ;;  %v7857_v19 = vrot.slane %v15632_v63, 2  ;;  %v17778_v63 = vld [vmem:[#allocation74_spill] sm:$0xff]  ;;  %v17784_v40 = vld [vmem:[#allocation137_spill] sm:$0xff]  ;;  %vm17787_vm12 = vmmov %vm17764_vm9 }
 0x650   : > { %v7590_v11 = vrot.slane %v7588_v33, 2  ;;  %v8618_v39 = vor.u32 %v8617_v9, %v8614_v38  ;;  %v7020_v33 = vadd.f32 %v17777_v45, %v6726_v14  ;;  %v8624_v8 = vshll.u32 %v15852_v5, 16  ;;  %v17780_v9 = vld [vmem:[#allocation140_spill] sm:$0xff] }
 0x651   : > { %v7720_v23 = vpop.f32.mrf.mxu2  ;;  %v7404_v18 = vadd.f32 %v17773_v53, %v7019_v21  ;;  %v7594_v14 = vshrl.u32 %v15968_v26, 16 }
 0x652   : > { %v15937_v42 = vadd.f32 %v7720_v23, %v7403_v35  ;;  %v15939_v16 = vpop.f32.mrf.mxu3  ;;  %v15948_v35 = vpop.f32.mrf.mxu1  ;;  %v8619_v43 = vsel %vm17760_vm3, %v8609_v17, %v8618_v39  ;;  %v17779_v17 = vld [vmem:[#allocation54_spill] sm:$0xff]  ;;  %v7405_v21 = vadd.f32 %v17780_v9, %v7020_v33  ;;  %v8626_v45 = vrot.slane %v8624_v8, 3 }
 0x653   : > { %17769 = vst [vmem:[#allocation106_spill] sm:$0xff] %v15939_v16  ;;  %v7591_v16 = vor.u32 %v7590_v11, %v7587_v61  ;;  %v11199_v61 = vld [vmem:[%s16629_s5 + $0x200] sm:$0xff]  ;;  %v8621_v11 = vshrl.u32 %v15852_v5, 16  ;;  %v6728_v38 = vadd.f32 %v17779_v17, %v17778_v63  ;;  %v8258_v17 = vrot.slane %v15880_v27, 2 }
 0x654   : > { %17774 = vst [vmem:[#allocation59_spill] sm:$0xff] %v15948_v35  ;;  %8988 = vmatpush.bf16.msra.mxu2 %v11199_v61  ;;  %11339 = vmatpush.bf16.msra.mxu3 %v11199_v61  ;;  %v7596_v61 = vrot.slane %v7594_v14, 1  ;;  %v17785_v35 = vld [vmem:[#allocation115_spill] sm:$0xff]  ;;  %v7859_v14 = vrot.slane %v15674_v37, 2 }
 0x655   : > { %v7592_v53 = vsel %vm17762_vm4, %v7582_v57, %v7591_v16  ;;  %v8259_v8 = vsel %vm17787_vm12, %v8256_v31, %v8258_v17  ;;  %v8633_v31 = vshll.u32 %v15880_v27, 16  ;;  %vm17799_vm12 = vmmov %vm17764_vm9 }
 0x659   : > { %v7722_v23 = vpop.f32.mrf.mxu2 }
 0x65a   : > { %v15950_v30 = vadd.f32 %v7722_v23, %v7404_v18  ;;  %v15952_v12 = vpop.f32.mrf.mxu3  ;;  %v7858_v18 = vsel %vm17764_vm9, %v7855_v48, %v7857_v19  ;;  %v7597_v23 = vshll.u32 %v15968_v26, 16  ;;  %v15972_v48 = vpop.f32.mrf.mxu0 }
 0x65b   : > { %17775 = vst [vmem:[#allocation11_spill] sm:$0xff] %v15952_v12  ;;  %v6731_v12 = vadd.f32 %v17785_v35, %v17784_v40  ;;  %v7860_v35 = vsel %vm17764_vm9, %v7857_v19, %v7859_v14 }
 0x65c   : > { %8408 = vmatmul.bf16.gmra.mxu0 %v8257_v52  ;;  %17781 = vst [vmem:[#allocation113_spill] sm:$0xff] %v15972_v48  ;;  %v7599_v63 = vrot.slane %v7597_v23, 2  ;;  %v17788_v23 = vld [vmem:[#allocation133_spill] sm:$0xff] }
 0x65e   : > { %8795 = vmatmul.bf16.gmra.mxu1 %v8619_v43  ;;  %7764 = vmatmul.bf16.gmra.mxu2 %v7592_v53  ;;  %v8623_v43 = vrot.slane %v8621_v11, 2  ;;  %v15978_v53 = vpop.f32.mrf.mxu1 }
 0x65f   : > { %7988 = vmatmul.bf16.gmra.mxu3 %v7858_v18  ;;  %17782 = vst [vmem:[#allocation114_spill] sm:$0xff] %v15978_v53  ;;  %v17783_v18 = vld [vmem:[#allocation71_spill] sm:$0xff] }
 0x660   : > { %v7021_v33 = vadd.f32 %v17783_v18, %v6728_v38  ;;  %v8627_v9 = vor.u32 %v8626_v45, %v8623_v43  ;;  %v7022_v43 = vadd.f32 %v17788_v23, %v6731_v12  ;;  %v17792_v18 = vld [vmem:[#allocation147_spill] sm:$0xff] }
 0x661   : > { %v7725_v57 = vpop.f32.mrf.mxu2  ;;  %v17794_v23 = vld [vmem:[#allocation143_spill] sm:$0xff] }
 0x662   : > { %v15974_v52 = vadd.f32 %v7725_v57, %v7405_v21  ;;  %v15976_v5 = vpop.f32.mrf.mxu3  ;;  %v7406_v48 = vadd.f32 %v17786_v2, %v7021_v33  ;;  %v7600_v57 = vor.u32 %v7599_v63, %v7596_v61  ;;  %v8628_v38 = vsel %vm17760_vm3, %v8618_v39, %v8627_v9  ;;  %v15993_v45 = vpop.f32.mrf.mxu0  ;;  %v17791_v39 = vld [vmem:[#allocation112_spill] sm:$0xff] }
 0x663   : > { %17789 = vst [vmem:[#allocation111_spill] sm:$0xff] %v15993_v45  ;;  %v6733_v37 = vadd.f32 %v15576_v29, %v17791_v39  ;;  %v7407_v33 = vadd.f32 %v17792_v18, %v7022_v43  ;;  %v16004_v61 = vld [vmem:[#allocation3 + $0x90] sm:$0xff]  ;;  %v8260_v39 = vrot.slane %v15882_v7, 2  ;;  %v7429_v45 = vld [vmem:[#allocation3 + $0x98] sm:$0x3] }
 0x664   : > { %v7601_v2 = vsel %vm17762_vm4, %v7591_v16, %v7600_v57  ;;  %v7603_v63 = vshrl.u32 %v16004_v61, 16  ;;  %v7606_v16 = vshll.u32 %v16004_v61, 16 }
 0x666   : > { %v15995_v40 = vpop.f32.mrf.mxu1  ;;  %v7605_v29 = vrot.slane %v7603_v63, 1  ;;  %v8261_v63 = vsel %vm17799_vm12, %v8258_v17, %v8260_v39  ;;  %vm17810_vm12 = vmmov %vm17764_vm9 }
 0x667   : > { %17790 = vst [vmem:[#allocation45_spill] sm:$0xff] %v15995_v40 }
 0x669   : > { %v7727_v21 = vpop.f32.mrf.mxu2 }
 0x66a   : > { %v15985_v50 = vadd.f32 %v7727_v21, %v7406_v48  ;;  %v15987_v11 = vpop.f32.mrf.mxu3  ;;  %v8630_v48 = vshrl.u32 %v15880_v27, 16  ;;  %v16014_v43 = vpop.f32.mrf.mxu0 }
 0x66b   : > { %17795 = vst [vmem:[#allocation44_spill] sm:$0xff] %v16014_v43  ;;  %v17807_v43 = vld [vmem:[#allocation132_spill] sm:$0xff] }
 0x66c   : > { %8413 = vmatmul.bf16.gmra.mxu0 %v8259_v8  ;;  %v8632_v8 = vrot.slane %v8630_v48, 2  ;;  %v17798_v48 = vld [vmem:[#allocation88_spill] sm:$0xff] }
 0x66e   : > { %8800 = vmatmul.bf16.gmra.mxu1 %v8628_v38  ;;  %7769 = vmatmul.bf16.gmra.mxu2 %v7601_v2  ;;  %v8635_v38 = vrot.slane %v8633_v31, 3  ;;  %v7023_v2 = vadd.f32 %v17794_v23, %v6733_v37  ;;  %v16017_v40 = vpop.f32.mrf.mxu1  ;;  %v17801_v23 = vld [vmem:[#allocation81_spill] sm:$0xff] }
 0x66f   : > { %7993 = vmatmul.bf16.gmra.mxu3 %v7860_v35  ;;  %v7608_v35 = vrot.slane %v7606_v16, 2  ;;  %17796 = vst [vmem:[#allocation61_spill] sm:$0xff] %v16017_v40 }
 0x670   : > { %v8636_v18 = vor.u32 %v8635_v38, %v8632_v8  ;;  %v7408_v31 = vadd.f32 %v17798_v48, %v7023_v2  ;;  %v7861_v8 = vrot.slane %v15715_v28, 2  ;;  %v8642_v28 = vshll.u32 %v15882_v7, 16  ;;  %v17804_v48 = vld [vmem:[#allocation173_spill] sm:$0xff] }
 0x671   : > { %v7730_v12 = vpop.f32.mrf.mxu2 }
 0x672   : > { %v16008_v21 = vadd.f32 %v7730_v12, %v7407_v33  ;;  %v7954_v19 = vpop.f32.mrf.mxu3  ;;  %v17797_v33 = vld [vmem:[#allocation84_spill] sm:$0xff]  ;;  %v8637_v16 = vsel %vm17760_vm3, %v8627_v9, %v8636_v18  ;;  %v8639_v9 = vshrl.u32 %v15882_v7, 16 }
 0x673   : > { %v16011_v27 = vadd.f32 %v7954_v19, %v15719_v46  ;;  %v6736_v12 = vadd.f32 %v15604_v56, %v17797_v33  ;;  %v7609_v46 = vor.u32 %v7608_v35, %v7605_v29  ;;  %v7448_v19 = vunpack.c.l.b16 %v7429_v45  ;;  %v8116_v56 = vld [vmem:[#allocation3 + $0xa0] sm:$0x3]  ;;  %v16039_v33 = vpop.f32.mrf.mxu0 }
 0x674   : > { %v8207_v17 = vunpack.c.l.b16 %v8116_v56  ;;  %17803 = vst [vmem:[#allocation142_spill] sm:$0xff] %v16039_v33  ;;  %v8641_v56 = vrot.slane %v8639_v9, 2 }
 0x675   : > { %17793 = vst [vmem:[#allocation94_spill] sm:$0xff] %v16011_v27  ;;  %v7024_v2 = vadd.f32 %v17801_v23, %v6736_v12  ;;  %v7610_v29 = vsel %vm17762_vm4, %v7600_v57, %v7609_v46  ;;  %v16032_v45 = vpack.c.b16 %v7448_v19, %v7448_v19  ;;  %v8644_v23 = vrot.slane %v8642_v28, 3 }
 0x677   : > { %v7409_v12 = vadd.f32 %v17804_v48, %v7024_v2  ;;  %v7612_v19 = vshrl.u32 %v16032_v45, 16  ;;  %v16052_v33 = vor.u32 %v8644_v23, %v8641_v56 }
 0x679   : > { %v7732_v53 = vpop.f32.mrf.mxu2  ;;  %v8646_v28 = vsel %vm17760_vm3, %v8636_v18, %v16052_v33  ;;  %v17812_v18 = vld [vmem:[#allocation145_spill] sm:$0xff]  ;;  %vm17827_vm3 = vmmov %vm17764_vm9 }
 0x67a   : > { %v16022_v27 = vadd.f32 %v7732_v53, %v7408_v31  ;;  %v7956_v37 = vpop.f32.mrf.mxu3  ;;  %v7862_v53 = vsel %vm17764_vm9, %v7859_v14, %v7861_v8  ;;  %v16042_v31 = vpop.f32.mrf.mxu1  ;;  %v7615_v14 = vshll.u32 %v16032_v45, 16 }
 0x67b   : > { %v16028_v38 = vadd.f32 %v7956_v37, %v15736_v58  ;;  %v17802_v58 = vld [vmem:[#allocation149_spill] sm:$0xff]  ;;  %17805 = vst [vmem:[#allocation63_spill] sm:$0xff] %v16042_v31  ;;  %v17808_v31 = vld [vmem:[#allocation128_spill] sm:$0xff] }
 0x67c   : > { %8418 = vmatmul.bf16.gmra.mxu0 %v8261_v63  ;;  %v6738_v35 = vadd.f32 %v15615_v62, %v17802_v58  ;;  %v17806_v62 = vld [vmem:[#allocation171_spill] sm:$0xff]  ;;  %v7614_v58 = vrot.slane %v7612_v19, 1  ;;  %v7617_v2 = vrot.slane %v7615_v14, 2  ;;  %v6741_v40 = vadd.f32 %v17808_v31, %v17807_v43  ;;  %v16063_v19 = vpop.f32.mrf.mxu0 }
 0x67d   : > { %17800 = vst [vmem:[#allocation120_spill] sm:$0xff] %v16028_v38  ;;  %v17809_v38 = vld [vmem:[#allocation92_spill] sm:$0xff] }
 0x67e   : > { %8805 = vmatmul.bf16.gmra.mxu1 %v8637_v16  ;;  %7774 = vmatmul.bf16.gmra.mxu2 %v7610_v29  ;;  %v8226_v16 = vpack.c.b16 %v8207_v17, %v8207_v17  ;;  %v7618_v7 = vor.u32 %v7617_v2, %v7614_v58  ;;  %v17814_v58 = vld [vmem:[#allocation124_spill] sm:$0xff]  ;;  %v17815_v2 = vld [vmem:[#allocation131_spill] sm:$0xff] }
 0x67f   : > { %7998 = vmatmul.bf16.gmra.mxu3 %v7862_v53  ;;  %v7025_v53 = vadd.f32 %v17806_v62, %v6738_v35  ;;  %v7863_v35 = vrot.slane %v15753_v6, 2  ;;  %v6743_v6 = vadd.f32 %v15654_v36, %v17812_v18 }
 0x680   : > { %v8262_v48 = vrot.slane %v8226_v16, 2  ;;  %v17813_v16 = vld [vmem:[#allocation89_spill] sm:$0xff] }
 0x681   : > { %v7735_v57 = vpop.f32.mrf.mxu2 }
 0x682   : > { %v16046_v37 = vadd.f32 %v7735_v57, %v7409_v12  ;;  %v7959_v63 = vpop.f32.mrf.mxu3  ;;  %v7410_v12 = vadd.f32 %v17809_v38, %v7025_v53  ;;  %v16065_v14 = vpop.f32.mrf.mxu1  ;;  %v17811_v38 = vld [vmem:[#allocation85_spill] sm:$0xff] }
 0x683   : > { %v16049_v29 = vadd.f32 %v7959_v63, %v15759_v51  ;;  %v8263_v51 = vsel %vm17810_vm12, %v8260_v39, %v8262_v48  ;;  %v7026_v31 = vadd.f32 %v17811_v38, %v6741_v40  ;;  %v7619_v63 = vsel %vm17762_vm4, %v7609_v46, %v7618_v7  ;;  %v17816_v46 = vld [vmem:[#allocation152_spill] sm:$0xff]  ;;  %vm17819_vm12 = vmmov %vm17764_vm9 }
 0x684   : > { %v7864_v39 = vsel %vm17764_vm9, %v7861_v8, %v7863_v35  ;;  %v7027_v40 = vadd.f32 %v17814_v58, %v6743_v6  ;;  %v6746_v7 = vadd.f32 %v15678_v41, %v17815_v2  ;;  %v17824_v58 = vld [vmem:[#allocation175_spill] sm:$0xff]  ;;  %vm17835_vm4 = vmmov %vm17827_vm3 }
 0x685   : > { %v7411_v56 = vadd.f32 %v17813_v16, %v7026_v31  ;;  %v17820_v31 = vld [vmem:[#allocation93_spill] sm:$0xff]  ;;  %vm17843_vm9 = vmmov %vm17827_vm3 }
 0x686   : > { %v7412_v8 = vadd.f32 %v17816_v46, %v7027_v40  ;;  %v6748_v41 = vadd.f32 %v15695_v60, %v17820_v31 }
 0x689   : > { %v7737_v57 = vpop.f32.mrf.mxu2 }
 0x68a   : > { %v16057_v17 = vadd.f32 %v7737_v57, %v7410_v12  ;;  %v7961_v9 = vpop.f32.mrf.mxu3  ;;  %v7865_v57 = vrot.slane %v15798_v32, 2 }
 0x68b   : > { %v16068_v43 = vadd.f32 %v7961_v9, %v15777_v4 }
 0x68c   : > { %8423 = vmatmul.bf16.gmra.mxu0 %v8263_v51  ;;  %v17817_v51 = vld [vmem:[#allocation64_spill] sm:$0xff]  ;;  %v7866_v38 = vsel %vm17819_vm12, %v7863_v35, %v7865_v57  ;;  %vm17851_vm12 = vmmov %vm17827_vm3 }
 0x68e   : > { %8810 = vmatmul.bf16.gmra.mxu1 %v8646_v28  ;;  %7779 = vmatmul.bf16.gmra.mxu2 %v7619_v63  ;;  %v7028_v28 = vadd.f32 %v17817_v51, %v6746_v7  ;;  %v17821_v63 = vld [vmem:[#allocation86_spill] sm:$0xff]  ;;  %v7867_v7 = vrot.slane %v15840_v59, 2 }
 0x68f   : > { %8003 = vmatmul.bf16.gmra.mxu3 %v7864_v39  ;;  %v17828_v51 = vld [vmem:[#allocation70_spill] sm:$0xff] }
 0x690   : > { %v7413_v39 = vadd.f32 %v17821_v63, %v7028_v28  ;;  %v17829_v28 = vld [vmem:[#allocation99_spill] sm:$0xff] }
 0x691   : > { %v7740_v23 = vpop.f32.mrf.mxu2 }
 0x692   : > { %v16076_v62 = vadd.f32 %v7740_v23, %v7411_v56  ;;  %v7964_v4 = vpop.f32.mrf.mxu3  ;;  %v17823_v23 = vld [vmem:[#allocation154_spill] sm:$0xff] }
 0x693   : > { %v16079_v53 = vadd.f32 %v7964_v4, %v15802_v1  ;;  %v17818_v1 = vld [vmem:[#allocation76_spill] sm:$0xff]  ;;  %v6751_v4 = vadd.f32 %v15721_v47, %v17823_v23  ;;  %v6753_v47 = vadd.f32 %v15738_v54, %v17828_v51  ;;  %v7869_v23 = vrot.slane %v15887_v13, 2 }
 0x699   : > { %v7742_v48 = vpop.f32.mrf.mxu2 }
 0x69a   : > { %v16085_v12 = vadd.f32 %v7742_v48, %v7412_v8  ;;  %v7966_v36 = vpop.f32.mrf.mxu3  ;;  %v17825_v8 = vld [vmem:[#allocation136_spill] sm:$0xff] }
 0x69b   : > { %v16089_v9 = vadd.f32 %v7966_v36, %v15821_v55  ;;  %v17822_v55 = vld [vmem:[#allocation127_spill] sm:$0xff]  ;;  %v7030_v48 = vadd.f32 %v17825_v8, %v6751_v4  ;;  %v7868_v36 = vsel %vm17827_vm3, %v7865_v57, %v7867_v7 }
 0x69c   : > { %v7029_v56 = vadd.f32 %v17822_v55, %v6748_v41 }
 0x69e   : > { %8989 = vmatmul.bf16.vlgmr.msra.gmra.mxu2 %v17818_v1  ;;  %v7414_v35 = vadd.f32 %v17824_v58, %v7029_v56  ;;  %v7415_v1 = vadd.f32 %v17829_v28, %v7030_v48  ;;  %v17833_v58 = vld [vmem:[#allocation102_spill] sm:$0xff] }
 0x69f   : > { %8008 = vmatmul.bf16.gmra.mxu3 %v7866_v38  ;;  %v17837_v48 = vld [vmem:[#allocation110_spill] sm:$0xff] }
 0x6a1   : > { %v7745_v18 = vpop.f32.mrf.mxu2 }
 0x6a2   : > { %v16097_v6 = vadd.f32 %v7745_v18, %v7413_v39  ;;  %v7969_v16 = vpop.f32.mrf.mxu3  ;;  %v17831_v39 = vld [vmem:[#allocation156_spill] sm:$0xff] }
 0x6a3   : > { %v16100_v32 = vadd.f32 %v7969_v16, %v15844_v44  ;;  %v17826_v44 = vld [vmem:[#allocation138_spill] sm:$0xff]  ;;  %v6756_v18 = vadd.f32 %v15761_v24, %v17831_v39  ;;  %v17832_v16 = vld [vmem:[#allocation97_spill] sm:$0xff] }
 0x6a4   : > { %v17836_v24 = vld [vmem:[#allocation158_spill] sm:$0xff] }
 0x6a5   : > { %v6758_v8 = vadd.f32 %v15779_v10, %v17836_v24 }
 0x6a9   : > { %v7747_v40 = vpop.f32.mrf.mxu2 }
 0x6aa   : > { %v16106_v2 = vadd.f32 %v7747_v40, %v7414_v35  ;;  %v7971_v60 = vpop.f32.mrf.mxu3  ;;  %v7032_v35 = vadd.f32 %v17833_v58, %v6756_v18  ;;  %v17834_v40 = vld [vmem:[#allocation87_spill] sm:$0xff]  ;;  %v7871_v18 = vrot.slane %v15933_v49, 2  ;;  %v17844_v58 = vld [vmem:[#allocation100_spill] sm:$0xff] }
 0x6ab   : > { %v16110_v46 = vadd.f32 %v7971_v60, %v15861_v15  ;;  %v17830_v15 = vld [vmem:[#allocation96_spill] sm:$0xff]  ;;  %v7870_v60 = vsel %vm17835_vm4, %v7867_v7, %v7869_v23  ;;  %vm17872_vm4 = vmmov %vm17827_vm3 }
 0x6ac   : > { %v7031_v63 = vadd.f32 %v17830_v15, %v6753_v47  ;;  %v17838_v47 = vld [vmem:[#allocation107_spill] sm:$0xff] }
 0x6ad   : > { %v7033_v28 = vadd.f32 %v17838_v47, %v6758_v8 }
 0x6ae   : > { %8994 = vmatmul.bf16.gmra.mxu2 %v17826_v44  ;;  %v7416_v57 = vadd.f32 %v17832_v16, %v7031_v63  ;;  %v7417_v44 = vadd.f32 %v17837_v48, %v7032_v35  ;;  %v17846_v48 = vld [vmem:[#allocation75_spill] sm:$0xff] }
 0x6af   : > { %8013 = vmatmul.bf16.gmra.mxu3 %v7868_v36 }
 0x6b1   : > { %v7750_v38 = vpop.f32.mrf.mxu2 }
 0x6b2   : > { %v16118_v31 = vadd.f32 %v7750_v38, %v7415_v1  ;;  %v7974_v41 = vpop.f32.mrf.mxu3  ;;  %v17839_v38 = vld [vmem:[#allocation95_spill] sm:$0xff] }
 0x6b3   : > { %v16121_v59 = vadd.f32 %v7974_v41, %v15891_v0  ;;  %v16134_v0 = vpop.f32.mrf.mxu0  ;;  %v6761_v7 = vadd.f32 %v15804_v25, %v17839_v38  ;;  %v17840_v41 = vld [vmem:[#allocation34_spill] sm:$0xff]  ;;  %v6763_v25 = vadd.f32 %v15823_v20, %v17844_v58 }
 0x6b4   : > { %v7418_v15 = vadd.f32 %v17840_v41, %v7033_v28  ;;  %v7873_v41 = vrot.slane %v15968_v26, 2 }
 0x6b9   : > { %v7752_v55 = vpop.f32.mrf.mxu2 }
 0x6ba   : > { %v16127_v56 = vadd.f32 %v7752_v55, %v7416_v57  ;;  %v7976_v54 = vpop.f32.mrf.mxu3  ;;  %v17842_v55 = vld [vmem:[#allocation151_spill] sm:$0xff] }
 0x6bb   : > { %v16131_v4 = vadd.f32 %v7976_v54, %v15914_v3  ;;  %v16147_v1 = vpop.f32.mrf.mxu0  ;;  %v7872_v54 = vsel %vm17843_vm9, %v7869_v23, %v7871_v18  ;;  %vm17883_vm9 = vsmask.f32 5376 }
 0x6be   : > { %8999 = vmatmul.bf16.gmra.mxu2 %v17834_v40  ;;  %v17845_v40 = vld [vmem:[#allocation119_spill] sm:$0xff] }
 0x6bf   : > { %8018 = vmatmul.bf16.gmra.mxu3 %v7870_v60 }
 0x6c1   : > { %v7755_v36 = vpop.f32.mrf.mxu2 }
 0x6c2   : > { %v16141_v51 = vadd.f32 %v7755_v36, %v7417_v44  ;;  %v7979_v13 = vpop.f32.mrf.mxu3  ;;  %v7035_v44 = vadd.f32 %v17846_v48, %v6763_v25  ;;  %v17847_v36 = vld [vmem:[#allocation161_spill] sm:$0xff]  ;;  %v17856_v48 = vld [vmem:[#allocation104_spill] sm:$0xff] }
 0x6c3   : > { %v16144_v3 = vadd.f32 %v7979_v13, %v15937_v42  ;;  %v17841_v42 = vld [vmem:[#allocation73_spill] sm:$0xff]  ;;  %v16163_v35 = vpop.f32.mrf.mxu0  ;;  %v6766_v23 = vadd.f32 %v15846_v22, %v17847_v36  ;;  %v17852_v22 = vld [vmem:[#allocation162_spill] sm:$0xff] }
 0x6c4   : > { %v7034_v57 = vadd.f32 %v17841_v42, %v6761_v7  ;;  %v17848_v13 = vld [vmem:[#allocation105_spill] sm:$0xff]  ;;  %v7874_v42 = vsel %vm17851_vm12, %v7871_v18, %v7873_v41  ;;  %vm17895_vm12 = vcmask 1044480  }
 0x6c5   : > { %v7420_v47 = vadd.f32 %v17848_v13, %v7035_v44  ;;  %v17857_v44 = vld [vmem:[#allocation165_spill] sm:$0xff] }
 0x6c6   : > { %v7419_v60 = vadd.f32 %v17845_v40, %v7034_v57  ;;  %v6768_v57 = vadd.f32 %v15863_v34, %v17852_v22  ;;  %v17862_v22 = vld [vmem:[#allocation38_spill] sm:$0xff] }
 0x6c9   : > { %v7757_v63 = vpop.f32.mrf.mxu2 }
 0x6ca   : > { %v16152_v10 = vadd.f32 %v7757_v63, %v7418_v15  ;;  %v7981_v39 = vpop.f32.mrf.mxu3 }
 0x6cb   : > { %v16156_v16 = vadd.f32 %v7981_v39, %v15950_v30  ;;  %v16175_v20 = vpop.f32.mrf.mxu0  ;;  %v17850_v39 = vld [vmem:[#allocation90_spill] sm:$0xff] }
 0x6ce   : > { %9004 = vmatmul.bf16.gmra.mxu2 %v17842_v55  ;;  %v17853_v55 = vld [vmem:[#allocation164_spill] sm:$0xff] }
 0x6cf   : > { %8023 = vmatmul.bf16.gmra.mxu3 %v7872_v54 }
 0x6d1   : > { %v7760_v24 = vpop.f32.mrf.mxu2 }
 0x6d2   : > { %v16166_v8 = vadd.f32 %v7760_v24, %v7419_v60  ;;  %v7984_v49 = vpop.f32.mrf.mxu3 }
 0x6d3   : > { %v16169_v30 = vadd.f32 %v7984_v49, %v15974_v52  ;;  %v17849_v52 = vld [vmem:[#allocation62_spill] sm:$0xff]  ;;  %v16195_v24 = vpop.f32.mrf.mxu0  ;;  %v17855_v49 = vld [vmem:[#allocation101_spill] sm:$0xff] }
 0x6d4   : > { %v7036_v63 = vadd.f32 %v17849_v52, %v6766_v23  ;;  %v6771_v18 = vadd.f32 %v17856_v48, %v17855_v49  ;;  %v8465_v49 = vld [vmem:[#allocation3 + $0xa0] sm:$0x7] }
 0x6d5   : > { %v17866_v48 = vld [vmem:[#allocation78_spill] sm:$0xff] }
 0x6d6   : > { %v7421_v54 = vadd.f32 %v17853_v55, %v7036_v63  ;;  %v17860_v63 = vld [vmem:[#allocation52_spill] sm:$0xff]  ;;  %v17863_v55 = vld [vmem:[#allocation166_spill] sm:$0xff] }
 0x6d9   : > { %v7762_v28 = vpop.f32.mrf.mxu2 }
 0x6da   : > { %v16177_v38 = vadd.f32 %v7762_v28, %v7420_v47  ;;  %v7986_v7 = vpop.f32.mrf.mxu3  ;;  %v7875_v47 = vrot.slane %v16004_v61, 2 }
 0x6db   : > { %v16181_v15 = vadd.f32 %v7986_v7, %v15985_v50  ;;  %v17854_v50 = vld [vmem:[#allocation163_spill] sm:$0xff]  ;;  %v16207_v52 = vpop.f32.mrf.mxu0 }
 0x6dc   : > { %v7037_v60 = vadd.f32 %v17854_v50, %v6768_v57  ;;  %v17865_v50 = vld [vmem:[#allocation68_spill] sm:$0xff] }
 0x6de   : > { %9009 = vmatmul.bf16.gmra.mxu2 %v17850_v39  ;;  %v7422_v36 = vadd.f32 %v17857_v44, %v7037_v60  ;;  %v7876_v39 = vsel %vm17827_vm3, %v7873_v41, %v7875_v47  ;;  %vm17900_vm3 = vmmov %vm17895_vm12 }
 0x6df   : > { %8028 = vmatmul.bf16.gmra.mxu3 %v7874_v42  ;;  %v17861_v42 = vld [vmem:[#allocation123_spill] sm:$0xff] }
 0x6e0   : > { %v6773_v57 = vadd.f32 %v17862_v22, %v17861_v42  ;;  %v17870_v42 = vld [vmem:[#allocation139_spill] sm:$0xff] }
 0x6e1   : > { %v7765_v58 = vpop.f32.mrf.mxu2 }
 0x6e2   : > { %v16189_v25 = vadd.f32 %v7765_v58, %v7421_v54  ;;  %v7989_v40 = vpop.f32.mrf.mxu3  ;;  %v7039_v60 = vadd.f32 %v17865_v50, %v6773_v57  ;;  %v17871_v57 = vld [vmem:[#allocation29_spill] sm:$0xff] }
 0x6e3   : > { %v16192_v26 = vadd.f32 %v7989_v40, %v16008_v21  ;;  %v17859_v21 = vld [vmem:[#allocation55_spill] sm:$0xff]  ;;  %v16222_v41 = vpop.f32.mrf.mxu0 }
 0x6e4   : > { %v7038_v7 = vadd.f32 %v17859_v21, %v6771_v18  ;;  %v17867_v18 = vld [vmem:[#allocation106_spill] sm:$0xff] }
 0x6e5   : > { %v6776_v44 = vadd.f32 %v17867_v18, %v17866_v48 }
 0x6e6   : > { %v7423_v54 = vadd.f32 %v17863_v55, %v7038_v7 }
 0x6e7   : > { %v7040_v22 = vadd.f32 %v17870_v42, %v6776_v44 }
 0x6e9   : > { %v7767_v23 = vpop.f32.mrf.mxu2 }
 0x6ea   : > { %v16200_v34 = vadd.f32 %v7767_v23, %v7422_v36  ;;  %v7991_v13 = vpop.f32.mrf.mxu3  ;;  %v17868_v36 = vld [vmem:[#allocation83_spill] sm:$0xff] }
 0x6eb   : > { %v16204_v28 = vadd.f32 %v7991_v13, %v16022_v27  ;;  %v7424_v23 = vadd.f32 %v17868_v36, %v7039_v60  ;;  %v17875_v60 = vld [vmem:[#allocation72_spill] sm:$0xff]  ;;  %v16237_v36 = vpop.f32.mrf.mxu0 }
 0x6ec   : > { %17858 = vst [vmem:[#allocation117_spill] sm:$0xff] %v16200_v34  ;;  %v7425_v48 = vadd.f32 %v17875_v60, %v7040_v22  ;;  %v11290_v34 = vld [vmem:[#allocation2 + $0x18] sm:$0xff]  }
 0x6ee   : > { %9014 = vmatmul.bf16.gmra.mxu2 %v17860_v63  ;;  %v7877_v63 = vrot.slane %v16032_v45, 2 }
 0x6ef   : > { %8033 = vmatmul.bf16.gmra.mxu3 %v7876_v39  ;;  %v8484_v39 = vunpack.c.l.b16 %v8465_v49 }
 0x6f0   : > { %v7878_v55 = vsel %vm17872_vm4, %v7875_v47, %v7877_v63  ;;  %vm17902_vm4 = vmmov %vm17900_vm3 }
 0x6f1   : > { %v7770_v58 = vpop.f32.mrf.mxu2 }
 0x6f2   : > { %v16214_v40 = vadd.f32 %v7770_v58, %v7423_v54  ;;  %v7994_v61 = vpop.f32.mrf.mxu3  ;;  %v8485_v54 = vpack.c.b16 %v8484_v39, %v8484_v39  ;;  %v17873_v58 = vld [vmem:[#allocation159_spill] sm:$0xff]  ;;  %v17878_v39 = vld [vmem:[#allocation80_spill] sm:$0xff] }
 0x6f3   : > { %v16217_v27 = vadd.f32 %v7994_v61, %v16046_v37  ;;  %v17874_v61 = vld [vmem:[#allocation11_spill] sm:$0xff]  ;;  %v6781_v42 = vadd.f32 %v15976_v5, %v17878_v39  ;;  %v17884_v5 = vld [vmem:[#allocation144_spill] sm:$0xff] }
 0x6f4   : > { %17864 = vst [vmem:[#allocation118_spill] sm:$0xff] %v16214_v40  ;;  %v6778_v50 = vadd.f32 %v17874_v61, %v17873_v58  ;;  %v8648_v49 = vshrl.u32 %v8485_v54, 16  ;;  %v17904_v40 = vld [vmem:[#allocation57_spill] sm:$0xff] }
 0x6f9   : > { %v7772_v13 = vpop.f32.mrf.mxu2 }
 0x6fa   : > { %v16225_v21 = vadd.f32 %v7772_v13, %v7424_v23  ;;  %v7996_v7 = vpop.f32.mrf.mxu3  ;;  %v8651_v23 = vshll.u32 %v8485_v54, 16  ;;  %v17877_v13 = vld [vmem:[#allocation167_spill] sm:$0xff] }
 0x6fb   : > { %v16229_v37 = vadd.f32 %v7996_v7, %v16057_v17  ;;  %v7041_v47 = vadd.f32 %v17877_v13, %v6778_v50  ;;  %v8650_v7 = vrot.slane %v8648_v49, 2  ;;  %v17882_v50 = vld [vmem:[#allocation160_spill] sm:$0xff]  ;;  %v17885_v13 = vld [vmem:[#allocation170_spill] sm:$0xff] }
 0x6fc   : > { %17869 = vst [vmem:[#allocation30_spill] sm:$0xff] %v16225_v21  ;;  %v8653_v63 = vrot.slane %v8651_v23, 3  ;;  %v6783_v23 = vadd.f32 %v15987_v11, %v17884_v5  ;;  %v8913_v11 = vrot.slane %v8485_v54, 3 }
 0x6fe   : > { %9019 = vmatmul.bf16.gmra.mxu2 %v17871_v57  ;;  %v17879_v57 = vld [vmem:[#allocation169_spill] sm:$0xff]  ;;  %v8654_v60 = vor.u32 %v8653_v63, %v8650_v7 }
 0x6ff   : > { %8038 = vmatmul.bf16.gmra.mxu3 %v7878_v55  ;;  %v7426_v22 = vadd.f32 %v17879_v57, %v7041_v47 }
 0x700   : > { %v8655_v49 = vsel %vm17883_vm9, %v16052_v33, %v8654_v60  ;;  %vm17908_vm9 = vmmov %vm17900_vm3 }
 0x701   : > { %v7775_v18 = vpop.f32.mrf.mxu2 }
 0x702   : > { %v16239_v45 = vadd.f32 %v7775_v18, %v7425_v48  ;;  %v7999_v17 = vpop.f32.mrf.mxu3  ;;  %v17881_v18 = vld [vmem:[#allocation168_spill] sm:$0xff] }
 0x703   : > { %v16242_v44 = vadd.f32 %v7999_v17, %v16076_v62  ;;  %v7042_v62 = vadd.f32 %v17881_v18, %v6781_v42  ;;  %v16254_v17 = vpop.f32.mrf.mxu0  ;;  %v17887_v42 = vld [vmem:[#allocation148_spill] sm:$0xff] }
 0x704   : > { %17876 = vst [vmem:[#allocation66_spill] sm:$0xff] %v16239_v45  ;;  %v7043_v57 = vadd.f32 %v17887_v42, %v6783_v23  ;;  %v17896_v42 = vld [vmem:[#allocation155_spill] sm:$0xff] }
 0x705   : > { %v7427_v47 = vadd.f32 %v17885_v13, %v7042_v62  ;;  %v17892_v13 = vld [vmem:[#allocation33_spill] sm:$0xff] }
 0x709   : > { %v7777_v55 = vpop.f32.mrf.mxu2 }
 0x70a   : > { %v16248_v58 = vadd.f32 %v7777_v55, %v7426_v22  ;;  %v8001_v61 = vpop.f32.mrf.mxu3  ;;  %v17888_v55 = vld [vmem:[#allocation153_spill] sm:$0xff] }
 0x70b   : > { %v16251_v48 = vadd.f32 %v8001_v61, %v16085_v12  ;;  %v16268_v22 = vpop.f32.mrf.mxu0  ;;  %v7428_v61 = vadd.f32 %v17888_v55, %v7043_v57  ;;  %v9116_v55 = vld [vmem:[#allocation2 + $0x8] sm:$0xe] }
 0x70c   : > { %17880 = vst [vmem:[#allocation116_spill] sm:$0xff] %v16248_v58 }
 0x70e   : > { %9024 = vmatmul.bf16.gmra.mxu2 %v17882_v50  ;;  %v17890_v50 = vld [vmem:[#allocation94_spill] sm:$0xff] }
 0x70f   : > { %8815 = vmatmul.bf16.vlgmr.msrb.gmra.mxu3 %v8655_v49  ;;  %v17891_v49 = vld [vmem:[#allocation150_spill] sm:$0xff] }
 0x710   : > { %v8429_v5 = vadd.f32 %v17891_v49, %v17890_v50  ;;  %v11289_v50 = vld [vmem:[#allocation2 + $0x10] sm:$0xff]   ;;  %v9153_v49 = vunpack.c.l.bf16 %v9116_v55 }
 0x711   : > { %v7780_v39 = vpop.f32.mrf.mxu2 }
 0x712   : > { %v16262_v7 = vadd.f32 %v7780_v39, %v7427_v47  ;;  %v8004_v12 = vpop.f32.mrf.mxu3  ;;  %v9117_v39 = vld [vmem:[#allocation2 + $0xc] sm:$0xf]  ;;  %v8821_v57 = vadd.f32 %v17896_v42, %v8429_v5  ;;  %v11217_v5 = vunpack.c.l.bf16 %v11289_v50 }
 0x713   : > { %v16265_v63 = vadd.f32 %v8004_v12, %v16097_v6  ;;  %v17893_v6 = vld [vmem:[#allocation9_spill] sm:$0xff]  ;;  %v16282_v12 = vpop.f32.mrf.mxu0 }
 0x714   : > { %17886 = vst [vmem:[#allocation122_spill] sm:$0xff] %v16262_v7  ;;  %v17894_v47 = vrot.slane %v17893_v6, 3  ;;  %v17898_v6 = vld [vmem:[#allocation82_spill] sm:$0xff]  ;;  %v9271_v7 = vrot.slane %v11217_v5, 3 }
 0x716   : > { %v8914_v23 = vsel %vm17895_vm12, %v17894_v47, %v8913_v11 }
 0x719   : > { %v7782_v33 = vpop.f32.mrf.mxu2 }
 0x71a   : > { %v16271_v60 = vadd.f32 %v7782_v33, %v7428_v61  ;;  %v8006_v18 = vpop.f32.mrf.mxu3  ;;  %v9154_v61 = vunpack.c.l.bf16 %v9117_v39  ;;  %v16288_v33 = vld [vmem:[%s16630_s6] ss:$0 sm:$0xff]  ;;  %v9268_v39 = vrot.slane %v9153_v49, 3 }
 0x71b   : > { %v16274_v62 = vadd.f32 %v8006_v18, %v16106_v2  ;;  %v16298_v45 = vpop.f32.mrf.mxu0 }
 0x71c   : > { %17889 = vst [vmem:[#allocation60_spill] sm:$0xff] %v16271_v60 }
 0x71e   : > { %9029 = vmatmul.bf16.gmra.mxu2 %v17892_v13  ;;  %v17897_v13 = vld [vmem:[#allocation120_spill] sm:$0xff] }
 0x71f   : > { %9074 = vmatmul.bf16.vlgmr.msra.gmra.mxu3 %v8914_v23  ;;  %v8430_v47 = vadd.f32 %v17898_v6, %v17897_v13  ;;  %v9269_v23 = vrot.slane %v9154_v61, 3  ;;  %v17901_v61 = vld [vmem:[#allocation135_spill] sm:$0xff]  ;;  %v11218_v6 = vunpack.c.h.bf16 %v11289_v50 }
 0x720   : > { %v8431_v13 = vadd.f32 %v17901_v61, %v16049_v29 }
 0x721   : > { %v8990_v54 = vpop.f32.mrf.mxu2  ;;  %v9270_v58 = vsel %vm17900_vm3, %v9268_v39, %v9269_v23  ;;  %v9272_v49 = vsel %vm17902_vm4, %v9269_v23, %v9271_v7 }
 0x722   : > { %v9080_v2 = vadd.f32 %v8990_v54, %v8821_v57  ;;  %v8009_v18 = vpop.f32.mrf.mxu3  ;;  %v17899_v57 = vld [vmem:[#allocation91_spill] sm:$0xff] }
 0x723   : > { %v16291_v11 = vadd.f32 %v8009_v18, %v16118_v31  ;;  %v8822_v54 = vadd.f32 %v17899_v57, %v8430_v47  ;;  %v17903_v57 = vld [vmem:[#allocation50_spill] sm:$0xff] }
 0x724   : > { %v9194_v42 = vadd.f32 %v16288_v33, %v9080_v2 }
 0x726   : > { %v9377_v55 = vadd.f32 %v9270_v58, %v9194_v42  ;;  %v8823_v58 = vadd.f32 %v17904_v40, %v8431_v13  ;;  %v9273_v42 = vrot.slane %v11218_v6, 3 }
 0x728   : > { %v9413_v47 = vmax.f32 %v9377_v55, 0.0  ;;  %v17907_v55 = vld [vmem:[#allocation174_spill] sm:$0xff]  ;;  %v9274_v13 = vsel %vm17908_vm9, %v9271_v7, %v9273_v42  ;;  %v17911_v7 = vld [vmem:[#allocation65_spill] sm:$0xff] }
 0x729   : > { %v8992_v60 = vpop.f32.mrf.mxu2 }
 0x72a   : > { %v9081_v21 = vadd.f32 %v8992_v60, %v8822_v54  ;;  %v8011_v31 = vpop.f32.mrf.mxu3 }
 0x72b   : > { %v16301_v18 = vadd.f32 %v8011_v31, %v16127_v56  ;;  %v9449_v56 = vsel %vm11795_vm15, %v9413_v47, 0.0  ;;  %v11221_v47 = vunpack.c.l.bf16 %v11290_v34  ;;  %vm17912_vm15 = vmmov %vm17900_vm3 }
 0x72c   : > { %v9195_v2 = vadd.f32 %v16288_v33, %v9081_v21 }
 0x72d   : > { %v9275_v54 = vrot.slane %v11221_v47, 3 }
 0x72e   : > { %v9378_v39 = vadd.f32 %v9272_v49, %v9195_v2  ;;  %9034 = vmatmul.bf16.gmra.mxu2 %v17903_v57  ;;  %v8432_v2 = vadd.f32 %v17907_v55, %v16068_v43  ;;  %v8399_v49 = vpop.f32.mrf.mxu0 }
 0x730   : > { %v9414_v5 = vmax.f32 %v9378_v39, 0.0 }
 0x731   : > { %v8995_v60 = vpop.f32.mrf.mxu2 }
 0x732   : > { %v9450_v29 = vsel %vm11841_vm8, %v9414_v5, 0.0  ;;  %v9082_v61 = vadd.f32 %v8995_v60, %v8823_v58  ;;  %v8014_v21 = vpop.f32.mrf.mxu3  ;;  %v17909_v5 = vld [vmem:[#allocation103_spill] sm:$0xff]  ;;  %vm17917_vm8 = vmmov %vm17900_vm3 }
 0x733   : > { %v9485_v23 = vadd.f32 %v9450_v29, %v9449_v56  ;;  %v8068_v50 = vadd.f32 %v8014_v21, %v16141_v51  ;;  %v8824_v58 = vadd.f32 %v17909_v5, %v8432_v2  ;;  %v16321_v56 = vpop.f32.mrf.mxu1  ;;  %v9276_v2 = vsel %vm17912_vm15, %v9273_v42, %v9275_v54 }
 0x734   : > { %v9196_v40 = vadd.f32 %v16288_v33, %v9082_v61 }
 0x735   : > { %v16318_v6 = vadd.f32 %v8399_v49, %v8068_v50  ;;  %v8433_v50 = vadd.f32 %v17911_v7, %v16079_v53  ;;  %v11222_v49 = vunpack.c.h.bf16 %v11290_v34  ;;  %v17916_v34 = vld [vmem:[#allocation58_spill] sm:$0xff] }
 0x736   : > { %v9379_v39 = vadd.f32 %v9274_v13, %v9196_v40  ;;  %v17913_v13 = vld [vmem:[#allocation67_spill] sm:$0xff] }
 0x738   : > { %v9415_v57 = vmax.f32 %v9379_v39, 0.0  ;;  %v17914_v39 = vld [vmem:[#allocation59_spill] sm:$0xff] }
 0x739   : > { %v8997_v60 = vpop.f32.mrf.mxu2 }
 0x73a   : > { %v9451_v31 = vsel %vm11887_vm14, %v9415_v57, 0.0  ;;  %v9083_v43 = vadd.f32 %v8997_v60, %v8824_v58  ;;  %v8016_v29 = vpop.f32.mrf.mxu3  ;;  %v8825_v57 = vadd.f32 %v17914_v39, %v8433_v50  ;;  %v9277_v58 = vrot.slane %v11222_v49, 3  ;;  %vm17921_vm14 = vmmov %vm17900_vm3 }
 0x73b   : > { %v9486_v21 = vadd.f32 %v9485_v23, %v9451_v31  ;;  %v16326_v61 = vadd.f32 %v8016_v29, %v16152_v10  ;;  %v11291_v31 = vld [vmem:[#allocation2 + $0x20] sm:$0xff]   ;;  %v16339_v42 = vpop.f32.mrf.mxu1  ;;  %v8434_v29 = vadd.f32 %v17916_v34, %v16089_v9 }
 0x73c   : > { %v9197_v55 = vadd.f32 %v16288_v33, %v9083_v43  ;;  %v9278_v50 = vsel %vm17917_vm8, %v9275_v54, %v9277_v58  ;;  %v17920_v9 = vld [vmem:[#allocation109_spill] sm:$0xff]  ;;  %v11226_v34 = vunpack.c.h.bf16 %v11291_v31 }
 0x73e   : > { %v9380_v40 = vadd.f32 %v9276_v2, %v9197_v55  ;;  %9039 = vmatmul.bf16.gmra.mxu2 %v17913_v13  ;;  %v11225_v55 = vunpack.c.l.bf16 %v11291_v31  ;;  %v17925_v31 = vld [vmem:[#allocation113_spill] sm:$0xff] }
 0x740   : > { %v9416_v47 = vmax.f32 %v9380_v40, 0.0  ;;  %v17918_v40 = vld [vmem:[#allocation114_spill] sm:$0xff]  ;;  %v9279_v39 = vrot.slane %v11225_v55, 3 }
 0x741   : > { %v9000_v5 = vpop.f32.mrf.mxu2  ;;  %v8826_v13 = vadd.f32 %v17918_v40, %v8434_v29  ;;  %v9281_v40 = vrot.slane %v11226_v34, 3 }
 0x742   : > { %v9452_v10 = vsel %vm11952_vm7, %v9416_v47, 0.0  ;;  %v9084_v60 = vadd.f32 %v9000_v5, %v8825_v57  ;;  %v8019_v51 = vpop.f32.mrf.mxu3  ;;  %vm17926_vm7 = vmmov %vm17900_vm3 }
 0x743   : > { %v9487_v53 = vadd.f32 %v9486_v21, %v9452_v10  ;;  %v16337_v43 = vadd.f32 %v8019_v51, %v16166_v8  ;;  %v9280_v51 = vsel %vm17921_vm14, %v9277_v58, %v9279_v39  ;;  %v16355_v29 = vpop.f32.mrf.mxu1  ;;  %v11292_v21 = vld [vmem:[#allocation2 + $0x28] sm:$0xff]  }
 0x744   : > { %v9198_v7 = vadd.f32 %v16288_v33, %v9084_v60  ;;  %v8435_v60 = vadd.f32 %v17920_v9, %v16100_v32  ;;  %v9282_v9 = vsel %vm17926_vm7, %v9279_v39, %v9281_v40 }
 0x746   : > { %v9381_v2 = vadd.f32 %v9278_v50, %v9198_v7  ;;  %v17922_v50 = vld [vmem:[#allocation146_spill] sm:$0xff] }
 0x748   : > { %v9417_v49 = vmax.f32 %v9381_v2, 0.0  ;;  %v17923_v2 = vld [vmem:[#allocation45_spill] sm:$0xff] }
 0x749   : > { %v9002_v47 = vpop.f32.mrf.mxu2 }
 0x74a   : > { %v9453_v8 = vsel %vm11981_vm13, %v9417_v49, 0.0  ;;  %v9085_v57 = vadd.f32 %v9002_v47, %v8826_v13  ;;  %v8021_v5 = vpop.f32.mrf.mxu3  ;;  %v8827_v49 = vadd.f32 %v17923_v2, %v8435_v60  ;;  %v11229_v60 = vunpack.c.l.bf16 %v11292_v21  ;;  %vm17930_vm13 = vmmov %vm17900_vm3 }
 0x74b   : > { %v9488_v23 = vadd.f32 %v9487_v53, %v9453_v8  ;;  %v16349_v10 = vadd.f32 %v8021_v5, %v16177_v38 }
 0x74c   : > { %v9199_v54 = vadd.f32 %v16288_v33, %v9085_v57  ;;  %v8436_v57 = vadd.f32 %v17925_v31, %v16110_v46  ;;  %v9283_v2 = vrot.slane %v11229_v60, 3  ;;  %v17929_v46 = vld [vmem:[#allocation111_spill] sm:$0xff]  ;;  %v17931_v31 = vld [vmem:[#allocation77_spill] sm:$0xff] }
 0x74d   : > { %v8437_v38 = vadd.f32 %v17929_v46, %v16121_v59  ;;  %v11293_v59 = vld [vmem:[#allocation2 + $0x30] sm:$0xff]  }
 0x74e   : > { %v9382_v7 = vadd.f32 %v9280_v51, %v9199_v54  ;;  %9044 = vmatmul.bf16.gmra.mxu2 %v17922_v50  ;;  %v16368_v51 = vpop.f32.mrf.mxu1  ;;  %v9284_v39 = vsel %vm17930_vm13, %v9281_v40, %v9283_v2 }
 0x750   : > { %v9418_v55 = vmax.f32 %v9382_v7, 0.0  ;;  %v17927_v7 = vld [vmem:[#allocation61_spill] sm:$0xff] }
 0x751   : > { %v9005_v53 = vpop.f32.mrf.mxu2  ;;  %v8828_v50 = vadd.f32 %v17927_v7, %v8436_v57  ;;  %v17932_v57 = vld [vmem:[#allocation63_spill] sm:$0xff] }
 0x752   : > { %v9454_v13 = vsel %vm12028_vm10, %v9418_v55, 0.0  ;;  %v9086_v47 = vadd.f32 %v9005_v53, %v8827_v49  ;;  %v8024_v32 = vpop.f32.mrf.mxu3  ;;  %vm17935_vm10 = vmmov %vm17900_vm3 }
 0x753   : > { %v9489_v8 = vadd.f32 %v9488_v23, %v9454_v13  ;;  %v16362_v58 = vadd.f32 %v8024_v32, %v16189_v25  ;;  %v17934_v23 = vld [vmem:[#allocation44_spill] sm:$0xff] }
 0x754   : > { %v9200_v5 = vadd.f32 %v16288_v33, %v9086_v47  ;;  %v11230_v47 = vunpack.c.h.bf16 %v11292_v21  ;;  %v8438_v40 = vadd.f32 %v17934_v23, %v16131_v4  ;;  %v17937_v4 = vld [vmem:[#allocation142_spill] sm:$0xff] }
 0x756   : > { %v9383_v54 = vadd.f32 %v9282_v9, %v9200_v5  ;;  %v8829_v9 = vadd.f32 %v17932_v57, %v8437_v38  ;;  %v16379_v7 = vpop.f32.mrf.mxu1 }
 0x758   : > { %v9419_v34 = vmax.f32 %v9383_v54, 0.0  ;;  %v9285_v54 = vrot.slane %v11230_v47, 3 }
 0x759   : > { %v9007_v55 = vpop.f32.mrf.mxu2 }
 0x75a   : > { %v9455_v25 = vsel %vm12056_vm6, %v9419_v34, 0.0  ;;  %v9087_v49 = vadd.f32 %v9007_v55, %v8828_v50  ;;  %vm17938_vm6 = vmmov %vm17900_vm3  ;;  %v11234_v34 = vunpack.c.h.bf16 %v11293_v59 }
 0x75b   : > { %v9490_v53 = vadd.f32 %v9489_v8, %v9455_v25  ;;  %v9286_v25 = vsel %vm17935_vm10, %v9283_v2, %v9285_v54 }
 0x75c   : > { %v9201_v13 = vadd.f32 %v16288_v33, %v9087_v49  ;;  %v11233_v49 = vunpack.c.l.bf16 %v11293_v59 }
 0x75e   : > { %v9384_v32 = vadd.f32 %v9284_v39, %v9201_v13  ;;  %9049 = vmatmul.bf16.gmra.mxu2 %v17931_v31  ;;  %v8830_v13 = vadd.f32 %v16065_v14, %v8438_v40  ;;  %v9287_v47 = vrot.slane %v11233_v49, 3 }
 0x760   : > { %v9420_v5 = vmax.f32 %v9384_v32, 0.0  ;;  %v9288_v2 = vsel %vm17938_vm6, %v9285_v54, %v9287_v47 }
 0x761   : > { %v9010_v60 = vpop.f32.mrf.mxu2 }
 0x762   : > { %v9456_v8 = vsel %vm12105_vm2, %v9420_v5, 0.0  ;;  %v9088_v50 = vadd.f32 %v9010_v60, %v8829_v9  ;;  %v8439_v9 = vadd.f32 %v17937_v4, %v16144_v3  ;;  %v8440_v3 = vadd.f32 %v16063_v19, %v16156_v16  ;;  %vm17941_vm2 = vmmov %vm17900_vm3 }
 0x763   : > { %v9491_v55 = vadd.f32 %v9490_v53, %v9456_v8  ;;  %v16390_v53 = vpop.f32.mrf.mxu1  ;;  %v8441_v19 = vadd.f32 %v16134_v0, %v16169_v30  ;;  %v11295_v0 = vld [vmem:[#allocation2 + $0x40] sm:$0xff]  }
 0x764   : > { %v9202_v21 = vadd.f32 %v16288_v33, %v9088_v50  ;;  %v17939_v50 = vld [vmem:[#allocation172_spill] sm:$0xff]  ;;  %v8831_v23 = vadd.f32 %v16321_v56, %v8439_v9 }
 0x766   : > { %v9385_v46 = vadd.f32 %v9286_v25, %v9202_v21  ;;  %v9289_v21 = vrot.slane %v11234_v34, 3 }
 0x768   : > { %v9421_v38 = vmax.f32 %v9385_v46, 0.0  ;;  %v11294_v46 = vld [vmem:[#allocation2 + $0x38] sm:$0xff]   ;;  %v9290_v59 = vsel %vm17941_vm2, %v9287_v47, %v9289_v21 }
 0x769   : > { %v9012_v39 = vpop.f32.mrf.mxu2  ;;  %v11238_v34 = vunpack.c.h.bf16 %v11294_v46 }
 0x76a   : > { %v9457_v31 = vsel %vm17328_vm11, %v9421_v38, 0.0  ;;  %v9089_v5 = vadd.f32 %v9012_v39, %v8830_v13  ;;  %v11237_v13 = vunpack.c.l.bf16 %v11294_v46  ;;  %vm17943_vm11 = vmmov %vm17941_vm2 }
 0x76b   : > { %v9492_v57 = vadd.f32 %v9491_v55, %v9457_v31  ;;  %v16404_v39 = vpop.f32.mrf.mxu1  ;;  %v8832_v31 = vadd.f32 %v16339_v42, %v8440_v3  ;;  %v9293_v25 = vrot.slane %v11238_v34, 3 }
 0x76c   : > { %v9203_v60 = vadd.f32 %v16288_v33, %v9089_v5  ;;  %v9291_v4 = vrot.slane %v11237_v13, 3 }
 0x76e   : > { %v9386_v8 = vadd.f32 %v9288_v2, %v9203_v60  ;;  %9054 = vmatmul.bf16.gmra.mxu2 %v17939_v50  ;;  %v9292_v47 = vsel %vm17943_vm11, %v9289_v21, %v9291_v4  ;;  %v17944_v50 = vld [vmem:[#allocation157_spill] sm:$0xff]  ;;  %v8442_v21 = vadd.f32 %v16147_v1, %v16181_v15  ;;  %v8443_v1 = vadd.f32 %v16163_v35, %v16192_v26 }
 0x76f   : > { %v8444_v26 = vadd.f32 %v16175_v20, %v16204_v28 }
 0x770   : > { %v9422_v14 = vmax.f32 %v9386_v8, 0.0 }
 0x771   : > { %v9015_v40 = vpop.f32.mrf.mxu2 }
 0x772   : > { %v9458_v55 = vsel %vm17333_vm1, %v9422_v14, 0.0  ;;  %v9090_v49 = vadd.f32 %v9015_v40, %v8831_v23  ;;  %v8833_v23 = vadd.f32 %v16355_v29, %v8441_v19  ;;  %vm17947_vm1 = vmmov %vm17941_vm2  ;;  %v8834_v29 = vadd.f32 %v16368_v51, %v8442_v21 }
 0x773   : > { %v9493_v38 = vadd.f32 %v9492_v57, %v9458_v55  ;;  %v16414_v14 = vpop.f32.mrf.mxu1  ;;  %v17945_v55 = vld [vmem:[#allocation20_spill] sm:$0xff]  ;;  %v9294_v3 = vsel %vm17947_vm1, %v9291_v4, %v9293_v25  ;;  %vm17950_vm3 = vmmov %vm17947_vm1 }
 0x774   : > { %v9204_v54 = vadd.f32 %v16288_v33, %v9090_v49  ;;  %vm17954_vm9 = vmmov %vm17947_vm1 }
 0x775   : > { %vm17957_vm8 = vmmov %vm17947_vm1 }
 0x776   : > { %v9387_v32 = vadd.f32 %v9290_v59, %v9204_v54  ;;  %v11241_v54 = vunpack.c.l.bf16 %v11295_v0  ;;  %vm17961_vm7 = vmmov %vm17947_vm1 }
 0x777   : > { %vm17964_vm10 = vmmov %vm17947_vm1 }
 0x778   : > { %v9423_v56 = vmax.f32 %v9387_v32, 0.0  ;;  %vm17967_vm2 = vmmov %vm17947_vm1 }
 0x779   : > { %v9017_v5 = vpop.f32.mrf.mxu2 }
 0x77a   : > { %v9459_v60 = vsel %vm17339_vm5, %v9423_v56, 0.0  ;;  %v9091_v57 = vadd.f32 %v9017_v5, %v8832_v31  ;;  %vm17946_vm5 = vnez %v17945_v55  ;;  %v9295_v56 = vrot.slane %v11241_v54, 3  ;;  %v17948_v5 = vld [vmem:[#allocation21_spill] sm:$0xff] }
 0x77b   : > { %v9494_v2 = vadd.f32 %v9493_v38, %v9459_v60  ;;  %v16424_v31 = vpop.f32.mrf.mxu1  ;;  %vm17949_vm12 = vnez %v17948_v5 }
 0x77c   : > { %v9205_v16 = vadd.f32 %v16288_v33, %v9091_v57  ;;  %v9296_v4 = vsel %vm17950_vm3, %v9293_v25, %v9295_v56 }
 0x77e   : > { %v9388_v8 = vadd.f32 %v9292_v47, %v9205_v16  ;;  %9059 = vmatmul.bf16.gmra.mxu2 %v17944_v50  ;;  %v17951_v16 = vld [vmem:[#allocation108_spill] sm:$0xff]  ;;  %v8835_v47 = vadd.f32 %v16379_v7, %v8443_v1  ;;  %v17952_v50 = vld [vmem:[#allocation22_spill] sm:$0xff] }
 0x77f   : > { %vm17953_vm4 = vnez %v17952_v50 }
 0x780   : > { %v9424_v42 = vmax.f32 %v9388_v8, 0.0 }
 0x781   : > { %v9020_v40 = vpop.f32.mrf.mxu2 }
 0x782   : > { %v9460_v49 = vsel %vm17946_vm5, %v9424_v42, 0.0  ;;  %v9092_v38 = vadd.f32 %v9020_v40, %v8833_v23  ;;  %v11296_v40 = vld [vmem:[#allocation2 + $0x48] sm:$0xff]   ;;  %vm17970_vm5 = vmmov %vm17947_vm1 }
 0x783   : > { %v9495_v30 = vadd.f32 %v9494_v2, %v9460_v49  ;;  %v11242_v2 = vunpack.c.h.bf16 %v11295_v0  ;;  %v16436_v35 = vpop.f32.mrf.mxu1 }
 0x784   : > { %v9206_v46 = vadd.f32 %v16288_v33, %v9092_v38  ;;  %v11245_v38 = vunpack.c.l.bf16 %v11296_v40 }
 0x785   : > { %v9297_v8 = vrot.slane %v11242_v2, 3 }
 0x786   : > { %v9389_v59 = vadd.f32 %v9294_v3, %v9206_v46  ;;  %v9299_v46 = vrot.slane %v11245_v38, 3  ;;  %v17955_v3 = vld [vmem:[#allocation23_spill] sm:$0xff] }
 0x787   : > { %v9298_v49 = vsel %vm17954_vm9, %v9295_v56, %v9297_v8  ;;  %vm17956_vm15 = vnez %v17955_v3 }
 0x788   : > { %v9425_v13 = vmax.f32 %v9389_v59, 0.0  ;;  %v9300_v28 = vsel %vm17957_vm8, %v9297_v8, %v9299_v46 }
 0x789   : > { %v9022_v32 = vpop.f32.mrf.mxu2 }
 0x78a   : > { %v9461_v9 = vsel %vm17949_vm12, %v9425_v13, 0.0  ;;  %v9093_v60 = vadd.f32 %v9022_v32, %v8834_v29  ;;  %v8445_v29 = vadd.f32 %v16195_v24, %v16217_v27  ;;  %v11246_v32 = vunpack.c.h.bf16 %v11296_v40  ;;  %v17962_v40 = vld [vmem:[#allocation25_spill] sm:$0xff]  ;;  %vm17973_vm12 = vmmov %vm17967_vm2 }
 0x78b   : > { %v9496_v57 = vadd.f32 %v9495_v30, %v9461_v9  ;;  %v8836_v30 = vadd.f32 %v16390_v53, %v8444_v26  ;;  %v8781_v56 = vpop.f32.mrf.mxu1  ;;  %v17958_v9 = vld [vmem:[#allocation40_spill] sm:$0xff]  ;;  %v8446_v27 = vadd.f32 %v16207_v52, %v16229_v37  ;;  %vm17963_vm13 = vnez %v17962_v40 }
 0x78c   : > { %v9207_v15 = vadd.f32 %v16288_v33, %v9093_v60  ;;  %v8837_v60 = vadd.f32 %v16404_v39, %v8445_v29  ;;  %v9301_v1 = vrot.slane %v11246_v32, 3  ;;  %v8447_v52 = vadd.f32 %v16222_v41, %v16242_v44  ;;  %v11298_v41 = vld [vmem:[#allocation2 + $0x58] sm:$0xff]  }
 0x78d   : > { %v8838_v39 = vadd.f32 %v16414_v14, %v8446_v27  ;;  %v16482_v27 = vpop.f32.mrf.mxu3 }
 0x78e   : > { %v9390_v19 = vadd.f32 %v9296_v4, %v9207_v15  ;;  %9064 = vmatmul.bf16.gmra.mxu2 %v17951_v16  ;;  %v17959_v15 = vld [vmem:[#allocation24_spill] sm:$0xff] }
 0x78f   : > { %vm17960_vm14 = vnez %v17959_v15 }
 0x790   : > { %v9426_v51 = vmax.f32 %v9390_v19, 0.0  ;;  %v11297_v19 = vld [vmem:[#allocation2 + $0x50] sm:$0xff]  }
 0x791   : > { %v9025_v34 = vpop.f32.mrf.mxu2  ;;  %v11250_v38 = vunpack.c.h.bf16 %v11297_v19 }
 0x792   : > { %v9462_v42 = vsel %vm17953_vm4, %v9426_v51, 0.0  ;;  %v9094_v23 = vadd.f32 %v9025_v34, %v8835_v47  ;;  %v9302_v51 = vsel %vm17961_vm7, %v9299_v46, %v9301_v1  ;;  %v11249_v47 = vunpack.c.l.bf16 %v11297_v19  ;;  %vm17976_vm4 = vmmov %vm17967_vm2 }
 0x793   : > { %v9497_v55 = vadd.f32 %v9496_v57, %v9462_v42  ;;  %v8783_v8 = vpop.f32.mrf.mxu1  ;;  %v9305_v46 = vrot.slane %v11250_v38, 3  ;;  %v11254_v19 = vunpack.c.h.bf16 %v11298_v41 }
 0x794   : > { %v9208_v25 = vadd.f32 %v16288_v33, %v9094_v23  ;;  %v9303_v23 = vrot.slane %v11249_v47, 3 }
 0x795   : > { %v9309_v47 = vrot.slane %v11254_v19, 3 }
 0x796   : > { %v9391_v0 = vadd.f32 %v9298_v49, %v9208_v25  ;;  %v9304_v49 = vsel %vm17964_vm10, %v9301_v1, %v9303_v23 }
 0x798   : > { %v9427_v7 = vmax.f32 %v9391_v0, 0.0 }
 0x799   : > { %v9027_v21 = vpop.f32.mrf.mxu2 }
 0x79a   : > { %v9463_v54 = vsel %vm17956_vm15, %v9427_v7, 0.0  ;;  %v9095_v59 = vadd.f32 %v9027_v21, %v8836_v30  ;;  %v8451_v7 = vadd.f32 %v16282_v12, %v16291_v11  ;;  %v8839_v30 = vadd.f32 %v16424_v31, %v8447_v52  ;;  %vm17979_vm15 = vmmov %vm17967_vm2 }
 0x79b   : > { %v9498_v13 = vadd.f32 %v9497_v55, %v9463_v54  ;;  %v8786_v3 = vpop.f32.mrf.mxu1  ;;  %v17965_v54 = vld [vmem:[#allocation26_spill] sm:$0xff]  ;;  %v9306_v12 = vsel %vm17967_vm2, %v9303_v23, %v9305_v46  ;;  %v11253_v11 = vunpack.c.l.bf16 %v11298_v41  ;;  %v8450_v23 = vadd.f32 %v16268_v22, %v16274_v62 }
 0x79c   : > { %v9209_v20 = vadd.f32 %v16288_v33, %v9095_v59  ;;  %vm17966_vm6 = vnez %v17965_v54  ;;  %v8843_v29 = vadd.f32 %v8786_v3, %v8451_v7  ;;  %v17974_v7 = vld [vmem:[#allocation31_spill] sm:$0xff] }
 0x79d   : > { %vm17975_vm3 = vnez %v17974_v7 }
 0x79e   : > { %v9392_v5 = vadd.f32 %v9300_v28, %v9209_v20  ;;  %9069 = vmatmul.bf16.gmra.mxu2 %v17958_v9  ;;  %v8448_v20 = vadd.f32 %v16237_v36, %v16251_v48  ;;  %v16479_v48 = vpop.f32.mrf.mxu0 }
 0x7a0   : > { %v9428_v53 = vmax.f32 %v9392_v5, 0.0  ;;  %v8840_v5 = vadd.f32 %v16436_v35, %v8448_v20 }
 0x7a1   : > { %v9030_v57 = vpop.f32.mrf.mxu2 }
 0x7a2   : > { %v9464_v4 = vsel %vm17960_vm14, %v9428_v53, 0.0  ;;  %v9096_v2 = vadd.f32 %v9030_v57, %v8837_v60  ;;  %v9307_v53 = vrot.slane %v11253_v11, 3  ;;  %v17968_v60 = vld [vmem:[#allocation27_spill] sm:$0xff]  ;;  %vm17982_vm14 = vmmov %vm17967_vm2 }
 0x7a3   : > { %v9499_v24 = vadd.f32 %v9498_v13, %v9464_v4  ;;  %vm17969_vm11 = vnez %v17968_v60  ;;  %v8449_v4 = vadd.f32 %v16254_v17, %v16265_v63  ;;  %v8788_v17 = vpop.f32.mrf.mxu1 }
 0x7a4   : > { %v9210_v16 = vadd.f32 %v16288_v33, %v9096_v2  ;;  %v9308_v2 = vsel %vm17970_vm5, %v9305_v46, %v9307_v53 }
 0x7a6   : > { %v9393_v34 = vadd.f32 %v9302_v51, %v9210_v16  ;;  %v8841_v16 = vadd.f32 %v8781_v56, %v8449_v4  ;;  %v16490_v52 = vpop.f32.mrf.mxu0 }
 0x7a8   : > { %v9429_v50 = vmax.f32 %v9393_v34, 0.0  ;;  %v17971_v34 = vld [vmem:[#allocation28_spill] sm:$0xff] }
 0x7a9   : > { %v9032_v42 = vpop.f32.mrf.mxu2  ;;  %vm17972_vm1 = vnez %v17971_v34 }
 0x7aa   : > { %v9465_v55 = vsel %vm17963_vm13, %v9429_v50, 0.0  ;;  %v9097_v26 = vadd.f32 %v9032_v42, %v8838_v39  ;;  %v11299_v42 = vld [vmem:[#allocation2 + $0x60] sm:$0xff]   ;;  %vm17985_vm13 = vmmov %vm17967_vm2 }
 0x7ab   : > { %v9500_v25 = vadd.f32 %v9499_v24, %v9465_v55  ;;  %v9310_v55 = vsel %vm17973_vm12, %v9307_v53, %v9309_v47  ;;  %v8791_v62 = vpop.f32.mrf.mxu1  ;;  %v11258_v3 = vunpack.c.h.bf16 %v11299_v42 }
 0x7ac   : > { %v9211_v37 = vadd.f32 %v16288_v33, %v9097_v26  ;;  %v11257_v26 = vunpack.c.l.bf16 %v11299_v42 }
 0x7ad   : > { %v9313_v41 = vrot.slane %v11258_v3, 3 }
 0x7ae   : > { %v9394_v0 = vadd.f32 %v9304_v49, %v9211_v37  ;;  %v8842_v37 = vadd.f32 %v8783_v8, %v8450_v23  ;;  %v16492_v49 = vpop.f32.mrf.mxu3 }
 0x7b0   : > { %v9430_v14 = vmax.f32 %v9394_v0, 0.0  ;;  %v9311_v0 = vrot.slane %v11257_v26, 3 }
 0x7b1   : > { %v9035_v21 = vpop.f32.mrf.mxu2 }
 0x7b2   : > { %v9466_v59 = vsel %vm17966_vm6, %v9430_v14, 0.0  ;;  %v9098_v13 = vadd.f32 %v9035_v21, %v8839_v30  ;;  %v9312_v46 = vsel %vm17976_vm4, %v9309_v47, %v9311_v0  ;;  %vm17988_vm6 = vmmov %vm17967_vm2 }
 0x7b3   : > { %v9501_v44 = vadd.f32 %v9500_v25, %v9466_v59 }
 0x7b4   : > { %v9212_v28 = vadd.f32 %v16288_v33, %v9098_v13  ;;  %v16498_v13 = vpop.f32.mrf.mxu0 }
 0x7b6   : > { %v9395_v32 = vadd.f32 %v9306_v12, %v9212_v28  ;;  %v11300_v12 = vld [vmem:[#allocation2 + $0x68] sm:$0xff]   ;;  %v16502_v11 = vpop.f32.mrf.mxu3 }
 0x7b7   : > { %v11261_v53 = vunpack.c.l.bf16 %v11300_v12 }
 0x7b8   : > { %v9431_v31 = vmax.f32 %v9395_v32, 0.0 }
 0x7b9   : > { %v9037_v9 = vpop.f32.mrf.mxu2 }
 0x7ba   : > { %v9467_v57 = vsel %vm17969_vm11, %v9431_v31, 0.0  ;;  %v9099_v1 = vadd.f32 %v9037_v9, %v8840_v5  ;;  %v8452_v31 = vadd.f32 %v16298_v45, %v16301_v18  ;;  %v9314_v9 = vsel %vm17979_vm15, %v9311_v0, %v9313_v41  ;;  %vm17991_vm11 = vmmov %vm17976_vm4 }
 0x7bb   : > { %v9502_v15 = vadd.f32 %v9501_v44, %v9467_v57  ;;  %v17977_v44 = vld [vmem:[#allocation32_spill] sm:$0xff]  ;;  %v8793_v57 = vpop.f32.mrf.mxu1 }
 0x7bc   : > { %v9213_v36 = vadd.f32 %v16288_v33, %v9099_v1  ;;  %vm17978_vm9 = vnez %v17977_v44 }
 0x7be   : > { %v9396_v24 = vadd.f32 %v9308_v2, %v9213_v36  ;;  %v9315_v36 = vrot.slane %v11261_v53, 3  ;;  %v17980_v2 = vld [vmem:[#allocation35_spill] sm:$0xff]  ;;  %v16511_v45 = vpop.f32.mrf.mxu3 }
 0x7bf   : > { %vm17981_vm8 = vnez %v17980_v2 }
 0x7c0   : > { %v9432_v35 = vmax.f32 %v9396_v24, 0.0  ;;  %v8409_v24 = vpop.f32.mrf.mxu0  ;;  %v9316_v18 = vsel %vm17982_vm14, %v9313_v41, %v9315_v36 }
 0x7c1   : > { %v9040_v51 = vpop.f32.mrf.mxu2 }
 0x7c2   : > { %v9468_v50 = vsel %vm17972_vm1, %v9432_v35, 0.0  ;;  %v9100_v39 = vadd.f32 %v9040_v51, %v8841_v16  ;;  %v11262_v51 = vunpack.c.h.bf16 %v11300_v12  ;;  %vm17994_vm1 = vmmov %vm17976_vm4 }
 0x7c3   : > { %v9503_v63 = vadd.f32 %v9502_v15, %v9468_v50  ;;  %v8844_v15 = vadd.f32 %v8788_v17, %v8452_v31  ;;  %v8845_v50 = vadd.f32 %v8791_v62, %v16318_v6  ;;  %v17986_v62 = vld [vmem:[#allocation37_spill] sm:$0xff]  ;;  %vm18001_vm4 = vmmov %vm17994_vm1 }
 0x7c4   : > { %v9214_v40 = vadd.f32 %v16288_v33, %v9100_v39  ;;  %v8796_v39 = vpop.f32.mrf.mxu1  ;;  %v9317_v17 = vrot.slane %v11262_v51, 3  ;;  %vm17987_vm10 = vnez %v17986_v62  ;;  %v17992_v51 = vld [vmem:[#allocation42_spill] sm:$0xff] }
 0x7c5   : > { %vm17993_vm5 = vnez %v17992_v51 }
 0x7c6   : > { %v9397_v25 = vadd.f32 %v9310_v55, %v9214_v40  ;;  %v11301_v55 = vld [vmem:[#allocation2 + $0x70] sm:$0xff]   ;;  %v16521_v6 = vpop.f32.mrf.mxu3 }
 0x7c7   : > { %v11265_v0 = vunpack.c.l.bf16 %v11301_v55  ;;  %v11266_v41 = vunpack.c.h.bf16 %v11301_v55 }
 0x7c8   : > { %v9433_v56 = vmax.f32 %v9397_v25, 0.0  ;;  %v8454_v25 = vadd.f32 %v16479_v48, %v16326_v61  ;;  %v8455_v61 = vadd.f32 %v16490_v52, %v16337_v43  ;;  %v8456_v43 = vadd.f32 %v16498_v13, %v16349_v10 }
 0x7c9   : > { %v9042_v38 = vpop.f32.mrf.mxu2  ;;  %v8457_v10 = vadd.f32 %v8409_v24, %v16362_v58 }
 0x7ca   : > { %v9469_v14 = vsel %vm17975_vm3, %v9433_v56, 0.0  ;;  %v9101_v30 = vadd.f32 %v9042_v38, %v8842_v37  ;;  %v8411_v37 = vpop.f32.mrf.mxu0  ;;  %v9318_v38 = vsel %vm17985_vm13, %v9315_v36, %v9317_v17  ;;  %v8847_v12 = vadd.f32 %v8796_v39, %v8455_v61  ;;  %vm17998_vm3 = vmmov %vm17994_vm1 }
 0x7cb   : > { %v9504_v21 = vadd.f32 %v9503_v63, %v9469_v14  ;;  %v17983_v63 = vld [vmem:[#allocation36_spill] sm:$0xff] }
 0x7cc   : > { %v9215_v22 = vadd.f32 %v16288_v33, %v9101_v30  ;;  %vm17984_vm7 = vnez %v17983_v63  ;;  %v8846_v30 = vadd.f32 %v8793_v57, %v8454_v25  ;;  %v11302_v57 = vld [vmem:[#allocation2 + $0x78] sm:$0xff]  }
 0x7cd   : > { %v11269_v36 = vunpack.c.l.bf16 %v11302_v57 }
 0x7ce   : > { %v9398_v54 = vadd.f32 %v9312_v46, %v9215_v22  ;;  %v9319_v22 = vrot.slane %v11265_v0, 3  ;;  %v17996_v0 = vld [vmem:[#allocation46_spill] sm:$0xff] }
 0x7cf   : > { %vm17997_vm12 = vnez %v17996_v0 }
 0x7d0   : > { %v9434_v59 = vmax.f32 %v9398_v54, 0.0  ;;  %v8798_v54 = vpop.f32.mrf.mxu1 }
 0x7d1   : > { %v9045_v8 = vpop.f32.mrf.mxu2 }
 0x7d2   : > { %v9470_v20 = vsel %vm17978_vm9, %v9434_v59, 0.0  ;;  %v9102_v28 = vadd.f32 %v9045_v8, %v8843_v29  ;;  %v9320_v8 = vsel %vm17988_vm6, %v9317_v17, %v9319_v22  ;;  %v11270_v17 = vunpack.c.h.bf16 %v11302_v57  ;;  %vm18005_vm9 = vmmov %vm17994_vm1 }
 0x7d3   : > { %v9505_v32 = vadd.f32 %v9504_v21, %v9470_v20  ;;  %v8414_v20 = vpop.f32.mrf.mxu0  ;;  %vm18019_vm6 = vmmov %vm17994_vm1 }
 0x7d4   : > { %v9216_v5 = vadd.f32 %v16288_v33, %v9102_v28 }
 0x7d6   : > { %v9399_v60 = vadd.f32 %v9314_v9, %v9216_v5  ;;  %v9321_v5 = vrot.slane %v11266_v41, 3  ;;  %v17989_v9 = vld [vmem:[#allocation39_spill] sm:$0xff] }
 0x7d7   : > { %vm17990_vm2 = vnez %v17989_v9 }
 0x7d8   : > { %v9435_v1 = vmax.f32 %v9399_v60, 0.0 }
 0x7d9   : > { %v9047_v4 = vpop.f32.mrf.mxu2 }
 0x7da   : > { %v9471_v29 = vsel %vm17981_vm8, %v9435_v1, 0.0  ;;  %v9103_v19 = vadd.f32 %v9047_v4, %v8844_v15  ;;  %v8801_v15 = vpop.f32.mrf.mxu1  ;;  %v9322_v4 = vsel %vm17991_vm11, %v9319_v22, %v9321_v5  ;;  %vm18010_vm8 = vmmov %vm17994_vm1 }
 0x7db   : > { %v9506_v35 = vadd.f32 %v9505_v32, %v9471_v29  ;;  %v16529_v32 = vpop.f32.mrf.mxu3  ;;  %v8849_v25 = vadd.f32 %v8801_v15, %v8457_v10 }
 0x7dc   : > { %v9217_v16 = vadd.f32 %v16288_v33, %v9103_v19  ;;  %v8848_v19 = vadd.f32 %v8798_v54, %v8456_v43 }
 0x7de   : > { %v9400_v47 = vadd.f32 %v9316_v18, %v9217_v16  ;;  %v9323_v18 = vrot.slane %v11269_v36, 3 }
 0x7e0   : > { %v9436_v34 = vmax.f32 %v9400_v47, 0.0 }
 0x7e1   : > { %v9050_v42 = vpop.f32.mrf.mxu2 }
 0x7e2   : > { %v9472_v23 = vsel %vm17984_vm7, %v9436_v34, 0.0  ;;  %v9104_v40 = vadd.f32 %v9050_v42, %v8845_v50  ;;  %v9324_v42 = vsel %vm17994_vm1, %v9321_v5, %v9323_v18  ;;  %vm18015_vm7 = vmmov %vm17994_vm1 }
 0x7e3   : > { %v9507_v26 = vadd.f32 %v9506_v35, %v9472_v23  ;;  %v8416_v35 = vpop.f32.mrf.mxu0  ;;  %v16539_v50 = vpop.f32.mrf.mxu3 }
 0x7e4   : > { %v9218_v56 = vadd.f32 %v16288_v33, %v9104_v40  ;;  %v8803_v23 = vpop.f32.mrf.mxu1  ;;  %v17995_v40 = vld [vmem:[#allocation117_spill] sm:$0xff] }
 0x7e5   : > { %v8073_v55 = vadd.f32 %v16482_v27, %v17995_v40  ;;  %v17999_v27 = vld [vmem:[#allocation118_spill] sm:$0xff] }
 0x7e6   : > { %v9401_v7 = vadd.f32 %v9318_v38, %v9218_v56  ;;  %v9325_v38 = vrot.slane %v11270_v17, 3 }
 0x7e8   : > { %v9437_v14 = vmax.f32 %v9401_v7, 0.0 }
 0x7e9   : > { %v9052_v21 = vpop.f32.mrf.mxu2 }
 0x7ea   : > { %v9473_v46 = vsel %vm17987_vm10, %v9437_v14, 0.0  ;;  %v9105_v3 = vadd.f32 %v9052_v21, %v8846_v30  ;;  %v11303_v30 = vld [vmem:[#allocation2 + $0x80] sm:$0xff]   ;;  %v8458_v21 = vadd.f32 %v8411_v37, %v8073_v55  ;;  %vm18018_vm10 = vmmov %vm17994_vm1 }
 0x7eb   : > { %v9508_v59 = vadd.f32 %v9507_v26, %v9473_v46  ;;  %v8419_v58 = vpop.f32.mrf.mxu0  ;;  %v8816_v62 = vpop.f32.mrf.mxu3  ;;  %v9326_v46 = vsel %vm17998_vm3, %v9323_v18, %v9325_v38  ;;  %v11274_v57 = vunpack.c.h.bf16 %v11303_v30 }
 0x7ec   : > { %v9219_v48 = vadd.f32 %v16288_v33, %v9105_v3  ;;  %v11273_v3 = vunpack.c.l.bf16 %v11303_v30 }
 0x7ee   : > { %v9402_v44 = vadd.f32 %v9320_v8, %v9219_v48  ;;  %v8850_v48 = vadd.f32 %v8803_v23, %v8458_v21  ;;  %v8806_v8 = vpop.f32.mrf.mxu1 }
 0x7f0   : > { %v9438_v28 = vmax.f32 %v9402_v44, 0.0  ;;  %v9327_v44 = vrot.slane %v11273_v3, 3 }
 0x7f1   : > { %v9055_v31 = vpop.f32.mrf.mxu2 }
 0x7f2   : > { %v9474_v53 = vsel %vm17990_vm2, %v9438_v28, 0.0  ;;  %v9106_v60 = vadd.f32 %v9055_v31, %v8847_v12  ;;  %v11305_v28 = vld [vmem:[#allocation2 + $0x90] sm:$0xff]   ;;  %vm18020_vm2 = vmmov %vm17994_vm1 }
 0x7f3   : > { %v9509_v1 = vadd.f32 %v9508_v59, %v9474_v53  ;;  %v8074_v59 = vadd.f32 %v16492_v49, %v17999_v27  ;;  %v8421_v53 = vpop.f32.mrf.mxu0  ;;  %v8818_v43 = vpop.f32.mrf.mxu3  ;;  %v18002_v49 = vld [vmem:[#allocation30_spill] sm:$0xff] }
 0x7f4   : > { %v9220_v52 = vadd.f32 %v16288_v33, %v9106_v60  ;;  %v9328_v60 = vsel %vm18001_vm4, %v9325_v38, %v9327_v44 }
 0x7f5   : > { %v8459_v5 = vadd.f32 %v8414_v20, %v8074_v59  ;;  %v11304_v20 = vld [vmem:[#allocation2 + $0x88] sm:$0xff]  }
 0x7f6   : > { %v9403_v2 = vadd.f32 %v9322_v4, %v9220_v52  ;;  %v8075_v52 = vadd.f32 %v16502_v11, %v18002_v49  ;;  %v8808_v18 = vpop.f32.mrf.mxu1  ;;  %v11277_v10 = vunpack.c.l.bf16 %v11304_v20  ;;  %v18006_v11 = vld [vmem:[#allocation66_spill] sm:$0xff] }
 0x7f7   : > { %v8851_v4 = vadd.f32 %v8806_v8, %v8459_v5  ;;  %v8076_v17 = vadd.f32 %v16511_v45, %v18006_v11  ;;  %v11278_v45 = vunpack.c.h.bf16 %v11304_v20 }
 0x7f8   : > { %v9439_v29 = vmax.f32 %v9403_v2, 0.0  ;;  %v9329_v2 = vrot.slane %v11274_v57, 3 }
 0x7f9   : > { %v9057_v16 = vpop.f32.mrf.mxu2  ;;  %v8461_v0 = vadd.f32 %v8419_v58, %v8076_v17 }
 0x7fa   : > { %v9475_v47 = vsel %vm17993_vm5, %v9439_v29, 0.0  ;;  %v9107_v34 = vadd.f32 %v9057_v16, %v8848_v19  ;;  %v18003_v29 = vld [vmem:[#allocation51_spill] sm:$0xff] }
 0x7fb   : > { %v9510_v39 = vadd.f32 %v9509_v1, %v9475_v47  ;;  %v8460_v47 = vadd.f32 %v8416_v35, %v8075_v52  ;;  %v9075_v40 = vpop.f32.mrf.mxu3  ;;  %v11281_v52 = vunpack.c.l.bf16 %v11305_v28 }
 0x7fc   : > { %v9221_v13 = vadd.f32 %v16288_v33, %v9107_v34 }
 0x7fd   : > { %v8852_v23 = vadd.f32 %v8808_v18, %v8460_v47  ;;  %v9335_v18 = vrot.slane %v11281_v52, 3 }
 0x7fe   : > { %v9404_v63 = vadd.f32 %v9324_v42, %v9221_v13  ;;  %v8424_v42 = vpop.f32.mrf.mxu0 }
 0x800   : > { %v9440_v26 = vmax.f32 %v9404_v63, 0.0 }
 0x801   : > { %v9060_v56 = vpop.f32.mrf.mxu2 }
 0x802   : > { %v9476_v7 = vsel %vm17997_vm12, %v9440_v26, 0.0  ;;  %v9108_v14 = vadd.f32 %v9060_v56, %v8849_v25  ;;  %v9331_v26 = vrot.slane %v11277_v10, 3  ;;  %v18007_v25 = vld [vmem:[#allocation41_spill] sm:$0xff] }
 0x803   : > { %v9511_v24 = vadd.f32 %v9510_v39, %v9476_v7  ;;  %v9330_v39 = vsel %vm18005_vm9, %v9327_v44, %v9329_v2  ;;  %vm18008_vm15 = vnez %v18007_v25  ;;  %v18009_v7 = vld [vmem:[#allocation122_spill] sm:$0xff] }
 0x804   : > { %v9222_v22 = vadd.f32 %v16288_v33, %v9108_v14  ;;  %v8078_v14 = vadd.f32 %v16529_v32, %v18009_v7  ;;  %v9332_v21 = vsel %vm18010_vm8, %v9329_v2, %v9331_v26 }
 0x806   : > { %v9405_v54 = vadd.f32 %v9326_v46, %v9222_v22  ;;  %v18011_v22 = vld [vmem:[#allocation60_spill] sm:$0xff]  ;;  %v8463_v59 = vadd.f32 %v8424_v42, %v8078_v14  ;;  %v8426_v58 = vpop.f32.mrf.mxu0 }
 0x807   : > { %v8079_v46 = vadd.f32 %v16539_v50, %v18011_v22  ;;  %v9077_v50 = vpop.f32.mrf.mxu3 }
 0x808   : > { %v9441_v61 = vmax.f32 %v9405_v54, 0.0  ;;  %v18012_v54 = vld [vmem:[#allocation116_spill] sm:$0xff]  ;;  %v8855_v32 = vadd.f32 %v8816_v62, %v8463_v59 }
 0x809   : > { %v9062_v41 = vpop.f32.mrf.mxu2  ;;  %v8077_v27 = vadd.f32 %v16521_v6, %v18012_v54  ;;  %v8464_v44 = vadd.f32 %v8426_v58, %v8079_v46 }
 0x80a   : > { %v9477_v12 = vsel %vm17513_vm0, %v9441_v61, 0.0  ;;  %v9109_v31 = vadd.f32 %v9062_v41, %v8850_v48  ;;  %vm18004_vm0 = vnez %v18003_v29  ;;  %v9333_v41 = vrot.slane %v11278_v45, 3 }
 0x80b   : > { %v9512_v37 = vadd.f32 %v9511_v24, %v9477_v12  ;;  %v8811_v24 = vpop.f32.mrf.mxu1  ;;  %v9152_v12 = vld [vmem:[#allocation2 + $0x98] sm:$0x3]  ;;  %v8462_v57 = vadd.f32 %v8421_v53, %v8077_v27  ;;  %v9114_v6 = vadd.f32 %v9075_v40, %v8855_v32 }
 0x80c   : > { %v9223_v9 = vadd.f32 %v16288_v33, %v9109_v31  ;;  %v8853_v48 = vadd.f32 %v8811_v24, %v8461_v0  ;;  %v18013_v31 = vld [vmem:[#allocation43_spill] sm:$0xff]  ;;  %v18023_v0 = vld [vmem:[#allocation53_spill] sm:$0xff] }
 0x80d   : > { %vm18014_vm14 = vnez %v18013_v31  ;;  %vm18024_vm5 = vnez %v18023_v0 }
 0x80e   : > { %v9406_v1 = vadd.f32 %v9328_v60, %v9223_v9  ;;  %v11282_v9 = vunpack.c.h.bf16 %v11305_v28 }
 0x810   : > { %v9442_v15 = vmax.f32 %v9406_v1, 0.0  ;;  %v8856_v1 = vadd.f32 %v8818_v43, %v8464_v44  ;;  %v9337_v29 = vrot.slane %v11282_v9, 3  ;;  %v18016_v43 = vld [vmem:[#allocation47_spill] sm:$0xff] }
 0x811   : > { %v9065_v36 = vpop.f32.mrf.mxu2  ;;  %vm18017_vm13 = vnez %v18016_v43 }
 0x812   : > { %v9478_v19 = vsel %vm18004_vm0, %v9442_v15, 0.0  ;;  %v9110_v16 = vadd.f32 %v9065_v36, %v8851_v4  ;;  %v9189_v15 = vunpack.c.l.bf16 %v9152_v12  ;;  %v9334_v4 = vsel %vm18015_vm7, %v9331_v26, %v9333_v41 }
 0x813   : > { %v9513_v51 = vadd.f32 %v9512_v37, %v9478_v19  ;;  %v9115_v62 = vadd.f32 %v9077_v50, %v8856_v1  ;;  %v8813_v2 = vpop.f32.mrf.mxu1  ;;  %v9228_v19 = vadd.f32 %v16288_v33, %v9114_v6  ;;  %v9338_v10 = vsel %vm18018_vm10, %v9335_v18, %v9337_v29 }
 0x814   : > { %v9224_v34 = vadd.f32 %v16288_v33, %v9110_v16  ;;  %v8854_v20 = vadd.f32 %v8813_v2, %v8462_v57 }
 0x815   : > { %v9229_v53 = vadd.f32 %v16288_v33, %v9115_v62  ;;  %v9411_v42 = vadd.f32 %v9338_v10, %v9228_v19 }
 0x816   : > { %v9407_v13 = vadd.f32 %v9330_v39, %v9224_v34 }
 0x818   : > { %v9443_v63 = vmax.f32 %v9407_v13, 0.0 }
 0x819   : > { %v9067_v55 = vpop.f32.mrf.mxu2 }
 0x81a   : > { %v9479_v56 = vsel %vm18008_vm15, %v9443_v63, 0.0  ;;  %v9111_v38 = vadd.f32 %v9067_v55, %v8852_v23  ;;  %v9336_v63 = vsel %vm18020_vm2, %v9333_v41, %v9335_v18  ;;  %v9447_v55 = vmax.f32 %v9411_v42, 0.0 }
 0x81b   : > { %v9514_v35 = vadd.f32 %v9513_v51, %v9479_v56  ;;  %v9339_v51 = vrot.slane %v9189_v15, 3  ;;  %v18021_v56 = vld [vmem:[#allocation49_spill] sm:$0xff] }
 0x81c   : > { %v9225_v30 = vadd.f32 %v16288_v33, %v9111_v38  ;;  %vm18022_vm11 = vnez %v18021_v56  ;;  %v9483_v7 = vsel %vm18024_vm5, %v9447_v55, 0.0 }
 0x81d   : > { %v9340_v17 = vsel %vm18019_vm6, %v9337_v29, %v9339_v51 }
 0x81e   : > { %v9408_v3 = vadd.f32 %v9332_v21, %v9225_v30  ;;  %v9412_v23 = vadd.f32 %v9340_v17, %v9229_v53 }
 0x820   : > { %v9444_v61 = vmax.f32 %v9408_v3, 0.0  ;;  %v9448_v25 = vmax.f32 %v9412_v23, 0.0 }
 0x821   : > { %v9070_v8 = vpop.f32.mrf.mxu2 }
 0x822   : > { %v9480_v37 = vsel %vm18014_vm14, %v9444_v61, 0.0  ;;  %v9112_v5 = vadd.f32 %v9070_v8, %v8853_v48 }
 0x823   : > { %v9515_v60 = vadd.f32 %v9514_v35, %v9480_v37 }
 0x824   : > { %v9226_v49 = vadd.f32 %v16288_v33, %v9112_v5 }
 0x826   : > { %v9409_v36 = vadd.f32 %v9334_v4, %v9226_v49 }
 0x828   : > { %v9445_v16 = vmax.f32 %v9409_v36, 0.0 }
 0x829   : > { %v9072_v47 = vpop.f32.mrf.mxu2 }
 0x82a   : > { %v9481_v34 = vsel %vm18017_vm13, %v9445_v16, 0.0  ;;  %v9113_v39 = vadd.f32 %v9072_v47, %v8854_v20 }
 0x82b   : > { %v9516_v13 = vadd.f32 %v9515_v60, %v9481_v34 }
 0x82c   : > { %v9227_v11 = vadd.f32 %v16288_v33, %v9113_v39  ;;  %v18025_v33 = vld [vmem:[#allocation56_spill] sm:$0xff] }
 0x82d   : > { %vm18026_vm1 = vnez %v18025_v33 }
 0x82e   : > { %v9410_v40 = vadd.f32 %v9336_v63, %v9227_v11  ;;  %v9484_v30 = vsel %vm18026_vm1, %v9448_v25, 0.0 }
 0x830   : > { %v9446_v26 = vmax.f32 %v9410_v40, 0.0 }
 0x832   : > { %v9482_v38 = vsel %vm18022_vm11, %v9446_v26, 0.0 }
 0x833   : > { %v9517_v35 = vadd.f32 %v9516_v13, %v9482_v38 }
 0x835   : > { %v9518_v14 = vadd.f32 %v9517_v35, %v9483_v7 }
 0x837   : > { %v9519_v24 = vadd.f32 %v9518_v14, %v9484_v30 }
 0x839   : > { %v9520_v21 = vrot.slane %v9519_v24, 4 }
 0x83b   : > { %v9521_v45 = vadd.f32 %v9520_v21, %v9519_v24 }
 0x83d   : > { %v9522_v22 = vrot.slane %v9521_v45, 2 }
 0x83f   : > { %v9523_v46 = vadd.f32 %v9522_v22, %v9521_v45 }
 0x841   : > { %v9524_v3 = vrot.slane %v9523_v46, 1 }
 0x843   : > { %v9525_v54 = vadd.f32 %v9524_v3, %v9523_v46 }
 0x845   : > { %v9526_v27 = vmul.f32 0.00390625, %v9525_v54 }
 0x847   : > { %9527 = vst [vmem:[%s270_s19] sm:$0x1] %v9526_v27 }
 0x848   : > { %11472 = shalt.err (!%p11469_p3)
}
 0x849   : > { %11341 = dma.vmem_to_hbm [thread:$0]  (%p11588_p5), %s9540_s20, 16, %s9542_s22, %s9529_s23  }
 0x84a PF: > { %p11347_p4 = scmp.ge.s32.totalorder %s11507_s27, 2  ;;  %s9553_s15 = sand.u32 1, %s11495_s24  }
 0x84b   : > { %s9554_s16 = scalar_lea.sflag [#allocation5], %s9553_s15 }
 0x84c   : > { %p11344_p7 = pnand %p11347_p4, %p11592_p6 }
 0x84e   : > { %p11345_p8 = pneg %p11344_p7 }
 0x850   : > { %11490 = dma.done.wait (%p11345_p8), %s9554_s16, 16  }
 0x851   : > { %11492 = vsyncadd (%p11345_p8), %s9554_s16, 4294967280  ;;  %p17_p9 = scmp.ge.s32.totalorder %s11575_s30, 4   ;;  %s18027_s24 = smov %s11499_s25 }
 0x852   : > { %s18028_s25 = smov %s11503_s26  ;;  %s18029_s26 = smov %s11586_s10 }
 0x853   : > { %s18030_s27 = smov %s11575_s30  ;;  %19 = sbr.rel (!%p17_p9) target bundleno = 3 (0x3), region = 99 }
 0x858   :  { %9559 = vsyncpa [#allocation5], 1 }
 0x859   :  { %9561 = vsyncpa [#allocation5 + $0x1], 1 }

</bundles_post_ra>
